<compile_context>
chip_gen: v7x
topology: tpu7x:2x2x1
jax: 0.10.0
libtpu: 0.0.40
codegen_flags: <defaults>
</compile_context>

<pallas_src>
import jax
import jax.numpy as jnp
from jax.experimental import pallas as pl
from jax.experimental.pallas import tpu as pltpu


# ----------------------------------------------------------------------------
# Fused RCAB kernel: one grid step = one batch element.
# ----------------------------------------------------------------------------
def _rcab_kernel(x_ref, w1_ref, b1_ref, w2_ref, b2_ref,
                 ca_w1_ref, ca_b1_ref, ca_w2_ref, ca_b2_ref,
                 o_ref, pad1_ref, pad2_ref):
    _, H, W, C = o_ref.shape
    HW = H * W

    def conv3x3(pad_ref, w_slab_ref, b_ref):
        # pad_ref:    (H+2, W+2, C) bf16, zero-padded activation slab (VMEM)
        # w_slab_ref: (3, 3*C, Co) bf16, per-dh weight slab
        # One MXU matmul per dh with K = 3*C (dw taps concatenated on lanes).
        Co = w_slab_ref.shape[2]
        acc = jnp.zeros((HW, Co), jnp.float32)
        for dh in range(3):                              # static unroll
            rows = pad_ref[dh:dh + H, :, :]              # (H, W+2, C)
            patch = jnp.concatenate(
                [rows[:, 0:W, :], rows[:, 1:W + 1, :], rows[:, 2:W + 2, :]],
                axis=-1).reshape(HW, 3 * C)              # (H*W, 3C) bf16
            acc = acc + jnp.dot(patch, w_slab_ref[dh],
                                preferred_element_type=jnp.float32)
        return acc + b_ref[...].astype(jnp.float32)      # (1, Co) broadcast

    x = x_ref[0]                                         # (H, W, C) f32

    # ---- conv1 (+bias) + ReLU ------------------------------------------------
    # Build the zero halo in VMEM (no HBM-side padding).  bf16 MXU operands.
    pad1_ref[...] = jnp.zeros(pad1_ref.shape, pad1_ref.dtype)
    pad1_ref[1:H + 1, 1:W + 1, :] = x.astype(pad1_ref.dtype)
    h = conv3x3(pad1_ref, w1_ref, b1_ref)                # (H*W, C) f32
    h = jnp.maximum(h, 0.0)                              # ReLU in f32 (VPU)

    # ---- conv2 (+bias) ---------------------------------------------------------
    pad2_ref[...] = jnp.zeros(pad2_ref.shape, pad2_ref.dtype)
    pad2_ref[1:H + 1, 1:W + 1, :] = h.reshape(H, W, C).astype(pad2_ref.dtype)
    res = conv3x3(pad2_ref, w2_ref, b2_ref)              # (H*W, C) f32

    # ---- channel attention (squeeze / excite), tiny -> keep f32 ----------------
    y = jnp.sum(res, axis=0, keepdims=True) * (1.0 / float(HW))     # (1, C)
    z = jnp.dot(y, ca_w1_ref[...], preferred_element_type=jnp.float32)
    z = jnp.maximum(z + ca_b1_ref[...], 0.0)                        # (1, C/r)
    s = jnp.dot(z, ca_w2_ref[...], preferred_element_type=jnp.float32)
    s = jax.nn.sigmoid(s + ca_b2_ref[...])                          # (1, C)

    # ---- scale + residual add + single output store ----------------------------
    out = res * s + x.reshape(HW, C)
    o_ref[...] = out.reshape(1, H, W, C).astype(o_ref.dtype)


# ----------------------------------------------------------------------------
# Wrapper
# ----------------------------------------------------------------------------
def rcab_forward(x, p):
    """x: (N, H, W, C) NHWC float32.  p: parameter dict (see init_params)."""
    N, H, W, C = x.shape
    Cr = p["ca_w1"].shape[1]
    # (3, 3, Cin, Cout) -> per-dh slab (3, 3*Cin, Cout); bf16 for the MXU
    # (row order dw*Cin + ci matches the dw-concatenation in the kernel).
    w1 = p["w0"].reshape(3, 3 * C, C).astype(jnp.bfloat16)
    w2 = p["w1"].reshape(3, 3 * C, C).astype(jnp.bfloat16)

    return pl.pallas_call(
        _rcab_kernel,
        out_shape=jax.ShapeDtypeStruct((N, H, W, C), x.dtype),
        grid_spec=pltpu.PrefetchScalarGridSpec(
            num_scalar_prefetch=0,
            grid=(N,),
            in_specs=[
                pl.BlockSpec((1, H, W, C), lambda n: (n, 0, 0, 0)),   # x
                pl.BlockSpec((3, 3 * C, C), lambda n: (0, 0, 0)),     # w1 slab
                pl.BlockSpec((1, C), lambda n: (0, 0)),               # b1
                pl.BlockSpec((3, 3 * C, C), lambda n: (0, 0, 0)),     # w2 slab
                pl.BlockSpec((1, C), lambda n: (0, 0)),               # b2
                pl.BlockSpec((C, Cr), lambda n: (0, 0)),              # ca_w1
                pl.BlockSpec((1, Cr), lambda n: (0, 0)),              # ca_b1
                pl.BlockSpec((Cr, C), lambda n: (0, 0)),              # ca_w2
                pl.BlockSpec((1, C), lambda n: (0, 0)),               # ca_b2
            ],
            out_specs=pl.BlockSpec((1, H, W, C), lambda n: (n, 0, 0, 0)),
            scratch_shapes=[
                pltpu.VMEM((H + 2, W + 2, C), jnp.bfloat16),   # padded conv1 in
                pltpu.VMEM((H + 2, W + 2, C), jnp.bfloat16),   # padded conv2 in
            ],
        ),
        compiler_params=pltpu.CompilerParams(
            # Batch blocks are disjoint -> parallel (2x on v7x dual-TC,
            # neutral on v5e/v6e).
            dimension_semantics=("parallel",),
            vmem_limit_bytes=64 * 1024 * 1024,
        ),
    )(x, w1, p["b0"], w2, p["b1"],
      p["ca_w1"], p["ca_b1"], p["ca_w2"], p["ca_b2"])


# ----------------------------------------------------------------------------
# Deterministic synthetic parameters (shapes per the PyTorch module __init__)
# ----------------------------------------------------------------------------
def init_params(key, n_feat, reduction):
    cr = max(n_feat // reduction, 1)
    ks = jax.random.split(key, 6)
    return dict(
        w0=jax.random.normal(ks[0], (3, 3, n_feat, n_feat), jnp.float32) * 0.05,
        b0=jax.random.normal(ks[1], (1, n_feat), jnp.float32) * 0.05,
        w1=jax.random.normal(ks[2], (3, 3, n_feat, n_feat), jnp.float32) * 0.05,
        b1=jax.random.normal(ks[3], (1, n_feat), jnp.float32) * 0.05,
        ca_w1=jax.random.normal(ks[4], (n_feat, cr), jnp.float32) * 0.1,
        ca_b1=jnp.zeros((1, cr), jnp.float32),
        ca_w2=jax.random.normal(ks[5], (cr, n_feat), jnp.float32) * 0.1,
        ca_b2=jnp.zeros((1, n_feat), jnp.float32),
    )


# ----------------------------------------------------------------------------
# Pure-JAX reference (correctness check)
# ----------------------------------------------------------------------------
def rcab_reference(x, p, *, bf16_matmul):
    def conv(a, w, b):
        if bf16_matmul:                     # same numerics as the kernel:
            a = a.astype(jnp.bfloat16)      # bf16 operands, f32 accumulation
            w = w.astype(jnp.bfloat16)
        y = jax.lax.conv_general_dilated(
            a, w, window_strides=(1, 1), padding="SAME",
            dimension_numbers=("NHWC", "HWIO", "NHWC"),
            preferred_element_type=jnp.float32)
        return y + b.reshape(1, 1, 1, -1)

    h = jax.nn.relu(conv(x, p["w0"], p["b0"]))
    res = conv(h, p["w1"], p["b1"])
    y = jnp.mean(res, axis=(1, 2), keepdims=True)                    # (N,1,1,C)
    z = jax.nn.relu(jnp.einsum("nijc,cd->nijd", y, p["ca_w1"])
                    + p["ca_b1"].reshape(1, 1, 1, -1))
    s = jax.nn.sigmoid(jnp.einsum("nijd,dc->nijc", z, p["ca_w2"])
                       + p["ca_b2"].reshape(1, 1, 1, -1))
    return res * s + x


# ----------------------------------------------------------------------------
if __name__ == "__main__":
    # Small but lane-dense / MXU-friendly demo shapes: C = 128 fills the lane
    # dimension and the MXU N dimension; M = H*W = 256, K = 3*C = 384.
    N, H, W = 2, 16, 16
    n_feat, reduction = 128, 16

    key = jax.random.PRNGKey(0)
    kx, kp = jax.random.split(key)
    x = jax.random.normal(kx, (N, H, W, n_feat), jnp.float32)   # NHWC
    params = init_params(kp, n_feat, reduction)

    out = jax.block_until_ready(jax.jit(rcab_forward)(x, params))
    assert out.shape == (N, H, W, n_feat)

    # Strict check vs. a reference with identical numerics (bf16 conv operands,
    # f32 accumulation): differences are only reduction-order noise.
    ref_bf16 = rcab_reference(x, params, bf16_matmul=True)
    err = float(jnp.max(jnp.abs(out - ref_bf16)))
    assert jnp.allclose(out, ref_bf16, atol=1e-2, rtol=1e-2), err

    # Looser sanity check vs. the full-f32 reference (difference = bf16
    # rounding of the MXU operands only).
    ref_f32 = rcab_reference(x, params, bf16_matmul=False)
    err32 = float(jnp.max(jnp.abs(out - ref_f32)))
    assert jnp.allclose(out, ref_f32, atol=1e-1, rtol=1e-1), err32

    print("KERNEL_OK")
</pallas_src>

<mosaic_0001>
module attributes {stable_mosaic.version = 11 : i64} {
  func.func @_rcab_kernel(%arg0: i32, %arg1: memref<1x16x16x128xf32, #tpu.memory_space<vmem>>, %arg2: memref<3x384x128xbf16, #tpu.memory_space<vmem>>, %arg3: memref<1x128xf32, #tpu.memory_space<vmem>>, %arg4: memref<3x384x128xbf16, #tpu.memory_space<vmem>>, %arg5: memref<1x128xf32, #tpu.memory_space<vmem>>, %arg6: memref<128x8xf32, #tpu.memory_space<vmem>>, %arg7: memref<1x8xf32, #tpu.memory_space<vmem>>, %arg8: memref<8x128xf32, #tpu.memory_space<vmem>>, %arg9: memref<1x128xf32, #tpu.memory_space<vmem>>, %arg10: memref<1x16x16x128xf32, #tpu.memory_space<vmem>>, %arg11: memref<18x18x128xbf16, #tpu.memory_space<vmem>>, %arg12: memref<18x18x128xbf16, #tpu.memory_space<vmem>>) attributes {dimension_semantics = [#tpu.dimension_semantics<parallel>], iteration_bounds = array<i64: 2>, scalar_prefetch = 0 : i64, scratch_operands = 2 : i64, tpu.core_type = #tpu.core_type<tc>, window_params = [{transform_indices = @transform_0, window_bounds = array<i64: 1, 16, 16, 128>}, {pipeline_mode = #tpu.pipeline_mode<synchronous>, transform_indices = @transform_1, window_bounds = array<i64: 3, 384, 128>}, {pipeline_mode = #tpu.pipeline_mode<synchronous>, transform_indices = @transform_2, window_bounds = array<i64: 1, 128>}, {pipeline_mode = #tpu.pipeline_mode<synchronous>, transform_indices = @transform_3, window_bounds = array<i64: 3, 384, 128>}, {pipeline_mode = #tpu.pipeline_mode<synchronous>, transform_indices = @transform_4, window_bounds = array<i64: 1, 128>}, {pipeline_mode = #tpu.pipeline_mode<synchronous>, transform_indices = @transform_5, window_bounds = array<i64: 128, 8>}, {pipeline_mode = #tpu.pipeline_mode<synchronous>, transform_indices = @transform_6, window_bounds = array<i64: 1, 8>}, {pipeline_mode = #tpu.pipeline_mode<synchronous>, transform_indices = @transform_7, window_bounds = array<i64: 8, 128>}, {pipeline_mode = #tpu.pipeline_mode<synchronous>, transform_indices = @transform_8, window_bounds = array<i64: 1, 128>}, {transform_indices = @transform_9, window_bounds = array<i64: 1, 16, 16, 128>}]} {
    %c0 = arith.constant 0 : index
    %c0_0 = arith.constant 0 : index
    %c0_1 = arith.constant 0 : index
    %c0_2 = arith.constant 0 : index
    %0 = vector.load %arg1[%c0, %c0_0, %c0_1, %c0_2] : memref<1x16x16x128xf32, #tpu.memory_space<vmem>>, vector<1x16x16x128xf32>
    %1 = vector.shape_cast %0 : vector<1x16x16x128xf32> to vector<16x16x128xf32>
    %cst = arith.constant 0.000000e+00 : bf16
    %2 = vector.broadcast %cst : bf16 to vector<18x18x128xbf16>
    %c0_3 = arith.constant 0 : index
    %c0_4 = arith.constant 0 : index
    %c0_5 = arith.constant 0 : index
    %3 = vector.load %arg11[%c0_3, %c0_4, %c0_5] : memref<18x18x128xbf16, #tpu.memory_space<vmem>>, vector<18x18x128xbf16>
    tpu.vector_store %arg11[%c0_3, %c0_4, %c0_5], %2 {strides = array<i32>} : memref<18x18x128xbf16, #tpu.memory_space<vmem>>, vector<18x18x128xbf16>,
    %4 = arith.truncf %1 : vector<16x16x128xf32> to vector<16x16x128xbf16>
    %c1 = arith.constant 1 : index
    %c1_6 = arith.constant 1 : index
    %c0_7 = arith.constant 0 : index
    %5 = vector.load %arg11[%c1, %c1_6, %c0_7] : memref<18x18x128xbf16, #tpu.memory_space<vmem>>, vector<16x16x128xbf16>
    tpu.vector_store %arg11[%c1, %c1_6, %c0_7], %4 {strides = array<i32>} : memref<18x18x128xbf16, #tpu.memory_space<vmem>>, vector<16x16x128xbf16>,
    %cst_8 = arith.constant 0.000000e+00 : f32
    %6 = vector.broadcast %cst_8 : f32 to vector<256x128xf32>
    %c0_9 = arith.constant 0 : index
    %c0_10 = arith.constant 0 : index
    %c0_11 = arith.constant 0 : index
    %7 = vector.load %arg11[%c0_9, %c0_10, %c0_11] : memref<18x18x128xbf16, #tpu.memory_space<vmem>>, vector<16x18x128xbf16>
    %8 = vector.extract_strided_slice %7 {offsets = [0, 0, 0], sizes = [16, 16, 128], strides = [1, 1, 1]} : vector<16x18x128xbf16> to vector<16x16x128xbf16>
    %9 = vector.extract_strided_slice %7 {offsets = [0, 1, 0], sizes = [16, 16, 128], strides = [1, 1, 1]} : vector<16x18x128xbf16> to vector<16x16x128xbf16>
    %10 = vector.extract_strided_slice %7 {offsets = [0, 2, 0], sizes = [16, 16, 128], strides = [1, 1, 1]} : vector<16x18x128xbf16> to vector<16x16x128xbf16>
    %11 = tpu.concatenate %8, %9, %10 in 2 : vector<16x16x128xbf16>, vector<16x16x128xbf16>, vector<16x16x128xbf16> -> vector<16x16x384xbf16>
    %12 = vector.shape_cast %11 : vector<16x16x384xbf16> to vector<256x384xbf16>
    %c0_12 = arith.constant 0 : index
    %c0_13 = arith.constant 0 : index
    %c0_14 = arith.constant 0 : index
    %13 = vector.load %arg2[%c0_12, %c0_13, %c0_14] : memref<3x384x128xbf16, #tpu.memory_space<vmem>>, vector<1x384x128xbf16>
    %14 = vector.shape_cast %13 : vector<1x384x128xbf16> to vector<384x128xbf16>
    %cst_15 = arith.constant dense<0.000000e+00> : vector<256x128xf32>
    %15 = tpu.matmul %12, %14, %cst_15 {dimension_numbers = #tpu.dot_dimension_numbers<[1], [0], [0], [1], [0, 0, 1, 1], [], []>} : vector<256x384xbf16>, vector<384x128xbf16>, vector<256x128xf32> -> vector<256x128xf32>
    %16 = arith.addf %6, %15 : vector<256x128xf32>
    %c1_16 = arith.constant 1 : index
    %c0_17 = arith.constant 0 : index
    %c0_18 = arith.constant 0 : index
    %17 = vector.load %arg11[%c1_16, %c0_17, %c0_18] : memref<18x18x128xbf16, #tpu.memory_space<vmem>>, vector<16x18x128xbf16>
    %18 = vector.extract_strided_slice %17 {offsets = [0, 0, 0], sizes = [16, 16, 128], strides = [1, 1, 1]} : vector<16x18x128xbf16> to vector<16x16x128xbf16>
    %19 = vector.extract_strided_slice %17 {offsets = [0, 1, 0], sizes = [16, 16, 128], strides = [1, 1, 1]} : vector<16x18x128xbf16> to vector<16x16x128xbf16>
    %20 = vector.extract_strided_slice %17 {offsets = [0, 2, 0], sizes = [16, 16, 128], strides = [1, 1, 1]} : vector<16x18x128xbf16> to vector<16x16x128xbf16>
    %21 = tpu.concatenate %18, %19, %20 in 2 : vector<16x16x128xbf16>, vector<16x16x128xbf16>, vector<16x16x128xbf16> -> vector<16x16x384xbf16>
    %22 = vector.shape_cast %21 : vector<16x16x384xbf16> to vector<256x384xbf16>
    %c1_19 = arith.constant 1 : index
    %c0_20 = arith.constant 0 : index
    %c0_21 = arith.constant 0 : index
    %23 = vector.load %arg2[%c1_19, %c0_20, %c0_21] : memref<3x384x128xbf16, #tpu.memory_space<vmem>>, vector<1x384x128xbf16>
    %24 = vector.shape_cast %23 : vector<1x384x128xbf16> to vector<384x128xbf16>
    %cst_22 = arith.constant dense<0.000000e+00> : vector<256x128xf32>
    %25 = tpu.matmul %22, %24, %cst_22 {dimension_numbers = #tpu.dot_dimension_numbers<[1], [0], [0], [1], [0, 0, 1, 1], [], []>} : vector<256x384xbf16>, vector<384x128xbf16>, vector<256x128xf32> -> vector<256x128xf32>
    %26 = arith.addf %16, %25 : vector<256x128xf32>
    %c2 = arith.constant 2 : index
    %c0_23 = arith.constant 0 : index
    %c0_24 = arith.constant 0 : index
    %27 = vector.load %arg11[%c2, %c0_23, %c0_24] : memref<18x18x128xbf16, #tpu.memory_space<vmem>>, vector<16x18x128xbf16>
    %28 = vector.extract_strided_slice %27 {offsets = [0, 0, 0], sizes = [16, 16, 128], strides = [1, 1, 1]} : vector<16x18x128xbf16> to vector<16x16x128xbf16>
    %29 = vector.extract_strided_slice %27 {offsets = [0, 1, 0], sizes = [16, 16, 128], strides = [1, 1, 1]} : vector<16x18x128xbf16> to vector<16x16x128xbf16>
    %30 = vector.extract_strided_slice %27 {offsets = [0, 2, 0], sizes = [16, 16, 128], strides = [1, 1, 1]} : vector<16x18x128xbf16> to vector<16x16x128xbf16>
    %31 = tpu.concatenate %28, %29, %30 in 2 : vector<16x16x128xbf16>, vector<16x16x128xbf16>, vector<16x16x128xbf16> -> vector<16x16x384xbf16>
    %32 = vector.shape_cast %31 : vector<16x16x384xbf16> to vector<256x384xbf16>
    %c2_25 = arith.constant 2 : index
    %c0_26 = arith.constant 0 : index
    %c0_27 = arith.constant 0 : index
    %33 = vector.load %arg2[%c2_25, %c0_26, %c0_27] : memref<3x384x128xbf16, #tpu.memory_space<vmem>>, vector<1x384x128xbf16>
    %34 = vector.shape_cast %33 : vector<1x384x128xbf16> to vector<384x128xbf16>
    %cst_28 = arith.constant dense<0.000000e+00> : vector<256x128xf32>
    %35 = tpu.matmul %32, %34, %cst_28 {dimension_numbers = #tpu.dot_dimension_numbers<[1], [0], [0], [1], [0, 0, 1, 1], [], []>} : vector<256x384xbf16>, vector<384x128xbf16>, vector<256x128xf32> -> vector<256x128xf32>
    %36 = arith.addf %26, %35 : vector<256x128xf32>
    %c0_29 = arith.constant 0 : index
    %c0_30 = arith.constant 0 : index
    %37 = vector.load %arg3[%c0_29, %c0_30] : memref<1x128xf32, #tpu.memory_space<vmem>>, vector<1x128xf32>
    %38 = vector.broadcast %37 : vector<1x128xf32> to vector<256x128xf32>
    %39 = arith.addf %36, %38 : vector<256x128xf32>
    %cst_31 = arith.constant 0.000000e+00 : f32
    %40 = vector.broadcast %cst_31 : f32 to vector<256x128xf32>
    %41 = arith.maximumf %39, %40 : vector<256x128xf32>
    %cst_32 = arith.constant 0.000000e+00 : bf16
    %42 = vector.broadcast %cst_32 : bf16 to vector<18x18x128xbf16>
    %c0_33 = arith.constant 0 : index
    %c0_34 = arith.constant 0 : index
    %c0_35 = arith.constant 0 : index
    %43 = vector.load %arg12[%c0_33, %c0_34, %c0_35] : memref<18x18x128xbf16, #tpu.memory_space<vmem>>, vector<18x18x128xbf16>
    tpu.vector_store %arg12[%c0_33, %c0_34, %c0_35], %42 {strides = array<i32>} : memref<18x18x128xbf16, #tpu.memory_space<vmem>>, vector<18x18x128xbf16>,
    %44 = vector.shape_cast %41 : vector<256x128xf32> to vector<16x16x128xf32>
    %45 = arith.truncf %44 : vector<16x16x128xf32> to vector<16x16x128xbf16>
    %c1_36 = arith.constant 1 : index
    %c1_37 = arith.constant 1 : index
    %c0_38 = arith.constant 0 : index
    %46 = vector.load %arg12[%c1_36, %c1_37, %c0_38] : memref<18x18x128xbf16, #tpu.memory_space<vmem>>, vector<16x16x128xbf16>
    tpu.vector_store %arg12[%c1_36, %c1_37, %c0_38], %45 {strides = array<i32>} : memref<18x18x128xbf16, #tpu.memory_space<vmem>>, vector<16x16x128xbf16>,
    %cst_39 = arith.constant 0.000000e+00 : f32
    %47 = vector.broadcast %cst_39 : f32 to vector<256x128xf32>
    %c0_40 = arith.constant 0 : index
    %c0_41 = arith.constant 0 : index
    %c0_42 = arith.constant 0 : index
    %48 = vector.load %arg12[%c0_40, %c0_41, %c0_42] : memref<18x18x128xbf16, #tpu.memory_space<vmem>>, vector<16x18x128xbf16>
    %49 = vector.extract_strided_slice %48 {offsets = [0, 0, 0], sizes = [16, 16, 128], strides = [1, 1, 1]} : vector<16x18x128xbf16> to vector<16x16x128xbf16>
    %50 = vector.extract_strided_slice %48 {offsets = [0, 1, 0], sizes = [16, 16, 128], strides = [1, 1, 1]} : vector<16x18x128xbf16> to vector<16x16x128xbf16>
    %51 = vector.extract_strided_slice %48 {offsets = [0, 2, 0], sizes = [16, 16, 128], strides = [1, 1, 1]} : vector<16x18x128xbf16> to vector<16x16x128xbf16>
    %52 = tpu.concatenate %49, %50, %51 in 2 : vector<16x16x128xbf16>, vector<16x16x128xbf16>, vector<16x16x128xbf16> -> vector<16x16x384xbf16>
    %53 = vector.shape_cast %52 : vector<16x16x384xbf16> to vector<256x384xbf16>
    %c0_43 = arith.constant 0 : index
    %c0_44 = arith.constant 0 : index
    %c0_45 = arith.constant 0 : index
    %54 = vector.load %arg4[%c0_43, %c0_44, %c0_45] : memref<3x384x128xbf16, #tpu.memory_space<vmem>>, vector<1x384x128xbf16>
    %55 = vector.shape_cast %54 : vector<1x384x128xbf16> to vector<384x128xbf16>
    %cst_46 = arith.constant dense<0.000000e+00> : vector<256x128xf32>
    %56 = tpu.matmul %53, %55, %cst_46 {dimension_numbers = #tpu.dot_dimension_numbers<[1], [0], [0], [1], [0, 0, 1, 1], [], []>} : vector<256x384xbf16>, vector<384x128xbf16>, vector<256x128xf32> -> vector<256x128xf32>
    %57 = arith.addf %47, %56 : vector<256x128xf32>
    %c1_47 = arith.constant 1 : index
    %c0_48 = arith.constant 0 : index
    %c0_49 = arith.constant 0 : index
    %58 = vector.load %arg12[%c1_47, %c0_48, %c0_49] : memref<18x18x128xbf16, #tpu.memory_space<vmem>>, vector<16x18x128xbf16>
    %59 = vector.extract_strided_slice %58 {offsets = [0, 0, 0], sizes = [16, 16, 128], strides = [1, 1, 1]} : vector<16x18x128xbf16> to vector<16x16x128xbf16>
    %60 = vector.extract_strided_slice %58 {offsets = [0, 1, 0], sizes = [16, 16, 128], strides = [1, 1, 1]} : vector<16x18x128xbf16> to vector<16x16x128xbf16>
    %61 = vector.extract_strided_slice %58 {offsets = [0, 2, 0], sizes = [16, 16, 128], strides = [1, 1, 1]} : vector<16x18x128xbf16> to vector<16x16x128xbf16>
    %62 = tpu.concatenate %59, %60, %61 in 2 : vector<16x16x128xbf16>, vector<16x16x128xbf16>, vector<16x16x128xbf16> -> vector<16x16x384xbf16>
    %63 = vector.shape_cast %62 : vector<16x16x384xbf16> to vector<256x384xbf16>
    %c1_50 = arith.constant 1 : index
    %c0_51 = arith.constant 0 : index
    %c0_52 = arith.constant 0 : index
    %64 = vector.load %arg4[%c1_50, %c0_51, %c0_52] : memref<3x384x128xbf16, #tpu.memory_space<vmem>>, vector<1x384x128xbf16>
    %65 = vector.shape_cast %64 : vector<1x384x128xbf16> to vector<384x128xbf16>
    %cst_53 = arith.constant dense<0.000000e+00> : vector<256x128xf32>
    %66 = tpu.matmul %63, %65, %cst_53 {dimension_numbers = #tpu.dot_dimension_numbers<[1], [0], [0], [1], [0, 0, 1, 1], [], []>} : vector<256x384xbf16>, vector<384x128xbf16>, vector<256x128xf32> -> vector<256x128xf32>
    %67 = arith.addf %57, %66 : vector<256x128xf32>
    %c2_54 = arith.constant 2 : index
    %c0_55 = arith.constant 0 : index
    %c0_56 = arith.constant 0 : index
    %68 = vector.load %arg12[%c2_54, %c0_55, %c0_56] : memref<18x18x128xbf16, #tpu.memory_space<vmem>>, vector<16x18x128xbf16>
    %69 = vector.extract_strided_slice %68 {offsets = [0, 0, 0], sizes = [16, 16, 128], strides = [1, 1, 1]} : vector<16x18x128xbf16> to vector<16x16x128xbf16>
    %70 = vector.extract_strided_slice %68 {offsets = [0, 1, 0], sizes = [16, 16, 128], strides = [1, 1, 1]} : vector<16x18x128xbf16> to vector<16x16x128xbf16>
    %71 = vector.extract_strided_slice %68 {offsets = [0, 2, 0], sizes = [16, 16, 128], strides = [1, 1, 1]} : vector<16x18x128xbf16> to vector<16x16x128xbf16>
    %72 = tpu.concatenate %69, %70, %71 in 2 : vector<16x16x128xbf16>, vector<16x16x128xbf16>, vector<16x16x128xbf16> -> vector<16x16x384xbf16>
    %73 = vector.shape_cast %72 : vector<16x16x384xbf16> to vector<256x384xbf16>
    %c2_57 = arith.constant 2 : index
    %c0_58 = arith.constant 0 : index
    %c0_59 = arith.constant 0 : index
    %74 = vector.load %arg4[%c2_57, %c0_58, %c0_59] : memref<3x384x128xbf16, #tpu.memory_space<vmem>>, vector<1x384x128xbf16>
    %75 = vector.shape_cast %74 : vector<1x384x128xbf16> to vector<384x128xbf16>
    %cst_60 = arith.constant dense<0.000000e+00> : vector<256x128xf32>
    %76 = tpu.matmul %73, %75, %cst_60 {dimension_numbers = #tpu.dot_dimension_numbers<[1], [0], [0], [1], [0, 0, 1, 1], [], []>} : vector<256x384xbf16>, vector<384x128xbf16>, vector<256x128xf32> -> vector<256x128xf32>
    %77 = arith.addf %67, %76 : vector<256x128xf32>
    %c0_61 = arith.constant 0 : index
    %c0_62 = arith.constant 0 : index
    %78 = vector.load %arg5[%c0_61, %c0_62] : memref<1x128xf32, #tpu.memory_space<vmem>>, vector<1x128xf32>
    %79 = vector.broadcast %78 : vector<1x128xf32> to vector<256x128xf32>
    %80 = arith.addf %77, %79 : vector<256x128xf32>
    %cst_63 = arith.constant dense<0.000000e+00> : vector<128xf32>
    %81 = vector.multi_reduction <add>, %80, %cst_63 [0] : vector<256x128xf32> to vector<128xf32>
    %82 = vector.shape_cast %81 : vector<128xf32> to vector<1x128xf32>
    %cst_64 = arith.constant 3.906250e-03 : f32
    %83 = vector.broadcast %cst_64 : f32 to vector<1x128xf32>
    %84 = arith.mulf %82, %83 : vector<1x128xf32>
    %c0_65 = arith.constant 0 : index
    %c0_66 = arith.constant 0 : index
    %85 = vector.load %arg6[%c0_65, %c0_66] : memref<128x8xf32, #tpu.memory_space<vmem>>, vector<128x8xf32>
    %cst_67 = arith.constant dense<0.000000e+00> : vector<1x8xf32>
    %86 = tpu.matmul %84, %85, %cst_67 {dimension_numbers = #tpu.dot_dimension_numbers<[1], [0], [0], [1], [0, 0, 1, 1], [], []>} : vector<1x128xf32>, vector<128x8xf32>, vector<1x8xf32> -> vector<1x8xf32>
    %c0_68 = arith.constant 0 : index
    %c0_69 = arith.constant 0 : index
    %87 = vector.load %arg7[%c0_68, %c0_69] : memref<1x8xf32, #tpu.memory_space<vmem>>, vector<1x8xf32>
    %88 = arith.addf %86, %87 : vector<1x8xf32>
    %cst_70 = arith.constant 0.000000e+00 : f32
    %89 = vector.broadcast %cst_70 : f32 to vector<1x8xf32>
    %90 = arith.maximumf %88, %89 : vector<1x8xf32>
    %c0_71 = arith.constant 0 : index
    %c0_72 = arith.constant 0 : index
    %91 = vector.load %arg8[%c0_71, %c0_72] : memref<8x128xf32, #tpu.memory_space<vmem>>, vector<8x128xf32>
    %cst_73 = arith.constant dense<0.000000e+00> : vector<1x128xf32>
    %92 = tpu.matmul %90, %91, %cst_73 {dimension_numbers = #tpu.dot_dimension_numbers<[1], [0], [0], [1], [0, 0, 1, 1], [], []>} : vector<1x8xf32>, vector<8x128xf32>, vector<1x128xf32> -> vector<1x128xf32>
    %c0_74 = arith.constant 0 : index
    %c0_75 = arith.constant 0 : index
    %93 = vector.load %arg9[%c0_74, %c0_75] : memref<1x128xf32, #tpu.memory_space<vmem>>, vector<1x128xf32>
    %94 = arith.addf %92, %93 : vector<1x128xf32>
    %95 = arith.negf %94 : vector<1x128xf32>
    %96 = math.exp %95 : vector<1x128xf32>
    %cst_76 = arith.constant 1.000000e+00 : f32
    %97 = vector.broadcast %cst_76 : f32 to vector<1x128xf32>
    %98 = arith.addf %97, %96 : vector<1x128xf32>
    %99 = arith.divf %97, %98 : vector<1x128xf32>
    %100 = vector.broadcast %99 : vector<1x128xf32> to vector<256x128xf32>
    %101 = arith.mulf %80, %100 : vector<256x128xf32>
    %102 = vector.shape_cast %1 : vector<16x16x128xf32> to vector<256x128xf32>
    %103 = arith.addf %101, %102 : vector<256x128xf32>
    %104 = vector.shape_cast %103 : vector<256x128xf32> to vector<1x16x16x128xf32>
    %c0_77 = arith.constant 0 : index
    %c0_78 = arith.constant 0 : index
    %c0_79 = arith.constant 0 : index
    %c0_80 = arith.constant 0 : index
    %105 = vector.load %arg10[%c0_77, %c0_78, %c0_79, %c0_80] : memref<1x16x16x128xf32, #tpu.memory_space<vmem>>, vector<1x16x16x128xf32>
    tpu.vector_store %arg10[%c0_77, %c0_78, %c0_79, %c0_80], %104 {strides = array<i32>} : memref<1x16x16x128xf32, #tpu.memory_space<vmem>>, vector<1x16x16x128xf32>,
    return
  }
  func.func @transform_0(%arg0: i32) -> (i32, i32, i32, i32) {
    %c0_i32 = arith.constant 0 : i32
    %c0_i32_0 = arith.constant 0 : i32
    %c0_i32_1 = arith.constant 0 : i32
    %c0_i32_2 = arith.constant 0 : i32
    return %arg0, %c0_i32, %c0_i32_0, %c0_i32_1 : i32, i32, i32, i32
  }
  func.func @transform_1(%arg0: i32) -> (i32, i32, i32) {
    %c0_i32 = arith.constant 0 : i32
    %c0_i32_0 = arith.constant 0 : i32
    %c0_i32_1 = arith.constant 0 : i32
    %c0_i32_2 = arith.constant 0 : i32
    return %c0_i32, %c0_i32_0, %c0_i32_1 : i32, i32, i32
  }
  func.func @transform_2(%arg0: i32) -> (i32, i32) {
    %c0_i32 = arith.constant 0 : i32
    %c0_i32_0 = arith.constant 0 : i32
    %c0_i32_1 = arith.constant 0 : i32
    return %c0_i32, %c0_i32_0 : i32, i32
  }
  func.func @transform_3(%arg0: i32) -> (i32, i32, i32) {
    %c0_i32 = arith.constant 0 : i32
    %c0_i32_0 = arith.constant 0 : i32
    %c0_i32_1 = arith.constant 0 : i32
    %c0_i32_2 = arith.constant 0 : i32
    return %c0_i32, %c0_i32_0, %c0_i32_1 : i32, i32, i32
  }
  func.func @transform_4(%arg0: i32) -> (i32, i32) {
    %c0_i32 = arith.constant 0 : i32
    %c0_i32_0 = arith.constant 0 : i32
    %c0_i32_1 = arith.constant 0 : i32
    return %c0_i32, %c0_i32_0 : i32, i32
  }
  func.func @transform_5(%arg0: i32) -> (i32, i32) {
    %c0_i32 = arith.constant 0 : i32
    %c0_i32_0 = arith.constant 0 : i32
    %c0_i32_1 = arith.constant 0 : i32
    return %c0_i32, %c0_i32_0 : i32, i32
  }
  func.func @transform_6(%arg0: i32) -> (i32, i32) {
    %c0_i32 = arith.constant 0 : i32
    %c0_i32_0 = arith.constant 0 : i32
    %c0_i32_1 = arith.constant 0 : i32
    return %c0_i32, %c0_i32_0 : i32, i32
  }
  func.func @transform_7(%arg0: i32) -> (i32, i32) {
    %c0_i32 = arith.constant 0 : i32
    %c0_i32_0 = arith.constant 0 : i32
    %c0_i32_1 = arith.constant 0 : i32
    return %c0_i32, %c0_i32_0 : i32, i32
  }
  func.func @transform_8(%arg0: i32) -> (i32, i32) {
    %c0_i32 = arith.constant 0 : i32
    %c0_i32_0 = arith.constant 0 : i32
    %c0_i32_1 = arith.constant 0 : i32
    return %c0_i32, %c0_i32_0 : i32, i32
  }
  func.func @transform_9(%arg0: i32) -> (i32, i32, i32, i32) {
    %c0_i32 = arith.constant 0 : i32
    %c0_i32_0 = arith.constant 0 : i32
    %c0_i32_1 = arith.constant 0 : i32
    %c0_i32_2 = arith.constant 0 : i32
    return %arg0, %c0_i32, %c0_i32_0, %c0_i32_1 : i32, i32, i32, i32
  }
}

</mosaic_0001>

<bundles_post_ra>
// kernel: rcab_forward.1
= control target key start
LH: loop header
LB: loop body
LE: loop exit
PB: predicated region body
PF: predicated region fallthrough
CT: control target
= control target key end

     0   :  { %s14150_s0 = inlined_call_operand.hbm [shape: f32[2,16,16,128], index: 0, kind: input, shape index: {}]   ;;  %s14151_s1 = inlined_call_operand.hbm [shape: bf16[3,384,128], index: 1, kind: input, shape index: {}]   ;;  %s14152_s2 = inlined_call_operand.hbm [shape: f32[1,128], index: 2, kind: input, shape index: {}]   ;;  %s14153_s3 = inlined_call_operand.hbm [shape: bf16[3,384,128], index: 3, kind: input, shape index: {}]   ;;  %s14154_s4 = inlined_call_operand.hbm [shape: f32[1,128], index: 4, kind: input, shape index: {}]   ;;  %s14155_s5 = inlined_call_operand.hbm [shape: f32[128,8], index: 5, kind: input, shape index: {}]   ;;  %s14156_s6 = inlined_call_operand.hbm [shape: f32[1,8], index: 6, kind: input, shape index: {}]   ;;  %s14157_s7 = inlined_call_operand.hbm [shape: f32[8,128], index: 7, kind: input, shape index: {}]   ;;  %s14158_s8 = inlined_call_operand.hbm [shape: f32[1,128], index: 8, kind: input, shape index: {}]   ;;  %s14159_s9 = inlined_call_operand.hbm [shape: f32[2,16,16,128], index: 9, kind: output, shape index: {}]  }
   0x1   :  { %14170 = sst [smem:[#allocation42_spill]] %s14151_s1 }
   0x2   :  { %14171 = sst [smem:[#allocation43_spill]] %s14153_s3 }
   0x3   :  { %14172 = sst [smem:[#allocation44_spill]] %s14159_s9 }
   0x4   :  { %14 = vsyncpa [#allocation5], 0 }
   0x5   :  { %16 = vsyncpa [#allocation5 + $0x1], 0 }
   0x6   :  { %17 = vsyncpa [#allocation8], 0 }
   0x7   :  { %18 = vsyncpa [#allocation11], 0 }
   0x8   :  { %19 = vsyncpa [#allocation14], 0 }
   0x9   :  { %20 = vsyncpa [#allocation17], 0 }
   0xa   :  { %21 = vsyncpa [#allocation6], 0 }
   0xb   :  { %23 = vsyncpa [#allocation6 + $0x1], 0  ;;  %s11144_s30 = smov 0   ;;  %s11146_s10 = smov 0  }
   0xc   :  { %s11148_s11 = smov 0   ;;  %s11150_s12 = smov 0  }
   0xd LB: > { %s11074_s13 = smov [#allocation7]   ;;  %s11165_s15 = sadd.s32 4294967295, %s11072_s12   ;;  %s11072_s12 = sphi %s11150_s12, %s14272_s12   ;;  %s11068_s11 = sphi %s11148_s11, %s14271_s11   ;;  %s11064_s10 = sphi %s11146_s10, %s14270_s10   ;;  %s11060_s30 = sphi %s11144_s30, %s14269_s30  }
   0xe   : > { %s266_s14 = sshll.u32 %s11074_s13, 4  ;;  %p8186_p0 = scmp.ge.s32.totalorder %s11072_s12, 1  ;;  %s11170_s14 = int_to_ptr.vmem [resolvable:$true] %s266_s14 }
   0xf   : > { %p14161_p1 = scmp.eq.s32.totalorder %s11165_s15, 0  ;;  %p254_p2 = scmp.lt.s32.totalorder %s11072_s12, 3 }
  0x10   : > { %s11075_s17 = smov [#allocation10]   ;;  %s11076_s20 = smov [#allocation13]  }
  0x11   : > { %p11172_p3 = pnand %p8186_p0, %p254_p2  ;;  %s290_s18 = sshll.u32 %s11075_s17, 4  ;;  %s11185_s18 = int_to_ptr.vmem [resolvable:$true] %s290_s18 }
  0x12   : > { %s314_s21 = sshll.u32 %s11076_s20, 4  ;;  %s14175_s1 = sld [smem:[#allocation42_spill]]  ;;  %s11187_s21 = int_to_ptr.vmem [resolvable:$true] %s314_s21 }
  0x13   : > { %s14173_s16 = scalar_select %p11172_p3, 1, 0 }
  0x14   : > { %p10228_p5 = pneg %p11172_p3 }
  0x16   : > { %p11181_p6 = pnand %p10228_p5, %p14161_p1 }
  0x18   : > { %s10736_s24 = scalar_lea.hbm %s14175_s1, 9216  ;;  %p11197_p8 = pneg %p11181_p6 }
  0x19   : > { %p10737_p7 = scmp.ne.s32.totalorder %s14175_s1, %s10736_s24  ;;  %p10743_p11 = scmp.lt.u32.totalorder %s10736_s24, %s14175_s1 }
  0x1b   : > { %p10739_p9 = pnand %p11197_p8, %p10737_p7 }
  0x1d   : > { %p10740_p10 = pneg %p10739_p9 }
  0x1f   : > { %p10745_p12 = pnand %p10743_p11, %p10740_p10 }
  0x21   : > { %10748 = shalt.err (!%p10745_p12)
}
  0x22   : > { %s10749_s13 = scalar_lea.vmem %s11170_s14, 9216  ;;  %p10757_p5 = scmp.lt.s32.totalorder %s11170_s14, %s11170_s14 }
  0x23   : > { %p10750_p13 = scmp.ne.s32.totalorder %s11170_s14, %s10749_s13  ;;  %p10758_p4 = scmp.lt.s32.totalorder %s10749_s13, %s10749_s13 }
  0x25   : > { %p10752_p0 = pnand %p10750_p13, %p11197_p8  ;;  %p10759_p7 = por %p10758_p4, %p10757_p5 }
  0x27   : > { %p10753_p2 = pneg %p10752_p0 }
  0x29   : > { %p10760_p9 = pnand %p10759_p7, %p10753_p2 }
  0x2b   : > { %10763 = shalt.err (!%p10760_p9)
}
  0x2c   : > { %s11077_s17 = smov 64   ;;  %s11078_s20 = smov 4  }
  0x2d   : > { %10231 = dma.hbm_to_vmem [thread:$0]  (!%p11181_p6), %s14175_s1, 9216, %s11170_s14, [#allocation8], %s11077_s17, %s11077_s17, %s11078_s20  }
  0x2e   : > { %s14177_s3 = sld [smem:[#allocation43_spill]] }
  0x34   : > { %s10764_s26 = scalar_lea.hbm %s14177_s3, 9216 }
  0x35   : > { %p10765_p4 = scmp.ne.s32.totalorder %s14177_s3, %s10764_s26  ;;  %p10771_p12 = scmp.lt.u32.totalorder %s10764_s26, %s14177_s3 }
  0x37   : > { %p10767_p10 = pnand %p10765_p4, %p11197_p8 }
  0x39   : > { %p10768_p11 = pneg %p10767_p10 }
  0x3b   : > { %p10773_p13 = pnand %p10771_p12, %p10768_p11 }
  0x3d   : > { %10776 = shalt.err (!%p10773_p13)
}
  0x3e   : > { %s10777_s14 = scalar_lea.vmem %s11185_s18, 9216  ;;  %p10785_p7 = scmp.lt.s32.totalorder %s11185_s18, %s11185_s18 }
  0x3f   : > { %p10778_p0 = scmp.ne.s32.totalorder %s11185_s18, %s10777_s14  ;;  %p10786_p9 = scmp.lt.s32.totalorder %s10777_s14, %s10777_s14 }
  0x41   : > { %p10780_p2 = pnand %p10778_p0, %p11197_p8  ;;  %p10787_p4 = por %p10786_p9, %p10785_p7 }
  0x43   : > { %p10781_p5 = pneg %p10780_p2 }
  0x45   : > { %p10788_p10 = pnand %p10787_p4, %p10781_p5 }
  0x47   : > { %10791 = shalt.err (!%p10788_p10)
}
  0x48   : > { %10237 = dma.hbm_to_vmem [thread:$0]  (!%p11181_p6), %s14177_s3, 9216, %s11185_s18, [#allocation11], %s11077_s17, %s11077_s17, %s11078_s20  }
  0x49   : > { %s10792_s25 = scalar_lea.hbm %s14155_s5, 2048 }
  0x4a   : > { %p10793_p11 = scmp.ne.s32.totalorder %s14155_s5, %s10792_s25  ;;  %p10799_p0 = scmp.lt.u32.totalorder %s10792_s25, %s14155_s5 }
  0x4c   : > { %p10795_p12 = pnand %p10793_p11, %p11197_p8 }
  0x4e   : > { %p10796_p13 = pneg %p10795_p12 }
  0x50   : > { %p10801_p2 = pnand %p10799_p0, %p10796_p13 }
  0x52   : > { %10804 = shalt.err (!%p10801_p2)
}
  0x53   : > { %s10805_s18 = scalar_lea.vmem %s11187_s21, 2048  ;;  %p10813_p4 = scmp.lt.s32.totalorder %s11187_s21, %s11187_s21 }
  0x54   : > { %p10806_p5 = scmp.ne.s32.totalorder %s11187_s21, %s10805_s18  ;;  %p10814_p10 = scmp.lt.s32.totalorder %s10805_s18, %s10805_s18 }
  0x56   : > { %p10808_p7 = pnand %p10806_p5, %p11197_p8  ;;  %p10815_p11 = por %p10814_p10, %p10813_p4 }
  0x58   : > { %p10809_p9 = pneg %p10808_p7 }
  0x5a   : > { %p10816_p12 = pnand %p10815_p11, %p10809_p9 }
  0x5c   : > { %10819 = shalt.err (!%p10816_p12)
}
  0x5d   : > { %s11079_s17 = smov 128   ;;  %s11080_s20 = smov 8  }
  0x5e   : > { %10243 = dma.hbm_to_vmem [thread:$0]  (!%p11181_p6), %s14155_s5, 2048, %s11187_s21, [#allocation14], %s11079_s17, %s11079_s17, %s11080_s20  }
  0x5f   : > { %s11081_s22 = smov [#allocation16]   ;;  %s11082_s24 = smov [#allocation9]  }
  0x60   : > { %s339_s23 = sshll.u32 %s11081_s22, 4  ;;  %s280_s25 = sshll.u32 %s11082_s24, 4  ;;  %s340_s23 = int_to_ptr.vmem [resolvable:$true] %s339_s23  ;;  %s281_s25 = int_to_ptr.vmem [resolvable:$true] %s280_s25 }
  0x61   : > { %s10820_s29 = scalar_lea.hbm %s14157_s7, 128 }
  0x62   : > { %p10821_p13 = scmp.ne.s32.totalorder %s14157_s7, %s10820_s29  ;;  %p10827_p5 = scmp.lt.u32.totalorder %s10820_s29, %s14157_s7 }
  0x64   : > { %p10823_p0 = pnand %p10821_p13, %p11197_p8 }
  0x66   : > { %p10824_p2 = pneg %p10823_p0 }
  0x68   : > { %p10829_p7 = pnand %p10827_p5, %p10824_p2 }
  0x6a   : > { %10832 = shalt.err (!%p10829_p7)
}
  0x6b   : > { %s10833_s21 = scalar_lea.vmem %s340_s23, 128  ;;  %p10841_p11 = scmp.lt.s32.totalorder %s340_s23, %s340_s23 }
  0x6c   : > { %p10834_p9 = scmp.ne.s32.totalorder %s340_s23, %s10833_s21  ;;  %p10842_p12 = scmp.lt.s32.totalorder %s10833_s21, %s10833_s21 }
  0x6e   : > { %p10836_p4 = pnand %p10834_p9, %p11197_p8  ;;  %p10843_p1 = por %p10842_p12, %p10841_p11 }
  0x70   : > { %p10837_p10 = pneg %p10836_p4 }
  0x72   : > { %p10844_p3 = pnand %p10843_p1, %p10837_p10 }
  0x74   : > { %10847 = shalt.err (!%p10844_p3)
}
  0x75   : > { %10249 = dma.hbm_to_vmem [thread:$0]  (!%p11181_p6), %s14157_s7, 128, %s340_s23, [#allocation17]  }
  0x76   : > { %s10848_s22 = scalar_lea.hbm %s14152_s2, 16 }
  0x77   : > { %p10849_p13 = scmp.ne.s32.totalorder %s14152_s2, %s10848_s22  ;;  %p10855_p3 = scmp.lt.u32.totalorder %s10848_s22, %s14152_s2 }
  0x79   : > { %p10851_p0 = pnand %p10849_p13, %p11197_p8 }
  0x7b   : > { %p10852_p1 = pneg %p10851_p0 }
  0x7d   : > { %p10857_p2 = pnand %p10855_p3, %p10852_p1 }
  0x7f   : > { %10860 = shalt.err (!%p10857_p2)
}
  0x80   : > { %s10861_s13 = scalar_lea.vmem %s281_s25, 16  ;;  %s10868_s23 = scalar_lea.vmem %s281_s25, 32 }
  0x81   : > { %p10862_p5 = scmp.ne.s32.totalorder %s281_s25, %s10861_s13  ;;  %p10869_p4 = scmp.lt.s32.totalorder %s281_s25, %s281_s25 }
  0x82   : > { %p10870_p10 = scmp.lt.s32.totalorder %s10868_s23, %s10861_s13 }
  0x83   : > { %p10864_p7 = pnand %p10862_p5, %p11197_p8 }
  0x84   : > { %p10871_p11 = por %p10870_p10, %p10869_p4 }
  0x85   : > { %p10865_p9 = pneg %p10864_p7 }
  0x87   : > { %p10872_p12 = pnand %p10871_p11, %p10865_p9 }
  0x89   : > { %10875 = shalt.err (!%p10872_p12)
}
  0x8a   : > { %10234 = dma.hbm_to_vmem [thread:$0]  (!%p11181_p6), %s14152_s2, 16, %s281_s25, [#allocation8]  }
  0x8b   : > { %s11083_s14 = smov [#allocation12]   ;;  %s11084_s1 = smov [#allocation15]  }
  0x8c   : > { %s304_s9 = sshll.u32 %s11083_s14, 4  ;;  %s328_s3 = sshll.u32 %s11084_s1, 4  ;;  %s305_s9 = int_to_ptr.vmem [resolvable:$true] %s304_s9  ;;  %s329_s3 = int_to_ptr.vmem [resolvable:$true] %s328_s3 }
  0x8d   : > { %s10876_s26 = scalar_lea.hbm %s14154_s4, 16 }
  0x8e   : > { %p10877_p13 = scmp.ne.s32.totalorder %s14154_s4, %s10876_s26  ;;  %p10883_p3 = scmp.lt.u32.totalorder %s10876_s26, %s14154_s4 }
  0x90   : > { %p10879_p0 = pnand %p10877_p13, %p11197_p8 }
  0x92   : > { %p10880_p1 = pneg %p10879_p0 }
  0x94   : > { %p10885_p2 = pnand %p10883_p3, %p10880_p1 }
  0x96   : > { %10888 = shalt.err (!%p10885_p2)
}
  0x97   : > { %s10889_s25 = scalar_lea.vmem %s305_s9, 16  ;;  %s10896_s18 = scalar_lea.vmem %s305_s9, 32 }
  0x98   : > { %p10890_p5 = scmp.ne.s32.totalorder %s305_s9, %s10889_s25  ;;  %p10897_p4 = scmp.lt.s32.totalorder %s305_s9, %s305_s9 }
  0x99   : > { %p10898_p10 = scmp.lt.s32.totalorder %s10896_s18, %s10889_s25 }
  0x9a   : > { %p10892_p7 = pnand %p10890_p5, %p11197_p8 }
  0x9b   : > { %p10899_p11 = por %p10898_p10, %p10897_p4 }
  0x9c   : > { %p10893_p9 = pneg %p10892_p7 }
  0x9e   : > { %p10900_p12 = pnand %p10899_p11, %p10893_p9 }
  0xa0   : > { %10903 = shalt.err (!%p10900_p12)
}
  0xa1   : > { %10240 = dma.hbm_to_vmem [thread:$0]  (!%p11181_p6), %s14154_s4, 16, %s305_s9, [#allocation11]  }
  0xa2   : > { %s10904_s24 = scalar_lea.hbm %s14156_s6, 16 }
  0xa3   : > { %p10905_p13 = scmp.ne.s32.totalorder %s14156_s6, %s10904_s24  ;;  %p10911_p3 = scmp.lt.u32.totalorder %s10904_s24, %s14156_s6 }
  0xa5   : > { %p10907_p0 = pnand %p10905_p13, %p11197_p8 }
  0xa7   : > { %p10908_p1 = pneg %p10907_p0 }
  0xa9   : > { %p10913_p2 = pnand %p10911_p3, %p10908_p1 }
  0xab   : > { %10916 = shalt.err (!%p10913_p2)
}
  0xac   : > { %s10917_s23 = scalar_lea.vmem %s329_s3, 16  ;;  %s10924_s9 = scalar_lea.vmem %s329_s3, 32 }
  0xad   : > { %p10918_p5 = scmp.ne.s32.totalorder %s329_s3, %s10917_s23  ;;  %p10925_p4 = scmp.lt.s32.totalorder %s329_s3, %s329_s3 }
  0xae   : > { %p10926_p10 = scmp.lt.s32.totalorder %s10924_s9, %s10917_s23 }
  0xaf   : > { %p10920_p7 = pnand %p10918_p5, %p11197_p8 }
  0xb0   : > { %p10927_p11 = por %p10926_p10, %p10925_p4 }
  0xb1   : > { %p10921_p9 = pneg %p10920_p7 }
  0xb3   : > { %p10928_p12 = pnand %p10927_p11, %p10921_p9 }
  0xb5   : > { %10931 = shalt.err (!%p10928_p12)
}
  0xb6   : > { %10246 = dma.hbm_to_vmem [thread:$0]  (!%p11181_p6), %s14156_s6, 16, %s329_s3, [#allocation14]  }
  0xb7   : > { %s11085_s21 = smov [#allocation18]   ;;  %s10932_s24 = scalar_lea.hbm %s14158_s8, 16 }
  0xb8   : > { %s350_s14 = sshll.u32 %s11085_s21, 4  ;;  %p10933_p13 = scmp.ne.s32.totalorder %s14158_s8, %s10932_s24  ;;  %s351_s14 = int_to_ptr.vmem [resolvable:$true] %s350_s14 }
  0xb9   : > { %p10939_p3 = scmp.lt.u32.totalorder %s10932_s24, %s14158_s8 }
  0xba   : > { %p10935_p0 = pnand %p10933_p13, %p11197_p8 }
  0xbc   : > { %p10936_p1 = pneg %p10935_p0 }
  0xbe   : > { %p10941_p2 = pnand %p10939_p3, %p10936_p1 }
  0xc0   : > { %10944 = shalt.err (!%p10941_p2)
}
  0xc1   : > { %s10945_s3 = scalar_lea.vmem %s351_s14, 16  ;;  %s10952_s23 = scalar_lea.vmem %s351_s14, 32 }
  0xc2   : > { %p10946_p5 = scmp.ne.s32.totalorder %s351_s14, %s10945_s3  ;;  %p10953_p4 = scmp.lt.s32.totalorder %s351_s14, %s351_s14 }
  0xc3   : > { %p10954_p10 = scmp.lt.s32.totalorder %s10952_s23, %s10945_s3 }
  0xc4   : > { %p10948_p7 = pnand %p10946_p5, %p11197_p8 }
  0xc5   : > { %p10955_p11 = por %p10954_p10, %p10953_p4 }
  0xc6   : > { %p10949_p9 = pneg %p10948_p7 }
  0xc8   : > { %p10956_p12 = pnand %p10955_p11, %p10949_p9 }
  0xca   : > { %10959 = shalt.err (!%p10956_p12)
}
  0xcb   : > { %10252 = dma.hbm_to_vmem [thread:$0]  (!%p11181_p6), %s14158_s8, 16, %s351_s14, [#allocation17]  }
  0xcc   : > { %s8185_s27 = sadd.s32 4294967294, %s11072_s12   ;;  %s11359_s19 = sadd.s32 1, %s11072_s12  }
  0xcd   : > { %s33_s18 = ssub.s32 %s11072_s12, %s11359_s19  ;;  %s36_s21 = sadd.s32 1, %s11068_s11 }
  0xce   : > { %p34_p8 = scmp.eq.s32.totalorder %s33_s18, 0  ;;  %p43_p13 = scmp.ne.s32.totalorder %s11068_s11, %s11064_s10 }
  0xcf   : > { %p44_p0 = scmp.eq.s32.totalorder %s11072_s12, 0  ;;  %p49_p1 = scmp.ne.s32.totalorder %s11064_s10, %s11060_s30 }
  0xd0   : > { %s11370_s1 = scalar_select %p34_p8, %s11068_s11, %s36_s21  }
  0xd1   : > { %p11372_p3 = por %p44_p0, %p43_p13  ;;  %p14179_p2 = scmp.eq.s32.totalorder %s11165_s15, 0 }
  0xd2   : > { %p241_p5 = scmp.eq.s32.totalorder %s11165_s15, 1  ;;  %p247_p7 = scmp.eq.s32.totalorder %s8185_s27, 1 }
  0xd3   : > { %p11378_p6 = por %p14179_p2, %p49_p1  ;;  %p10269_p9 = scmp.lt.s32.totalorder %s11072_s12, 2 }
  0xd4   : > { %s361_s24 = sand.u32 1, %s11068_s11   ;;  %p11385_p4 = por %p241_p5, %p43_p13 }
  0xd5   : > { %p11389_p10 = por %p247_p7, %p49_p1  ;;  %s8196_s29 = sshll.u32 %s361_s24, 8 }
  0xd6   : > { %s14181_s26 = scalar_select %p11385_p4, 1, 0 }
  0xd7   : > { %s14182_s28 = scalar_select %p11389_p10, 1, 0 }
  0xd8   : > { %s8619_s13 = sshll.u32 %s11072_s12, 12  ;;  %s365_s25 = scalar_lea.vmem [#allocation4], %s8196_s29 }
  0xd9   : > { %s11397_s9 = scalar_lea.hbm %s14150_s0, %s8619_s13  ;;  %s372_s27 = sshll.u32 %s365_s25, 4  ;;  %s11399_s27 = int_to_ptr.vmem [resolvable:$true] %s372_s27 }
  0xda   : > { %p11403_p11 = pnand %p10269_p9, %p11372_p3  ;;  %s11407_s21 = scalar_lea.sflag [#allocation5], %s361_s24 }
  0xdb   : > { %s10960_s3 = scalar_lea.hbm %s11397_s9, 4096  ;;  %s10965_s22 = scalar_lea.hbm %s14150_s0, 8192 }
  0xdc   : > { %p10961_p12 = scmp.ne.s32.totalorder %s11397_s9, %s10960_s3  ;;  %p10962_p8 = pneg %p11403_p11 }
  0xdd   : > { %p10966_p1 = scmp.lt.u32.totalorder %s11397_s9, %s14150_s0  ;;  %p10967_p3 = scmp.lt.u32.totalorder %s10965_s22, %s10960_s3 }
  0xde   : > { %p10963_p13 = pnand %p10962_p8, %p10961_p12  ;;  %p10969_p5 = scmp.lt.u32.totalorder %s10960_s3, %s11397_s9 }
  0xdf   : > { %p10968_p2 = por %p10967_p3, %p10966_p1 }
  0xe0   : > { %p10964_p0 = pneg %p10963_p13 }
  0xe1   : > { %p10970_p7 = por %p10969_p5, %p10968_p2 }
  0xe3   : > { %p10971_p9 = pnand %p10970_p7, %p10964_p0 }
  0xe5   : > { %10974 = shalt.err (!%p10971_p9)
}
  0xe6   : > { %s10975_s24 = scalar_lea.vmem %s11399_s27, 4096  ;;  %s11086_s29 = smov [#allocation4]  }
  0xe7   : > { %p10976_p12 = scmp.ne.s32.totalorder %s11399_s27, %s10975_s24  ;;  %s10980_s13 = sshll.u32 %s11086_s29, 4  ;;  %s10981_s13 = int_to_ptr.vmem [resolvable:$false] %s10980_s13 }
  0xe8   : > { %s10982_s23 = scalar_lea.vmem %s10981_s13, 8192  ;;  %p10983_p4 = scmp.lt.s32.totalorder %s11399_s27, %s10981_s13 }
  0xe9   : > { %p10978_p13 = pnand %p10976_p12, %p10962_p8  ;;  %p10984_p1 = scmp.lt.s32.totalorder %s10982_s23, %s10975_s24 }
  0xeb   : > { %p10979_p10 = pneg %p10978_p13  ;;  %p10985_p3 = por %p10984_p1, %p10983_p4 }
  0xed   : > { %p10986_p2 = pnand %p10985_p3, %p10979_p10 }
  0xef   : > { %10989 = shalt.err (!%p10986_p2)
}
  0xf0   : > { %10256 = dma.hbm_to_vmem [thread:$0]  (!%p11403_p11), %s11397_s9, 4096, %s11399_s27, %s11407_s21, %s11079_s17, %s11079_s17, %s11080_s20  }
  0xf1   : > { %p14184_p8 = scmp.ne.s32.totalorder %s14173_s16, 0 }
  0xf3   : > { %384 = sbr.rel (%p14184_p8) target bundleno = 1900 (0x76c), region = 56 }
  0xfa   : > { %s11441_s3 = sand.u32 1, %s11064_s10  }
  0xfb   : > { %s8200_s22 = sshll.u32 %s11441_s3, 8  ;;  %s387_s25 = scalar_lea.sflag [#allocation5], %s11441_s3 }
  0xfc   : > { %s11447_s18 = scalar_lea.vmem [#allocation4], %s8200_s22 }
  0xfd   : > { %11035 = dma.done.wait (%p11378_p6), %s387_s25, 4096  }
  0xfe   : > { %11037 = vsyncadd (%p11378_p6), %s387_s25, 4294963200  ;;  %p14185_p4 = scmp.eq.s32.totalorder %s11165_s15, 0 }
 0x100   : > { %11039 = dma.done.wait (%p14185_p4), [#allocation8], 9232   ;;  %p14186_p10 = pmov %p14185_p4 }
 0x101   : > { %p14187_p11 = pmov %p14185_p4 }
 0x102   : > { %11041 = vsyncadd (%p14186_p10), [#allocation8], 4294958064 }
 0x103   : > { %11043 = dma.done.wait (%p14187_p11), [#allocation11], 9232   ;;  %p14188_p0 = pmov %p14185_p4 }
 0x105   : > { %11045 = vsyncadd (%p14188_p0), [#allocation11], 4294958064  ;;  %p14189_p5 = pmov %p14188_p0 }
 0x106   : > { %p14190_p7 = pmov %p14188_p0 }
 0x107   : > { %11047 = dma.done.wait (%p14189_p5), [#allocation14], 2064  }
 0x108   : > { %11049 = vsyncadd (%p14190_p7), [#allocation14], 4294965232  ;;  %p14191_p6 = pmov %p14188_p0 }
 0x109   : > { %p14192_p9 = pmov %p14188_p0 }
 0x10a   : > { %11051 = dma.done.wait (%p14191_p6), [#allocation17], 144  }
 0x10b   : > { %11053 = vsyncadd (%p14192_p9), [#allocation17], 4294967152  ;;  %v11087_v0 = vmov 0   ;;  %v10329_v1 = vld [vmem:[#allocation7 + $0x100] sm:$0xff]   ;;  %v10333_v5 = vld [vmem:[#allocation7 + $0x108] sm:$0xff]   ;;  %vm964_vm1 = vcmask 1043456  }
 0x10c   : > { %493 = vst [vmem:[#allocation2 + $0xc] sm:$0xf] %v11087_v0  ;;  %494 = vst [vmem:[#allocation2 + $0x10] sm:$0xf] %v11087_v0  ;;  %v10330_v2 = vld [vmem:[#allocation7 + $0xc0] sm:$0xff]   ;;  %8685 = vmatprep.subr.bf16.mxu0 %v10329_v1  ;;  %v10334_v6 = vld [vmem:[#allocation7 + $0xc8] sm:$0xff]  }
 0x10d   : > { %495 = vst [vmem:[#allocation2 + $0x14] sm:$0x1] %v11087_v0  ;;  %490 = vst [vmem:[#allocation2] sm:$0xf] %v11087_v0  ;;  %v10331_v3 = vld [vmem:[#allocation7 + $0x40] sm:$0xff]   ;;  %8686 = vmatpush3.bf16.msra.mxu0 %v10330_v2  ;;  %v10335_v7 = vld [vmem:[#allocation7 + $0x48] sm:$0xff]  }
 0x10e   : > { %491 = vst [vmem:[#allocation2 + $0x4] sm:$0xf] %v11087_v0  ;;  %492 = vst [vmem:[#allocation2 + $0x8] sm:$0x1] %v11087_v0  ;;  %v10332_v4 = vld [vmem:[#allocation7] sm:$0xff]   ;;  %8821 = vmatprep.subr.bf16.mxu1 %v10331_v3  ;;  %8687 = vmatprep.subr.bf16.mxu0 %v10333_v5  ;;  %v10336_v8 = vld [vmem:[#allocation7 + $0x8] sm:$0xff]  }
 0x10f   : > { %496 = vst [vmem:[#allocation2 + $0x18] sm:$0xf] %v11087_v0  ;;  %497 = vst [vmem:[#allocation2 + $0x1c] sm:$0xf] %v11087_v0  ;;  %8822 = vmatpush3.bf16.msra.mxu1 %v10332_v4  ;;  %v10337_v9 = vld [vmem:[#allocation7 + $0x110] sm:$0xff]   ;;  %v10341_v13 = vld [vmem:[#allocation7 + $0x118] sm:$0xff]  }
 0x110   : > { %498 = vst [vmem:[#allocation2 + $0x20] sm:$0x1] %v11087_v0  ;;  %499 = vst [vmem:[#allocation2 + $0x24] sm:$0xf] %v11087_v0  ;;  %8823 = vmatprep.subr.bf16.mxu1 %v10335_v7  ;;  %v10338_v10 = vld [vmem:[#allocation7 + $0xd0] sm:$0xff]   ;;  %v10342_v14 = vld [vmem:[#allocation7 + $0xd8] sm:$0xff]  }
 0x111   : > { %500 = vst [vmem:[#allocation2 + $0x28] sm:$0xf] %v11087_v0  ;;  %501 = vst [vmem:[#allocation2 + $0x2c] sm:$0x1] %v11087_v0  ;;  %8688 = vmatpush3.bf16.msra.mxu0 %v10334_v6  ;;  %v10339_v11 = vld [vmem:[#allocation7 + $0x50] sm:$0xff]   ;;  %v10343_v15 = vld [vmem:[#allocation7 + $0x58] sm:$0xff]  }
 0x112   : > { %502 = vst [vmem:[#allocation2 + $0x30] sm:$0xf] %v11087_v0  ;;  %503 = vst [vmem:[#allocation2 + $0x34] sm:$0xf] %v11087_v0  ;;  %8689 = vmatprep.subr.bf16.mxu0 %v10337_v9  ;;  %v10340_v12 = vld [vmem:[#allocation7 + $0x10] sm:$0xff]   ;;  %v10344_v16 = vld [vmem:[#allocation7 + $0x18] sm:$0xff]  }
 0x113   : > { %504 = vst [vmem:[#allocation2 + $0x38] sm:$0x1] %v11087_v0  ;;  %505 = vst [vmem:[#allocation2 + $0x3c] sm:$0xf] %v11087_v0  ;;  %8824 = vmatpush3.bf16.msra.mxu1 %v10336_v8  ;;  %v10345_v17 = vld [vmem:[#allocation7 + $0x120] sm:$0xff]   ;;  %v10349_v21 = vld [vmem:[#allocation7 + $0x128] sm:$0xff]  }
 0x114   : > { %506 = vst [vmem:[#allocation2 + $0x40] sm:$0xf] %v11087_v0  ;;  %507 = vst [vmem:[#allocation2 + $0x44] sm:$0x1] %v11087_v0  ;;  %8825 = vmatprep.subr.bf16.mxu1 %v10339_v11  ;;  %v10346_v18 = vld [vmem:[#allocation7 + $0xe0] sm:$0xff]   ;;  %v10350_v22 = vld [vmem:[#allocation7 + $0xe8] sm:$0xff]  }
 0x115   : > { %508 = vst [vmem:[#allocation2 + $0x48] sm:$0xf] %v11087_v0  ;;  %509 = vst [vmem:[#allocation2 + $0x4c] sm:$0xf] %v11087_v0  ;;  %8690 = vmatpush3.bf16.msra.mxu0 %v10338_v10  ;;  %v10347_v19 = vld [vmem:[#allocation7 + $0x60] sm:$0xff]   ;;  %v10351_v23 = vld [vmem:[#allocation7 + $0x68] sm:$0xff]  }
 0x116   : > { %510 = vst [vmem:[#allocation2 + $0x50] sm:$0x1] %v11087_v0  ;;  %511 = vst [vmem:[#allocation2 + $0x54] sm:$0xf] %v11087_v0  ;;  %8691 = vmatprep.subr.bf16.mxu0 %v10341_v13  ;;  %v10348_v20 = vld [vmem:[#allocation7 + $0x20] sm:$0xff]   ;;  %v10352_v24 = vld [vmem:[#allocation7 + $0x28] sm:$0xff]  }
 0x117   : > { %512 = vst [vmem:[#allocation2 + $0x58] sm:$0xf] %v11087_v0  ;;  %513 = vst [vmem:[#allocation2 + $0x5c] sm:$0x1] %v11087_v0  ;;  %8826 = vmatpush3.bf16.msra.mxu1 %v10340_v12  ;;  %v10353_v25 = vld [vmem:[#allocation7 + $0x130] sm:$0xff]   ;;  %v10357_v29 = vld [vmem:[#allocation7 + $0x138] sm:$0xff]  }
 0x118   : > { %514 = vst [vmem:[#allocation2 + $0x60] sm:$0xf] %v11087_v0  ;;  %515 = vst [vmem:[#allocation2 + $0x64] sm:$0xf] %v11087_v0  ;;  %8827 = vmatprep.subr.bf16.mxu1 %v10343_v15  ;;  %vm640_vm0 = vsmask.f32 256 }
 0x119   : > { %516 = vst [vmem:[#allocation2 + $0x68] sm:$0x1] %v11087_v0  ;;  %517 = vst [vmem:[#allocation2 + $0x6c] sm:$0xf] %v11087_v0  ;;  %8692 = vmatpush3.bf16.msra.mxu0 %v10342_v14  ;;  %v10354_v26 = vld [vmem:[#allocation7 + $0xf0] sm:$0xff]   ;;  %v10358_v30 = vld [vmem:[#allocation7 + $0xf8] sm:$0xff]  }
 0x11a   : > { %518 = vst [vmem:[#allocation2 + $0x70] sm:$0xf] %v11087_v0  ;;  %519 = vst [vmem:[#allocation2 + $0x74] sm:$0x1] %v11087_v0  ;;  %8693 = vmatprep.subr.bf16.mxu0 %v10345_v17  ;;  %v10355_v27 = vld [vmem:[#allocation7 + $0x70] sm:$0xff]   ;;  %v10359_v31 = vld [vmem:[#allocation7 + $0x78] sm:$0xff]  }
 0x11b   : > { %520 = vst [vmem:[#allocation2 + $0x78] sm:$0xf] %v11087_v0  ;;  %521 = vst [vmem:[#allocation2 + $0x7c] sm:$0xf] %v11087_v0  ;;  %8828 = vmatpush3.bf16.msra.mxu1 %v10344_v16  ;;  %v10356_v28 = vld [vmem:[#allocation7 + $0x30] sm:$0xff]   ;;  %v10360_v32 = vld [vmem:[#allocation7 + $0x38] sm:$0xff]  }
 0x11c   : > { %522 = vst [vmem:[#allocation2 + $0x80] sm:$0x1] %v11087_v0  ;;  %523 = vst [vmem:[#allocation2 + $0x84] sm:$0xf] %v11087_v0  ;;  %8829 = vmatprep.subr.bf16.mxu1 %v10347_v19  ;;  %v458_v33 = vld [vmem:[%s11447_s18] sm:$0xff]  ;;  %v459_v34 = vld [vmem:[%s11447_s18 + $0x8] sm:$0xff] }
 0x11d   : > { %524 = vst [vmem:[#allocation2 + $0x88] sm:$0xf] %v11087_v0  ;;  %525 = vst [vmem:[#allocation2 + $0x8c] sm:$0x1] %v11087_v0  ;;  %8694 = vmatpush3.bf16.msra.mxu0 %v10346_v18  ;;  %vm641_vm2 = vsmask.f32 4368  ;;  %v8620_v35 = vpack.c.bf16 %v458_v33, %v458_v33  ;;  %v8621_v36 = vpack.c.bf16 %v459_v34, %v459_v34 }
 0x11e   : > { %526 = vst [vmem:[#allocation2 + $0x90] sm:$0xf] %v11087_v0  ;;  %527 = vst [vmem:[#allocation2 + $0x94] sm:$0xf] %v11087_v0  ;;  %8695 = vmatprep.subr.bf16.mxu0 %v10349_v21  ;;  %vm965_vm3 = vsmask.f32 7938 }
 0x11f   : > { %528 = vst [vmem:[#allocation2 + $0x98] sm:$0x1] %v11087_v0  ;;  %529 = vst [vmem:[#allocation2 + $0x9c] sm:$0xf] %v11087_v0  ;;  %8830 = vmatpush3.bf16.msra.mxu1 %v10348_v20  ;;  %vm1273_vm4 = vsmask.f32 7424 }
 0x120   : > { %530 = vst [vmem:[#allocation2 + $0xa0] sm:$0xf] %v11087_v0  ;;  %531 = vst [vmem:[#allocation2 + $0xa4] sm:$0x1] %v11087_v0  ;;  %8831 = vmatprep.subr.bf16.mxu1 %v10351_v23  ;;  %vm971_vm5 = vcmask 1040384   ;;  %v11579_v37 = vld [vmem:[#allocation7 + $0x140] sm:$0xff]  }
 0x121   : > { %532 = vst [vmem:[#allocation2 + $0xa8] sm:$0xf] %v11087_v0  ;;  %533 = vst [vmem:[#allocation2 + $0xac] sm:$0xf] %v11087_v0  ;;  %8696 = vmatpush3.bf16.msra.mxu0 %v10350_v22  ;;  %v14193_v38 = vmov 0  ;;  %v644_v39 = vshrl.u32 %v8620_v35, 16 }
 0x122   : > { %534 = vst [vmem:[#allocation2 + $0xb0] sm:$0x1] %v11087_v0  ;;  %535 = vst [vmem:[#allocation2 + $0xb4] sm:$0xf] %v11087_v0  ;;  %8697 = vmatprep.subr.bf16.mxu0 %v10353_v25  ;;  %v647_v40 = vshll.u32 %v8620_v35, 16  ;;  %v652_v41 = vshrl.u32 %v8621_v36, 16 }
 0x123   : > { %536 = vst [vmem:[#allocation2 + $0xb8] sm:$0xf] %v11087_v0  ;;  %537 = vst [vmem:[#allocation2 + $0xbc] sm:$0x1] %v11087_v0  ;;  %8832 = vmatpush3.bf16.msra.mxu1 %v10352_v24  ;;  %v655_v42 = vshll.u32 %v8621_v36, 16  ;;  %v10364_v43 = vld [vmem:[#allocation2] sm:$0xff]  }
 0x124   : > { %538 = vst [vmem:[#allocation2 + $0xc0] sm:$0xf] %v11087_v0  ;;  %539 = vst [vmem:[#allocation2 + $0xc4] sm:$0xf] %v11087_v0  ;;  %8833 = vmatprep.subr.bf16.mxu1 %v10355_v27  ;;  %v460_v45 = vld [vmem:[%s11447_s18 + $0x10] sm:$0xff]  ;;  %v646_v46 = vrot.slane %v644_v39, 7 }
 0x125   : > { %540 = vst [vmem:[#allocation2 + $0xc8] sm:$0x1] %v11087_v0  ;;  %541 = vst [vmem:[#allocation2 + $0xcc] sm:$0xf] %v11087_v0  ;;  %8698 = vmatpush3.bf16.msra.mxu0 %v10354_v26  ;;  %v654_v47 = vrot.slane %v652_v41, 7  ;;  %v14196_v48 = vmov 0  ;;  %v8622_v51 = vpack.c.bf16 %v460_v45, %v460_v45 }
 0x126   : > { %542 = vst [vmem:[#allocation2 + $0xd0] sm:$0xf] %v11087_v0  ;;  %543 = vst [vmem:[#allocation2 + $0xd4] sm:$0x1] %v11087_v0  ;;  %8699 = vmatprep.subr.bf16.mxu0 %v10357_v29  ;;  %v967_v49 = vld [vmem:[#allocation2 + $0xc] sm:$0xf]  ;;  %v649_v58 = vor.u32 %v647_v40, %v646_v46 }
 0x127   : > { %4123 = vst [vmem:[#allocation3] sm:$0xf] %v11087_v0  ;;  %4124 = vst [vmem:[#allocation3 + $0x4] sm:$0xf] %v11087_v0  ;;  %8834 = vmatpush3.bf16.msra.mxu1 %v10356_v28  ;;  %v461_v50 = vld [vmem:[%s11447_s18 + $0x18] sm:$0xff]  ;;  %v14199_v52 = vmov 0  ;;  %v657_v60 = vor.u32 %v655_v42, %v654_v47 }
 0x128   : > { %4125 = vst [vmem:[#allocation3 + $0x8] sm:$0x1] %v11087_v0  ;;  %4126 = vst [vmem:[#allocation3 + $0xc] sm:$0xf] %v11087_v0  ;;  %8835 = vmatprep.subr.bf16.mxu1 %v10359_v31  ;;  %v973_v53 = vld [vmem:[#allocation2 + $0x14] sm:$0x1]  ;;  %v8623_v57 = vpack.c.bf16 %v461_v50, %v461_v50 }
 0x129   : > { %4127 = vst [vmem:[#allocation3 + $0x10] sm:$0xf] %v11087_v0  ;;  %4128 = vst [vmem:[#allocation3 + $0x14] sm:$0x1] %v11087_v0  ;;  %8700 = vmatpush3.bf16.msra.mxu0 %v10358_v30  ;;  %v1275_v54 = vshrl.u32 %v10364_v43, 16  ;;  %v1277_v55 = vshll.u32 %v10364_v43, 16 }
 0x12a   : > { %4129 = vst [vmem:[#allocation3 + $0x18] sm:$0xf] %v11087_v0  ;;  %4130 = vst [vmem:[#allocation3 + $0x1c] sm:$0xf] %v11087_v0  ;;  %9520 = vmatprep.subr.bf16.mxu0 %v11579_v37  ;;  %v650_v59 = vrot.slane %v646_v46, 4  ;;  %v659_v61 = vrot.slane %v654_v47, 4 }
 0x12b   : > { %4131 = vst [vmem:[#allocation3 + $0x20] sm:$0x1] %v11087_v0  ;;  %4132 = vst [vmem:[#allocation3 + $0x24] sm:$0xf] %v11087_v0  ;;  %8836 = vmatpush3.bf16.msra.mxu1 %v10360_v32  ;;  %v462_v62 = vld [vmem:[%s11447_s18 + $0x20] sm:$0xff]  ;;  %v463_v63 = vld [vmem:[%s11447_s18 + $0x28] sm:$0xff] }
 0x12c   : > { %4133 = vst [vmem:[#allocation3 + $0x28] sm:$0xf] %v11087_v0  ;;  %4134 = vst [vmem:[#allocation3 + $0x2c] sm:$0x1] %v11087_v0  ;;  %v661_v2 = vshrl.u32 %v8622_v51, 16  ;;  %v664_v3 = vshll.u32 %v8622_v51, 16  ;;  %v8624_v12 = vpack.c.bf16 %v462_v62, %v462_v62  ;;  %v8625_v16 = vpack.c.bf16 %v463_v63, %v463_v63 }
 0x12d   : > { %4135 = vst [vmem:[#allocation3 + $0x30] sm:$0xf] %v11087_v0  ;;  %4136 = vst [vmem:[#allocation3 + $0x34] sm:$0xf] %v11087_v0  ;;  %v669_v7 = vshrl.u32 %v8623_v57, 16  ;;  %v464_v8 = vld [vmem:[%s11447_s18 + $0x30] sm:$0xff] }
 0x12e   : > { %4137 = vst [vmem:[#allocation3 + $0x38] sm:$0x1] %v11087_v0  ;;  %4138 = vst [vmem:[#allocation3 + $0x3c] sm:$0xf] %v11087_v0  ;;  %v663_v10 = vrot.slane %v661_v2, 7  ;;  %v672_v11 = vshll.u32 %v8623_v57, 16  ;;  %v8626_v17 = vpack.c.bf16 %v464_v8, %v464_v8 }
 0x12f   : > { %4139 = vst [vmem:[#allocation3 + $0x40] sm:$0xf] %v11087_v0  ;;  %4140 = vst [vmem:[#allocation3 + $0x44] sm:$0x1] %v11087_v0  ;;  %v465_v13 = vld [vmem:[%s11447_s18 + $0x38] sm:$0xff]  ;;  %v671_v14 = vrot.slane %v669_v7, 7 }
 0x130   : > { %4141 = vst [vmem:[#allocation3 + $0x48] sm:$0xf] %v11087_v0  ;;  %4142 = vst [vmem:[#allocation3 + $0x4c] sm:$0xf] %v11087_v0  ;;  %v976_v15 = vld [vmem:[#allocation2 + $0x18] sm:$0xf]  ;;  %v11611_v18 = vpack.c.bf16 %v465_v13, %v465_v13  ;;  %v666_v20 = vor.u32 %v664_v3, %v663_v10 }
 0x131   : > { %4143 = vst [vmem:[#allocation3 + $0x50] sm:$0x1] %v11087_v0  ;;  %4144 = vst [vmem:[#allocation3 + $0x54] sm:$0xf] %v11087_v0  ;;  %v667_v21 = vrot.slane %v663_v10, 4  ;;  %v678_v23 = vshrl.u32 %v8624_v12, 16  ;;  %v674_v24 = vor.u32 %v672_v11, %v671_v14 }
 0x132   : > { %4145 = vst [vmem:[#allocation3 + $0x58] sm:$0xf] %v11087_v0  ;;  %4146 = vst [vmem:[#allocation3 + $0x5c] sm:$0x1] %v11087_v0  ;;  %v980_v22 = vld [vmem:[#allocation2 + $0x20] sm:$0x1] }
 0x133   : > { %4147 = vst [vmem:[#allocation3 + $0x60] sm:$0xf] %v11087_v0  ;;  %4148 = vst [vmem:[#allocation3 + $0x64] sm:$0xf] %v11087_v0  ;;  %v676_v25 = vrot.slane %v671_v14, 4  ;;  %v681_v26 = vshll.u32 %v8624_v12, 16 }
 0x134   : > { %4149 = vst [vmem:[#allocation3 + $0x68] sm:$0x1] %v11087_v0  ;;  %4150 = vst [vmem:[#allocation3 + $0x6c] sm:$0xf] %v11087_v0  ;;  %v686_v27 = vshrl.u32 %v8625_v16, 16  ;;  %v680_v29 = vrot.slane %v678_v23, 7 }
 0x135   : > { %4151 = vst [vmem:[#allocation3 + $0x70] sm:$0xf] %v11087_v0  ;;  %4152 = vst [vmem:[#allocation3 + $0x74] sm:$0x1] %v11087_v0  ;;  %v689_v30 = vshll.u32 %v8625_v16, 16  ;;  %v695_v31 = vshrl.u32 %v8626_v17, 16 }
 0x136   : > { %4153 = vst [vmem:[#allocation3 + $0x78] sm:$0xf] %v11087_v0  ;;  %4154 = vst [vmem:[#allocation3 + $0x7c] sm:$0xf] %v11087_v0  ;;  %v688_v34 = vrot.slane %v686_v27, 7  ;;  %v698_v36 = vshll.u32 %v8626_v17, 16  ;;  %v683_v39 = vor.u32 %v681_v26, %v680_v29 }
 0x137   : > { %4155 = vst [vmem:[#allocation3 + $0x80] sm:$0x1] %v11087_v0  ;;  %4156 = vst [vmem:[#allocation3 + $0x84] sm:$0xf] %v11087_v0  ;;  %v983_v35 = vld [vmem:[#allocation2 + $0x24] sm:$0xf] }
 0x138   : > { %4157 = vst [vmem:[#allocation3 + $0x88] sm:$0xf] %v11087_v0  ;;  %4158 = vst [vmem:[#allocation3 + $0x8c] sm:$0x1] %v11087_v0  ;;  %v684_v40 = vrot.slane %v680_v29, 4  ;;  %v11620_v42 = vrot.slane %v695_v31, 7  ;;  %v691_v45 = vor.u32 %v689_v30, %v688_v34 }
 0x139   : > { %4159 = vst [vmem:[#allocation3 + $0x90] sm:$0xf] %v11087_v0  ;;  %4160 = vst [vmem:[#allocation3 + $0x94] sm:$0xf] %v11087_v0  ;;  %v987_v41 = vld [vmem:[#allocation2 + $0x2c] sm:$0x1] }
 0x13a   : > { %4161 = vst [vmem:[#allocation3 + $0x98] sm:$0x1] %v11087_v0  ;;  %4162 = vst [vmem:[#allocation3 + $0x9c] sm:$0xf] %v11087_v0  ;;  %v700_v50 = vor.u32 %v698_v36, %v11620_v42  ;;  %v701_v63 = vrot.slane %v11620_v42, 4  ;;  %v10372_v11 = vld [vmem:[#allocation7 + $0x148] sm:$0xff]  }
 0x13b   : > { %4163 = vst [vmem:[#allocation3 + $0xa0] sm:$0xf] %v11087_v0  ;;  %4164 = vst [vmem:[#allocation3 + $0xa4] sm:$0x1] %v11087_v0  ;;  %v994_v12 = vld [vmem:[#allocation2 + $0x38] sm:$0x1] }
 0x13c   : > { %4165 = vst [vmem:[#allocation3 + $0xa8] sm:$0xf] %v11087_v0  ;;  %4166 = vst [vmem:[#allocation3 + $0xac] sm:$0xf] %v11087_v0  ;;  %v468_v13 = vld [vmem:[%s11447_s18 + $0x50] sm:$0xff]  ;;  %v469_v23 = vld [vmem:[%s11447_s18 + $0x58] sm:$0xff] }
 0x13d   : > { %4167 = vst [vmem:[#allocation3 + $0xb0] sm:$0x1] %v11087_v0  ;;  %4168 = vst [vmem:[#allocation3 + $0xb4] sm:$0xf] %v11087_v0  ;;  %vm1482_vm9 = vcmask 1046528   ;;  %vm11089_vm10 = vmmov 0  }
 0x13e   : > { %4169 = vst [vmem:[#allocation3 + $0xb8] sm:$0xf] %v11087_v0  ;;  %4170 = vst [vmem:[#allocation3 + $0xbc] sm:$0x1] %v11087_v0  ;;  %vm7842_vm11 = vcmask 64512   ;;  %s14028_s16 = scalar_lea.vmem [#allocation19], %s8200_s22 }
 0x13f   : > { %4171 = vst [vmem:[#allocation3 + $0xc0] sm:$0xf] %v11087_v0  ;;  %4172 = vst [vmem:[#allocation3 + $0xc4] sm:$0xf] %v11087_v0  ;;  %s8684_s17 = sshll.u32 %s11165_s15, 12  ;;  %s8036_s20 = sshll.u32 %s14028_s16, 4  ;;  %s14086_s20 = int_to_ptr.vmem [resolvable:$true] %s8036_s20 }
 0x140   : > { %4173 = vst [vmem:[#allocation3 + $0xc8] sm:$0x1] %v11087_v0  ;;  %4174 = vst [vmem:[#allocation3 + $0xcc] sm:$0xf] %v11087_v0  ;;  %s14265_s27 = sld [smem:[#allocation44_spill]]  ;;  %s8023_s15 = scalar_lea.sflag [#allocation6], %s11441_s3 }
 0x141   : > { %4175 = vst [vmem:[#allocation3 + $0xd0] sm:$0xf] %v11087_v0  ;;  %4176 = vst [vmem:[#allocation3 + $0xd4] sm:$0x1] %v11087_v0  ;;  %v1279_v0 = vrot.slane %v1277_v55, 1  ;;  %s10990_s24 = scalar_lea.vmem %s14086_s20, 4096 }
 0x142   : > { %vm11582_vm6 = vmor %vm640_vm0, %vm641_vm2  ;;  %v10365_v44 = vld [vmem:[#allocation2 + $0x8] ss:$0 sps:$4 sm:$0x11]   ;;  %p10991_p12 = scmp.ne.s32.totalorder %s14086_s20, %s10990_s24  ;;  %p14266_p13 = scmp.ne.s32.totalorder %s14181_s26, 0 }
 0x143   : > { %v14194_v38 = vsel %vm11582_vm6, 4294967295, %v14193_v38  ;;  %vm11590_vm7 = vmand %vm964_vm1, %vm965_vm3  ;;  %v1282_v56 = vshll.u32 %v10365_v44, 16  ;;  %v658_v4 = vsel %vm11582_vm6, %v650_v59, %v657_v60  ;;  %v1280_v9 = vor.u32 %v1279_v0, %v1275_v54  ;;  %v990_v44 = vld [vmem:[#allocation2 + $0x30] sm:$0xf]  ;;  %s11091_s29 = smov [#allocation19]  }
 0x144   : > { %14195 = vst [vmem:[#allocation26_spill] sm:$0xff] %v14194_v38  ;;  %v14197_v48 = vsel %vm11590_vm7, 4294967295, %v14196_v48  ;;  %vm11597_vm8 = vmand %vm971_vm5, %vm640_vm0  ;;  %v968_v5 = vsel %vm11590_vm7, %v649_v58, %v967_v49  ;;  %v977_v28 = vsel %vm11590_vm7, %v666_v20, %v976_v15  ;;  %v675_v32 = vsel %vm11582_vm6, %v667_v21, %v674_v24  ;;  %p10992_p1 = pnand %p10991_p12, %p14266_p13  ;;  %s10994_s13 = sshll.u32 %s11091_s29, 4  ;;  %s10995_s13 = int_to_ptr.vmem [resolvable:$false] %s10994_s13 }
 0x145   : > { %14198 = vst [vmem:[#allocation27_spill] sm:$0xff] %v14197_v48  ;;  %v14200_v52 = vsel %vm11597_vm8, 4294967295, %v14199_v52  ;;  %v1284_v1 = vrot.slane %v1282_v56, 1  ;;  %v974_v6 = vsel %vm11597_vm8, %v659_v61, %v973_v53  ;;  %969 = vst [vmem:[#allocation2 + $0xc] sm:$0xf] %v968_v5  ;;  %v981_v33 = vsel %vm11597_vm8, %v676_v25, %v980_v22  ;;  %v467_v5 = vld [vmem:[%s11447_s18 + $0x48] sm:$0xff]  ;;  %p10997_p2 = scmp.lt.s32.totalorder %s14086_s20, %s10995_s13 }
 0x146   : > { %14201 = vst [vmem:[#allocation28_spill] sm:$0xff] %v14200_v52  ;;  %970 = vst [vmem:[#allocation2 + $0x10] sm:$0xf] %v658_v4  ;;  %v984_v49 = vsel %vm11590_vm7, %v683_v39, %v983_v35  ;;  %v692_v53 = vsel %vm11582_vm6, %v684_v40, %v691_v45  ;;  %v693_v54 = vrot.slane %v688_v34, 4  ;;  %v991_v59 = vsel %vm11590_vm7, %v700_v50, %v990_v44  ;;  %v466_v4 = vld [vmem:[%s11447_s18 + $0x40] sm:$0xff]  ;;  %s14082_s21 = scalar_lea.hbm %s14265_s27, %s8684_s17  ;;  %p10993_p3 = pneg %p10992_p1 }
 0x147   : > { %975 = vst [vmem:[#allocation2 + $0x14] sm:$0x1] %v974_v6  ;;  %v1285_v19 = vsel %vm1273_vm4, %v1280_v9, %v1284_v1  ;;  %978 = vst [vmem:[#allocation2 + $0x18] sm:$0xf] %v977_v28  ;;  %v706_v21 = vshll.u32 %v11611_v18, 16  ;;  %v8628_v27 = vpack.c.bf16 %v466_v4, %v466_v4  ;;  %v11648_v28 = vpack.c.bf16 %v467_v5, %v467_v5  ;;  %v10497_v52 = vld [vmem:[#allocation10 + $0x100] sm:$0xff]  }
 0x148   : > { %2750 = vmatprep.mubr.bf16.mxu1 %v1285_v19  ;;  %979 = vst [vmem:[#allocation2 + $0x1c] sm:$0xf] %v675_v32  ;;  %982 = vst [vmem:[#allocation2 + $0x20] sm:$0x1] %v981_v33  ;;  %v988_v62 = vsel %vm11597_vm8, %v693_v54, %v987_v41  ;;  %v10381_v33 = vld [vmem:[#allocation7 + $0x150] sm:$0xff]   ;;  %v11656_v40 = vpack.c.bf16 %v468_v13, %v468_v13  ;;  %s10996_s23 = scalar_lea.vmem %s10995_s13, 8192 }
 0x149   : > { %2751 = vmatmul.mubr.bf16.vlgmr.msra.gmra.mrb[0].mxu1 %v10364_v43  ;;  %v703_v43 = vshrl.u32 %v11611_v18, 16  ;;  %985 = vst [vmem:[#allocation2 + $0x24] sm:$0xf] %v984_v49  ;;  %986 = vst [vmem:[#allocation2 + $0x28] sm:$0xf] %v692_v53  ;;  %v11664_v49 = vpack.c.bf16 %v469_v23, %v469_v23  ;;  %v723_v5 = vshll.u32 %v11648_v28, 16  ;;  %p10998_p8 = scmp.lt.s32.totalorder %s10996_s23, %s10990_s24 }
 0x14a   : > { %992 = vst [vmem:[#allocation2 + $0x30] sm:$0xf] %v991_v59  ;;  %989 = vst [vmem:[#allocation2 + $0x2c] sm:$0x1] %v988_v62  ;;  %v1001_v13 = vld [vmem:[#allocation2 + $0x44] sm:$0x1] }
 0x14b   : > { %v705_v3 = vrot.slane %v703_v43, 7  ;;  %p10999_p4 = por %p10998_p8, %p10997_p2 }
 0x14d   : > { %v10361_v46 = vld [vmem:[#allocation2 + $0xc] sm:$0xff]   ;;  %v710_v22 = vrot.slane %v705_v3, 4  ;;  %v708_v18 = vor.u32 %v706_v21, %v705_v3  ;;  %p11000_p10 = pnand %p10999_p4, %p10993_p3 }
 0x14e   : > { %v10362_v47 = vld [vmem:[#allocation2 + $0x14] ss:$0 sps:$4 sm:$0x11]   ;;  %v10368_v51 = vld [vmem:[#allocation2 + $0xc] sm:$0xff]   ;;  %v1788_v55 = vshrl.u32 %v10361_v46, 16  ;;  %v1790_v56 = vshll.u32 %v10361_v46, 16 }
 0x14f   : > { %v1795_v57 = vshll.u32 %v10362_v47, 16  ;;  %v10369_v58 = vld [vmem:[#allocation2 + $0x14] ss:$0 sps:$4 sm:$0x11]   ;;  %v1287_v60 = vshrl.u32 %v10368_v51, 16  ;;  %v1289_v61 = vshll.u32 %v10368_v51, 16  ;;  %v995_v39 = vsel %vm11597_vm8, %v710_v22, %v994_v12 }
 0x150   : > { %v1792_v0 = vrot.slane %v1790_v56, 1  ;;  %v1294_v2 = vshll.u32 %v10369_v58, 16  ;;  %v11635_v6 = vld [vmem:[#allocation2 + $0x18] sm:$0xff]   ;;  %v10367_v9 = vld [vmem:[#allocation2 + $0x20] ss:$0 sps:$4 sm:$0x11]   ;;  %v709_v44 = vsel %vm11582_vm6, %v701_v63, %v708_v18 }
 0x151   : > { %v1797_v1 = vrot.slane %v1795_v57, 1  ;;  %v1291_v7 = vrot.slane %v1289_v61, 1  ;;  %v1800_v14 = vshrl.u32 %v11635_v6, 16  ;;  %v1802_v15 = vshll.u32 %v11635_v6, 16  ;;  %v11641_v20 = vld [vmem:[#allocation2 + $0x18] sm:$0xff]   ;;  %v11646_v26 = vld [vmem:[#allocation2 + $0x24] sm:$0xff]  }
 0x152   : > { %v1793_v8 = vor.u32 %v1792_v0, %v1788_v55  ;;  %v1296_v10 = vrot.slane %v1294_v2, 1  ;;  %v1807_v19 = vshll.u32 %v10367_v9, 16  ;;  %v10374_v30 = vld [vmem:[#allocation2 + $0x20] ss:$0 sps:$4 sm:$0x11]   ;;  %v1299_v31 = vshrl.u32 %v11641_v20, 16 }
 0x153   : > { %v1292_v16 = vor.u32 %v1291_v7, %v1287_v60  ;;  %v1804_v24 = vrot.slane %v1802_v15, 1  ;;  %v1301_v32 = vshll.u32 %v11641_v20, 16  ;;  %v10371_v35 = vld [vmem:[#allocation2 + $0x2c] ss:$0 sps:$4 sm:$0x11]   ;;  %v1812_v36 = vshrl.u32 %v11646_v26, 16 }
 0x154   : > { %v1798_v17 = vsel %vm1273_vm4, %v1793_v8, %v1797_v1  ;;  %v1809_v29 = vrot.slane %v1807_v19, 1  ;;  %v1814_v41 = vshll.u32 %v11646_v26, 16  ;;  %v1306_v43 = vshll.u32 %v10374_v30, 16  ;;  %996 = vst [vmem:[#allocation2 + $0x38] sm:$0x1] %v995_v39  ;;  %v470_v57 = vld [vmem:[%s11447_s18 + $0x60] sm:$0xff] }
 0x155   : > { %2284 = vmatprep.mubr.bf16.mxu0 %v1798_v17  ;;  %v1297_v25 = vsel %vm1273_vm4, %v1292_v16, %v1296_v10  ;;  %v1805_v34 = vor.u32 %v1804_v24, %v1800_v14  ;;  %v1303_v42 = vrot.slane %v1301_v32, 1  ;;  %993 = vst [vmem:[#allocation2 + $0x34] sm:$0xf] %v709_v44  ;;  %v712_v47 = vshrl.u32 %v8628_v27, 16  ;;  %v997_v56 = vld [vmem:[#allocation2 + $0x3c] sm:$0xf] }
 0x156   : > { %2285 = vmatmul.mubr.bf16.vlgmr.msra.gmra.mrb[0].mxu0 %v10361_v46  ;;  %2758 = vmatprep.mubr.bf16.mxu1 %v1297_v25  ;;  %v1819_v46 = vshll.u32 %v10371_v35, 16  ;;  %v1816_v50 = vrot.slane %v1814_v41, 1  ;;  %v1308_v53 = vrot.slane %v1306_v43, 1  ;;  %v10378_v54 = vld [vmem:[#allocation2 + $0x2c] ss:$0 sps:$4 sm:$0x11]   ;;  %v11681_v21 = vpack.c.bf16 %v470_v57, %v470_v57 }
 0x157   : > { %9521 = vmatpush3.bf16.msra.mxu0 %v11579_v37  ;;  %2759 = vmatmul.mubr.bf16.gmra.mrb[4].mxu1 %v10368_v51  ;;  %v11661_v37 = vld [vmem:[#allocation2 + $0x24] sm:$0xff]   ;;  %v1810_v45 = vsel %vm1273_vm4, %v1805_v34, %v1809_v29  ;;  %v1304_v51 = vor.u32 %v1303_v42, %v1299_v31  ;;  %v714_v60 = vrot.slane %v712_v47, 7  ;;  %v715_v61 = vshll.u32 %v8628_v27, 16  ;;  %v471_v7 = vld [vmem:[%s11447_s18 + $0x68] sm:$0xff]  ;;  %v10402_v43 = vld [vmem:[#allocation7 + $0x80] sm:$0xff]  }
 0x158   : > { %9522 = vmatprep.subr.bf16.mxu0 %v10372_v11  ;;  %2292 = vmatprep.mubr.bf16.mxu0 %v1810_v45  ;;  %v1311_v55 = vshrl.u32 %v11661_v37, 16  ;;  %v1821_v58 = vrot.slane %v1819_v46, 1  ;;  %v1313_v59 = vshll.u32 %v11661_v37, 16  ;;  %v1817_v62 = vor.u32 %v1816_v50, %v1812_v36  ;;  %v10390_v8 = vld [vmem:[#allocation7 + $0x158] sm:$0xff]   ;;  %v472_v9 = vld [vmem:[%s11447_s18 + $0x70] sm:$0xff]  ;;  %v10399_v36 = vld [vmem:[#allocation7 + $0x160] sm:$0xff]  }
 0x159   : > { %v1309_v63 = vsel %vm1273_vm4, %v1304_v51, %v1308_v53  ;;  %v1318_v0 = vshll.u32 %v10378_v54, 16  ;;  %v720_v1 = vshrl.u32 %v11648_v28, 16  ;;  %v717_v3 = vor.u32 %v715_v61, %v714_v60  ;;  %v1004_v24 = vld [vmem:[#allocation2 + $0x48] sm:$0xf]  ;;  %v1008_v54 = vld [vmem:[#allocation2 + $0x50] sm:$0x1]  ;;  %9568 = vmatprep.subr.bf16.mxu1 %v10402_v43 }
 0x15a   : > { %2766 = vmatprep.mubr.bf16.mxu1 %v1309_v63  ;;  %v1315_v2 = vrot.slane %v1313_v59, 1  ;;  %v718_v4 = vrot.slane %v714_v60, 4  ;;  %v1822_v10 = vsel %vm1273_vm4, %v1817_v62, %v1821_v58  ;;  %v729_v14 = vshrl.u32 %v11656_v40, 16  ;;  %v1011_v60 = vld [vmem:[#allocation2 + $0x54] sm:$0xf]  ;;  %9569 = vmatpush3.bf16.msra.mxu1 %v10402_v43 }
 0x15b   : > { %9523 = vmatpush3.bf16.msra.mxu0 %v10372_v11  ;;  %v1320_v11 = vrot.slane %v1318_v0, 1  ;;  %v722_v12 = vrot.slane %v720_v1, 7  ;;  %v10376_v15 = vld [vmem:[#allocation2 + $0x38] ss:$0 sps:$4 sm:$0x11]   ;;  %v998_v17 = vsel %vm11590_vm7, %v717_v3, %v997_v56  ;;  %v732_v19 = vshll.u32 %v11656_v40, 16 }
 0x15c   : > { %9524 = vmatprep.subr.bf16.mxu0 %v10381_v33  ;;  %v1316_v16 = vor.u32 %v1315_v2, %v1311_v55  ;;  %999 = vst [vmem:[#allocation2 + $0x3c] sm:$0xf] %v998_v17  ;;  %v11685_v25 = vpack.c.bf16 %v471_v7, %v471_v7  ;;  %v11687_v27 = vpack.c.bf16 %v472_v9, %v472_v9  ;;  %v11690_v29 = vld [vmem:[#allocation2 + $0x30] sm:$0xff]   ;;  %v731_v30 = vrot.slane %v729_v14, 7  ;;  %v473_v7 = vld [vmem:[%s11447_s18 + $0x78] sm:$0xff] }
 0x15d   : > { %v725_v22 = vor.u32 %v723_v5, %v722_v12  ;;  %v727_v23 = vrot.slane %v722_v12, 4  ;;  %v737_v31 = vshrl.u32 %v11664_v49, 16  ;;  %v10383_v35 = vld [vmem:[#allocation2 + $0x38] ss:$0 sps:$4 sm:$0x11]   ;;  %v1323_v40 = vshrl.u32 %v11690_v29, 16 }
 0x15e   : > { %2293 = vmatmul.mubr.bf16.gmra.mrb[4].mxu0 %v11635_v6  ;;  %v11683_v6 = vld [vmem:[#allocation2 + $0x30] sm:$0xff]   ;;  %v1321_v28 = vsel %vm1273_vm4, %v1316_v16, %v1320_v11  ;;  %v1325_v41 = vshll.u32 %v11690_v29, 16  ;;  %v734_v42 = vor.u32 %v732_v19, %v731_v30  ;;  %v1330_v45 = vshll.u32 %v10383_v35, 16 }
 0x15f   : > { %2300 = vmatprep.mubr.bf16.mxu0 %v1822_v10  ;;  %2767 = vmatmul.mubr.bf16.gmra.mrb[8].mxu1 %v11641_v20  ;;  %v1831_v20 = vshll.u32 %v10376_v15, 16  ;;  %v1824_v32 = vshrl.u32 %v11683_v6, 16  ;;  %v1826_v18 = vshll.u32 %v11683_v6, 16  ;;  %v1002_v34 = vsel %vm11597_vm8, %v727_v23, %v1001_v13  ;;  %v1015_v10 = vld [vmem:[#allocation2 + $0x5c] sm:$0x1]  ;;  %v474_v19 = vld [vmem:[%s11447_s18 + $0x80] sm:$0xff] }
 0x160   : > { %9525 = vmatpush3.bf16.msra.mxu0 %v10381_v33  ;;  %2774 = vmatprep.mubr.bf16.mxu1 %v1321_v28  ;;  %v726_v33 = vsel %vm11582_vm6, %v718_v4, %v725_v22  ;;  %1003 = vst [vmem:[#allocation2 + $0x44] sm:$0x1] %v1002_v34  ;;  %v735_v46 = vrot.slane %v731_v30, 4  ;;  %v739_v47 = vrot.slane %v737_v31, 7  ;;  %v1327_v50 = vrot.slane %v1325_v41, 1  ;;  %v10409_v31 = vld [vmem:[#allocation7 + $0x168] sm:$0xff]  }
 0x161   : > { %9526 = vmatprep.subr.bf16.mxu0 %v10390_v8  ;;  %v1833_v39 = vrot.slane %v1831_v20, 1  ;;  %1000 = vst [vmem:[#allocation2 + $0x40] sm:$0xf] %v726_v33  ;;  %v1828_v44 = vrot.slane %v1826_v18, 1  ;;  %v740_v51 = vshll.u32 %v11664_v49, 16  ;;  %v1005_v53 = vsel %vm11590_vm7, %v734_v42, %v1004_v24 }
 0x162   : > { %v746_v55 = vshrl.u32 %v11681_v21, 16  ;;  %v1332_v57 = vrot.slane %v1330_v45, 1  ;;  %v744_v58 = vrot.slane %v739_v47, 4  ;;  %1006 = vst [vmem:[#allocation2 + $0x48] sm:$0xf] %v1005_v53  ;;  %v749_v59 = vshll.u32 %v11681_v21, 16 }
 0x163   : > { %v1829_v56 = vor.u32 %v1828_v44, %v1824_v32  ;;  %v1328_v49 = vor.u32 %v1327_v50, %v1323_v40  ;;  %v742_v61 = vor.u32 %v740_v51, %v739_v47  ;;  %v754_v63 = vshrl.u32 %v11685_v25, 16  ;;  %v475_v21 = vld [vmem:[%s11447_s18 + $0x88] sm:$0xff]  ;;  %v1018_v51 = vld [vmem:[#allocation2 + $0x60] sm:$0xf]  ;;  %v477_v53 = vld [vmem:[%s11447_s18 + $0x98] sm:$0xff] }
 0x164   : > { %9527 = vmatpush3.bf16.msra.mxu0 %v10390_v8  ;;  %v748_v62 = vrot.slane %v746_v55, 7  ;;  %v757_v1 = vshll.u32 %v11685_v25, 16  ;;  %v763_v2 = vshrl.u32 %v11687_v27, 16  ;;  %v8635_v24 = vpack.c.bf16 %v473_v7, %v473_v7 }
 0x165   : > { %9528 = vmatprep.subr.bf16.mxu0 %v10399_v36  ;;  %v1834_v0 = vsel %vm1273_vm4, %v1829_v56, %v1833_v39  ;;  %v1333_v3 = vsel %vm1273_vm4, %v1328_v49, %v1332_v57  ;;  %v756_v9 = vrot.slane %v754_v63, 7  ;;  %v11738_v42 = vpack.c.bf16 %v474_v19, %v474_v19 }
 0x166   : > { %2301 = vmatmul.mubr.bf16.gmra.mrb[8].mxu0 %v11646_v26  ;;  %v1009_v26 = vsel %vm11597_vm8, %v744_v58, %v1008_v54  ;;  %v751_v4 = vor.u32 %v749_v59, %v748_v62  ;;  %v752_v5 = vrot.slane %v748_v62, 4  ;;  %v765_v34 = vrot.slane %v763_v2, 7  ;;  %v1022_v62 = vld [vmem:[#allocation2 + $0x68] sm:$0x1] }
 0x167   : > { %2775 = vmatmul.mubr.bf16.gmra.mrb[12].mxu1 %v11661_v37  ;;  %2308 = vmatprep.mubr.bf16.mxu0 %v1834_v0  ;;  %v743_v37 = vsel %vm11582_vm6, %v735_v46, %v742_v61  ;;  %1010 = vst [vmem:[#allocation2 + $0x50] sm:$0x1] %v1009_v26  ;;  %v10380_v11 = vld [vmem:[#allocation2 + $0x44] ss:$0 sps:$4 sm:$0x11]   ;;  %v759_v16 = vor.u32 %v757_v1, %v756_v9  ;;  %v761_v17 = vrot.slane %v756_v9, 4 }
 0x168   : > { %9529 = vmatpush3.bf16.msra.mxu0 %v10399_v36  ;;  %v11718_v8 = vld [vmem:[#allocation2 + $0x3c] sm:$0xff]   ;;  %2782 = vmatprep.mubr.bf16.mxu1 %v1333_v3  ;;  %1007 = vst [vmem:[#allocation2 + $0x4c] sm:$0xf] %v743_v37  ;;  %v1012_v13 = vsel %vm11590_vm7, %v751_v4, %v1011_v60  ;;  %v1843_v22 = vshll.u32 %v10380_v11, 16  ;;  %v11740_v43 = vpack.c.bf16 %v475_v21, %v475_v21  ;;  %v766_v50 = vshll.u32 %v11687_v27, 16 }
 0x169   : > { %v11720_v12 = vld [vmem:[#allocation2 + $0x3c] sm:$0xff]   ;;  %v1836_v14 = vshrl.u32 %v11718_v8, 16  ;;  %v1838_v15 = vshll.u32 %v11718_v8, 16  ;;  %1013 = vst [vmem:[#allocation2 + $0x54] sm:$0xf] %v1012_v13  ;;  %v760_v30 = vsel %vm11582_vm6, %v752_v5, %v759_v16  ;;  %v1016_v33 = vsel %vm11597_vm8, %v761_v17, %v1015_v10  ;;  %9530 = vmatprep.subr.bf16.mxu0 %v10409_v31 }
 0x16a   : > { %v10387_v23 = vld [vmem:[#allocation2 + $0x44] ss:$0 sps:$4 sm:$0x11]   ;;  %v1335_v20 = vshrl.u32 %v11720_v12, 16  ;;  %v1337_v28 = vshll.u32 %v11720_v12, 16  ;;  %v1845_v32 = vrot.slane %v1843_v22, 1  ;;  %v768_v63 = vor.u32 %v766_v50, %v765_v34 }
 0x16b   : > { %v1840_v25 = vrot.slane %v1838_v15, 1  ;;  %v1342_v18 = vshll.u32 %v10387_v23, 16  ;;  %1014 = vst [vmem:[#allocation2 + $0x58] sm:$0xf] %v760_v30  ;;  %1017 = vst [vmem:[#allocation2 + $0x5c] sm:$0x1] %v1016_v33  ;;  %v11760_v5 = vpack.c.bf16 %v477_v53, %v477_v53 }
 0x16c   : > { %v1339_v39 = vrot.slane %v1337_v28, 1  ;;  %9531 = vmatpush3.bf16.msra.mxu0 %v10409_v31  ;;  %v769_v56 = vrot.slane %v765_v34, 4  ;;  %v771_v57 = vshrl.u32 %v8635_v24, 16  ;;  %v774_v26 = vshll.u32 %v8635_v24, 16  ;;  %v479_v50 = vld [vmem:[%s11447_s18 + $0xa8] sm:$0xff] }
 0x16d   : > { %v1841_v35 = vor.u32 %v1840_v25, %v1836_v14  ;;  %v1344_v41 = vrot.slane %v1342_v18, 1  ;;  %v1019_v13 = vsel %vm11590_vm7, %v768_v63, %v1018_v51  ;;  %v780_v31 = vshrl.u32 %v11738_v42, 16  ;;  %v480_v51 = vld [vmem:[%s11447_s18 + $0xb0] sm:$0xff] }
 0x16e   : > { %2309 = vmatmul.mubr.bf16.gmra.mrb[12].mxu0 %v11683_v6  ;;  %v10412_v6 = vld [vmem:[#allocation7 + $0x88] sm:$0xff]   ;;  %v10385_v36 = vld [vmem:[#allocation2 + $0x50] ss:$0 sps:$4 sm:$0x11]   ;;  %v1340_v46 = vor.u32 %v1339_v39, %v1335_v20  ;;  %v773_v0 = vrot.slane %v771_v57, 7  ;;  %v788_v34 = vshrl.u32 %v11740_v43, 16 }
 0x16f   : > { %2783 = vmatmul.mubr.bf16.gmra.mrb[16].mxu1 %v11690_v29  ;;  %v11736_v40 = vld [vmem:[#allocation2 + $0x48] sm:$0xff]   ;;  %v476_v29 = vld [vmem:[%s11447_s18 + $0x90] sm:$0xff]  ;;  %9570 = vmatprep.subr.bf16.mxu1 %v10412_v6  ;;  %v1846_v44 = vsel %vm1273_vm4, %v1841_v35, %v1845_v32  ;;  %v1855_v45 = vshll.u32 %v10385_v36, 16  ;;  %v10392_v60 = vld [vmem:[#allocation2 + $0x50] ss:$0 sps:$4 sm:$0x11]  }
 0x170   : > { %v11744_v47 = vld [vmem:[#allocation2 + $0x48] sm:$0xff]   ;;  %9571 = vmatpush3.bf16.msra.mxu1 %v10412_v6  ;;  %2316 = vmatprep.mubr.bf16.mxu0 %v1846_v44  ;;  %v1848_v54 = vshrl.u32 %v11736_v40, 16  ;;  %v1850_v55 = vshll.u32 %v11736_v40, 16  ;;  %v1345_v59 = vsel %vm1273_vm4, %v1340_v46, %v1344_v41  ;;  %v1354_v3 = vshll.u32 %v10392_v60, 16  ;;  %1020 = vst [vmem:[#allocation2 + $0x60] sm:$0xf] %v1019_v13 }
 0x171   : > { %v1857_v58 = vrot.slane %v1855_v45, 1  ;;  %v1347_v49 = vshrl.u32 %v11744_v47, 16  ;;  %v1349_v61 = vshll.u32 %v11744_v47, 16  ;;  %2790 = vmatprep.mubr.bf16.mxu1 %v1345_v59  ;;  %v11758_v4 = vpack.c.bf16 %v476_v29, %v476_v29  ;;  %v1025_v35 = vld [vmem:[#allocation2 + $0x6c] sm:$0xf]  ;;  %v478_v36 = vld [vmem:[%s11447_s18 + $0xa0] sm:$0xff] }
 0x172   : > { %v1852_v27 = vrot.slane %v1850_v55, 1  ;;  %v11754_v1 = vld [vmem:[#allocation2 + $0x54] sm:$0xff]   ;;  %v10389_v9 = vld [vmem:[#allocation2 + $0x5c] ss:$0 sps:$4 sm:$0x11]   ;;  %v776_v10 = vor.u32 %v774_v26, %v773_v0  ;;  %v778_v11 = vrot.slane %v773_v0, 4 }
 0x173   : > { %v1351_v2 = vrot.slane %v1349_v61, 1  ;;  %v11756_v37 = vld [vmem:[#allocation2 + $0x54] sm:$0xff]   ;;  %v1862_v14 = vshll.u32 %v11754_v1, 16  ;;  %v1356_v16 = vrot.slane %v1354_v3, 1  ;;  %v1867_v19 = vshll.u32 %v10389_v9, 16  ;;  %v10419_v39 = vld [vmem:[#allocation7 + $0x170] sm:$0xff]  }
 0x174   : > { %v1853_v7 = vor.u32 %v1852_v27, %v1848_v54  ;;  %v777_v21 = vsel %vm11582_vm6, %v769_v56, %v776_v10  ;;  %v10396_v22 = vld [vmem:[#allocation2 + $0x5c] ss:$0 sps:$4 sm:$0x11]   ;;  %v1359_v25 = vshrl.u32 %v11756_v37, 16  ;;  %v1361_v20 = vshll.u32 %v11756_v37, 16  ;;  %9532 = vmatprep.subr.bf16.mxu0 %v10419_v39 }
 0x175   : > { %v1352_v15 = vor.u32 %v1351_v2, %v1347_v49  ;;  %v1864_v23 = vrot.slane %v1862_v14, 1  ;;  %1021 = vst [vmem:[#allocation2 + $0x64] sm:$0xf] %v777_v21  ;;  %v1869_v28 = vrot.slane %v1867_v19, 1  ;;  %v1366_v30 = vshll.u32 %v10396_v22, 16  ;;  %9533 = vmatpush3.bf16.msra.mxu0 %v10419_v39 }
 0x176   : > { %2317 = vmatmul.mubr.bf16.gmra.mrb[16].mxu0 %v11718_v8  ;;  %v1860_v8 = vshrl.u32 %v11754_v1, 16  ;;  %v1858_v17 = vsel %vm1273_vm4, %v1853_v7, %v1857_v58  ;;  %v783_v32 = vshll.u32 %v11738_v42, 16  ;;  %v1363_v33 = vrot.slane %v1361_v20, 1  ;;  %v1029_v44 = vld [vmem:[#allocation2 + $0x74] sm:$0x1] }
 0x177   : > { %2791 = vmatmul.mubr.bf16.gmra.mrb[20].mxu1 %v11720_v12  ;;  %v1023_v12 = vsel %vm11597_vm8, %v778_v11, %v1022_v62  ;;  %2324 = vmatprep.mubr.bf16.mxu0 %v1858_v17  ;;  %v1357_v24 = vsel %vm1273_vm4, %v1352_v15, %v1356_v16  ;;  %v791_v6 = vshll.u32 %v11740_v43, 16  ;;  %v1368_v41 = vrot.slane %v1366_v30, 1  ;;  %v1032_v61 = vld [vmem:[#allocation2 + $0x78] sm:$0xf] }
 0x178   : > { %1024 = vst [vmem:[#allocation2 + $0x68] sm:$0x1] %v1023_v12  ;;  %2798 = vmatprep.mubr.bf16.mxu1 %v1357_v24  ;;  %v1865_v18 = vor.u32 %v1864_v23, %v1860_v8  ;;  %v782_v29 = vrot.slane %v780_v31, 7  ;;  %v797_v45 = vshrl.u32 %v11758_v4, 16  ;;  %v800_v46 = vshll.u32 %v11758_v4, 16 }
 0x179   : > { %v1364_v53 = vor.u32 %v1363_v33, %v1359_v25  ;;  %v790_v54 = vrot.slane %v788_v34, 7  ;;  %v805_v43 = vshrl.u32 %v11760_v5, 16  ;;  %v8641_v7 = vpack.c.bf16 %v479_v50, %v479_v50 }
 0x17a   : > { %v1870_v42 = vsel %vm1273_vm4, %v1865_v18, %v1869_v28  ;;  %v785_v55 = vor.u32 %v783_v32, %v782_v29  ;;  %v786_v56 = vrot.slane %v782_v29, 4  ;;  %v799_v57 = vrot.slane %v797_v45, 7  ;;  %v1039_v28 = vld [vmem:[#allocation2 + $0x84] sm:$0xf]  ;;  %v481_v45 = vld [vmem:[%s11447_s18 + $0xb8] sm:$0xff] }
 0x17b   : > { %v1369_v58 = vsel %vm1273_vm4, %v1364_v53, %v1368_v41  ;;  %v793_v59 = vor.u32 %v791_v6, %v790_v54  ;;  %v795_v60 = vrot.slane %v790_v54, 4  ;;  %v807_v49 = vrot.slane %v805_v43, 7  ;;  %v482_v54 = vld [vmem:[%s11447_s18 + $0xc0] sm:$0xff] }
 0x17c   : > { %v11789_v62 = vld [vmem:[#allocation2 + $0x60] sm:$0xff]   ;;  %v1026_v27 = vsel %vm11590_vm7, %v785_v55, %v1025_v35  ;;  %v802_v63 = vor.u32 %v800_v46, %v799_v57  ;;  %v803_v0 = vrot.slane %v799_v57, 4  ;;  %v11799_v9 = vpack.c.bf16 %v480_v51, %v480_v51 }
 0x17d   : > { %v794_v2 = vsel %vm11582_vm6, %v786_v56, %v793_v59  ;;  %1027 = vst [vmem:[#allocation2 + $0x6c] sm:$0xf] %v1026_v27  ;;  %v1030_v3 = vsel %vm11597_vm8, %v795_v60, %v1029_v44  ;;  %v11797_v4 = vld [vmem:[#allocation2 + $0x60] sm:$0xff]   ;;  %v1872_v10 = vshrl.u32 %v11789_v62, 16  ;;  %v1874_v11 = vshll.u32 %v11789_v62, 16 }
 0x17e   : > { %2325 = vmatmul.mubr.bf16.gmra.mrb[20].mxu0 %v11736_v40  ;;  %v1036_v40 = vld [vmem:[#allocation2 + $0x80] sm:$0x1]  ;;  %1028 = vst [vmem:[#allocation2 + $0x70] sm:$0xf] %v794_v2  ;;  %1031 = vst [vmem:[#allocation2 + $0x74] sm:$0x1] %v1030_v3  ;;  %v1033_v19 = vsel %vm11590_vm7, %v802_v63, %v1032_v61 }
 0x17f   : > { %2332 = vmatprep.mubr.bf16.mxu0 %v1870_v42  ;;  %2799 = vmatmul.mubr.bf16.gmra.mrb[24].mxu1 %v11744_v47  ;;  %v8640_v47 = vpack.c.bf16 %v478_v36, %v478_v36  ;;  %v10394_v26 = vld [vmem:[#allocation2 + $0x68] ss:$0 sps:$4 sm:$0x11]   ;;  %v808_v13 = vshll.u32 %v11760_v5, 16  ;;  %v812_v8 = vrot.slane %v807_v49, 4  ;;  %v1371_v16 = vshrl.u32 %v11797_v4, 16 }
 0x180   : > { %2806 = vmatprep.mubr.bf16.mxu1 %v1369_v58  ;;  %v1879_v14 = vshll.u32 %v10394_v26, 16  ;;  %v10401_v15 = vld [vmem:[#allocation2 + $0x68] ss:$0 sps:$4 sm:$0x11]   ;;  %v1373_v17 = vshll.u32 %v11797_v4, 16  ;;  %v1876_v21 = vrot.slane %v1874_v11, 1  ;;  %v8643_v26 = vpack.c.bf16 %v481_v45, %v481_v45 }
 0x181   : > { %v810_v12 = vor.u32 %v808_v13, %v807_v49  ;;  %1034 = vst [vmem:[#allocation2 + $0x78] sm:$0xf] %v1033_v19  ;;  %v1037_v22 = vsel %vm11597_vm8, %v812_v8, %v1036_v40  ;;  %v814_v23 = vshrl.u32 %v8640_v47, 16  ;;  %v1378_v25 = vshll.u32 %v10401_v15, 16  ;;  %v10422_v35 = vld [vmem:[#allocation7 + $0x90] sm:$0xff]  }
 0x182   : > { %v1881_v5 = vrot.slane %v1879_v14, 1  ;;  %v1375_v24 = vrot.slane %v1373_v17, 1  ;;  %1038 = vst [vmem:[#allocation2 + $0x80] sm:$0x1] %v1037_v22  ;;  %v817_v20 = vshll.u32 %v8640_v47, 16  ;;  %v1877_v30 = vor.u32 %v1876_v21, %v1872_v10  ;;  %9572 = vmatprep.subr.bf16.mxu1 %v10422_v35 }
 0x183   : > { %v811_v31 = vsel %vm11582_vm6, %v803_v0, %v810_v12  ;;  %v816_v32 = vrot.slane %v814_v23, 7  ;;  %v822_v18 = vshrl.u32 %v8641_v7, 16  ;;  %v1380_v34 = vrot.slane %v1378_v25, 1  ;;  %9573 = vmatpush3.bf16.msra.mxu1 %v10422_v35  ;;  %v1043_v56 = vld [vmem:[#allocation2 + $0x8c] sm:$0x1]  ;;  %v483_v12 = vld [vmem:[%s11447_s18 + $0xc8] sm:$0xff] }
 0x184   : > { %v1376_v33 = vor.u32 %v1375_v24, %v1371_v16  ;;  %1035 = vst [vmem:[#allocation2 + $0x7c] sm:$0xf] %v811_v31  ;;  %v825_v6 = vshll.u32 %v8641_v7, 16  ;;  %v1882_v36 = vsel %vm1273_vm4, %v1877_v30, %v1881_v5  ;;  %v11846_v7 = vpack.c.bf16 %v482_v54, %v482_v54  ;;  %v1046_v14 = vld [vmem:[#allocation2 + $0x90] sm:$0xf]  ;;  %v484_v31 = vld [vmem:[%s11447_s18 + $0xd0] sm:$0xff] }
 0x185   : > { %v819_v39 = vor.u32 %v817_v20, %v816_v32  ;;  %v820_v41 = vrot.slane %v816_v32, 4  ;;  %v824_v29 = vrot.slane %v822_v18, 7  ;;  %v11822_v50 = vld [vmem:[#allocation2 + $0x74] ss:$0 sps:$4 sm:$0x11]   ;;  %v11824_v51 = vld [vmem:[#allocation2 + $0x6c] sm:$0xff]  }
 0x186   : > { %2333 = vmatmul.mubr.bf16.gmra.mrb[24].mxu0 %v11754_v1  ;;  %v831_v1 = vshrl.u32 %v11799_v9, 16  ;;  %v1381_v44 = vsel %vm1273_vm4, %v1376_v33, %v1380_v34  ;;  %v1891_v57 = vshll.u32 %v11822_v50, 16  ;;  %v11837_v49 = vld [vmem:[#allocation2 + $0x74] ss:$0 sps:$4 sm:$0x11]   ;;  %v1383_v61 = vshrl.u32 %v11824_v51, 16 }
 0x187   : > { %2807 = vmatmul.mubr.bf16.gmra.mrb[28].mxu1 %v11756_v37  ;;  %2340 = vmatprep.mubr.bf16.mxu0 %v1882_v36  ;;  %v11816_v37 = vld [vmem:[#allocation2 + $0x6c] sm:$0xff]   ;;  %v827_v42 = vor.u32 %v825_v6, %v824_v29  ;;  %v1040_v53 = vsel %vm11590_vm7, %v819_v39, %v1039_v28  ;;  %v1385_v40 = vshll.u32 %v11824_v51, 16  ;;  %v829_v47 = vrot.slane %v824_v29, 4 }
 0x188   : > { %v11820_v46 = vrot.slane %v831_v1, 7  ;;  %2814 = vmatprep.mubr.bf16.mxu1 %v1381_v44  ;;  %v1884_v43 = vshrl.u32 %v11816_v37, 16  ;;  %v1886_v55 = vshll.u32 %v11816_v37, 16  ;;  %1041 = vst [vmem:[#allocation2 + $0x84] sm:$0xf] %v1040_v53  ;;  %v1893_v27 = vrot.slane %v1891_v57, 1 }
 0x189   : > { %v11832_v58 = vld [vmem:[#allocation2 + $0x80] ss:$0 sps:$4 sm:$0x11]   ;;  %v828_v59 = vsel %vm11582_vm6, %v820_v41, %v827_v42  ;;  %v1390_v3 = vshll.u32 %v11837_v49, 16  ;;  %v834_v21 = vshll.u32 %v11799_v9, 16  ;;  %v839_v30 = vshrl.u32 %v8643_v26, 16 }
 0x18a   : > { %v1888_v60 = vrot.slane %v1886_v55, 1  ;;  %1042 = vst [vmem:[#allocation2 + $0x88] sm:$0xf] %v828_v59  ;;  %v1903_v0 = vshll.u32 %v11832_v58, 16  ;;  %v837_v24 = vrot.slane %v11820_v46, 4  ;;  %v10427_v32 = vld [vmem:[#allocation7 + $0x98] sm:$0xff]   ;;  %v11870_v1 = vpack.c.bf16 %v483_v12, %v483_v12 }
 0x18b   : > { %v11842_v63 = vld [vmem:[#allocation2 + $0x78] sm:$0xff]   ;;  %v1392_v17 = vrot.slane %v1390_v3, 1  ;;  %v11855_v19 = vld [vmem:[#allocation2 + $0x80] ss:$0 sps:$4 sm:$0x11]   ;;  %v836_v28 = vor.u32 %v834_v21, %v11820_v46  ;;  %v842_v34 = vshll.u32 %v8643_v26, 16  ;;  %9574 = vmatprep.subr.bf16.mxu1 %v10427_v32 }
 0x18c   : > { %v1889_v2 = vor.u32 %v1888_v60, %v1884_v43  ;;  %v1896_v10 = vshrl.u32 %v11842_v63, 16  ;;  %v1898_v11 = vshll.u32 %v11842_v63, 16  ;;  %v1905_v13 = vrot.slane %v1903_v0, 1  ;;  %v11852_v8 = vld [vmem:[#allocation2 + $0x78] sm:$0xff]   ;;  %v485_v29 = vld [vmem:[%s11447_s18 + $0xd8] sm:$0xff]  ;;  %v486_v54 = vld [vmem:[%s11447_s18 + $0xe0] sm:$0xff]  ;;  %9575 = vmatpush3.bf16.msra.mxu1 %v10427_v32 }
 0x18d   : > { %v1395_v23 = vshrl.u32 %v11852_v8, 16  ;;  %v1397_v5 = vshll.u32 %v11852_v8, 16  ;;  %v1402_v20 = vshll.u32 %v11855_v19, 16  ;;  %v841_v36 = vrot.slane %v839_v30, 7  ;;  %v1050_v53 = vld [vmem:[#allocation2 + $0x98] sm:$0x1] }
 0x18e   : > { %2341 = vmatmul.mubr.bf16.gmra.mrb[28].mxu0 %v11789_v62  ;;  %v1387_v62 = vrot.slane %v1385_v40, 1  ;;  %v1894_v15 = vsel %vm1273_vm4, %v1889_v2, %v1893_v27  ;;  %v1900_v22 = vrot.slane %v1898_v11, 1  ;;  %v1047_v39 = vsel %vm11590_vm7, %v836_v28, %v1046_v14  ;;  %v1053_v21 = vld [vmem:[#allocation2 + $0x9c] sm:$0xf]  ;;  %v10433_v12 = vld [vmem:[#allocation7 + $0xa0] sm:$0xff]  }
 0x18f   : > { %2815 = vmatmul.mubr.bf16.gmra.mrb[32].mxu1 %v11797_v4  ;;  %v1044_v4 = vsel %vm11597_vm8, %v829_v47, %v1043_v56  ;;  %2348 = vmatprep.mubr.bf16.mxu0 %v1894_v15  ;;  %v1399_v33 = vrot.slane %v1397_v5, 1  ;;  %v1404_v35 = vrot.slane %v1402_v20, 1  ;;  %v848_v41 = vshrl.u32 %v11846_v7, 16  ;;  %1048 = vst [vmem:[#allocation2 + $0x90] sm:$0xf] %v1047_v39  ;;  %v10434_v20 = vld [vmem:[#allocation7 + $0xa8] sm:$0xff]  }
 0x190   : > { %v1388_v16 = vor.u32 %v1387_v62, %v1383_v61  ;;  %1045 = vst [vmem:[#allocation2 + $0x8c] sm:$0x1] %v1044_v4  ;;  %v1901_v9 = vor.u32 %v1900_v22, %v1896_v10  ;;  %v844_v43 = vor.u32 %v842_v34, %v841_v36  ;;  %v846_v55 = vrot.slane %v841_v36, 4  ;;  %v10430_v4 = vld [vmem:[#allocation7 + $0x178] sm:$0xff]   ;;  %9576 = vmatprep.subr.bf16.mxu1 %v10433_v12 }
 0x191   : > { %v11866_v18 = vld [vmem:[#allocation2 + $0x84] sm:$0xff]   ;;  %v1400_v42 = vor.u32 %v1399_v33, %v1395_v23  ;;  %v8646_v40 = vpack.c.bf16 %v484_v31, %v484_v31  ;;  %v11887_v27 = vpack.c.bf16 %v485_v29, %v485_v29  ;;  %v11895_v62 = vpack.c.bf16 %v486_v54, %v486_v54  ;;  %9534 = vmatprep.subr.bf16.mxu0 %v10430_v4  ;;  %v487_v31 = vld [vmem:[%s11447_s18 + $0xe8] sm:$0xff] }
 0x192   : > { %v1393_v25 = vsel %vm1273_vm4, %v1388_v16, %v1392_v17  ;;  %v11868_v6 = vld [vmem:[#allocation2 + $0x84] sm:$0xff]   ;;  %v1906_v44 = vsel %vm1273_vm4, %v1901_v9, %v1905_v13  ;;  %v1908_v45 = vshrl.u32 %v11866_v18, 16  ;;  %v1910_v46 = vshll.u32 %v11866_v18, 16  ;;  %9535 = vmatpush3.bf16.msra.mxu0 %v10430_v4  ;;  %9577 = vmatpush3.bf16.msra.mxu1 %v10433_v12 }
 0x193   : > { %2822 = vmatprep.mubr.bf16.mxu1 %v1393_v25  ;;  %v1407_v56 = vshrl.u32 %v11868_v6, 16  ;;  %v1409_v57 = vshll.u32 %v11868_v6, 16  ;;  %v1405_v61 = vsel %vm1273_vm4, %v1400_v42, %v1404_v35  ;;  %v845_v0 = vsel %vm11582_vm6, %v837_v24, %v844_v43  ;;  %v1057_v24 = vld [vmem:[#allocation2 + $0xa4] sm:$0x1]  ;;  %v1060_v30 = vld [vmem:[#allocation2 + $0xa8] sm:$0xf]  ;;  %9578 = vmatprep.subr.bf16.mxu1 %v10434_v20 }
 0x194   : > { %v1912_v60 = vrot.slane %v1910_v46, 1  ;;  %v1051_v47 = vsel %vm11597_vm8, %v846_v55, %v1050_v53  ;;  %1049 = vst [vmem:[#allocation2 + $0x94] sm:$0xf] %v845_v0  ;;  %v850_v11 = vrot.slane %v848_v41, 7  ;;  %v851_v13 = vshll.u32 %v11846_v7, 16  ;;  %v488_v42 = vld [vmem:[%s11447_s18 + $0xf0] sm:$0xff] }
 0x195   : > { %v1411_v2 = vrot.slane %v1409_v57, 1  ;;  %1052 = vst [vmem:[#allocation2 + $0x98] sm:$0x1] %v1051_v47  ;;  %v856_v16 = vshrl.u32 %v11870_v1, 16  ;;  %v859_v17 = vshll.u32 %v11870_v1, 16  ;;  %v865_v25 = vshrl.u32 %v8646_v40, 16 }
 0x196   : > { %2349 = vmatmul.mubr.bf16.gmra.mrb[32].mxu0 %v11816_v37  ;;  %v1913_v3 = vor.u32 %v1912_v60, %v1908_v45  ;;  %v853_v23 = vor.u32 %v851_v13, %v850_v11  ;;  %v854_v5 = vrot.slane %v850_v11, 4  ;;  %v868_v34 = vshll.u32 %v8646_v40, 16  ;;  %v1064_v45 = vld [vmem:[#allocation2 + $0xb0] sm:$0x1]  ;;  %9579 = vmatpush3.bf16.msra.mxu1 %v10434_v20 }
 0x197   : > { %2823 = vmatmul.mubr.bf16.gmra.mrb[36].mxu1 %v11824_v51  ;;  %2356 = vmatprep.mubr.bf16.mxu0 %v1906_v44  ;;  %v11884_v59 = vld [vmem:[#allocation2 + $0x8c] ss:$0 sps:$4 sm:$0x11]   ;;  %v1412_v14 = vor.u32 %v1411_v2, %v1407_v56  ;;  %v858_v28 = vrot.slane %v856_v16, 7  ;;  %v867_v33 = vrot.slane %v865_v25, 7  ;;  %v873_v39 = vshrl.u32 %v11887_v27, 16 }
 0x198   : > { %2830 = vmatprep.mubr.bf16.mxu1 %v1405_v61  ;;  %v11893_v26 = vld [vmem:[#allocation2 + $0x8c] ss:$0 sps:$4 sm:$0x11]   ;;  %v1915_v10 = vshll.u32 %v11884_v59, 16  ;;  %v1054_v9 = vsel %vm11590_vm7, %v853_v23, %v1053_v21  ;;  %v876_v44 = vshll.u32 %v11887_v27, 16  ;;  %v882_v46 = vshrl.u32 %v11895_v62, 16 }
 0x199   : > { %v1414_v15 = vshll.u32 %v11893_v26, 16  ;;  %v861_v35 = vor.u32 %v859_v17, %v858_v28  ;;  %v863_v36 = vrot.slane %v858_v28, 4  ;;  %1055 = vst [vmem:[#allocation2 + $0x9c] sm:$0xf] %v1054_v9  ;;  %v870_v41 = vor.u32 %v868_v34, %v867_v33  ;;  %v1067_v17 = vld [vmem:[#allocation2 + $0xb4] sm:$0xf] }
 0x19a   : > { %v1917_v22 = vrot.slane %v1915_v10, 1  ;;  %v871_v29 = vrot.slane %v867_v33, 4  ;;  %v875_v55 = vrot.slane %v873_v39, 7  ;;  %v8649_v61 = vpack.c.bf16 %v487_v31, %v487_v31 }
 0x19b   : > { %v1416_v7 = vrot.slane %v1414_v15, 1  ;;  %v11913_v53 = vld [vmem:[#allocation2 + $0x90] sm:$0xff]   ;;  %v862_v54 = vsel %vm11582_vm6, %v854_v5, %v861_v35  ;;  %v1058_v43 = vsel %vm11597_vm8, %v863_v36, %v1057_v24  ;;  %v1061_v60 = vsel %vm11590_vm7, %v870_v41, %v1060_v30 }
 0x19c   : > { %v1918_v32 = vsel %vm1273_vm4, %v1913_v3, %v1917_v22  ;;  %v11919_v56 = vld [vmem:[#allocation2 + $0x98] ss:$0 sps:$4 sm:$0x11]   ;;  %1056 = vst [vmem:[#allocation2 + $0xa0] sm:$0xf] %v862_v54  ;;  %v11921_v57 = vld [vmem:[#allocation2 + $0x90] sm:$0xff]   ;;  %v878_v0 = vor.u32 %v876_v44, %v875_v55  ;;  %v11932_v13 = vpack.c.bf16 %v488_v42, %v488_v42 }
 0x19d   : > { %v1417_v1 = vsel %vm1273_vm4, %v1412_v14, %v1416_v7  ;;  %1059 = vst [vmem:[#allocation2 + $0xa4] sm:$0x1] %v1058_v43  ;;  %v1920_v40 = vshrl.u32 %v11913_v53, 16  ;;  %v1922_v27 = vshll.u32 %v11913_v53, 16  ;;  %v880_v47 = vrot.slane %v875_v55, 4  ;;  %v10439_v7 = vld [vmem:[#allocation7 + $0xb0] sm:$0xff]  }
 0x19e   : > { %2357 = vmatmul.mubr.bf16.gmra.mrb[36].mxu0 %v11842_v63  ;;  %1062 = vst [vmem:[#allocation2 + $0xa8] sm:$0xf] %v1061_v60  ;;  %v1927_v2 = vshll.u32 %v11919_v56, 16  ;;  %v11928_v3 = vld [vmem:[#allocation2 + $0x98] ss:$0 sps:$4 sm:$0x11]   ;;  %v879_v14 = vsel %vm11582_vm6, %v871_v29, %v878_v0  ;;  %9580 = vmatprep.subr.bf16.mxu1 %v10439_v7 }
 0x19f   : > { %2831 = vmatmul.mubr.bf16.gmra.mrb[40].mxu1 %v11852_v8  ;;  %2364 = vmatprep.mubr.bf16.mxu0 %v1918_v32  ;;  %v1419_v10 = vshrl.u32 %v11921_v57, 16  ;;  %v1421_v11 = vshll.u32 %v11921_v57, 16  ;;  %v1924_v4 = vrot.slane %v1922_v27, 1  ;;  %v1065_v15 = vsel %vm11597_vm8, %v880_v47, %v1064_v45  ;;  %1063 = vst [vmem:[#allocation2 + $0xac] sm:$0xf] %v879_v14 }
 0x1a0   : > { %2838 = vmatprep.mubr.bf16.mxu1 %v1417_v1  ;;  %v884_v16 = vrot.slane %v882_v46, 7  ;;  %v1929_v21 = vrot.slane %v1927_v2, 1  ;;  %v1426_v22 = vshll.u32 %v11928_v3, 16  ;;  %1066 = vst [vmem:[#allocation2 + $0xb0] sm:$0x1] %v1065_v15  ;;  %v885_v23 = vshll.u32 %v11895_v62, 16  ;;  %9581 = vmatpush3.bf16.msra.mxu1 %v10439_v7 }
 0x1a1   : > { %v1423_v12 = vrot.slane %v1421_v11, 1  ;;  %v1925_v5 = vor.u32 %v1924_v4, %v1920_v40  ;;  %v890_v25 = vshrl.u32 %v8649_v61, 16  ;;  %v893_v20 = vshll.u32 %v8649_v61, 16  ;;  %v489_v1 = vld [vmem:[%s11447_s18 + $0xf8] sm:$0xff]  ;;  %v1071_v43 = vld [vmem:[#allocation2 + $0xbc] sm:$0x1] }
 0x1a2   : > { %v888_v24 = vrot.slane %v884_v16, 4  ;;  %v1428_v30 = vrot.slane %v1426_v22, 1  ;;  %v887_v31 = vor.u32 %v885_v23, %v884_v16  ;;  %v899_v32 = vshrl.u32 %v11932_v13, 16 }
 0x1a3   : > { %v1424_v28 = vor.u32 %v1423_v12, %v1419_v10  ;;  %v1930_v9 = vsel %vm1273_vm4, %v1925_v5, %v1929_v21  ;;  %v11944_v33 = vld [vmem:[#allocation2 + $0x9c] sm:$0xff]   ;;  %v892_v34 = vrot.slane %v890_v25, 7  ;;  %v8651_v2 = vpack.c.bf16 %v489_v1, %v489_v1  ;;  %v10440_v25 = vld [vmem:[#allocation7 + $0xb8] sm:$0xff]  }
 0x1a4   : > { %v11947_v35 = vld [vmem:[#allocation2 + $0xa4] ss:$0 sps:$4 sm:$0x11]   ;;  %v11950_v36 = vld [vmem:[#allocation2 + $0x9c] sm:$0xff]   ;;  %v1068_v39 = vsel %vm11590_vm7, %v887_v31, %v1067_v17  ;;  %v1932_v41 = vshrl.u32 %v11944_v33, 16  ;;  %v1934_v29 = vshll.u32 %v11944_v33, 16  ;;  %9582 = vmatprep.subr.bf16.mxu1 %v10440_v25 }
 0x1a5   : > { %v1429_v62 = vsel %vm1273_vm4, %v1424_v28, %v1428_v30  ;;  %v895_v44 = vor.u32 %v893_v20, %v892_v34  ;;  %1069 = vst [vmem:[#allocation2 + $0xb4] sm:$0xf] %v1068_v39  ;;  %v1939_v45 = vshll.u32 %v11947_v35, 16  ;;  %v11957_v46 = vld [vmem:[#allocation2 + $0xa4] ss:$0 sps:$4 sm:$0x11]   ;;  %9583 = vmatpush3.bf16.msra.mxu1 %v10440_v25 }
 0x1a6   : > { %2365 = vmatmul.mubr.bf16.gmra.mrb[40].mxu0 %v11866_v18  ;;  %v1431_v42 = vshrl.u32 %v11950_v36, 16  ;;  %v1433_v54 = vshll.u32 %v11950_v36, 16  ;;  %v1936_v55 = vrot.slane %v1934_v29, 1  ;;  %v11962_v60 = vld [vmem:[#allocation2 + $0xa8] sm:$0xff]   ;;  %v1438_v47 = vshll.u32 %v11957_v46, 16  ;;  %v10441_v31 = vld [vmem:[#allocation7 + $0x1c0] sm:$0xff]  }
 0x1a7   : > { %2839 = vmatmul.mubr.bf16.gmra.mrb[44].mxu1 %v11868_v6  ;;  %2372 = vmatprep.mubr.bf16.mxu0 %v1930_v9  ;;  %v896_v61 = vsel %vm11582_vm6, %v888_v24, %v895_v44  ;;  %v1941_v40 = vrot.slane %v1939_v45, 1  ;;  %v11967_v27 = vld [vmem:[#allocation2 + $0xb0] ss:$0 sps:$4 sm:$0x11]   ;;  %v1944_v11 = vshrl.u32 %v11962_v60, 16  ;;  %v1946_v4 = vshll.u32 %v11962_v60, 16 }
 0x1a8   : > { %2846 = vmatprep.mubr.bf16.mxu1 %v1429_v62  ;;  %v1435_v0 = vrot.slane %v1433_v54, 1  ;;  %1070 = vst [vmem:[#allocation2 + $0xb8] sm:$0xf] %v896_v61  ;;  %v1937_v10 = vor.u32 %v1936_v55, %v1932_v41  ;;  %v897_v14 = vrot.slane %v892_v34, 4  ;;  %v11972_v15 = vld [vmem:[#allocation2 + $0xa8] sm:$0xff]   ;;  %v1951_v16 = vshll.u32 %v11967_v27, 16  ;;  %8957 = vmatprep.subr.bf16.mxu0 %v10441_v31 }
 0x1a9   : > { %v1440_v21 = vrot.slane %v1438_v47, 1  ;;  %v1948_v22 = vrot.slane %v1946_v4, 1  ;;  %v11978_v5 = vld [vmem:[#allocation2 + $0xb0] ss:$0 sps:$4 sm:$0x11]   ;;  %v1443_v24 = vshrl.u32 %v11972_v15, 16 }
 0x1aa   : > { %v1436_v17 = vor.u32 %v1435_v0, %v1431_v42  ;;  %v1942_v12 = vsel %vm1273_vm4, %v1937_v10, %v1941_v40  ;;  %v1072_v23 = vsel %vm11597_vm8, %v897_v14, %v1071_v43  ;;  %v1953_v20 = vrot.slane %v1951_v16, 1  ;;  %v1074_v39 = vld [vmem:[#allocation2 + $0xc0] sm:$0xf]  ;;  %v1078_v45 = vld [vmem:[#allocation2 + $0xc8] sm:$0x1] }
 0x1ab   : > { %1073 = vst [vmem:[#allocation2 + $0xbc] sm:$0x1] %v1072_v23  ;;  %v1445_v28 = vshll.u32 %v11972_v15, 16  ;;  %v901_v30 = vrot.slane %v899_v32, 7  ;;  %v1949_v9 = vor.u32 %v1948_v22, %v1944_v11  ;;  %v1450_v34 = vshll.u32 %v11978_v5, 16 }
 0x1ac   : > { %v1441_v7 = vsel %vm1273_vm4, %v1436_v17, %v1440_v21  ;;  %v902_v1 = vshll.u32 %v11932_v13, 16  ;;  %v907_v62 = vshrl.u32 %v8651_v2, 16  ;;  %v910_v44 = vshll.u32 %v8651_v2, 16 }
 0x1ad   : > { %v1447_v41 = vrot.slane %v1445_v28, 1  ;;  %v905_v29 = vrot.slane %v901_v30, 4  ;;  %v1954_v32 = vsel %vm1273_vm4, %v1949_v9, %v1953_v20  ;;  %v1452_v54 = vrot.slane %v1450_v34, 1  ;;  %v10669_v34 = vld [vmem:[#allocation2] sm:$0xff]  }
 0x1ae   : > { %2373 = vmatmul.mubr.bf16.gmra.mrb[44].mxu0 %v11913_v53  ;;  %v904_v43 = vor.u32 %v902_v1, %v901_v30  ;;  %v909_v55 = vrot.slane %v907_v62, 7  ;;  %v1483_v1 = vrot.slane %v10669_v34, 1  ;;  %v10670_v62 = vld [vmem:[#allocation2 + $0x8] ss:$0 sps:$4 sm:$0x11]  }
 0x1af   : > { %2847 = vmatmul.mubr.bf16.gmra.mrb[48].mxu1 %v11921_v57  ;;  %2380 = vmatprep.mubr.bf16.mxu0 %v1942_v12  ;;  %v11987_v42 = vld [vmem:[#allocation2 + $0xb4] sm:$0xff]   ;;  %v1448_v13 = vor.u32 %v1447_v41, %v1443_v24  ;;  %v10681_v34 = vld [vmem:[#allocation2 + $0x20] ss:$0 sps:$4 sm:$0x11]  }
 0x1b0   : > { %2854 = vmatprep.mubr.bf16.mxu1 %v1441_v7  ;;  %v11989_v61 = vld [vmem:[#allocation2 + $0xb4] sm:$0xff]   ;;  %v1956_v40 = vshrl.u32 %v11987_v42, 16  ;;  %v1958_v0 = vshll.u32 %v11987_v42, 16  ;;  %v912_v47 = vor.u32 %v910_v44, %v909_v55  ;;  %v914_v2 = vrot.slane %v909_v55, 4  ;;  %v10671_v55 = vld [vmem:[#allocation2 + $0xc] sm:$0xff]  }
 0x1b1   : > { %v1453_v10 = vsel %vm1273_vm4, %v1448_v13, %v1452_v54  ;;  %v1075_v11 = vsel %vm11590_vm7, %v904_v43, %v1074_v39  ;;  %v1455_v4 = vshrl.u32 %v11989_v61, 16  ;;  %v1457_v14 = vshll.u32 %v11989_v61, 16 }
 0x1b2   : > { %v11999_v16 = vld [vmem:[#allocation2 + $0xbc] ss:$0 sps:$4 sm:$0x11]   ;;  %v1960_v17 = vrot.slane %v1958_v0, 1  ;;  %v913_v21 = vsel %vm11582_vm6, %v905_v29, %v912_v47  ;;  %1076 = vst [vmem:[#allocation2 + $0xc0] sm:$0xf] %v1075_v11  ;;  %v1079_v12 = vsel %vm11597_vm8, %v914_v2, %v1078_v45 }
 0x1b3   : > { %1077 = vst [vmem:[#allocation2 + $0xc4] sm:$0xf] %v913_v21  ;;  %1080 = vst [vmem:[#allocation2 + $0xc8] sm:$0x1] %v1079_v12  ;;  %v1459_v23 = vrot.slane %v1457_v14, 1  ;;  %v1963_v25 = vshll.u32 %v11999_v16, 16 }
 0x1b4   : > { %v12005_v22 = vld [vmem:[#allocation2 + $0xbc] ss:$0 sps:$4 sm:$0x11]   ;;  %v1961_v24 = vor.u32 %v1960_v17, %v1956_v40  ;;  %v1484_v39 = vrot.slane %v10670_v62, 1  ;;  %v1995_v13 = vrot.slane %v10671_v55, 1  ;;  %v10674_v11 = vld [vmem:[#allocation2 + $0xc] sm:$0xff]  }
 0x1b5   : > { %v1460_v20 = vor.u32 %v1459_v23, %v1455_v4  ;;  %v1462_v7 = vshll.u32 %v12005_v22, 16  ;;  %v1965_v28 = vrot.slane %v1963_v25, 1  ;;  %v10672_v40 = vld [vmem:[#allocation2 + $0x14] ss:$0 sps:$4 sm:$0x11]   ;;  %v12023_v2 = vld [vmem:[#allocation2 + $0x18] sm:$0xff]  }
 0x1b6   : > { %2381 = vmatmul.mubr.bf16.gmra.mrb[48].mxu0 %v11944_v33  ;;  %v1485_v54 = vsel %vm1482_vm9, %v1483_v1, %v1484_v39  ;;  %v1996_v0 = vrot.slane %v10672_v40, 1  ;;  %v1486_v4 = vrot.slane %v10674_v11, 1  ;;  %v10675_v14 = vld [vmem:[#allocation2 + $0x14] ss:$0 sps:$4 sm:$0x11]   ;;  %v1490_v1 = vrot.slane %v10681_v34, 1 }
 0x1b7   : > { %2388 = vmatprep.mubr.bf16.mxu0 %v1954_v32  ;;  %2855 = vmatmul.mubr.bf16.gmra.mrb[52].mxu1 %v11950_v36  ;;  %v1464_v30 = vrot.slane %v1462_v7, 1  ;;  %v1966_v31 = vsel %vm1273_vm4, %v1961_v24, %v1965_v28  ;;  %v1487_v17 = vrot.slane %v10675_v14, 1  ;;  %v12026_v12 = vld [vmem:[#allocation2 + $0x20] ss:$0 sps:$4 sm:$0x11]   ;;  %v12029_v24 = vld [vmem:[#allocation2 + $0x24] sm:$0xff]  }
 0x1b8   : > { %2862 = vmatprep.mubr.bf16.mxu1 %v1453_v10  ;;  %v1998_v10 = vrot.slane %v12023_v2, 1  ;;  %v1999_v23 = vrot.slane %v12026_v12, 1  ;;  %v2001_v25 = vrot.slane %v12029_v24, 1  ;;  %v12032_v28 = vld [vmem:[#allocation2 + $0x30] sm:$0xff]   ;;  %v1997_v39 = vsel %vm1482_vm9, %v1995_v13, %v1996_v0  ;;  %v12041_v11 = vld [vmem:[#allocation2 + $0x3c] sm:$0xff]  }
 0x1b9   : > { %v1465_v9 = vsel %vm1273_vm4, %v1460_v20, %v1464_v30  ;;  %v10678_v20 = vld [vmem:[#allocation2 + $0x2c] ss:$0 sps:$4 sm:$0x11]   ;;  %v2004_v30 = vrot.slane %v12032_v28, 1  ;;  %v2019_v24 = vrot.slane %v11816_v37, 1  ;;  %v2020_v0 = vrot.slane %v11822_v50, 1 }
 0x1ba   : > { %v12013_v41 = vld [vmem:[#allocation2 + $0xc0] sm:$0xff]   ;;  %v12015_v29 = vld [vmem:[#allocation2 + $0xc8] ss:$0 sps:$4 sm:$0x11]   ;;  %v2002_v7 = vrot.slane %v10678_v20, 1  ;;  %v2022_v20 = vrot.slane %v11842_v63, 1 }
 0x1bb   : > { %v1968_v44 = vshrl.u32 %v12013_v41, 16  ;;  %v1970_v45 = vshll.u32 %v12013_v41, 16  ;;  %v1975_v32 = vshll.u32 %v12015_v29, 16  ;;  %v10684_v55 = vld [vmem:[#allocation2 + $0x2c] ss:$0 sps:$4 sm:$0x11]   ;;  %v12055_v14 = vsel %vm1482_vm9, %v2019_v24, %v2020_v0 }
 0x1bc   : > { %v1493_v40 = vrot.slane %v10684_v55, 1  ;;  %v1510_v55 = vrot.slane %v11824_v51, 1  ;;  %v10452_v37 = vld [vmem:[#allocation7 + $0x208] sm:$0xff]   ;;  %v2025_v63 = vrot.slane %v11866_v18, 1  ;;  %v2029_v24 = vrot.slane %v11919_v56, 1  ;;  %v10455_v56 = vld [vmem:[#allocation7 + $0x210] sm:$0xff]  }
 0x1bd   : > { %v1972_v43 = vrot.slane %v1970_v45, 1  ;;  %v1977_v47 = vrot.slane %v1975_v32, 1  ;;  %v10683_v32 = vld [vmem:[#allocation2 + $0x24] sm:$0xff]   ;;  %v1514_v18 = vrot.slane %v11855_v19, 1  ;;  %v2003_v19 = vsel %vm1482_vm9, %v2001_v25, %v2002_v7  ;;  %v10444_v7 = vld [vmem:[#allocation7 + $0x188] sm:$0xff]  }
 0x1be   : > { %2389 = vmatmul.mubr.bf16.gmra.mrb[52].mxu0 %v11962_v60  ;;  %v2035_v2 = vrot.slane %v11967_v27, 1  ;;  %v1520_v12 = vrot.slane %v11928_v3, 1  ;;  %v10445_v27 = vld [vmem:[#allocation7 + $0x1d0] sm:$0xff]  }
 0x1bf   : > { %2863 = vmatmul.mubr.bf16.gmra.mrb[56].mxu1 %v11972_v15  ;;  %2396 = vmatprep.mubr.bf16.mxu0 %v1966_v31  ;;  %v1973_v21 = vor.u32 %v1972_v43, %v1968_v44  ;;  %v10680_v31 = vld [vmem:[#allocation2 + $0x18] sm:$0xff]   ;;  %v1488_v43 = vsel %vm1482_vm9, %v1486_v4, %v1487_v17  ;;  %v10687_v17 = vld [vmem:[#allocation2 + $0x30] sm:$0xff]  }
 0x1c0   : > { %2870 = vmatprep.mubr.bf16.mxu1 %v1465_v9  ;;  %v1489_v9 = vrot.slane %v10680_v31, 1  ;;  %v12037_v44 = vld [vmem:[#allocation2 + $0x38] ss:$0 sps:$4 sm:$0x11]   ;;  %v2023_v31 = vrot.slane %v11832_v58, 1  ;;  %v1495_v34 = vrot.slane %v10687_v17, 1 }
 0x1c1   : > { %v1978_v62 = vsel %vm1273_vm4, %v1973_v21, %v1977_v47  ;;  %v2005_v45 = vrot.slane %v12037_v44, 1  ;;  %v10451_v47 = vld [vmem:[#allocation7 + $0x200] sm:$0xff]   ;;  %v12045_v21 = vld [vmem:[#allocation2 + $0x44] ss:$0 sps:$4 sm:$0x11]   ;;  %v1511_v58 = vrot.slane %v11837_v49, 1 }
 0x1c2   : > { %v2008_v13 = vrot.slane %v12045_v21, 1  ;;  %v1491_v4 = vsel %vm1482_vm9, %v1489_v9, %v1490_v1  ;;  %9616 = vmatprep.subr.bf16.mxu1 %v10451_v47  ;;  %v12058_v50 = vsel %vm1482_vm9, %v2022_v20, %v2023_v31  ;;  %v12062_v9 = vld [vmem:[#allocation2 + $0x3c] sm:$0xff]   ;;  %v2026_v1 = vrot.slane %v11884_v59, 1  ;;  %v10694_v21 = vld [vmem:[#allocation2 + $0x50] ss:$0 sps:$4 sm:$0x11]  }
 0x1c3   : > { %v1498_v51 = vrot.slane %v12062_v9, 1  ;;  %v2028_v17 = vrot.slane %v11913_v53, 1  ;;  %v12069_v0 = vsel %vm1482_vm9, %v1510_v55, %v1511_v58  ;;  %v1513_v49 = vrot.slane %v11852_v8, 1  ;;  %v10690_v55 = vld [vmem:[#allocation2 + $0x44] ss:$0 sps:$4 sm:$0x11]  }
 0x1c4   : > { %v12075_v20 = vsel %vm1482_vm9, %v2025_v63, %v2026_v1  ;;  %v1517_v53 = vrot.slane %v11893_v26, 1  ;;  %v2000_v8 = vsel %vm1482_vm9, %v1998_v10, %v1999_v23  ;;  %v2032_v26 = vrot.slane %v11947_v35, 1 }
 0x1c5   : > { %v12078_v59 = vsel %vm1482_vm9, %v2028_v17, %v2029_v24  ;;  %v1519_v10 = vrot.slane %v11921_v57, 1  ;;  %v1522_v23 = vrot.slane %v11950_v36, 1  ;;  %v1499_v58 = vrot.slane %v10690_v55, 1  ;;  %v10456_v57 = vld [vmem:[#allocation7 + $0x218] sm:$0xff]  }
 0x1c6   : > { %2397 = vmatmul.mubr.bf16.gmra.mrb[56].mxu0 %v11987_v42  ;;  %v1523_v35 = vrot.slane %v11957_v46, 1  ;;  %v2038_v46 = vrot.slane %v11999_v16, 1  ;;  %v1525_v1 = vrot.slane %v11972_v15, 1  ;;  %v1526_v17 = vrot.slane %v11978_v5, 1 }
 0x1c7   : > { %2871 = vmatmul.mubr.bf16.gmra.mrb[60].mxu1 %v11989_v61  ;;  %2404 = vmatprep.mubr.bf16.mxu0 %v1978_v62  ;;  %v10688_v62 = vld [vmem:[#allocation2 + $0x38] ss:$0 sps:$4 sm:$0x11]   ;;  %v12110_v36 = vsel %vm1482_vm9, %v1519_v10, %v1520_v12  ;;  %v1528_v16 = vrot.slane %v11989_v61, 1  ;;  %v2006_v5 = vsel %vm1482_vm9, %v2004_v30, %v2005_v45  ;;  %v14202_v61 = vrot.slane %v12041_v11, 1  ;;  %v10693_v45 = vld [vmem:[#allocation2 + $0x48] sm:$0xff]  }
 0x1c8   : > { %9584 = vmatprep.mubr.bf16.mxu1 %v1485_v54  ;;  %v1492_v54 = vrot.slane %v10683_v32, 1  ;;  %v1496_v32 = vrot.slane %v10688_v62, 1  ;;  %v2034_v62 = vrot.slane %v11962_v60, 1  ;;  %v12114_v63 = vsel %vm1482_vm9, %v1522_v23, %v1523_v35  ;;  %v10460_v30 = vld [vmem:[#allocation7 + $0x228] sm:$0xff]   ;;  %v10448_v11 = vld [vmem:[#allocation7 + $0x198] sm:$0xff]   ;;  %v10699_v10 = vld [vmem:[#allocation2 + $0x60] sm:$0xff]  }
 0x1c9   : > { %v12130_v15 = vsel %vm1482_vm9, %v1525_v1, %v1526_v17  ;;  %v1500_v44 = vsel %vm1482_vm9, %v1498_v51, %v1499_v58  ;;  %v10449_v51 = vld [vmem:[#allocation7 + $0x1e0] sm:$0xff]   ;;  %v1507_v12 = vrot.slane %v10699_v10, 1  ;;  %v10700_v23 = vld [vmem:[#allocation2 + $0x68] ss:$0 sps:$4 sm:$0x11]   ;;  %v10457_v1 = vld [vmem:[#allocation7 + $0x1f0] sm:$0xff]  }
 0x1ca   : > { %v1494_v25 = vsel %vm1482_vm9, %v1492_v54, %v1493_v40  ;;  %v1497_v60 = vsel %vm1482_vm9, %v1495_v34, %v1496_v32  ;;  %v12107_v3 = vsel %vm1482_vm9, %v2034_v62, %v2035_v2  ;;  %v2037_v54 = vrot.slane %v11987_v42, 1  ;;  %v10691_v40 = vld [vmem:[#allocation2 + $0x48] sm:$0xff]   ;;  %v10692_v42 = vld [vmem:[#allocation2 + $0x50] ss:$0 sps:$4 sm:$0x11]  }
 0x1cb   : > { %v2040_v34 = vrot.slane %v12013_v41, 1  ;;  %v2041_v32 = vrot.slane %v12015_v29, 1  ;;  %v1502_v24 = vrot.slane %v10692_v42, 1  ;;  %v10446_v29 = vld [vmem:[#allocation7 + $0x190] sm:$0xff]   ;;  %v10450_v58 = vld [vmem:[#allocation7 + $0x1a0] sm:$0xff]  }
 0x1cc   : > { %v10698_v62 = vld [vmem:[#allocation2 + $0x5c] ss:$0 sps:$4 sm:$0x11]   ;;  %v10458_v42 = vld [vmem:[#allocation7 + $0x1b0] sm:$0xff]  }
 0x1cd   : > { %v1505_v2 = vrot.slane %v10698_v62, 1  ;;  %v12201_v62 = vld [vmem:[#allocation2 + $0x54] sm:$0xff]  }
 0x1ce   : > { %2405 = vmatmul.mubr.bf16.gmra.mrb[60].mxu0 %v12013_v41  ;;  %v12127_v41 = vsel %vm1482_vm9, %v2040_v34, %v2041_v32  ;;  %v10454_v32 = vld [vmem:[#allocation7 + $0x1a8] sm:$0xff]  }
 0x1cf   : > { %9536 = vmatprep.mubr.bf16.mxu0 %v1997_v39  ;;  %9585 = vmatmul.mubr.bf16.vlgmr.msra.gmra.mrb[64].mxu1 %v1488_v43  ;;  %v1516_v39 = vrot.slane %v11868_v6, 1  ;;  %v10442_v43 = vld [vmem:[#allocation7 + $0x180] sm:$0xff]   ;;  %v12088_v6 = vsel %vm1482_vm9, %v1513_v49, %v1514_v18  ;;  %v12122_v18 = vsel %vm1482_vm9, %v2037_v54, %v2038_v46  ;;  %v10702_v46 = vld [vmem:[#allocation2 + $0x68] ss:$0 sps:$4 sm:$0x11]  }
 0x1d0   : > { %9588 = vmatprep.mubr.bf16.mxu1 %v1491_v4  ;;  %9617 = vmatpush3.bf16.msra.mxu1 %v10451_v47  ;;  %v10443_v47 = vld [vmem:[#allocation7 + $0x1c8] sm:$0xff]   ;;  %v2031_v4 = vrot.slane %v11944_v33, 1  ;;  %v10459_v49 = vld [vmem:[#allocation7 + $0x220] sm:$0xff]   ;;  %v2017_v34 = vrot.slane %v10702_v46, 1 }
 0x1d1   : > { %9618 = vmatprep.subr.bf16.mxu1 %v10452_v37  ;;  %v12091_v31 = vsel %vm1482_vm9, %v1516_v39, %v1517_v53  ;;  %v1529_v39 = vrot.slane %v12005_v22, 1  ;;  %v2009_v22 = vsel %vm1482_vm9, %v14202_v61, %v2008_v13  ;;  %v10447_v53 = vld [vmem:[#allocation7 + $0x1d8] sm:$0xff]   ;;  %v10695_v13 = vld [vmem:[#allocation2 + $0x54] sm:$0xff]  }
 0x1d2   : > { %v12102_v33 = vsel %vm1482_vm9, %v2031_v4, %v2032_v26  ;;  %v10697_v4 = vld [vmem:[#allocation2 + $0x54] sm:$0xff]  }
 0x1d3   : > { %v1504_v26 = vrot.slane %v10697_v4, 1 }
 0x1d4   : > { %9619 = vmatpush3.bf16.msra.mxu1 %v10452_v37  ;;  %v1501_v37 = vrot.slane %v10691_v40, 1 }
 0x1d5   : > { %9620 = vmatprep.subr.bf16.mxu1 %v10455_v56 }
 0x1d6   : > { %9537 = vmatmul.mubr.bf16.vlgmr.msra.gmra.mrb[64].mxu0 %v2000_v8  ;;  %v1503_v28 = vsel %vm1482_vm9, %v1501_v37, %v1502_v24  ;;  %v2011_v8 = vrot.slane %v10694_v21, 1  ;;  %v10464_v37 = vld [vmem:[#allocation7 + $0x238] sm:$0xff]  }
 0x1d7   : > { %8958 = vmatpush3.bf16.msra.mxu0 %v10442_v43  ;;  %9540 = vmatprep.mubr.bf16.mxu0 %v2003_v19  ;;  %v12138_v43 = vsel %vm1482_vm9, %v1528_v16, %v1529_v39  ;;  %v2013_v19 = vrot.slane %v10695_v13, 1  ;;  %v10461_v24 = vld [vmem:[#allocation7 + $0x1f8] sm:$0xff]   ;;  %v12156_v16 = vld [vmem:[#allocation2 + $0x20] ss:$0 sps:$4 sm:$0x11]  }
 0x1d8   : > { %8959 = vmatprep.subr.bf16.mxu0 %v10443_v47  ;;  %9589 = vmatmul.mubr.bf16.gmra.mrb[68].mxu1 %v1494_v25  ;;  %v10696_v47 = vld [vmem:[#allocation2 + $0x5c] ss:$0 sps:$4 sm:$0x11]   ;;  %v1508_v25 = vrot.slane %v10700_v23, 1  ;;  %v12158_v39 = vld [vmem:[#allocation2 + $0x24] sm:$0xff]   ;;  %v3241_v61 = vshll.u32 %v12156_v16, 16 }
 0x1d9   : > { %9592 = vmatprep.mubr.bf16.mxu1 %v1497_v60  ;;  %9621 = vmatpush3.bf16.msra.mxu1 %v10455_v56  ;;  %v2010_v56 = vrot.slane %v10693_v45, 1  ;;  %v2014_v9 = vrot.slane %v10696_v47, 1  ;;  %v10453_v60 = vld [vmem:[#allocation7 + $0x1e8] sm:$0xff]   ;;  %v3246_v45 = vshrl.u32 %v12158_v39, 16 }
 0x1da   : > { %9622 = vmatprep.subr.bf16.mxu1 %v10456_v57  ;;  %v1509_v40 = vsel %vm1482_vm9, %v1507_v12, %v1508_v25  ;;  %v12185_v13 = vld [vmem:[#allocation2 + $0x38] ss:$0 sps:$4 sm:$0x11]   ;;  %v12209_v23 = vld [vmem:[#allocation2 + $0x5c] ss:$0 sps:$4 sm:$0x11]  }
 0x1db   : > { %8960 = vmatpush3.bf16.msra.mxu0 %v10444_v7  ;;  %v10463_v7 = vld [vmem:[#allocation7 + $0x230] sm:$0xff]   ;;  %v2012_v55 = vsel %vm1482_vm9, %v2010_v56, %v2011_v8  ;;  %v2015_v35 = vsel %vm1482_vm9, %v2013_v19, %v2014_v9  ;;  %v12177_v56 = vrot.slane %v3241_v61, 1  ;;  %v12191_v9 = vld [vmem:[#allocation2 + $0x48] sm:$0xff]   ;;  %v3265_v4 = vshll.u32 %v12185_v13, 16 }
 0x1dc   : > { %8961 = vmatprep.subr.bf16.mxu0 %v10445_v27  ;;  %v1506_v27 = vsel %vm1482_vm9, %v1504_v26, %v1505_v2  ;;  %v12187_v19 = vld [vmem:[#allocation2 + $0x44] ss:$0 sps:$4 sm:$0x11]   ;;  %v12198_v26 = vld [vmem:[#allocation2 + $0x50] ss:$0 sps:$4 sm:$0x11]  }
 0x1dd   : > { %9623 = vmatpush3.bf16.msra.mxu1 %v10456_v57  ;;  %v10701_v57 = vld [vmem:[#allocation2 + $0x60] sm:$0xff]   ;;  %v3451_v10 = vrot.slane %v12187_v19, 1  ;;  %v3453_v12 = vrot.slane %v12191_v9, 1 }
 0x1de   : > { %9541 = vmatmul.mubr.bf16.gmra.mrb[68].mxu0 %v2006_v5  ;;  %9624 = vmatprep.subr.bf16.mxu1 %v10459_v49  ;;  %v2016_v54 = vrot.slane %v10701_v57, 1  ;;  %v10462_v5 = vld [vmem:[#allocation7 + $0x1b8] sm:$0xff]   ;;  %v3277_v57 = vshll.u32 %v12187_v19, 16 }
 0x1df   : > { %9544 = vmatprep.mubr.bf16.mxu0 %v2009_v22  ;;  %8962 = vmatpush3.bf16.msra.mxu0 %v10446_v29  ;;  %v12165_v22 = vld [vmem:[#allocation2 + $0x30] sm:$0xff]  }
 0x1e0   : > { %9593 = vmatmul.mubr.bf16.gmra.mrb[72].mxu1 %v1500_v44  ;;  %8963 = vmatprep.subr.bf16.mxu0 %v10447_v53  ;;  %v2018_v17 = vsel %vm1482_vm9, %v2016_v54, %v2017_v34  ;;  %v3447_v21 = vrot.slane %v12165_v22, 1  ;;  %v3457_v54 = vrot.slane %v12209_v23, 1  ;;  %v3289_v34 = vshll.u32 %v12198_v26, 16 }
 0x1e1   : > { %9596 = vmatprep.mubr.bf16.mxu1 %v1503_v28  ;;  %9625 = vmatpush3.bf16.msra.mxu1 %v10459_v49  ;;  %v12154_v49 = vld [vmem:[#allocation2 + $0x18] sm:$0xff]   ;;  %v3442_v28 = vrot.slane %v12156_v16, 1 }
 0x1e2   : > { %9626 = vmatprep.subr.bf16.mxu1 %v10460_v30  ;;  %v3236_v29 = vshll.u32 %v12154_v49, 16  ;;  %v3234_v53 = vshrl.u32 %v12154_v49, 16  ;;  %v3441_v44 = vrot.slane %v12154_v49, 1 }
 0x1e3   : > { %8964 = vmatpush3.bf16.msra.mxu0 %v10448_v11  ;;  %v12182_v11 = vld [vmem:[#allocation2 + $0x3c] sm:$0xff]  }
 0x1e4   : > { %8965 = vmatprep.subr.bf16.mxu0 %v10449_v51  ;;  %v3443_v16 = vsel %vm1482_vm9, %v3441_v44, %v3442_v28  ;;  %v12276_v28 = vld [vmem:[#allocation2 + $0xa4] ss:$0 sps:$4 sm:$0x11]  }
 0x1e5   : > { %9627 = vmatpush3.bf16.msra.mxu1 %v10460_v30  ;;  %v12171_v30 = vrot.slane %v3236_v29, 1  ;;  %v12250_v29 = vld [vmem:[#allocation2 + $0x8c] ss:$0 sps:$4 sm:$0x11]  }
 0x1e6   : > { %9545 = vmatmul.mubr.bf16.gmra.mrb[72].mxu0 %v2012_v55  ;;  %9628 = vmatprep.subr.bf16.mxu1 %v10463_v7  ;;  %v3454_v55 = vrot.slane %v12198_v26, 1 }
 0x1e7   : > { %9548 = vmatprep.mubr.bf16.mxu0 %v2015_v35  ;;  %8966 = vmatpush3.bf16.msra.mxu0 %v10450_v58  ;;  %v3456_v58 = vrot.slane %v12201_v62, 1  ;;  %v3272_v35 = vshll.u32 %v12182_v11, 16 }
 0x1e8   : > { %9597 = vmatmul.mubr.bf16.gmra.mrb[76].mxu1 %v1506_v27  ;;  %8967 = vmatprep.subr.bf16.mxu0 %v10453_v60  ;;  %v12219_v60 = vld [vmem:[#allocation2 + $0x68] ss:$0 sps:$4 sm:$0x11]   ;;  %v3270_v27 = vshrl.u32 %v12182_v11, 16 }
 0x1e9   : > { %9600 = vmatprep.mubr.bf16.mxu1 %v1509_v40  ;;  %9629 = vmatpush3.bf16.msra.mxu1 %v10463_v7  ;;  %v12213_v7 = vrot.slane %v3265_v4, 1  ;;  %v12226_v40 = vld [vmem:[#allocation2 + $0x60] sm:$0xff]   ;;  %v12233_v46 = vrot.slane %v3272_v35, 1  ;;  %v3301_v35 = vshll.u32 %v12209_v23, 16 }
 0x1ea   : > { %9630 = vmatprep.subr.bf16.mxu1 %v10464_v37  ;;  %v3308_v44 = vshll.u32 %v12226_v40, 16 }
 0x1eb   : > { %8968 = vmatpush3.bf16.msra.mxu0 %v10454_v32  ;;  %v12237_v32 = vld [vmem:[#allocation2 + $0x78] sm:$0xff]   ;;  %v12278_v4 = vrot.slane %v3301_v35, 1 }
 0x1ec   : > { %8969 = vmatprep.subr.bf16.mxu0 %v10457_v1  ;;  %v12239_v1 = vld [vmem:[#allocation2 + $0x80] ss:$0 sps:$4 sm:$0x11]  }
 0x1ed   : > { %9631 = vmatpush3.bf16.msra.mxu1 %v10464_v37  ;;  %v12231_v37 = vld [vmem:[#allocation2 + $0x74] ss:$0 sps:$4 sm:$0x11]  }
 0x1ee   : > { %9549 = vmatmul.mubr.bf16.gmra.mrb[76].mxu0 %v2018_v17  ;;  %v12243_v17 = vrot.slane %v3277_v57, 1  ;;  %v3463_v61 = vrot.slane %v12231_v37, 1  ;;  %v12268_v57 = vld [vmem:[#allocation2 + $0x90] sm:$0xff]  }
 0x1ef   : > { %9552 = vmatprep.mubr.bf16.mxu0 %v12055_v14  ;;  %8970 = vmatpush3.bf16.msra.mxu0 %v10458_v42  ;;  %v3444_v14 = vrot.slane %v12158_v39, 1  ;;  %v3460_v42 = vrot.slane %v12219_v60, 1 }
 0x1f0   : > { %9601 = vmatmul.mubr.bf16.gmra.mrb[80].mxu1 %v12069_v0  ;;  %8971 = vmatprep.subr.bf16.mxu0 %v10461_v24  ;;  %v12173_v0 = vld [vmem:[#allocation2 + $0x2c] ss:$0 sps:$4 sm:$0x11]  }
 0x1f1   : > { %9604 = vmatprep.mubr.bf16.mxu1 %v12088_v6  ;;  %v3248_v6 = vshll.u32 %v12158_v39, 16  ;;  %v3253_v8 = vshll.u32 %v12173_v0, 16  ;;  %v3445_v47 = vrot.slane %v12173_v0, 1 }
 0x1f3   : > { %8972 = vmatpush3.bf16.msra.mxu0 %v10462_v5  ;;  %v12194_v51 = vrot.slane %v3248_v6, 1  ;;  %v12203_v2 = vrot.slane %v3253_v8, 1  ;;  %v12256_v8 = vrot.slane %v3289_v34, 1  ;;  %v12295_v34 = vld [vmem:[#allocation2 + $0xb0] ss:$0 sps:$4 sm:$0x11]  }
 0x1f4   : > { %9093 = vmatprep.subr.bf16.mxu0 %v10497_v52  ;;  %v10500_v52 = vld [vmem:[#allocation10 + $0x108] sm:$0xff]  }
 0x1f6   : > { %9553 = vmatmul.mubr.bf16.gmra.mrb[80].mxu0 %v12058_v50  ;;  %v3260_v50 = vshll.u32 %v12165_v22, 16 }
 0x1f7   : > { %9556 = vmatprep.mubr.bf16.mxu0 %v12075_v20  ;;  %v3450_v20 = vrot.slane %v12182_v11, 1 }
 0x1f8   : > { %9605 = vmatmul.mubr.bf16.gmra.mrb[84].mxu1 %v12091_v31  ;;  %v3448_v31 = vrot.slane %v12185_v13, 1  ;;  %v12211_v25 = vrot.slane %v3260_v50, 1  ;;  %v3296_v50 = vshll.u32 %v12201_v62, 16 }
 0x1f9   : > { %9608 = vmatprep.mubr.bf16.mxu1 %v12110_v36  ;;  %v3258_v36 = vshrl.u32 %v12165_v22, 16 }
 0x1fa   : > { %v12274_v24 = vrot.slane %v3296_v50, 1  ;;  %v3446_v50 = vsel %vm1482_vm9, %v3444_v14, %v3445_v47  ;;  %v3475_v14 = vrot.slane %v12276_v28, 1  ;;  %v12308_v47 = vrot.slane %v3308_v44, 1 }
 0x1fb   : > { %v3325_v44 = vshll.u32 %v12231_v37, 16  ;;  %v3263_v19 = vor.u32 %v12211_v25, %v3258_v36 }
 0x1fd   : > { %v3268_v26 = vsel %vm1273_vm4, %v3263_v19, %v12213_v7 }
 0x1fe   : > { %9557 = vmatmul.mubr.bf16.gmra.mrb[84].mxu0 %v12078_v59  ;;  %v12229_v59 = vld [vmem:[#allocation2 + $0x6c] sm:$0xff]  }
 0x1ff   : > { %9560 = vmatprep.mubr.bf16.mxu0 %v12102_v33  ;;  %v3284_v33 = vshll.u32 %v12191_v9, 16  ;;  %v3462_v5 = vrot.slane %v12229_v59, 1  ;;  %v3318_v13 = vshrl.u32 %v12229_v59, 16 }
 0x200   : > { %9609 = vmatmul.mubr.bf16.gmra.mrb[88].mxu1 %v12114_v63  ;;  %v12241_v63 = vld [vmem:[#allocation2 + $0x84] sm:$0xff]  }
 0x201   : > { %9612 = vmatprep.mubr.bf16.mxu1 %v12130_v15  ;;  %v3459_v15 = vrot.slane %v12226_v40, 1  ;;  %v12254_v6 = vrot.slane %v3284_v33, 1  ;;  %v12270_v33 = vld [vmem:[#allocation2 + $0x98] ss:$0 sps:$4 sm:$0x11]  }
 0x203   : > { %v3461_v7 = vsel %vm1482_vm9, %v3459_v15, %v3460_v42  ;;  %v14203_v15 = vrot.slane %v12239_v1, 1  ;;  %v14204_v42 = vrot.slane %v12237_v32, 1 }
 0x206   : > { %9561 = vmatmul.mubr.bf16.gmra.mrb[88].mxu0 %v12107_v3  ;;  %v3239_v3 = vor.u32 %v12171_v30, %v3234_v53  ;;  %v3313_v53 = vshll.u32 %v12219_v60, 16  ;;  %v3464_v60 = vsel %vm1482_vm9, %v3462_v5, %v3463_v61 }
 0x207   : > { %9564 = vmatprep.mubr.bf16.mxu0 %v12122_v18  ;;  %v12287_v18 = vld [vmem:[#allocation2 + $0xa8] sm:$0xff]  }
 0x208   : > { %9613 = vmatmul.mubr.bf16.gmra.mrb[92].mxu1 %v12138_v43  ;;  %v12280_v43 = vld [vmem:[#allocation2 + $0x9c] sm:$0xff]   ;;  %v3244_v30 = vsel %vm1273_vm4, %v3239_v3, %v12177_v56  ;;  %v3449_v56 = vsel %vm1482_vm9, %v3447_v21, %v3448_v31  ;;  %v3472_v3 = vrot.slane %v12270_v33, 1  ;;  %v12310_v35 = vrot.slane %v3313_v53, 1 }
 0x209   : > { %9632 = vmatprep.mubr.bf16.mxu1 %v3443_v16  ;;  %v12304_v16 = vld [vmem:[#allocation2 + $0xb4] sm:$0xff]   ;;  %v3477_v21 = vrot.slane %v12287_v18, 1  ;;  %v3478_v31 = vrot.slane %v12295_v34, 1 }
 0x20a   : > { %v3480_v0 = vrot.slane %v12304_v16, 1 }
 0x20e   : > { %9565 = vmatmul.mubr.bf16.gmra.mrb[92].mxu0 %v12127_v41  ;;  %v3251_v41 = vor.u32 %v12194_v51, %v3246_v45  ;;  %v3452_v45 = vsel %vm1482_vm9, %v3450_v20, %v3451_v10  ;;  %v3455_v51 = vsel %vm1482_vm9, %v3453_v12, %v3454_v55  ;;  %v3458_v55 = vsel %vm1482_vm9, %v3456_v58, %v3457_v54  ;;  %v12367_v54 = vld [vmem:[#allocation2 + $0xc8] ss:$0 sps:$4 sm:$0x11]  }
 0x20f   : > { %3730 = vmatprep.mubr.bf16.mxu0 %v3244_v30  ;;  %v3320_v30 = vshll.u32 %v12229_v59, 16  ;;  %v3275_v58 = vor.u32 %v12233_v46, %v3270_v27  ;;  %v3467_v27 = vsel %vm1482_vm9, %v14204_v42, %v14203_v15  ;;  %v14205_v46 = vshrl.u32 %v12191_v9, 16 }
 0x210   : > { %9633 = vmatmul.mubr.bf16.vlgmr.msra.gmra.mrb[64].mxu1 %v3446_v50  ;;  %v3256_v53 = vsel %vm1273_vm4, %v3251_v41, %v12203_v2  ;;  %v12334_v50 = vld [vmem:[#allocation2 + $0xbc] ss:$0 sps:$4 sm:$0x11]   ;;  %v12339_v2 = vld [vmem:[#allocation2 + $0xc0] sm:$0xff]   ;;  %v3484_v37 = vrot.slane %v12367_v54, 1  ;;  %v14209_v15 = vshrl.u32 %v12201_v62, 16 }
 0x211   : > { %9636 = vmatprep.mubr.bf16.mxu1 %v3449_v56  ;;  %v12341_v20 = vrot.slane %v3320_v30, 1  ;;  %v3481_v10 = vrot.slane %v12334_v50, 1  ;;  %v12351_v56 = vrot.slane %v3325_v44, 1  ;;  %v3483_v41 = vrot.slane %v12339_v2, 1 }
 0x212   : > { %v3299_v42 = vor.u32 %v12274_v24, %v14209_v15  ;;  %v14210_v24 = vrot.slane %v12280_v43, 1  ;;  %v3404_v38 = vshll.u32 %v12339_v2, 16 }
 0x216   : > { %3731 = vmatmul.mubr.bf16.vlgmr.msra.gmra.mrb[96].mxu0 %v12154_v49 }
 0x217   : > { %3738 = vmatprep.mubr.bf16.mxu0 %v3256_v53 }
 0x218   : > { %9637 = vmatmul.mubr.bf16.gmra.mrb[68].mxu1 %v3452_v45 }
 0x219   : > { %9640 = vmatprep.mubr.bf16.mxu1 %v3455_v51 }
 0x21c   : > { %v8837_v49 = vpop.f32.mrb[0].mxu1 }
 0x21d   : > { %v8838_v12 = vpop.f32.mrb[1].mxu1 }
 0x21e   : > { %v12353_v36 = vadd.f32 %v8838_v12, %v8837_v49  ;;  %v8840_v25 = vpop.f32.mrb[2].mxu1  ;;  %3739 = vmatmul.mubr.bf16.gmra.mrb[100].mxu0 %v12158_v39  ;;  %v3280_v39 = vsel %vm1273_vm4, %v3275_v58, %v12243_v17  ;;  %v3287_v17 = vor.u32 %v12254_v6, %v14205_v46  ;;  %v14206_v12 = vrot.slane %v12250_v29, 1 }
 0x21f   : > { %v8841_v23 = vpop.f32.mrb[3].mxu1  ;;  %3746 = vmatprep.mubr.bf16.mxu0 %v3268_v26  ;;  %v14207_v6 = vrot.slane %v12241_v63, 1 }
 0x220   : > { %v12362_v30 = vadd.f32 %v8841_v23, %v8840_v25  ;;  %9641 = vmatmul.mubr.bf16.gmra.mrb[72].mxu1 %v3458_v55  ;;  %v3292_v19 = vsel %vm1273_vm4, %v3287_v17, %v12256_v8  ;;  %v3330_v25 = vshrl.u32 %v12237_v32, 16  ;;  %v14208_v8 = vrot.slane %v12268_v57, 1 }
 0x221   : > { %9644 = vmatprep.mubr.bf16.mxu1 %v3461_v7  ;;  %v3470_v55 = vsel %vm1482_vm9, %v14207_v6, %v14206_v12 }
 0x222   : > { %v3473_v58 = vsel %vm1482_vm9, %v14208_v8, %v3472_v3  ;;  %v14211_v8 = vshrl.u32 %v12226_v40, 16 }
 0x226   : > { %3747 = vmatmul.mubr.bf16.gmra.mrb[104].mxu0 %v12165_v22 }
 0x227   : > { %3754 = vmatprep.mubr.bf16.mxu0 %v3280_v39 }
 0x228   : > { %9645 = vmatmul.mubr.bf16.gmra.mrb[76].mxu1 %v3464_v60  ;;  %v12408_v60 = vld [vmem:[#allocation2 + $0xcc] sm:$0xff]  }
 0x229   : > { %v8701_v44 = vpop.f32.mrb[0].mxu0  ;;  %9648 = vmatprep.mubr.bf16.mxu1 %v3467_v27  ;;  %v3486_v12 = vrot.slane %v12408_v60, 1 }
 0x22a   : > { %v8702_v53 = vpop.f32.mrb[1].mxu0  ;;  %v8843_v5 = vpop.f32.mrb[4].mxu1 }
 0x22b   : > { %v8704_v61 = vpop.f32.mrb[2].mxu0  ;;  %v8844_v22 = vpop.f32.mrb[5].mxu1  ;;  %v12386_v45 = vadd.f32 %v8702_v53, %v8701_v44  ;;  %v12414_v53 = vld [vmem:[#allocation2 + $0xd4] ss:$0 sps:$4 sm:$0x11]  }
 0x22c   : > { %v8705_v51 = vpop.f32.mrb[3].mxu0  ;;  %v12390_v49 = vadd.f32 %v8844_v22, %v8843_v5  ;;  %v8846_v26 = vpop.f32.mrb[6].mxu1  ;;  %v3304_v22 = vsel %vm1273_vm4, %v3299_v42, %v12278_v4  ;;  %v3479_v4 = vsel %vm1482_vm9, %v3477_v21, %v3478_v31  ;;  %v3487_v15 = vrot.slane %v12414_v53, 1 }
 0x22d   : > { %v8847_v7 = vpop.f32.mrb[7].mxu1  ;;  %v12398_v23 = vadd.f32 %v8705_v51, %v8704_v61 }
 0x22e   : > { %3755 = vmatmul.mubr.bf16.gmra.mrb[108].mxu0 %v12182_v11  ;;  %v12406_v39 = vadd.f32 %v8847_v7, %v8846_v26  ;;  %v3332_v11 = vshll.u32 %v12237_v32, 16  ;;  %v3476_v26 = vsel %vm1482_vm9, %v14210_v24, %v3475_v14  ;;  %v3311_v14 = vor.u32 %v12308_v47, %v14211_v8 }
 0x22f   : > { %3762 = vmatprep.mubr.bf16.mxu0 %v3292_v19  ;;  %v3482_v47 = vsel %vm1482_vm9, %v3480_v0, %v3481_v10 }
 0x230   : > { %9649 = vmatmul.mubr.bf16.gmra.mrb[80].mxu1 %v3470_v55  ;;  %v3316_v21 = vsel %vm1273_vm4, %v3311_v14, %v12310_v35  ;;  %v3485_v35 = vsel %vm1482_vm9, %v3483_v41, %v3484_v37 }
 0x231   : > { %v8707_v27 = vpop.f32.mrb[4].mxu0  ;;  %9652 = vmatprep.mubr.bf16.mxu1 %v3473_v58 }
 0x232   : > { %v8708_v46 = vpop.f32.mrb[5].mxu0  ;;  %v8849_v17 = vpop.f32.mrb[8].mxu1 }
 0x233   : > { %v8710_v44 = vpop.f32.mrb[6].mxu0  ;;  %v8850_v3 = vpop.f32.mrb[9].mxu1  ;;  %v12416_v5 = vadd.f32 %v8708_v46, %v8707_v27 }
 0x234   : > { %v8711_v61 = vpop.f32.mrb[7].mxu0  ;;  %v12420_v51 = vadd.f32 %v8850_v3, %v8849_v17  ;;  %v8852_v19 = vpop.f32.mrb[10].mxu1 }
 0x235   : > { %v8853_v6 = vpop.f32.mrb[11].mxu1  ;;  %v12428_v55 = vadd.f32 %v8711_v61, %v8710_v44  ;;  %v3337_v61 = vshll.u32 %v12239_v1, 16  ;;  %v3334_v1 = vrot.slane %v3332_v11, 1 }
 0x236   : > { %3763 = vmatmul.mubr.bf16.gmra.mrb[112].mxu0 %v12191_v9  ;;  %v12436_v7 = vadd.f32 %v8853_v6, %v8852_v19 }
 0x237   : > { %3770 = vmatprep.mubr.bf16.mxu0 %v3304_v22  ;;  %v3335_v11 = vor.u32 %v3334_v1, %v3330_v25 }
 0x238   : > { %9653 = vmatmul.mubr.bf16.gmra.mrb[84].mxu1 %v3476_v26  ;;  %v3323_v26 = vor.u32 %v12341_v20, %v3318_v13 }
 0x239   : > { %v8713_v58 = vpop.f32.mrb[8].mxu0  ;;  %9656 = vmatprep.mubr.bf16.mxu1 %v3479_v4 }
 0x23a   : > { %v8714_v42 = vpop.f32.mrb[9].mxu0  ;;  %v8855_v9 = vpop.f32.mrb[12].mxu1  ;;  %v3328_v41 = vsel %vm1273_vm4, %v3323_v26, %v12351_v56  ;;  %v3344_v56 = vshll.u32 %v12241_v63, 16  ;;  %v3349_v26 = vshll.u32 %v12250_v29, 16  ;;  %v3354_v29 = vshrl.u32 %v12268_v57, 16 }
 0x23b   : > { %v8716_v27 = vpop.f32.mrb[10].mxu0  ;;  %v8856_v46 = vpop.f32.mrb[13].mxu1  ;;  %v12442_v17 = vadd.f32 %v8714_v42, %v8713_v58  ;;  %v3488_v42 = vsel %vm1482_vm9, %v3486_v12, %v3487_v15  ;;  %v3342_v12 = vshrl.u32 %v12241_v63, 16 }
 0x23c   : > { %v8717_v44 = vpop.f32.mrb[11].mxu0  ;;  %v12446_v31 = vadd.f32 %v8856_v46, %v8855_v9  ;;  %v8858_v3 = vpop.f32.mrb[14].mxu1 }
 0x23d   : > { %v8859_v22 = vpop.f32.mrb[15].mxu1  ;;  %v12454_v19 = vadd.f32 %v8717_v44, %v8716_v27  ;;  %v3339_v27 = vrot.slane %v3337_v61, 1 }
 0x23e   : > { %3771 = vmatmul.mubr.bf16.gmra.mrb[116].mxu0 %v12201_v62  ;;  %v12460_v24 = vadd.f32 %v8859_v22, %v8858_v3 }
 0x23f   : > { %3778 = vmatprep.mubr.bf16.mxu0 %v3316_v21  ;;  %v3340_v22 = vsel %vm1273_vm4, %v3335_v11, %v3339_v27 }
 0x240   : > { %9657 = vmatmul.mubr.bf16.gmra.mrb[88].mxu1 %v3482_v47 }
 0x241   : > { %v8719_v0 = vpop.f32.mrb[12].mxu0  ;;  %9660 = vmatprep.mubr.bf16.mxu1 %v3485_v35  ;;  %v3346_v35 = vrot.slane %v3344_v56, 1 }
 0x242   : > { %v8720_v10 = vpop.f32.mrb[13].mxu0  ;;  %v8861_v6 = vpop.f32.mrb[16].mxu1 }
 0x243   : > { %v8722_v4 = vpop.f32.mrb[14].mxu0  ;;  %v8862_v8 = vpop.f32.mrb[17].mxu1  ;;  %v12465_v62 = vadd.f32 %v8720_v10, %v8719_v0 }
 0x244   : > { %v8723_v14 = vpop.f32.mrb[15].mxu0  ;;  %v12469_v37 = vadd.f32 %v8862_v8, %v8861_v6  ;;  %v8864_v58 = vpop.f32.mrb[18].mxu1  ;;  %v3347_v6 = vor.u32 %v3346_v35, %v3342_v12  ;;  %v3356_v8 = vshll.u32 %v12268_v57, 16  ;;  %v3368_v35 = vshll.u32 %v12280_v43, 16 }
 0x245   : > { %v8865_v9 = vpop.f32.mrb[19].mxu1  ;;  %v12472_v13 = vadd.f32 %v8723_v14, %v8722_v4  ;;  %v3351_v4 = vrot.slane %v3349_v26, 1 }
 0x246   : > { %3779 = vmatmul.mubr.bf16.gmra.mrb[120].mxu0 %v12226_v40  ;;  %v12475_v20 = vadd.f32 %v8865_v9, %v8864_v58 }
 0x247   : > { %3786 = vmatprep.mubr.bf16.mxu0 %v3328_v41  ;;  %v3352_v56 = vsel %vm1273_vm4, %v3347_v6, %v3351_v4 }
 0x248   : > { %9661 = vmatmul.mubr.bf16.gmra.mrb[92].mxu1 %v3488_v42 }
 0x249   : > { %v8725_v46 = vpop.f32.mrb[16].mxu0 }
 0x24a   : > { %v8726_v44 = vpop.f32.mrb[17].mxu0  ;;  %v8867_v21 = vpop.f32.mrb[20].mxu1 }
 0x24b   : > { %v8728_v3 = vpop.f32.mrb[18].mxu0  ;;  %v8868_v15 = vpop.f32.mrb[21].mxu1  ;;  %v12481_v47 = vadd.f32 %v8726_v44, %v8725_v46  ;;  %v3361_v46 = vshll.u32 %v12270_v33, 16  ;;  %v3366_v33 = vshrl.u32 %v12280_v43, 16 }
 0x24c   : > { %v8729_v40 = vpop.f32.mrb[19].mxu0  ;;  %v12485_v0 = vadd.f32 %v8868_v15, %v8867_v21  ;;  %v8870_v25 = vpop.f32.mrb[22].mxu1 }
 0x24d   : > { %v8871_v61 = vpop.f32.mrb[23].mxu1  ;;  %v12487_v1 = vadd.f32 %v8729_v40, %v8728_v3 }
 0x24e   : > { %3787 = vmatmul.mubr.bf16.gmra.mrb[124].mxu0 %v12229_v59  ;;  %v12490_v10 = vadd.f32 %v8871_v61, %v8870_v25  ;;  %v3358_v59 = vrot.slane %v3356_v8, 1 }
 0x24f   : > { %3794 = vmatprep.mubr.bf16.mxu0 %v3340_v22  ;;  %v3363_v22 = vrot.slane %v3361_v46, 1 }
 0x250   : > { %v3359_v40 = vor.u32 %v3358_v59, %v3354_v29 }
 0x251   : > { %v8731_v14 = vpop.f32.mrb[20].mxu0 }
 0x252   : > { %v8732_v41 = vpop.f32.mrb[21].mxu0  ;;  %v8873_v58 = vpop.f32.mrb[24].mxu1 }
 0x253   : > { %v8734_v42 = vpop.f32.mrb[22].mxu0  ;;  %v8874_v9 = vpop.f32.mrb[25].mxu1  ;;  %v12494_v11 = vadd.f32 %v8732_v41, %v8731_v14  ;;  %v3364_v41 = vsel %vm1273_vm4, %v3359_v40, %v3363_v22 }
 0x254   : > { %v8735_v27 = vpop.f32.mrb[23].mxu0  ;;  %v12498_v44 = vadd.f32 %v8874_v9, %v8873_v58  ;;  %v8876_v21 = vpop.f32.mrb[26].mxu1  ;;  %v3373_v58 = vshll.u32 %v12276_v28, 16  ;;  %v3378_v28 = vshrl.u32 %v12287_v18, 16 }
 0x255   : > { %v8877_v3 = vpop.f32.mrb[27].mxu1  ;;  %v12500_v12 = vadd.f32 %v8735_v27, %v8734_v42 }
 0x256   : > { %3795 = vmatmul.mubr.bf16.gmra.mrb[128].mxu0 %v12237_v32  ;;  %v12503_v15 = vadd.f32 %v8877_v3, %v8876_v21  ;;  %v3370_v32 = vrot.slane %v3368_v35, 1  ;;  %v3375_v46 = vrot.slane %v3373_v58, 1  ;;  %v3380_v21 = vshll.u32 %v12287_v18, 16 }
 0x257   : > { %3802 = vmatprep.mubr.bf16.mxu0 %v3352_v56 }
 0x258   : > { %v3371_v59 = vor.u32 %v3370_v32, %v3366_v33 }
 0x259   : > { %v8737_v26 = vpop.f32.mrb[24].mxu0 }
 0x25a   : > { %v8738_v25 = vpop.f32.mrb[25].mxu0  ;;  %v8879_v61 = vpop.f32.mrb[28].mxu1 }
 0x25b   : > { %v8740_v6 = vpop.f32.mrb[26].mxu0  ;;  %v8880_v4 = vpop.f32.mrb[29].mxu1  ;;  %v12507_v8 = vadd.f32 %v8738_v25, %v8737_v26 }
 0x25c   : > { %v8741_v14 = vpop.f32.mrb[27].mxu0  ;;  %v12511_v42 = vadd.f32 %v8880_v4, %v8879_v61  ;;  %v8882_v29 = vpop.f32.mrb[30].mxu1  ;;  %v3385_v4 = vshll.u32 %v12295_v34, 16  ;;  %v3390_v34 = vshrl.u32 %v12304_v16, 16 }
 0x25d   : > { %v8883_v9 = vpop.f32.mrb[31].mxu1  ;;  %v12513_v27 = vadd.f32 %v8741_v14, %v8740_v6  ;;  %v3376_v6 = vsel %vm1273_vm4, %v3371_v59, %v3375_v46 }
 0x25e   : > { %3803 = vmatmul.mubr.bf16.gmra.mrb[132].mxu0 %v12241_v63  ;;  %v12516_v56 = vadd.f32 %v8883_v9, %v8882_v29  ;;  %v3382_v63 = vrot.slane %v3380_v21, 1  ;;  %v3387_v9 = vrot.slane %v3385_v4, 1 }
 0x25f   : > { %3810 = vmatprep.mubr.bf16.mxu0 %v3364_v41 }
 0x260   : > { %v3383_v29 = vor.u32 %v3382_v63, %v3378_v28 }
 0x261   : > { %v8743_v3 = vpop.f32.mrb[28].mxu0 }
 0x262   : > { %v8744_v40 = vpop.f32.mrb[29].mxu0  ;;  %v8885_v22 = vpop.f32.mrb[32].mxu1 }
 0x263   : > { %v8746_v35 = vpop.f32.mrb[30].mxu0  ;;  %v8886_v26 = vpop.f32.mrb[33].mxu1  ;;  %v12520_v25 = vadd.f32 %v8744_v40, %v8743_v3  ;;  %v3392_v3 = vshll.u32 %v12304_v16, 16 }
 0x264   : > { %v8747_v61 = vpop.f32.mrb[31].mxu0  ;;  %v12524_v14 = vadd.f32 %v8886_v26, %v8885_v22  ;;  %v8888_v33 = vpop.f32.mrb[34].mxu1 }
 0x265   : > { %v8889_v41 = vpop.f32.mrb[35].mxu1  ;;  %v12526_v32 = vadd.f32 %v8747_v61, %v8746_v35  ;;  %v3388_v61 = vsel %vm1273_vm4, %v3383_v29, %v3387_v9  ;;  %v10498_v29 = vld [vmem:[#allocation10 + $0xc0] sm:$0xff]  }
 0x266   : > { %3811 = vmatmul.mubr.bf16.gmra.mrb[136].mxu0 %v12268_v57  ;;  %v12529_v58 = vadd.f32 %v8889_v41, %v8888_v33  ;;  %v3394_v57 = vrot.slane %v3392_v3, 1  ;;  %v3397_v33 = vshll.u32 %v12334_v50, 16 }
 0x267   : > { %3818 = vmatprep.mubr.bf16.mxu0 %v3376_v6  ;;  %9094 = vmatpush3.bf16.msra.mxu0 %v10498_v29 }
 0x268   : > { %14212 = vst [vmem:[#allocation29_spill] sm:$0xff] %v12529_v58  ;;  %9095 = vmatprep.subr.bf16.mxu0 %v10500_v52 }
 0x269   : > { %v8749_v40 = vpop.f32.mrb[32].mxu0 }
 0x26a   : > { %v8750_v59 = vpop.f32.mrb[33].mxu0  ;;  %v8891_v46 = vpop.f32.mrb[36].mxu1 }
 0x26b   : > { %v8752_v21 = vpop.f32.mrb[34].mxu0  ;;  %v8892_v22 = vpop.f32.mrb[37].mxu1  ;;  %v12533_v26 = vadd.f32 %v8750_v59, %v8749_v40  ;;  %v3395_v40 = vor.u32 %v3394_v57, %v3390_v34  ;;  %v3399_v59 = vrot.slane %v3397_v33, 1  ;;  %v3406_v34 = vrot.slane %v3404_v38, 1 }
 0x26c   : > { %v8753_v35 = vpop.f32.mrb[35].mxu0  ;;  %v12537_v6 = vadd.f32 %v8892_v22, %v8891_v46  ;;  %v8894_v28 = vpop.f32.mrb[38].mxu1  ;;  %v3402_v22 = vshrl.u32 %v12339_v2, 16  ;;  %v3409_v57 = vshll.u32 %v12367_v54, 16  ;;  %v3416_v54 = vshll.u32 %v12408_v60, 16 }
 0x26d   : > { %v12539_v63 = vadd.f32 %v8753_v35, %v8752_v21  ;;  %v8895_v4 = vpop.f32.mrb[39].mxu1  ;;  %v10499_v35 = vld [vmem:[#allocation10 + $0x140] sm:$0xff]  }
 0x26e   : > { %3819 = vmatmul.mubr.bf16.gmra.mrb[140].mxu0 %v12280_v43  ;;  %v12542_v41 = vadd.f32 %v8895_v4, %v8894_v28  ;;  %9664 = vmatprep.subr.bf16.mxu1 %v10499_v35  ;;  %v3407_v38 = vor.u32 %v3406_v34, %v3402_v22  ;;  %v3418_v34 = vrot.slane %v3416_v54, 1  ;;  %v10509_v54 = vld [vmem:[#allocation10 + $0x120] sm:$0xff]  }
 0x26f   : > { %3826 = vmatprep.mubr.bf16.mxu0 %v3388_v61  ;;  %v3400_v61 = vsel %vm1273_vm4, %v3395_v40, %v3399_v59  ;;  %9665 = vmatpush3.bf16.msra.mxu1 %v10499_v35  ;;  %v10502_v40 = vld [vmem:[#allocation10 + $0x148] sm:$0xff]   ;;  %v3411_v59 = vrot.slane %v3409_v57, 1  ;;  %v3421_v57 = vshll.u32 %v12414_v53, 16  ;;  %v10508_v53 = vld [vmem:[#allocation10 + $0x158] sm:$0xff]  }
 0x270   : > { %9666 = vmatprep.subr.bf16.mxu1 %v10502_v40 }
 0x271   : > { %v8755_v9 = vpop.f32.mrb[36].mxu0  ;;  %v3412_v22 = vsel %vm1273_vm4, %v3407_v38, %v3411_v59  ;;  %v3423_v59 = vrot.slane %v3421_v57, 1 }
 0x272   : > { %v8756_v50 = vpop.f32.mrb[37].mxu0  ;;  %v8897_v3 = vpop.f32.mrb[40].mxu1 }
 0x273   : > { %v12545_v46 = vadd.f32 %v8756_v50, %v8755_v9  ;;  %v8758_v21 = vpop.f32.mrb[38].mxu0  ;;  %v8898_v43 = vpop.f32.mrb[41].mxu1  ;;  %v10501_v9 = vld [vmem:[#allocation10 + $0xc8] sm:$0xff]   ;;  %9667 = vmatpush3.bf16.msra.mxu1 %v10502_v40  ;;  %v10507_v40 = vld [vmem:[#allocation10 + $0xd8] sm:$0xff]  }
 0x274   : > { %v8759_v28 = vpop.f32.mrb[39].mxu0  ;;  %v12550_v33 = vadd.f32 %v8898_v43, %v8897_v3  ;;  %v8900_v4 = vpop.f32.mrb[42].mxu1  ;;  %9096 = vmatpush3.bf16.msra.mxu0 %v10501_v9  ;;  %v10503_v3 = vld [vmem:[#allocation10 + $0x110] sm:$0xff]  }
 0x275   : > { %v12552_v48 = vadd.f32 %v8759_v28, %v8758_v21  ;;  %v8901_v29 = vpop.f32.mrb[43].mxu1  ;;  %v10504_v21 = vld [vmem:[#allocation10 + $0xd0] sm:$0xff]   ;;  %9097 = vmatprep.subr.bf16.mxu0 %v10503_v3 }
 0x276   : > { %14213 = vst [vmem:[#allocation30_spill] sm:$0xff] %v12550_v33  ;;  %3827 = vmatmul.mubr.bf16.gmra.mrb[144].mxu0 %v12287_v18  ;;  %v12555_v50 = vadd.f32 %v8901_v29, %v8900_v4  ;;  %v3414_v4 = vshrl.u32 %v12408_v60, 16  ;;  %v10505_v9 = vld [vmem:[#allocation10 + $0x150] sm:$0xff]  }
 0x277   : > { %3834 = vmatprep.mubr.bf16.mxu0 %v3400_v61  ;;  %9668 = vmatprep.subr.bf16.mxu1 %v10505_v9 }
 0x278   : > { %14214 = vst [vmem:[#allocation31_spill] sm:$0xff] %v12555_v50  ;;  %9098 = vmatpush3.bf16.msra.mxu0 %v10504_v21  ;;  %v3419_v38 = vor.u32 %v3418_v34, %v3414_v4  ;;  %9669 = vmatpush3.bf16.msra.mxu1 %v10505_v9  ;;  %v10511_v34 = vld [vmem:[#allocation10 + $0x160] sm:$0xff]  }
 0x279   : > { %v8761_v43 = vpop.f32.mrb[40].mxu0  ;;  %9670 = vmatprep.subr.bf16.mxu1 %v10508_v53 }
 0x27a   : > { %v8762_v28 = vpop.f32.mrb[41].mxu0  ;;  %v8903_v33 = vpop.f32.mrb[44].mxu1 }
 0x27b   : > { %v12558_v58 = vadd.f32 %v8762_v28, %v8761_v43  ;;  %v8764_v18 = vpop.f32.mrb[42].mxu0  ;;  %v8904_v61 = vpop.f32.mrb[45].mxu1  ;;  %v10506_v43 = vld [vmem:[#allocation10 + $0x118] sm:$0xff]  }
 0x27c   : > { %v8765_v35 = vpop.f32.mrb[43].mxu0  ;;  %v12563_v52 = vadd.f32 %v8904_v61, %v8903_v33  ;;  %v8906_v29 = vpop.f32.mrb[46].mxu1  ;;  %9099 = vmatprep.subr.bf16.mxu0 %v10506_v43  ;;  %v10510_v61 = vld [vmem:[#allocation10 + $0xe0] sm:$0xff]   ;;  %9671 = vmatpush3.bf16.msra.mxu1 %v10508_v53 }
 0x27d   : > { %v12565_v50 = vadd.f32 %v8765_v35, %v8764_v18  ;;  %v8907_v3 = vpop.f32.mrb[47].mxu1  ;;  %9100 = vmatpush3.bf16.msra.mxu0 %v10507_v40  ;;  %v10512_v40 = vld [vmem:[#allocation10 + $0x128] sm:$0xff]   ;;  %9672 = vmatprep.subr.bf16.mxu1 %v10511_v34 }
 0x27e   : > { %3835 = vmatmul.mubr.bf16.gmra.mrb[148].mxu0 %v12304_v16  ;;  %v12568_v28 = vadd.f32 %v8907_v3, %v8906_v29  ;;  %9101 = vmatprep.subr.bf16.mxu0 %v10509_v54  ;;  %v10515_v54 = vld [vmem:[#allocation10 + $0x130] sm:$0xff]  }
 0x27f   : > { %3842 = vmatprep.mubr.bf16.mxu0 %v3412_v22  ;;  %v3424_v22 = vsel %vm1273_vm4, %v3419_v38, %v3423_v59  ;;  %v10514_v38 = vld [vmem:[#allocation10 + $0x168] sm:$0xff]  }
 0x280   : > { %9673 = vmatpush3.bf16.msra.mxu1 %v10511_v34 }
 0x281   : > { %v8767_v33 = vpop.f32.mrb[44].mxu0  ;;  %9102 = vmatpush3.bf16.msra.mxu0 %v10510_v61  ;;  %9674 = vmatprep.subr.bf16.mxu1 %v10514_v38  ;;  %v10516_v61 = vld [vmem:[#allocation10 + $0xf0] sm:$0xff]  }
 0x282   : > { %v8768_v21 = vpop.f32.mrb[45].mxu0  ;;  %v8909_v18 = vpop.f32.mrb[48].mxu1  ;;  %9103 = vmatprep.subr.bf16.mxu0 %v10512_v40 }
 0x283   : > { %v12570_v35 = vadd.f32 %v8768_v21, %v8767_v33  ;;  %v8770_v16 = vpop.f32.mrb[46].mxu0  ;;  %v8910_v29 = vpop.f32.mrb[49].mxu1  ;;  %v10513_v21 = vld [vmem:[#allocation10 + $0xe8] sm:$0xff]  }
 0x284   : > { %v8771_v3 = vpop.f32.mrb[47].mxu0  ;;  %v12573_v43 = vadd.f32 %v8910_v29, %v8909_v18  ;;  %v8912_v4 = vpop.f32.mrb[50].mxu1  ;;  %9675 = vmatpush3.bf16.msra.mxu1 %v10514_v38 }
 0x285   : > { %v12575_v57 = vadd.f32 %v8771_v3, %v8770_v16  ;;  %v8913_v9 = vpop.f32.mrb[51].mxu1  ;;  %9104 = vmatpush3.bf16.msra.mxu0 %v10513_v21  ;;  %v10520_v21 = vld [vmem:[#allocation10 + $0x138] sm:$0xff]  }
 0x286   : > { %14215 = vst [vmem:[#allocation32_spill] sm:$0xff] %v12573_v43  ;;  %3843 = vmatmul.mubr.bf16.gmra.mrb[152].mxu0 %v12339_v2  ;;  %v12578_v33 = vadd.f32 %v8913_v9, %v8912_v4  ;;  %9105 = vmatprep.subr.bf16.mxu0 %v10515_v54  ;;  %v10522_v43 = vld [vmem:[#allocation10 + $0x178] sm:$0xff]  }
 0x287   : > { %3850 = vmatprep.mubr.bf16.mxu0 %v3424_v22  ;;  %v10517_v22 = vld [vmem:[#allocation10 + $0x170] sm:$0xff]  }
 0x288   : > { %14216 = vst [vmem:[#allocation33_spill] sm:$0xff] %v12578_v33  ;;  %9676 = vmatprep.subr.bf16.mxu1 %v10517_v22 }
 0x289   : > { %v8773_v59 = vpop.f32.mrb[48].mxu0  ;;  %9106 = vmatpush3.bf16.msra.mxu0 %v10516_v61  ;;  %9677 = vmatpush3.bf16.msra.mxu1 %v10517_v22 }
 0x28a   : > { %v8774_v53 = vpop.f32.mrb[49].mxu0  ;;  %v8915_v18 = vpop.f32.mrb[52].mxu1  ;;  %9107 = vmatprep.subr.bf16.mxu0 %v10520_v21  ;;  %9678 = vmatprep.subr.bf16.mxu1 %v10522_v43 }
 0x28b   : > { %v12580_v16 = vadd.f32 %v8774_v53, %v8773_v59  ;;  %v8776_v29 = vpop.f32.mrb[50].mxu0  ;;  %v8916_v3 = vpop.f32.mrb[53].mxu1  ;;  %v10521_v59 = vld [vmem:[#allocation10 + $0xf8] sm:$0xff]  }
 0x28c   : > { %v8777_v2 = vpop.f32.mrb[51].mxu0  ;;  %v12582_v4 = vadd.f32 %v8916_v3, %v8915_v18  ;;  %v8918_v9 = vpop.f32.mrb[54].mxu1 }
 0x28d   : > { %14217 = vst [vmem:[#allocation34_spill] sm:$0xff] %v12580_v16  ;;  %v12584_v34 = vadd.f32 %v8777_v2, %v8776_v29  ;;  %v8919_v40 = vpop.f32.mrb[55].mxu1  ;;  %9108 = vmatpush3.bf16.msra.mxu0 %v10521_v59  ;;  %9679 = vmatpush3.bf16.msra.mxu1 %v10522_v43 }
 0x28e   : > { %14218 = vst [vmem:[#allocation35_spill] sm:$0xff] %v12582_v4  ;;  %3851 = vmatmul.mubr.bf16.gmra.mrb[156].mxu0 %v12408_v60  ;;  %v12587_v33 = vadd.f32 %v8919_v40, %v8918_v9 }
 0x28f   : > { %14219 = vst [vmem:[#allocation36_spill] sm:$0xff] %v12584_v34 }
 0x290   : > { %14220 = vst [vmem:[#allocation37_spill] sm:$0xff] %v12587_v33 }
 0x291   : > { %v8779_v54 = vpop.f32.mrb[52].mxu0 }
 0x292   : > { %v8780_v53 = vpop.f32.mrb[53].mxu0  ;;  %v8921_v18 = vpop.f32.mrb[56].mxu1 }
 0x293   : > { %v12589_v3 = vadd.f32 %v8780_v53, %v8779_v54  ;;  %v8782_v38 = vpop.f32.mrb[54].mxu0  ;;  %v8922_v61 = vpop.f32.mrb[57].mxu1 }
 0x294   : > { %v8783_v29 = vpop.f32.mrb[55].mxu0  ;;  %v12591_v2 = vadd.f32 %v8922_v61, %v8921_v18  ;;  %v8924_v34 = vpop.f32.mrb[58].mxu1 }
 0x295   : > { %v12593_v60 = vadd.f32 %v8783_v29, %v8782_v38  ;;  %v8925_v9 = vpop.f32.mrb[59].mxu1 }
 0x296   : > { %14221 = vst [vmem:[#allocation38_spill] sm:$0xff] %v12591_v2  ;;  %v12595_v40 = vadd.f32 %v8925_v9, %v8924_v34 }
 0x297   : > { %14222 = vst [vmem:[#allocation39_spill] sm:$0xff] %v12593_v60 }
 0x298   : > { %14223 = vst [vmem:[#allocation40_spill] sm:$0xff] %v12595_v40 }
 0x299   : > { %v8785_v22 = vpop.f32.mrb[56].mxu0 }
 0x29a   : > { %v8786_v21 = vpop.f32.mrb[57].mxu0  ;;  %v8927_v59 = vpop.f32.mrb[60].mxu1 }
 0x29b   : > { %v12597_v33 = vadd.f32 %v8786_v21, %v8785_v22  ;;  %v8788_v54 = vpop.f32.mrb[58].mxu0  ;;  %v8928_v53 = vpop.f32.mrb[61].mxu1 }
 0x29c   : > { %v8789_v4 = vpop.f32.mrb[59].mxu0  ;;  %v12599_v16 = vadd.f32 %v8928_v53, %v8927_v59  ;;  %v8930_v18 = vpop.f32.mrb[62].mxu1 }
 0x29d   : > { %14224 = vst [vmem:[#allocation41_spill] sm:$0xff] %v12597_v33  ;;  %v12601_v61 = vadd.f32 %v8789_v4, %v8788_v54  ;;  %v8931_v38 = vpop.f32.mrb[63].mxu1 }
 0x29e   : > { %v12603_v29 = vadd.f32 %v8931_v38, %v8930_v18 }
 0x2a1   : > { %v8791_v34 = vpop.f32.mrb[60].mxu0 }
 0x2a2   : > { %v8792_v9 = vpop.f32.mrb[61].mxu0 }
 0x2a3   : > { %v12605_v40 = vadd.f32 %v8792_v9, %v8791_v34  ;;  %v8794_v43 = vpop.f32.mrb[62].mxu0 }
 0x2a4   : > { %v8795_v2 = vpop.f32.mrb[63].mxu0 }
 0x2a5   : > { %v12607_v60 = vadd.f32 %v8795_v2, %v8794_v43 }
 0x2a9   : > { %v9538_v22 = vpop.f32.mrb[64].mxu0 }
 0x2aa   : > { %v2456_v21 = vadd.f32 %v9538_v22, %v12416_v5  ;;  %v2447_v33 = vpop.f32.mrb[65].mxu0 }
 0x2ab   : > { %v2448_v59 = vadd.f32 %v12386_v45, %v2447_v33  ;;  %v9539_v53 = vpop.f32.mrb[66].mxu0 }
 0x2ac   : > { %v12612_v4 = vadd.f32 %v12390_v49, %v2456_v21  ;;  %v2459_v54 = vadd.f32 %v9539_v53, %v12428_v55  ;;  %v2450_v18 = vpop.f32.mrb[67].mxu0 }
 0x2ad   : > { %v12616_v38 = vadd.f32 %v12353_v36, %v2448_v59  ;;  %v2451_v34 = vadd.f32 %v12398_v23, %v2450_v18 }
 0x2ae   : > { %v12620_v2 = vadd.f32 %v12406_v39, %v2459_v54 }
 0x2af   : > { %v12623_v5 = vadd.f32 %v12362_v30, %v2451_v34 }
 0x2b1   : > { %v9542_v9 = vpop.f32.mrb[68].mxu0 }
 0x2b2   : > { %v2472_v45 = vadd.f32 %v9542_v9, %v12465_v62  ;;  %v2463_v33 = vpop.f32.mrb[69].mxu0 }
 0x2b3   : > { %v2464_v49 = vadd.f32 %v12442_v17, %v2463_v33  ;;  %v9543_v43 = vpop.f32.mrb[70].mxu0 }
 0x2b4   : > { %v12628_v55 = vadd.f32 %v12446_v31, %v2472_v45  ;;  %v2475_v36 = vadd.f32 %v9543_v43, %v12472_v13  ;;  %v2466_v22 = vpop.f32.mrb[71].mxu0 }
 0x2b5   : > { %v12632_v23 = vadd.f32 %v12420_v51, %v2464_v49  ;;  %v2467_v39 = vadd.f32 %v12454_v19, %v2466_v22  ;;  %v14225_v22 = vld [vmem:[#allocation29_spill] sm:$0xff] }
 0x2b6   : > { %v12636_v30 = vadd.f32 %v12460_v24, %v2475_v36 }
 0x2b7   : > { %v12639_v62 = vadd.f32 %v12436_v7, %v2467_v39 }
 0x2b9   : > { %v9546_v21 = vpop.f32.mrb[72].mxu0 }
 0x2ba   : > { %v2488_v17 = vadd.f32 %v9546_v21, %v12494_v11  ;;  %v2479_v59 = vpop.f32.mrb[73].mxu0 }
 0x2bb   : > { %v2480_v31 = vadd.f32 %v12481_v47, %v2479_v59  ;;  %v9547_v53 = vpop.f32.mrb[74].mxu0 }
 0x2bc   : > { %v12644_v13 = vadd.f32 %v12485_v0, %v2488_v17  ;;  %v2491_v51 = vadd.f32 %v9547_v53, %v12500_v12  ;;  %v2482_v54 = vpop.f32.mrb[75].mxu0 }
 0x2bd   : > { %v12648_v19 = vadd.f32 %v12469_v37, %v2480_v31  ;;  %v2483_v24 = vadd.f32 %v12487_v1, %v2482_v54 }
 0x2be   : > { %v12652_v7 = vadd.f32 %v12490_v10, %v2491_v51  ;;  %v14227_v51 = vld [vmem:[#allocation31_spill] sm:$0xff] }
 0x2bf   : > { %v12655_v11 = vadd.f32 %v12475_v20, %v2483_v24 }
 0x2c1   : > { %v9550_v18 = vpop.f32.mrb[76].mxu0 }
 0x2c2   : > { %v2504_v47 = vadd.f32 %v9550_v18, %v12520_v25  ;;  %v2495_v34 = vpop.f32.mrb[77].mxu0 }
 0x2c3   : > { %v2496_v0 = vadd.f32 %v12507_v8, %v2495_v34  ;;  %v9551_v9 = vpop.f32.mrb[78].mxu0 }
 0x2c4   : > { %v12660_v12 = vadd.f32 %v12511_v42, %v2504_v47  ;;  %v2507_v37 = vadd.f32 %v9551_v9, %v12526_v32  ;;  %v2498_v45 = vpop.f32.mrb[79].mxu0 }
 0x2c5   : > { %v12664_v1 = vadd.f32 %v12498_v44, %v2496_v0  ;;  %v2499_v10 = vadd.f32 %v12513_v27, %v2498_v45  ;;  %v14231_v0 = vld [vmem:[#allocation39_spill] sm:$0xff] }
 0x2c6   : > { %v12668_v20 = vadd.f32 %v12516_v56, %v2507_v37 }
 0x2c7   : > { %v12671_v25 = vadd.f32 %v12503_v15, %v2499_v10 }
 0x2c9   : > { %v9554_v33 = vpop.f32.mrb[80].mxu0 }
 0x2ca   : > { %v2520_v8 = vadd.f32 %v9554_v33, %v12545_v46  ;;  %v2511_v49 = vpop.f32.mrb[81].mxu0  ;;  %v14235_v33 = vld [vmem:[#allocation37_spill] sm:$0xff] }
 0x2cb   : > { %v2512_v42 = vadd.f32 %v12533_v26, %v2511_v49  ;;  %v9555_v43 = vpop.f32.mrb[82].mxu0  ;;  %v14237_v49 = vld [vmem:[#allocation33_spill] sm:$0xff] }
 0x2cc   : > { %v12676_v32 = vadd.f32 %v12537_v6, %v2520_v8  ;;  %v2523_v44 = vadd.f32 %v9555_v43, %v12552_v48  ;;  %v2514_v36 = vpop.f32.mrb[83].mxu0 }
 0x2cd   : > { %v12680_v27 = vadd.f32 %v12524_v14, %v2512_v42  ;;  %v2515_v56 = vadd.f32 %v12539_v63, %v2514_v36  ;;  %v14226_v63 = vld [vmem:[#allocation30_spill] sm:$0xff]  ;;  %v14239_v36 = vld [vmem:[#allocation41_spill] sm:$0xff] }
 0x2ce   : > { %v12684_v15 = vadd.f32 %v12542_v41, %v2523_v44 }
 0x2cf   : > { %v12687_v46 = vadd.f32 %v14225_v22, %v2515_v56 }
 0x2d1   : > { %v9558_v39 = vpop.f32.mrb[84].mxu0 }
 0x2d2   : > { %v2536_v26 = vadd.f32 %v9558_v39, %v12570_v35  ;;  %v2527_v21 = vpop.f32.mrb[85].mxu0 }
 0x2d3   : > { %v2528_v6 = vadd.f32 %v12558_v58, %v2527_v21  ;;  %v9559_v17 = vpop.f32.mrb[86].mxu0 }
 0x2d4   : > { %v12692_v48 = vadd.f32 %v12563_v52, %v2536_v26  ;;  %v2539_v14 = vadd.f32 %v9559_v17, %v12575_v57  ;;  %v2530_v59 = vpop.f32.mrb[87].mxu0  ;;  %v14228_v52 = vld [vmem:[#allocation34_spill] sm:$0xff]  ;;  %v14229_v57 = vld [vmem:[#allocation35_spill] sm:$0xff] }
 0x2d5   : > { %v12696_v31 = vadd.f32 %v14226_v63, %v2528_v6  ;;  %v2531_v41 = vadd.f32 %v12565_v50, %v2530_v59  ;;  %v14232_v50 = vld [vmem:[#allocation32_spill] sm:$0xff]  ;;  %v14241_v59 = vld [vmem:[#allocation38_spill] sm:$0xff] }
 0x2d6   : > { %v12700_v53 = vadd.f32 %v12568_v28, %v2539_v14  ;;  %v14234_v28 = vld [vmem:[#allocation36_spill] sm:$0xff] }
 0x2d7   : > { %v12703_v35 = vadd.f32 %v14227_v51, %v2531_v41  ;;  %v12727_v14 = vld [vmem:[#allocation10 + $0x80] sm:$0xff]  }
 0x2d8   : > { %9712 = vmatprep.subr.bf16.mxu1 %v12727_v14 }
 0x2d9   : > { %v9562_v54 = vpop.f32.mrb[88].mxu0 }
 0x2da   : > { %v2552_v58 = vadd.f32 %v9562_v54, %v12589_v3  ;;  %v2543_v24 = vpop.f32.mrb[89].mxu0 }
 0x2db   : > { %v2544_v18 = vadd.f32 %v14228_v52, %v2543_v24  ;;  %v9563_v47 = vpop.f32.mrb[90].mxu0 }
 0x2dc   : > { %v12708_v34 = vadd.f32 %v14229_v57, %v2552_v58  ;;  %v2555_v9 = vadd.f32 %v9563_v47, %v14231_v0  ;;  %v2546_v37 = vpop.f32.mrb[91].mxu0 }
 0x2dd   : > { %v12712_v45 = vadd.f32 %v14232_v50, %v2544_v18  ;;  %v2547_v10 = vadd.f32 %v14234_v28, %v2546_v37  ;;  %v12747_v37 = vld [vmem:[#allocation9] ss:$0 sm:$0xff] }
 0x2de   : > { %14230 = vst [vmem:[#allocation29_spill] sm:$0xff] %v12708_v34  ;;  %v12716_v8 = vadd.f32 %v14235_v33, %v2555_v9 }
 0x2df   : > { %14233 = vst [vmem:[#allocation30_spill] sm:$0xff] %v12712_v45  ;;  %v12719_v3 = vadd.f32 %v14237_v49, %v2547_v10 }
 0x2e0   : > { %14236 = vst [vmem:[#allocation31_spill] sm:$0xff] %v12716_v8 }
 0x2e1   : > { %14238 = vst [vmem:[#allocation34_spill] sm:$0xff] %v12719_v3  ;;  %v9566_v42 = vpop.f32.mrb[92].mxu0 }
 0x2e2   : > { %v2568_v43 = vadd.f32 %v9566_v42, %v12605_v40  ;;  %v2559_v44 = vpop.f32.mrb[93].mxu0 }
 0x2e3   : > { %v2560_v56 = vadd.f32 %v14239_v36, %v2559_v44  ;;  %v9567_v22 = vpop.f32.mrb[94].mxu0  ;;  %v9634_v39 = vpop.f32.mrb[64].mxu1 }
 0x2e4   : > { %v12724_v26 = vadd.f32 %v12599_v16, %v2568_v43  ;;  %v2571_v21 = vadd.f32 %v9567_v22, %v12607_v60  ;;  %v2562_v6 = vpop.f32.mrb[95].mxu0  ;;  %v3893_v17 = vpop.f32.mrb[65].mxu1  ;;  %v14244_v16 = vld [vmem:[#allocation40_spill] sm:$0xff] }
 0x2e5   : > { %v12730_v63 = vadd.f32 %v14241_v59, %v2560_v56  ;;  %v2563_v41 = vadd.f32 %v12601_v61, %v2562_v6  ;;  %v9635_v40 = vpop.f32.mrb[66].mxu1 }
 0x2e6   : > { %14240 = vst [vmem:[#allocation35_spill] sm:$0xff] %v12724_v26  ;;  %v12734_v51 = vadd.f32 %v12603_v29, %v2571_v21  ;;  %v3896_v54 = vpop.f32.mrb[67].mxu1 }
 0x2e7   : > { %14242 = vst [vmem:[#allocation39_spill] sm:$0xff] %v12730_v63  ;;  %v12738_v58 = vadd.f32 %v14244_v16, %v2563_v41 }
 0x2e8   : > { %14243 = vst [vmem:[#allocation32_spill] sm:$0xff] %v12734_v51 }
 0x2e9   : > { %14245 = vst [vmem:[#allocation36_spill] sm:$0xff] %v12738_v58  ;;  %v8973_v60 = vpop.f32.mrb[96].mxu0 }
 0x2ea   : > { %v8974_v24 = vpop.f32.mrb[97].mxu0 }
 0x2eb   : > { %v8975_v52 = vadd.f32 %v8974_v24, %v8973_v60  ;;  %v8976_v18 = vpop.f32.mrb[98].mxu0  ;;  %v12740_v47 = vpop.f32.mrb[68].mxu1 }
 0x2ec   : > { %v8977_v57 = vpop.f32.mrb[99].mxu0  ;;  %v12742_v0 = vpop.f32.mrb[69].mxu1 }
 0x2ed   : > { %v9878_v61 = vadd.f32 %v8975_v52, %v12616_v38  ;;  %v8978_v9 = vadd.f32 %v8977_v57, %v8976_v18  ;;  %v12745_v29 = vpop.f32.mrb[70].mxu1 }
 0x2ee   : > { %v12749_v50 = vpop.f32.mrb[71].mxu1 }
 0x2ef   : > { %v9879_v28 = vadd.f32 %v9878_v61, %v3893_v17  ;;  %v9886_v10 = vadd.f32 %v8978_v9, %v12623_v5 }
 0x2f1   : > { %v4059_v33 = vadd.f32 %v9879_v28, %v12747_v37  ;;  %v9887_v49 = vadd.f32 %v9886_v10, %v3896_v54  ;;  %v8979_v42 = vpop.f32.mrb[100].mxu0 }
 0x2f2   : > { %v8980_v43 = vpop.f32.mrb[101].mxu0 }
 0x2f3   : > { %v4091_v44 = vmax.f32 %v4059_v33, 0.0  ;;  %v4060_v36 = vadd.f32 %v9887_v49, %v12747_v37  ;;  %v8981_v56 = vadd.f32 %v8980_v43, %v8979_v42  ;;  %v8982_v38 = vpop.f32.mrb[102].mxu0  ;;  %v12754_v22 = vpop.f32.mrb[72].mxu1  ;;  %v4594_v33 = vld [vmem:[#allocation3 + $0xc] sm:$0xf] }
 0x2f4   : > { %v8983_v21 = vpop.f32.mrb[103].mxu0  ;;  %v12756_v6 = vpop.f32.mrb[73].mxu1 }
 0x2f5   : > { %v8652_v59 = vpack.c.bf16 %v4091_v44, %v4091_v44  ;;  %v4092_v41 = vmax.f32 %v4060_v36, 0.0  ;;  %v9874_v17 = vadd.f32 %v8981_v56, %v12612_v4  ;;  %v8984_v5 = vadd.f32 %v8983_v21, %v8982_v38  ;;  %v12759_v16 = vpop.f32.mrb[74].mxu1 }
 0x2f6   : > { %v12761_v54 = vpop.f32.mrb[75].mxu1 }
 0x2f7   : > { %v4274_v60 = vshrl.u32 %v8652_v59, 16  ;;  %v8653_v24 = vpack.c.bf16 %v4092_v41, %v4092_v41  ;;  %v9875_v52 = vadd.f32 %v9874_v17, %v9634_v39  ;;  %v9882_v18 = vadd.f32 %v8984_v5, %v12620_v2  ;;  %v4598_v39 = vld [vmem:[#allocation3 + $0x14] sm:$0x1] }
 0x2f8   : > { %v4277_v61 = vshll.u32 %v8652_v59, 16 }
 0x2f9   : > { %v4276_v57 = vrot.slane %v4274_v60, 7  ;;  %v4282_v9 = vshrl.u32 %v8653_v24, 16  ;;  %v4061_v28 = vadd.f32 %v9875_v52, %v12747_v37  ;;  %v8985_v10 = vpop.f32.mrb[104].mxu0  ;;  %v9883_v49 = vadd.f32 %v9882_v18, %v9635_v40 }
 0x2fa   : > { %v8986_v42 = vpop.f32.mrb[105].mxu0  ;;  %v4285_v44 = vshll.u32 %v8653_v24, 16 }
 0x2fb   : > { %v4279_v4 = vor.u32 %v4277_v61, %v4276_v57  ;;  %v4284_v43 = vrot.slane %v4282_v9, 7  ;;  %v4093_v36 = vmax.f32 %v4061_v28, 0.0  ;;  %v8988_v56 = vpop.f32.mrb[106].mxu0  ;;  %v12765_v38 = vpop.f32.mrb[76].mxu1  ;;  %v4280_v21 = vrot.slane %v4276_v57, 4 }
 0x2fc   : > { %v4062_v2 = vadd.f32 %v9883_v49, %v12747_v37  ;;  %v8987_v41 = vadd.f32 %v8986_v42, %v8985_v10  ;;  %v8989_v59 = vpop.f32.mrb[107].mxu0  ;;  %v12768_v17 = vpop.f32.mrb[77].mxu1  ;;  %v13141_v49 = vld [vmem:[#allocation3 + $0x8] ss:$0 sps:$4 sm:$0x11]  }
 0x2fd   : > { %v4595_v60 = vsel %vm11590_vm7, %v4279_v4, %v4594_v33  ;;  %v4287_v40 = vor.u32 %v4285_v44, %v4284_v43  ;;  %v4289_v52 = vrot.slane %v4284_v43, 4  ;;  %v8654_v18 = vpack.c.bf16 %v4093_v36, %v4093_v36  ;;  %v12772_v61 = vpop.f32.mrb[78].mxu1 }
 0x2fe   : > { %4596 = vst [vmem:[#allocation3 + $0xc] sm:$0xf] %v4595_v60  ;;  %v4094_v24 = vmax.f32 %v4062_v2, 0.0  ;;  %v9894_v9 = vadd.f32 %v8987_v41, %v12632_v23  ;;  %v8990_v57 = vadd.f32 %v8989_v59, %v8988_v56  ;;  %v12775_v28 = vpop.f32.mrb[79].mxu1  ;;  %v4601_v56 = vld [vmem:[#allocation3 + $0x18] sm:$0xf] }
 0x2ff   : > { %v4288_v10 = vsel %vm11582_vm6, %v4280_v21, %v4287_v40  ;;  %v4599_v51 = vsel %vm11597_vm8, %v4289_v52, %v4598_v39  ;;  %v4291_v26 = vshrl.u32 %v8654_v18, 16  ;;  %v4294_v36 = vshll.u32 %v8654_v18, 16 }
 0x300   : > { %4597 = vst [vmem:[#allocation3 + $0x10] sm:$0xf] %v4288_v10  ;;  %4600 = vst [vmem:[#allocation3 + $0x14] sm:$0x1] %v4599_v51  ;;  %v8655_v33 = vpack.c.bf16 %v4094_v24, %v4094_v24  ;;  %v9895_v4 = vadd.f32 %v9894_v9, %v12742_v0  ;;  %v9902_v43 = vadd.f32 %v8990_v57, %v12639_v62  ;;  %v10552_v9 = vld [vmem:[#allocation10 + $0x40] sm:$0xff]  }
 0x301   : > { %v4293_v44 = vrot.slane %v4291_v26, 7  ;;  %v8991_v23 = vpop.f32.mrb[108].mxu0  ;;  %9229 = vmatprep.subr.bf16.mxu0 %v10552_v9 }
 0x302   : > { %v4299_v2 = vshrl.u32 %v8655_v33, 16  ;;  %v4063_v41 = vadd.f32 %v9895_v4, %v12747_v37  ;;  %v9903_v21 = vadd.f32 %v9902_v43, %v12749_v50  ;;  %v8992_v59 = vpop.f32.mrb[109].mxu0  ;;  %v4302_v24 = vshll.u32 %v8655_v33, 16  ;;  %v4605_v50 = vld [vmem:[#allocation3 + $0x20] sm:$0x1] }
 0x303   : > { %v4296_v60 = vor.u32 %v4294_v36, %v4293_v44  ;;  %v8993_v39 = vadd.f32 %v8992_v59, %v8991_v23  ;;  %v8994_v40 = vpop.f32.mrb[110].mxu0  ;;  %v12785_v52 = vpop.f32.mrb[80].mxu1  ;;  %v4297_v57 = vrot.slane %v4293_v44, 4 }
 0x304   : > { %v4301_v51 = vrot.slane %v4299_v2, 7  ;;  %v4095_v0 = vmax.f32 %v4063_v41, 0.0  ;;  %v4064_v62 = vadd.f32 %v9903_v21, %v12747_v37  ;;  %v8995_v26 = vpop.f32.mrb[111].mxu0  ;;  %v12788_v18 = vpop.f32.mrb[81].mxu1 }
 0x305   : > { %v4602_v10 = vsel %vm11590_vm7, %v4296_v60, %v4601_v56  ;;  %v9890_v4 = vadd.f32 %v8993_v39, %v12628_v55  ;;  %v8996_v43 = vadd.f32 %v8995_v26, %v8994_v40  ;;  %v12793_v36 = vpop.f32.mrb[82].mxu1 }
 0x306   : > { %4603 = vst [vmem:[#allocation3 + $0x18] sm:$0xf] %v4602_v10  ;;  %v4304_v23 = vor.u32 %v4302_v24, %v4301_v51  ;;  %v4306_v33 = vrot.slane %v4301_v51, 4  ;;  %v8656_v2 = vpack.c.bf16 %v4095_v0, %v4095_v0  ;;  %v4096_v41 = vmax.f32 %v4064_v62, 0.0  ;;  %v12795_v21 = vpop.f32.mrb[83].mxu1 }
 0x307   : > { %v9891_v59 = vadd.f32 %v9890_v4, %v12740_v47  ;;  %v9898_v44 = vadd.f32 %v8996_v43, %v12636_v30  ;;  %v12799_v58 = vld [vmem:[#allocation3 + $0xc] sm:$0xff]   ;;  %v10519_v40 = vld [vmem:[#allocation3 + $0x14] ss:$0 sps:$4 sm:$0x11]   ;;  %v4608_v51 = vld [vmem:[#allocation3 + $0x24] sm:$0xf] }
 0x308   : > { %v4305_v55 = vsel %vm11582_vm6, %v4297_v57, %v4304_v23  ;;  %v4606_v56 = vsel %vm11597_vm8, %v4306_v33, %v4605_v50  ;;  %v4308_v60 = vshrl.u32 %v8656_v2, 16  ;;  %v4311_v39 = vshll.u32 %v8656_v2, 16 }
 0x309   : > { %4604 = vst [vmem:[#allocation3 + $0x1c] sm:$0xf] %v4305_v55  ;;  %4607 = vst [vmem:[#allocation3 + $0x20] sm:$0x1] %v4606_v56  ;;  %v8657_v24 = vpack.c.bf16 %v4096_v41, %v4096_v41  ;;  %v4065_v0 = vadd.f32 %v9891_v59, %v12747_v37  ;;  %v9899_v47 = vadd.f32 %v9898_v44, %v12745_v29  ;;  %v8997_v30 = vpop.f32.mrb[112].mxu0  ;;  %v5618_v62 = vrot.slane %v12799_v58, 1 }
 0x30a   : > { %v4310_v26 = vrot.slane %v4308_v60, 7  ;;  %v8998_v9 = vpop.f32.mrb[113].mxu0  ;;  %v5619_v57 = vrot.slane %v10519_v40, 1  ;;  %v5411_v10 = vshrl.u32 %v12799_v58, 16  ;;  %v5413_v50 = vshll.u32 %v12799_v58, 16 }
 0x30b   : > { %v4316_v4 = vshrl.u32 %v8657_v24, 16  ;;  %v4319_v43 = vshll.u32 %v8657_v24, 16  ;;  %v4097_v23 = vmax.f32 %v4065_v0, 0.0  ;;  %v4066_v33 = vadd.f32 %v9899_v47, %v12747_v37  ;;  %v9000_v2 = vpop.f32.mrb[114].mxu0  ;;  %v12811_v41 = vpop.f32.mrb[84].mxu1 }
 0x30c   : > { %v4313_v59 = vor.u32 %v4311_v39, %v4310_v26  ;;  %v4314_v29 = vrot.slane %v4310_v26, 4  ;;  %v8999_v44 = vadd.f32 %v8998_v9, %v8997_v30  ;;  %v9001_v55 = vpop.f32.mrb[115].mxu0  ;;  %v5620_v56 = vsel %vm1482_vm9, %v5618_v62, %v5619_v57  ;;  %v12814_v60 = vpop.f32.mrb[85].mxu1  ;;  %v4612_v47 = vld [vmem:[#allocation3 + $0x2c] sm:$0x1] }
 0x30d   : > { %v4318_v63 = vrot.slane %v4316_v4, 7  ;;  %v8658_v8 = vpack.c.bf16 %v4097_v23, %v4097_v23  ;;  %v4098_v34 = vmax.f32 %v4066_v33, 0.0  ;;  %v9002_v3 = vadd.f32 %v9001_v55, %v9000_v2  ;;  %9680 = vmatprep.mubr.bf16.mxu1 %v5620_v56  ;;  %v12816_v24 = vpop.f32.mrb[86].mxu1  ;;  %v4615_v33 = vld [vmem:[#allocation3 + $0x30] sm:$0xf] }
 0x30e   : > { %v4609_v0 = vsel %vm11590_vm7, %v4313_v59, %v4608_v51  ;;  %v9910_v39 = vadd.f32 %v8999_v44, %v12648_v19  ;;  %v5415_v26 = vrot.slane %v5413_v50, 1  ;;  %v5418_v30 = vshll.u32 %v10519_v40, 16  ;;  %v12821_v9 = vpop.f32.mrb[87].mxu1 }
 0x30f   : > { %4610 = vst [vmem:[#allocation3 + $0x24] sm:$0xf] %v4609_v0  ;;  %v4321_v62 = vor.u32 %v4319_v43, %v4318_v63  ;;  %v4323_v57 = vrot.slane %v4318_v63, 4  ;;  %v4325_v4 = vshrl.u32 %v8658_v8, 16  ;;  %v4328_v23 = vshll.u32 %v8658_v8, 16 }
 0x310   : > { %v8659_v2 = vpack.c.bf16 %v4098_v34, %v4098_v34  ;;  %v9911_v55 = vadd.f32 %v9910_v39, %v12756_v6  ;;  %v9918_v56 = vadd.f32 %v9002_v3, %v12655_v11  ;;  %v5416_v45 = vor.u32 %v5415_v26, %v5411_v10  ;;  %v12825_v51 = vld [vmem:[#allocation3 + $0x18] sm:$0xff]   ;;  %v12831_v59 = vld [vmem:[#allocation3 + $0x20] ss:$0 sps:$4 sm:$0x11]  }
 0x311   : > { %v4322_v19 = vsel %vm11582_vm6, %v4314_v29, %v4321_v62  ;;  %v4613_v40 = vsel %vm11597_vm8, %v4323_v57, %v4612_v47  ;;  %v4327_v50 = vrot.slane %v4325_v4, 7  ;;  %v9003_v43 = vpop.f32.mrb[116].mxu0  ;;  %v5420_v63 = vrot.slane %v5418_v30, 1  ;;  %v10553_v10 = vld [vmem:[#allocation10] sm:$0xff]   ;;  %v10557_v30 = vld [vmem:[#allocation10 + $0x48] sm:$0xff]  }
 0x312   : > { %4611 = vst [vmem:[#allocation3 + $0x28] sm:$0xf] %v4322_v19  ;;  %4614 = vst [vmem:[#allocation3 + $0x2c] sm:$0x1] %v4613_v40  ;;  %v4333_v34 = vshrl.u32 %v8659_v2, 16  ;;  %v4336_v8 = vshll.u32 %v8659_v2, 16  ;;  %v4067_v11 = vadd.f32 %v9911_v55, %v12747_v37  ;;  %v9919_v3 = vadd.f32 %v9918_v56, %v12761_v54 }
 0x313   : > { %v9004_v6 = vpop.f32.mrb[117].mxu0  ;;  %v4330_v44 = vor.u32 %v4328_v23, %v4327_v50  ;;  %v4331_v29 = vrot.slane %v4327_v50, 4  ;;  %v5421_v0 = vsel %vm1273_vm4, %v5416_v45, %v5420_v63  ;;  %v12836_v26 = vpop.f32.mrb[88].mxu1  ;;  %v5621_v55 = vrot.slane %v12825_v51, 1  ;;  %v4619_v56 = vld [vmem:[#allocation3 + $0x38] sm:$0x1] }
 0x314   : > { %v9005_v47 = vadd.f32 %v9004_v6, %v9003_v43  ;;  %v9006_v39 = vpop.f32.mrb[118].mxu0  ;;  %14249 = vst [vmem:[#allocation37_spill] sm:$0xff] %v12836_v26  ;;  %v4335_v62 = vrot.slane %v4333_v34, 7  ;;  %v4099_v57 = vmax.f32 %v4067_v11, 0.0  ;;  %v4068_v4 = vadd.f32 %v9919_v3, %v12747_v37  ;;  %5907 = vmatprep.mubr.bf16.mxu0 %v5421_v0  ;;  %v12840_v54 = vpop.f32.mrb[89].mxu1  ;;  %v10542_v43 = vld [vmem:[#allocation10 + $0x88] sm:$0xff]  }
 0x315   : > { %v9007_v2 = vpop.f32.mrb[119].mxu0  ;;  %v4616_v23 = vsel %vm11590_vm7, %v4330_v44, %v4615_v33  ;;  %5908 = vmatmul.mubr.bf16.vlgmr.msra.gmra.mrb[160].mxu0 %v12799_v58  ;;  %v5622_v40 = vrot.slane %v12831_v59, 1  ;;  %v12847_v50 = vpop.f32.mrb[90].mxu1  ;;  %v10558_v33 = vld [vmem:[#allocation10 + $0x8] sm:$0xff]   ;;  %v10559_v0 = vld [vmem:[#allocation10 + $0x50] sm:$0xff]  }
 0x316   : > { %v9906_v45 = vadd.f32 %v9005_v47, %v12644_v13  ;;  %v9008_v19 = vadd.f32 %v9007_v2, %v9006_v39  ;;  %14250 = vst [vmem:[#allocation33_spill] sm:$0xff] %v12847_v50  ;;  %4617 = vst [vmem:[#allocation3 + $0x30] sm:$0xf] %v4616_v23  ;;  %v4338_v63 = vor.u32 %v4336_v8, %v4335_v62  ;;  %v4340_v34 = vrot.slane %v4335_v62, 4  ;;  %v12849_v6 = vpop.f32.mrb[91].mxu1  ;;  %v12858_v62 = vld [vmem:[#allocation10 + $0x90] sm:$0xff]  }
 0x317   : > { %v8660_v11 = vpack.c.bf16 %v4099_v57, %v4099_v57  ;;  %v4100_v3 = vmax.f32 %v4068_v4, 0.0  ;;  %9230 = vmatpush3.bf16.msra.mxu0 %v10553_v10  ;;  %v5623_v58 = vsel %vm1482_vm9, %v5621_v55, %v5622_v40  ;;  %v10560_v10 = vld [vmem:[#allocation10 + $0x10] sm:$0xff]   ;;  %v5425_v2 = vshll.u32 %v12825_v51, 16 }
 0x318   : > { %v9907_v44 = vadd.f32 %v9906_v45, %v12754_v22  ;;  %v9914_v13 = vadd.f32 %v9008_v19, %v12652_v7  ;;  %9231 = vmatprep.subr.bf16.mxu0 %v10557_v30  ;;  %v4339_v47 = vsel %vm11582_vm6, %v4331_v29, %v4338_v63  ;;  %v4620_v8 = vsel %vm11597_vm8, %v4340_v34, %v4619_v56  ;;  %v4622_v22 = vld [vmem:[#allocation3 + $0x3c] sm:$0xf] }
 0x319   : > { %v4342_v39 = vshrl.u32 %v8660_v11, 16  ;;  %9681 = vmatmul.mubr.bf16.vlgmr.msra.gmra.mrb[96].mxu1 %v5623_v58  ;;  %4618 = vst [vmem:[#allocation3 + $0x34] sm:$0xf] %v4339_v47  ;;  %4621 = vst [vmem:[#allocation3 + $0x38] sm:$0x1] %v4620_v8  ;;  %v8661_v57 = vpack.c.bf16 %v4100_v3, %v4100_v3  ;;  %v9009_v4 = vpop.f32.mrb[120].mxu0 }
 0x31a   : > { %v4069_v7 = vadd.f32 %v9907_v44, %v12747_v37  ;;  %v9915_v30 = vadd.f32 %v9914_v13, %v12759_v16  ;;  %9713 = vmatpush3.bf16.msra.mxu1 %v12727_v14  ;;  %v4345_v55 = vshll.u32 %v8660_v11, 16  ;;  %v5423_v23 = vshrl.u32 %v12825_v51, 16  ;;  %v9010_v45 = vpop.f32.mrb[121].mxu0  ;;  %v12866_v19 = vld [vmem:[#allocation3 + $0x24] sm:$0xff]   ;;  %v10564_v14 = vld [vmem:[#allocation10 + $0x58] sm:$0xff]  }
 0x31b   : > { %v4344_v29 = vrot.slane %v4342_v39, 7  ;;  %v5430_v56 = vshll.u32 %v12831_v59, 16  ;;  %9714 = vmatprep.subr.bf16.mxu1 %v10542_v43  ;;  %9232 = vmatpush3.bf16.msra.mxu0 %v10558_v33  ;;  %v4350_v40 = vshrl.u32 %v8661_v57, 16  ;;  %v4353_v63 = vshll.u32 %v8661_v57, 16  ;;  %v9012_v3 = vpop.f32.mrb[122].mxu0  ;;  %v12869_v44 = vpop.f32.mrb[92].mxu1 }
 0x31c   : > { %v4101_v34 = vmax.f32 %v4069_v7, 0.0  ;;  %v4070_v16 = vadd.f32 %v9915_v30, %v12747_v37  ;;  %9233 = vmatprep.subr.bf16.mxu0 %v10559_v0  ;;  %v4626_v58 = vld [vmem:[#allocation3 + $0x44] sm:$0x1]  ;;  %v5427_v47 = vrot.slane %v5425_v2, 1  ;;  %v9013_v8 = vpop.f32.mrb[123].mxu0  ;;  %v12871_v39 = vpop.f32.mrb[93].mxu1  ;;  %v9011_v57 = vadd.f32 %v9010_v45, %v9009_v4 }
 0x31d   : > { %v4347_v11 = vor.u32 %v4345_v55, %v4344_v29  ;;  %v4348_v13 = vrot.slane %v4344_v29, 4  ;;  %v5432_v59 = vrot.slane %v5430_v56, 1  ;;  %v4352_v50 = vrot.slane %v4350_v40, 7  ;;  %v12873_v7 = vld [vmem:[#allocation3 + $0x2c] ss:$0 sps:$4 sm:$0x11]  }
 0x31e   : > { %v8662_v33 = vpack.c.bf16 %v4101_v34, %v4101_v34  ;;  %v4102_v26 = vmax.f32 %v4070_v16, 0.0  ;;  %v12875_v30 = vpop.f32.mrb[94].mxu1  ;;  %9715 = vmatpush3.bf16.msra.mxu1 %v10542_v43  ;;  %v5428_v55 = vor.u32 %v5427_v47, %v5423_v23  ;;  %v9014_v29 = vadd.f32 %v9013_v8, %v9012_v3  ;;  %v10548_v40 = vld [vmem:[#allocation10 + $0x98] sm:$0xff]  }
 0x31f   : > { %14251 = vst [vmem:[#allocation41_spill] sm:$0xff] %v12875_v30  ;;  %v4623_v0 = vsel %vm11590_vm7, %v4347_v11, %v4622_v22  ;;  %v5624_v2 = vrot.slane %v12866_v19, 1  ;;  %v12880_v56 = vpop.f32.mrb[95].mxu1  ;;  %9716 = vmatprep.subr.bf16.mxu1 %v12858_v62  ;;  %9234 = vmatpush3.bf16.msra.mxu0 %v10560_v10  ;;  %v4355_v4 = vor.u32 %v4353_v63, %v4352_v50  ;;  %v4357_v45 = vrot.slane %v4352_v50, 4  ;;  %v10565_v43 = vld [vmem:[#allocation10 + $0x18] sm:$0xff]   ;;  %v10566_v11 = vld [vmem:[#allocation10 + $0x60] sm:$0xff]  }
 0x320   : > { %4624 = vst [vmem:[#allocation3 + $0x3c] sm:$0xf] %v4623_v0  ;;  %v4359_v34 = vshrl.u32 %v8662_v33, 16  ;;  %v4362_v16 = vshll.u32 %v8662_v33, 16  ;;  %9235 = vmatprep.subr.bf16.mxu0 %v10564_v14  ;;  %v8663_v30 = vpack.c.bf16 %v4102_v26, %v4102_v26  ;;  %v5433_v22 = vsel %vm1273_vm4, %v5428_v55, %v5432_v59  ;;  %v4629_v50 = vld [vmem:[#allocation3 + $0x48] sm:$0xf] }
 0x321   : > { %v9926_v23 = vadd.f32 %v9011_v57, %v12664_v1  ;;  %v9934_v3 = vadd.f32 %v9014_v29, %v12671_v25  ;;  %v4356_v47 = vsel %vm11582_vm6, %v4348_v13, %v4355_v4  ;;  %v4627_v10 = vsel %vm11597_vm8, %v4357_v45, %v4626_v58  ;;  %5915 = vmatprep.mubr.bf16.mxu0 %v5433_v22  ;;  %v9015_v8 = vpop.f32.mrb[124].mxu0  ;;  %v10551_v58 = vld [vmem:[#allocation10 + $0xa0] sm:$0xff]   ;;  %v4633_v55 = vld [vmem:[#allocation3 + $0x50] sm:$0x1] }
 0x322   : > { %v4361_v63 = vrot.slane %v4359_v34, 7  ;;  %v5625_v14 = vrot.slane %v12873_v7, 1  ;;  %9717 = vmatpush3.bf16.msra.mxu1 %v12858_v62  ;;  %4625 = vst [vmem:[#allocation3 + $0x40] sm:$0xf] %v4356_v47  ;;  %4628 = vst [vmem:[#allocation3 + $0x44] sm:$0x1] %v4627_v10  ;;  %5916 = vmatmul.mubr.bf16.gmra.mrb[164].mxu0 %v12825_v51 }
 0x323   : > { %v4367_v1 = vshrl.u32 %v8663_v30, 16  ;;  %v4370_v26 = vshll.u32 %v8663_v30, 16  ;;  %v9927_v25 = vadd.f32 %v9926_v23, %v12768_v17  ;;  %v9935_v13 = vadd.f32 %v9934_v3, %v12775_v28  ;;  %v9016_v59 = vpop.f32.mrb[125].mxu0  ;;  %9718 = vmatprep.subr.bf16.mxu1 %v10548_v40  ;;  %v10567_v33 = vld [vmem:[#allocation10 + $0x20] sm:$0xff]   ;;  %9236 = vmatpush3.bf16.msra.mxu0 %v10565_v43  ;;  %v10571_v30 = vld [vmem:[#allocation10 + $0x68] sm:$0xff]   ;;  %v12900_v22 = vld [vmem:[#allocation3 + $0x30] sm:$0xff]  }
 0x324   : > { %v4364_v57 = vor.u32 %v4362_v16, %v4361_v63  ;;  %v4365_v0 = vrot.slane %v4361_v63, 4  ;;  %v5626_v29 = vsel %vm1482_vm9, %v5624_v2, %v5625_v14  ;;  %v5435_v62 = vshrl.u32 %v12866_v19, 16  ;;  %v9018_v4 = vpop.f32.mrb[126].mxu0  ;;  %v12902_v16 = vld [vmem:[#allocation10 + $0xa8] sm:$0xff]   ;;  %9237 = vmatprep.subr.bf16.mxu0 %v10566_v11 }
 0x325   : > { %v4369_v45 = vrot.slane %v4367_v1, 7  ;;  %v4071_v17 = vadd.f32 %v9927_v25, %v12747_v37  ;;  %v4072_v51 = vadd.f32 %v9935_v13, %v12747_v37  ;;  %9684 = vmatprep.mubr.bf16.mxu1 %v5626_v29  ;;  %v5437_v28 = vshll.u32 %v12866_v19, 16  ;;  %v9019_v34 = vpop.f32.mrb[127].mxu0  ;;  %v12907_v47 = vld [vmem:[#allocation3 + $0x38] ss:$0 sps:$4 sm:$0x11]  }
 0x326   : > { %v4630_v2 = vsel %vm11590_vm7, %v4364_v57, %v4629_v50  ;;  %v5442_v43 = vshll.u32 %v12873_v7, 16  ;;  %v9017_v23 = vadd.f32 %v9016_v59, %v9015_v8  ;;  %v9020_v3 = vadd.f32 %v9019_v34, %v9018_v4  ;;  %9719 = vmatpush3.bf16.msra.mxu1 %v10548_v40  ;;  %v10572_v25 = vld [vmem:[#allocation10 + $0x28] sm:$0xff]   ;;  %v10573_v59 = vld [vmem:[#allocation10 + $0x70] sm:$0xff]   ;;  %v4640_v34 = vld [vmem:[#allocation3 + $0x5c] sm:$0x1] }
 0x327   : > { %4631 = vst [vmem:[#allocation3 + $0x48] sm:$0xf] %v4630_v2  ;;  %v4372_v10 = vor.u32 %v4370_v26, %v4369_v45  ;;  %v4374_v63 = vrot.slane %v4369_v45, 4  ;;  %v4103_v14 = vmax.f32 %v4071_v17, 0.0  ;;  %v4104_v1 = vmax.f32 %v4072_v51, 0.0  ;;  %9720 = vmatprep.subr.bf16.mxu1 %v10551_v58  ;;  %9238 = vmatpush3.bf16.msra.mxu0 %v10567_v33 }
 0x328   : > { %v5439_v13 = vrot.slane %v5437_v28, 1  ;;  %v5444_v29 = vrot.slane %v5442_v43, 1  ;;  %v9922_v11 = vadd.f32 %v9017_v23, %v12660_v12  ;;  %v9930_v50 = vadd.f32 %v9020_v3, %v12668_v20  ;;  %9239 = vmatprep.subr.bf16.mxu0 %v10571_v30  ;;  %v10563_v30 = vld [vmem:[#allocation10 + $0xb0] sm:$0xff]   ;;  %v4636_v28 = vld [vmem:[#allocation3 + $0x54] sm:$0xf] }
 0x329   : > { %v4373_v7 = vsel %vm11582_vm6, %v4365_v0, %v4372_v10  ;;  %v4634_v40 = vsel %vm11597_vm8, %v4374_v63, %v4633_v55  ;;  %v8664_v8 = vpack.c.bf16 %v4103_v14, %v4103_v14  ;;  %v8665_v26 = vpack.c.bf16 %v4104_v1, %v4104_v1  ;;  %v9021_v33 = vpop.f32.mrb[128].mxu0  ;;  %v12925_v1 = vld [vmem:[#allocation10 + $0xb8] sm:$0xff]  }
 0x32a   : > { %4632 = vst [vmem:[#allocation3 + $0x4c] sm:$0xf] %v4373_v7  ;;  %4635 = vst [vmem:[#allocation3 + $0x50] sm:$0x1] %v4634_v40  ;;  %v5440_v57 = vor.u32 %v5439_v13, %v5435_v62  ;;  %v9923_v4 = vadd.f32 %v9922_v11, %v12765_v38  ;;  %v9931_v12 = vadd.f32 %v9930_v50, %v12772_v61  ;;  %v5627_v20 = vrot.slane %v12900_v22, 1  ;;  %v9022_v55 = vpop.f32.mrb[129].mxu0 }
 0x32b   : > { %9721 = vmatpush3.bf16.msra.mxu1 %v10551_v58  ;;  %v4376_v45 = vshrl.u32 %v8664_v8, 16  ;;  %v4379_v0 = vshll.u32 %v8664_v8, 16  ;;  %v4384_v17 = vshrl.u32 %v8665_v26, 16  ;;  %v4387_v51 = vshll.u32 %v8665_v26, 16  ;;  %v9024_v43 = vpop.f32.mrb[130].mxu0  ;;  %9240 = vmatpush3.bf16.msra.mxu0 %v10572_v25  ;;  %v10574_v58 = vld [vmem:[#allocation10 + $0x30] sm:$0xff]  }
 0x32c   : > { %9722 = vmatprep.subr.bf16.mxu1 %v12902_v16  ;;  %v5445_v62 = vsel %vm1273_vm4, %v5440_v57, %v5444_v29  ;;  %v4073_v38 = vadd.f32 %v9923_v4, %v12747_v37  ;;  %v4074_v61 = vadd.f32 %v9931_v12, %v12747_v37  ;;  %v5628_v2 = vrot.slane %v12907_v47, 1  ;;  %v9025_v14 = vpop.f32.mrb[131].mxu0  ;;  %9241 = vmatprep.subr.bf16.mxu0 %v10573_v59  ;;  %v10580_v13 = vld [vmem:[#allocation10 + $0x78] sm:$0xff]   ;;  %v12930_v7 = vld [vmem:[#allocation3 + $0x3c] sm:$0xff]  }
 0x32d   : > { %v4378_v23 = vrot.slane %v4376_v45, 7  ;;  %v4386_v3 = vrot.slane %v4384_v17, 7  ;;  %5923 = vmatprep.mubr.bf16.mxu0 %v5445_v62  ;;  %v5447_v10 = vshrl.u32 %v12900_v22, 16  ;;  %v5449_v63 = vshll.u32 %v12900_v22, 16 }
 0x32e   : > { %v4105_v29 = vmax.f32 %v4073_v38, 0.0  ;;  %5924 = vmatmul.mubr.bf16.gmra.mrb[168].mxu0 %v12866_v19  ;;  %v4106_v11 = vmax.f32 %v4074_v61, 0.0  ;;  %v5629_v50 = vsel %vm1482_vm9, %v5627_v20, %v5628_v2  ;;  %v5454_v25 = vshll.u32 %v12907_v47, 16  ;;  %v12933_v19 = vld [vmem:[#allocation3 + $0x44] ss:$0 sps:$4 sm:$0x11]  }
 0x32f   : > { %9723 = vmatpush3.bf16.msra.mxu1 %v12902_v16  ;;  %v4381_v40 = vor.u32 %v4379_v0, %v4378_v23  ;;  %v4382_v8 = vrot.slane %v4378_v23, 4  ;;  %v4389_v26 = vor.u32 %v4387_v51, %v4386_v3  ;;  %v4391_v57 = vrot.slane %v4386_v3, 4  ;;  %9242 = vmatpush3.bf16.msra.mxu0 %v10574_v58  ;;  %v10584_v20 = vld [vmem:[#allocation10 + $0x38] sm:$0xff]   ;;  %v4643_v58 = vld [vmem:[#allocation3 + $0x60] sm:$0xf] }
 0x330   : > { %9685 = vmatmul.mubr.bf16.gmra.mrb[100].mxu1 %v5629_v50  ;;  %9724 = vmatprep.subr.bf16.mxu1 %v10563_v30  ;;  %v8666_v59 = vpack.c.bf16 %v4105_v29, %v4105_v29  ;;  %v8667_v4 = vpack.c.bf16 %v4106_v11, %v4106_v11  ;;  %v5451_v12 = vrot.slane %v5449_v63, 1  ;;  %v5456_v45 = vrot.slane %v5454_v25, 1  ;;  %v4647_v23 = vld [vmem:[#allocation3 + $0x68] sm:$0x1] }
 0x331   : > { %v4637_v47 = vsel %vm11590_vm7, %v4381_v40, %v4636_v28  ;;  %v4390_v16 = vsel %vm11582_vm6, %v4382_v8, %v4389_v26  ;;  %v4641_v0 = vsel %vm11597_vm8, %v4391_v57, %v4640_v34  ;;  %v9023_v17 = vadd.f32 %v9022_v55, %v9021_v33  ;;  %9243 = vmatprep.subr.bf16.mxu0 %v10580_v13  ;;  %v9027_v2 = vpop.f32.mrb[132].mxu0  ;;  %v10579_v33 = vld [vmem:[#allocation10 + $0x1c0] sm:$0xff]   ;;  %v12948_v40 = vld [vmem:[#allocation3 + $0x50] ss:$0 sps:$4 sm:$0x11]  }
 0x332   : > { %4638 = vst [vmem:[#allocation3 + $0x54] sm:$0xf] %v4637_v47  ;;  %4639 = vst [vmem:[#allocation3 + $0x58] sm:$0xf] %v4390_v16  ;;  %v4393_v51 = vshrl.u32 %v8666_v59, 16  ;;  %v4396_v62 = vshll.u32 %v8666_v59, 16  ;;  %v5452_v28 = vor.u32 %v5451_v12, %v5447_v10  ;;  %v9026_v63 = vadd.f32 %v9025_v14, %v9024_v43 }
 0x333   : > { %4642 = vst [vmem:[#allocation3 + $0x5c] sm:$0x1] %v4641_v0  ;;  %v4401_v38 = vshrl.u32 %v8667_v4, 16  ;;  %v4404_v61 = vshll.u32 %v8667_v4, 16  ;;  %9725 = vmatpush3.bf16.msra.mxu1 %v10563_v30  ;;  %v9942_v3 = vadd.f32 %v9023_v17, %v12680_v27  ;;  %v5630_v29 = vrot.slane %v12930_v7, 1  ;;  %v9028_v34 = vpop.f32.mrb[133].mxu0  ;;  %9244 = vmatpush3.bf16.msra.mxu0 %v10584_v20 }
 0x334   : > { %9726 = vmatprep.subr.bf16.mxu1 %v12925_v1  ;;  %v4395_v55 = vrot.slane %v4393_v51, 7  ;;  %v5631_v11 = vrot.slane %v12933_v19, 1  ;;  %v5459_v50 = vshrl.u32 %v12930_v7, 16  ;;  %v9030_v25 = vpop.f32.mrb[134].mxu0  ;;  %v12946_v30 = vld [vmem:[#allocation3 + $0x48] sm:$0xff]   ;;  %v5457_v27 = vsel %vm1273_vm4, %v5452_v28, %v5456_v45 }
 0x335   : > { %v4403_v13 = vrot.slane %v4401_v38, 7  ;;  %v9943_v43 = vadd.f32 %v9942_v3, %v12788_v18  ;;  %v9950_v10 = vadd.f32 %v9026_v63, %v12687_v46  ;;  %v5461_v14 = vshll.u32 %v12930_v7, 16  ;;  %v9031_v8 = vpop.f32.mrb[135].mxu0  ;;  %5931 = vmatprep.mubr.bf16.mxu0 %v5457_v27 }
 0x336   : > { %v4398_v26 = vor.u32 %v4396_v62, %v4395_v55  ;;  %v4399_v57 = vrot.slane %v4395_v55, 4  ;;  %5932 = vmatmul.mubr.bf16.gmra.mrb[172].mxu0 %v12900_v22  ;;  %v5632_v18 = vsel %vm1482_vm9, %v5630_v29, %v5631_v11  ;;  %v9029_v17 = vadd.f32 %v9028_v34, %v9027_v2 }
 0x337   : > { %v4406_v59 = vor.u32 %v4404_v61, %v4403_v13  ;;  %v4408_v4 = vrot.slane %v4403_v13, 4  ;;  %9727 = vmatpush3.bf16.msra.mxu1 %v12925_v1  ;;  %v4075_v12 = vadd.f32 %v9943_v43, %v12747_v37  ;;  %v9951_v45 = vadd.f32 %v9950_v10, %v12795_v21  ;;  %9688 = vmatprep.mubr.bf16.mxu1 %v5632_v18 }
 0x338   : > { %v5463_v20 = vrot.slane %v5461_v14, 1  ;;  %9365 = vmatprep.subr.bf16.mxu1 %v10579_v33  ;;  %v4644_v46 = vsel %vm11590_vm7, %v4398_v26, %v4643_v58  ;;  %v5466_v1 = vshll.u32 %v12933_v19, 16  ;;  %v9032_v62 = vadd.f32 %v9031_v8, %v9030_v25  ;;  %v4650_v14 = vld [vmem:[#allocation3 + $0x6c] sm:$0xf] }
 0x339   : > { %v4407_v47 = vsel %vm11582_vm6, %v4399_v57, %v4406_v59  ;;  %v4648_v16 = vsel %vm11597_vm8, %v4408_v4, %v4647_v23  ;;  %4645 = vst [vmem:[#allocation3 + $0x60] sm:$0xf] %v4644_v46  ;;  %v4107_v21 = vmax.f32 %v4075_v12, 0.0  ;;  %v4076_v22 = vadd.f32 %v9951_v45, %v12747_v37  ;;  %v9033_v58 = vpop.f32.mrb[136].mxu0  ;;  %v12978_v57 = vld [vmem:[#allocation9] ss:$0 sm:$0xff] }
 0x33a   : > { %4646 = vst [vmem:[#allocation3 + $0x64] sm:$0xf] %v4407_v47  ;;  %4649 = vst [vmem:[#allocation3 + $0x68] sm:$0x1] %v4648_v16  ;;  %v5464_v0 = vor.u32 %v5463_v20, %v5459_v50  ;;  %v5468_v51 = vrot.slane %v5466_v1, 1  ;;  %v5633_v38 = vrot.slane %v12946_v30, 1  ;;  %v9938_v3 = vadd.f32 %v9029_v17, %v12676_v32 }
 0x33b   : > { %v5634_v61 = vrot.slane %v12948_v40, 1  ;;  %v8668_v28 = vpack.c.bf16 %v4107_v21, %v4107_v21  ;;  %v4108_v23 = vmax.f32 %v4076_v22, 0.0  ;;  %v5471_v19 = vshrl.u32 %v12946_v30, 16  ;;  %v9034_v63 = vpop.f32.mrb[137].mxu0  ;;  %v4654_v4 = vld [vmem:[#allocation3 + $0x74] sm:$0x1] }
 0x33c   : > { %v5469_v29 = vsel %vm1273_vm4, %v5464_v0, %v5468_v51  ;;  %v9946_v37 = vadd.f32 %v9032_v62, %v12684_v15  ;;  %v5473_v34 = vshll.u32 %v12946_v30, 16  ;;  %v9036_v33 = vpop.f32.mrb[138].mxu0  ;;  %v9939_v50 = vadd.f32 %v9938_v3, %v12785_v52  ;;  %v12984_v18 = vld [vmem:[#allocation3 + $0x54] sm:$0xff]  }
 0x33d   : > { %v5635_v2 = vsel %vm1482_vm9, %v5633_v38, %v5634_v61  ;;  %v4410_v55 = vshrl.u32 %v8668_v28, 16  ;;  %v4413_v13 = vshll.u32 %v8668_v28, 16  ;;  %v8669_v11 = vpack.c.bf16 %v4108_v23, %v4108_v23  ;;  %5939 = vmatprep.mubr.bf16.mxu0 %v5469_v29  ;;  %v9037_v32 = vpop.f32.mrb[139].mxu0 }
 0x33e   : > { %9689 = vmatmul.mubr.bf16.gmra.mrb[104].mxu1 %v5635_v2  ;;  %v9947_v25 = vadd.f32 %v9946_v37, %v12793_v36  ;;  %v5475_v27 = vrot.slane %v5473_v34, 1  ;;  %v5478_v43 = vshll.u32 %v12948_v40, 16  ;;  %v9035_v10 = vadd.f32 %v9034_v63, %v9033_v58  ;;  %5940 = vmatmul.mubr.bf16.gmra.mrb[176].mxu0 %v12930_v7  ;;  %v10534_v7 = vld [vmem:[#allocation3 + $0x5c] ss:$0 sps:$4 sm:$0x11]  }
 0x33f   : > { %v4412_v15 = vrot.slane %v4410_v55, 7  ;;  %v4418_v8 = vshrl.u32 %v8669_v11, 16  ;;  %v4421_v26 = vshll.u32 %v8669_v11, 16  ;;  %v4077_v59 = vadd.f32 %v12978_v57, %v9939_v50  ;;  %v4657_v2 = vld [vmem:[#allocation3 + $0x78] sm:$0xf] }
 0x340   : > { %v4078_v52 = vadd.f32 %v12978_v57, %v9947_v25  ;;  %v5476_v12 = vor.u32 %v5475_v27, %v5471_v19  ;;  %v5480_v45 = vrot.slane %v5478_v43, 1  ;;  %v9958_v36 = vadd.f32 %v9035_v10, %v12696_v31  ;;  %v4661_v11 = vld [vmem:[#allocation3 + $0x80] sm:$0x1] }
 0x341   : > { %v4415_v40 = vor.u32 %v4413_v13, %v4412_v15  ;;  %v4416_v20 = vrot.slane %v4412_v15, 4  ;;  %v4420_v46 = vrot.slane %v4418_v8, 7  ;;  %v4109_v47 = vmax.f32 %v4077_v59, 0.0  ;;  %v9039_v0 = vpop.f32.mrb[140].mxu0 }
 0x342   : > { %v4110_v16 = vmax.f32 %v4078_v52, 0.0  ;;  %v5481_v1 = vsel %vm1273_vm4, %v5476_v12, %v5480_v45  ;;  %v9959_v21 = vadd.f32 %v9958_v36, %v12814_v60  ;;  %v9038_v22 = vadd.f32 %v9037_v32, %v9036_v33  ;;  %v9040_v38 = vpop.f32.mrb[141].mxu0 }
 0x343   : > { %v4651_v17 = vsel %vm11590_vm7, %v4415_v40, %v4650_v14  ;;  %v4423_v51 = vor.u32 %v4421_v26, %v4420_v46  ;;  %v4425_v62 = vrot.slane %v4420_v46, 4  ;;  %v8670_v31 = vpack.c.bf16 %v4109_v47, %v4109_v47  ;;  %5947 = vmatprep.mubr.bf16.mxu0 %v5481_v1  ;;  %v9042_v60 = vpop.f32.mrb[142].mxu0 }
 0x344   : > { %4652 = vst [vmem:[#allocation3 + $0x6c] sm:$0xf] %v4651_v17  ;;  %v8671_v61 = vpack.c.bf16 %v4110_v16, %v4110_v16  ;;  %v4079_v58 = vadd.f32 %v12978_v57, %v9959_v21  ;;  %v9966_v28 = vadd.f32 %v9038_v22, %v12703_v35  ;;  %v5636_v23 = vrot.slane %v12984_v18, 1  ;;  %v9043_v37 = vpop.f32.mrb[143].mxu0 }
 0x345   : > { %v4424_v3 = vsel %vm11582_vm6, %v4416_v20, %v4423_v51  ;;  %v4655_v19 = vsel %vm11597_vm8, %v4425_v62, %v4654_v4  ;;  %v4427_v63 = vshrl.u32 %v8670_v31, 16  ;;  %v4430_v29 = vshll.u32 %v8670_v31, 16  ;;  %v10536_v4 = vld [vmem:[#allocation3 + $0x68] ss:$0 sps:$4 sm:$0x11]  }
 0x346   : > { %4653 = vst [vmem:[#allocation3 + $0x70] sm:$0xf] %v4424_v3  ;;  %4656 = vst [vmem:[#allocation3 + $0x74] sm:$0x1] %v4655_v19  ;;  %v4435_v34 = vshrl.u32 %v8671_v61, 16  ;;  %v4438_v33 = vshll.u32 %v8671_v61, 16  ;;  %v9967_v35 = vadd.f32 %v9966_v28, %v12821_v9  ;;  %5948 = vmatmul.mubr.bf16.gmra.mrb[180].mxu0 %v12946_v30  ;;  %v9041_v17 = vadd.f32 %v9040_v38, %v9039_v0 }
 0x347   : > { %v4111_v55 = vmax.f32 %v4079_v58, 0.0  ;;  %v4429_v13 = vrot.slane %v4427_v63, 7  ;;  %v5637_v50 = vrot.slane %v10534_v7, 1  ;;  %v5483_v32 = vshrl.u32 %v12984_v18, 16  ;;  %v13003_v9 = vld [vmem:[#allocation3 + $0x60] sm:$0xff]  }
 0x348   : > { %v5485_v25 = vshll.u32 %v12984_v18, 16  ;;  %v4437_v27 = vrot.slane %v4435_v34, 7  ;;  %v4080_v10 = vadd.f32 %v12978_v57, %v9967_v35  ;;  %v5490_v15 = vshll.u32 %v10534_v7, 16  ;;  %v4664_v20 = vld [vmem:[#allocation3 + $0x84] sm:$0xf] }
 0x349   : > { %v8672_v43 = vpack.c.bf16 %v4111_v55, %v4111_v55  ;;  %v4432_v14 = vor.u32 %v4430_v29, %v4429_v13  ;;  %v4433_v8 = vrot.slane %v4429_v13, 4  ;;  %v5638_v26 = vsel %vm1482_vm9, %v5636_v23, %v5637_v50  ;;  %v9045_v36 = vpop.f32.mrb[144].mxu0 }
 0x34a   : > { %v5487_v59 = vrot.slane %v5485_v25, 1  ;;  %v4440_v52 = vor.u32 %v4438_v33, %v4437_v27  ;;  %v4442_v30 = vrot.slane %v4437_v27, 4  ;;  %9692 = vmatprep.mubr.bf16.mxu1 %v5638_v26  ;;  %v4112_v46 = vmax.f32 %v4080_v10, 0.0  ;;  %v9046_v1 = vpop.f32.mrb[145].mxu0 }
 0x34b   : > { %v4444_v12 = vshrl.u32 %v8672_v43, 16  ;;  %v4447_v45 = vshll.u32 %v8672_v43, 16  ;;  %v4658_v40 = vsel %vm11590_vm7, %v4432_v14, %v4657_v2  ;;  %v5492_v16 = vrot.slane %v5490_v15, 1  ;;  %v9048_v51 = vpop.f32.mrb[146].mxu0 }
 0x34c   : > { %v5488_v47 = vor.u32 %v5487_v59, %v5483_v32  ;;  %4659 = vst [vmem:[#allocation3 + $0x78] sm:$0xf] %v4658_v40  ;;  %v4441_v21 = vsel %vm11582_vm6, %v4433_v8, %v4440_v52  ;;  %v4662_v22 = vsel %vm11597_vm8, %v4442_v30, %v4661_v11  ;;  %v8673_v62 = vpack.c.bf16 %v4112_v46, %v4112_v46  ;;  %v9049_v28 = vpop.f32.mrb[147].mxu0 }
 0x34d   : > { %v4446_v7 = vrot.slane %v4444_v12, 7  ;;  %4660 = vst [vmem:[#allocation3 + $0x7c] sm:$0xf] %v4441_v21  ;;  %4663 = vst [vmem:[#allocation3 + $0x80] sm:$0x1] %v4662_v22  ;;  %v9044_v61 = vadd.f32 %v9043_v37, %v9042_v60  ;;  %v5639_v58 = vrot.slane %v13003_v9, 1  ;;  %v9954_v19 = vadd.f32 %v9041_v17, %v12692_v48 }
 0x34e   : > { %v5493_v31 = vsel %vm1273_vm4, %v5488_v47, %v5492_v16  ;;  %v5640_v63 = vrot.slane %v10536_v4, 1  ;;  %v13014_v29 = vld [vmem:[#allocation3 + $0x6c] sm:$0xff]   ;;  %v4452_v2 = vshrl.u32 %v8673_v62, 16  ;;  %v4455_v0 = vshll.u32 %v8673_v62, 16 }
 0x34f   : > { %v4449_v23 = vor.u32 %v4447_v45, %v4446_v7  ;;  %v4450_v3 = vrot.slane %v4446_v7, 4  ;;  %5955 = vmatprep.mubr.bf16.mxu0 %v5493_v31  ;;  %v9962_v38 = vadd.f32 %v9044_v61, %v12700_v53  ;;  %v5495_v34 = vshrl.u32 %v13003_v9, 16  ;;  %v10538_v55 = vld [vmem:[#allocation3 + $0x74] ss:$0 sps:$4 sm:$0x11]  }
 0x350   : > { %5956 = vmatmul.mubr.bf16.gmra.mrb[184].mxu0 %v12984_v18  ;;  %v9955_v37 = vadd.f32 %v9954_v19, %v12811_v41  ;;  %v5641_v33 = vsel %vm1482_vm9, %v5639_v58, %v5640_v63  ;;  %v5497_v48 = vshll.u32 %v13003_v9, 16  ;;  %v4454_v35 = vrot.slane %v4452_v2, 7  ;;  %v4668_v53 = vld [vmem:[#allocation3 + $0x8c] sm:$0x1] }
 0x351   : > { %v4665_v60 = vsel %vm11590_vm7, %v4449_v23, %v4664_v20  ;;  %v9963_v13 = vadd.f32 %v9962_v38, %v12816_v24  ;;  %9693 = vmatmul.mubr.bf16.gmra.mrb[108].mxu1 %v5641_v33  ;;  %v5502_v18 = vshll.u32 %v10536_v4, 16  ;;  %v9047_v11 = vadd.f32 %v9046_v1, %v9045_v36  ;;  %v9051_v41 = vpop.f32.mrb[148].mxu0  ;;  %v14252_v24 = vld [vmem:[#allocation30_spill] sm:$0xff] }
 0x352   : > { %4666 = vst [vmem:[#allocation3 + $0x84] sm:$0xf] %v4665_v60  ;;  %v4081_v50 = vadd.f32 %v12978_v57, %v9955_v37  ;;  %v5499_v32 = vrot.slane %v5497_v48, 1  ;;  %v9050_v25 = vadd.f32 %v9049_v28, %v9048_v51  ;;  %v5642_v27 = vrot.slane %v13014_v29, 1  ;;  %v9052_v8 = vpop.f32.mrb[149].mxu0  ;;  %v14253_v4 = vld [vmem:[#allocation34_spill] sm:$0xff] }
 0x353   : > { %v4457_v43 = vor.u32 %v4455_v0, %v4454_v35  ;;  %v4459_v10 = vrot.slane %v4454_v35, 4  ;;  %v4082_v15 = vadd.f32 %v12978_v57, %v9963_v13  ;;  %v5504_v14 = vrot.slane %v5502_v18, 1  ;;  %v9054_v12 = vpop.f32.mrb[150].mxu0  ;;  %v4675_v60 = vld [vmem:[#allocation3 + $0x98] sm:$0x1] }
 0x354   : > { %v4113_v26 = vmax.f32 %v4081_v50, 0.0  ;;  %v5500_v59 = vor.u32 %v5499_v32, %v5495_v34  ;;  %v9974_v52 = vadd.f32 %v9047_v11, %v14252_v24  ;;  %v9982_v30 = vadd.f32 %v9050_v25, %v14253_v4  ;;  %v9055_v46 = vpop.f32.mrb[151].mxu0  ;;  %v10541_v50 = vld [vmem:[#allocation3 + $0x80] ss:$0 sps:$4 sm:$0x11]  }
 0x355   : > { %v4458_v45 = vsel %vm11582_vm6, %v4450_v3, %v4457_v43  ;;  %v4669_v36 = vsel %vm11597_vm8, %v4459_v10, %v4668_v53  ;;  %v4114_v40 = vmax.f32 %v4082_v15, 0.0  ;;  %v5643_v20 = vrot.slane %v10538_v55, 1  ;;  %v13045_v53 = vld [vmem:[#allocation3 + $0x78] sm:$0xff]  }
 0x356   : > { %4667 = vst [vmem:[#allocation3 + $0x88] sm:$0xf] %v4458_v45  ;;  %4670 = vst [vmem:[#allocation3 + $0x8c] sm:$0x1] %v4669_v36  ;;  %v8674_v47 = vpack.c.bf16 %v4113_v26, %v4113_v26  ;;  %v5505_v16 = vsel %vm1273_vm4, %v5500_v59, %v5504_v14  ;;  %v9975_v1 = vadd.f32 %v9974_v52, %v12840_v54  ;;  %v5507_v17 = vshrl.u32 %v13014_v29, 16 }
 0x357   : > { %v9983_v21 = vadd.f32 %v9982_v30, %v12849_v6  ;;  %v8675_v22 = vpack.c.bf16 %v4114_v40, %v4114_v40  ;;  %5963 = vmatprep.mubr.bf16.mxu0 %v5505_v16  ;;  %v5644_v7 = vsel %vm1482_vm9, %v5642_v27, %v5643_v20  ;;  %v5509_v51 = vshll.u32 %v13014_v29, 16  ;;  %v4671_v54 = vld [vmem:[#allocation3 + $0x90] sm:$0xf]  ;;  %v4678_v52 = vld [vmem:[#allocation3 + $0x9c] sm:$0xf]  ;;  %v14255_v30 = vld [vmem:[#allocation37_spill] sm:$0xff] }
 0x358   : > { %v4461_v62 = vshrl.u32 %v8674_v47, 16  ;;  %v4464_v31 = vshll.u32 %v8674_v47, 16  ;;  %v4083_v61 = vadd.f32 %v12978_v57, %v9975_v1  ;;  %5964 = vmatmul.mubr.bf16.gmra.mrb[188].mxu0 %v13003_v9  ;;  %9696 = vmatprep.mubr.bf16.mxu1 %v5644_v7  ;;  %v5514_v3 = vshll.u32 %v10538_v55, 16  ;;  %v4682_v40 = vld [vmem:[#allocation3 + $0xa4] sm:$0x1]  ;;  %v14256_v20 = vld [vmem:[#allocation31_spill] sm:$0xff] }
 0x359   : > { %v4084_v58 = vadd.f32 %v12978_v57, %v9983_v21  ;;  %v4469_v28 = vshrl.u32 %v8675_v22, 16  ;;  %v4472_v6 = vshll.u32 %v8675_v22, 16  ;;  %v5511_v23 = vrot.slane %v5509_v51, 1  ;;  %v13043_v38 = vpop.f32.mrb[152].mxu0 }
 0x35a   : > { %v4463_v19 = vrot.slane %v4461_v62, 7  ;;  %v4115_v63 = vmax.f32 %v4083_v61, 0.0  ;;  %v9053_v0 = vadd.f32 %v9052_v8, %v9051_v41  ;;  %v5516_v33 = vrot.slane %v5514_v3, 1  ;;  %v9058_v9 = vpop.f32.mrb[153].mxu0  ;;  %v14254_v41 = vld [vmem:[#allocation29_spill] sm:$0xff] }
 0x35b   : > { %v4116_v2 = vmax.f32 %v4084_v58, 0.0  ;;  %v4471_v34 = vrot.slane %v4469_v28, 7  ;;  %v5512_v37 = vor.u32 %v5511_v23, %v5507_v17  ;;  %v9056_v48 = vadd.f32 %v9055_v46, %v9054_v12  ;;  %v9060_v55 = vpop.f32.mrb[154].mxu0 }
 0x35c   : > { %v4466_v35 = vor.u32 %v4464_v31, %v4463_v19  ;;  %v4467_v13 = vrot.slane %v4463_v19, 4  ;;  %v8676_v18 = vpack.c.bf16 %v4115_v63, %v4115_v63  ;;  %v9970_v43 = vadd.f32 %v9053_v0, %v14254_v41  ;;  %v9061_v10 = vpop.f32.mrb[155].mxu0 }
 0x35d   : > { %v8677_v11 = vpack.c.bf16 %v4116_v2, %v4116_v2  ;;  %v4474_v32 = vor.u32 %v4472_v6, %v4471_v34  ;;  %v4476_v25 = vrot.slane %v4471_v34, 4  ;;  %v5517_v27 = vsel %vm1273_vm4, %v5512_v37, %v5516_v33  ;;  %v10544_v7 = vld [vmem:[#allocation3 + $0x8c] ss:$0 sps:$4 sm:$0x11]   ;;  %v13062_v61 = vld [vmem:[#allocation3 + $0x84] sm:$0xff]  }
 0x35e   : > { %v4672_v15 = vsel %vm11590_vm7, %v4466_v35, %v4671_v54  ;;  %v4478_v14 = vshrl.u32 %v8676_v18, 16  ;;  %v4481_v8 = vshll.u32 %v8676_v18, 16  ;;  %5971 = vmatprep.mubr.bf16.mxu0 %v5517_v27  ;;  %v9971_v12 = vadd.f32 %v9970_v43, %v14255_v30  ;;  %v14257_v54 = vld [vmem:[#allocation33_spill] sm:$0xff] }
 0x35f   : > { %v4486_v26 = vshrl.u32 %v8677_v11, 16  ;;  %4673 = vst [vmem:[#allocation3 + $0x90] sm:$0xf] %v4672_v15  ;;  %v4475_v59 = vsel %vm11582_vm6, %v4467_v13, %v4474_v32  ;;  %v4676_v24 = vsel %vm11597_vm8, %v4476_v25, %v4675_v60  ;;  %v4489_v4 = vshll.u32 %v8677_v11, 16  ;;  %v4685_v15 = vld [vmem:[#allocation3 + $0xa8] sm:$0xf] }
 0x360   : > { %4674 = vst [vmem:[#allocation3 + $0x94] sm:$0xf] %v4475_v59  ;;  %4677 = vst [vmem:[#allocation3 + $0x98] sm:$0x1] %v4676_v24  ;;  %v4480_v45 = vrot.slane %v4478_v14, 7  ;;  %5972 = vmatmul.mubr.bf16.gmra.mrb[192].mxu0 %v13014_v29  ;;  %v9978_v46 = vadd.f32 %v9056_v48, %v14256_v20  ;;  %v5645_v47 = vrot.slane %v13045_v53, 1  ;;  %v4085_v16 = vadd.f32 %v12978_v57, %v9971_v12 }
 0x361   : > { %v4488_v36 = vrot.slane %v4486_v26, 7  ;;  %v5646_v1 = vrot.slane %v10541_v50, 1  ;;  %v5519_v21 = vshrl.u32 %v13045_v53, 16  ;;  %v5521_v22 = vshll.u32 %v13045_v53, 16  ;;  %v9063_v58 = vpop.f32.mrb[156].mxu0 }
 0x362   : > { %v4483_v17 = vor.u32 %v4481_v8, %v4480_v45  ;;  %v4484_v51 = vrot.slane %v4480_v45, 4  ;;  %v4117_v29 = vmax.f32 %v4085_v16, 0.0  ;;  %v9979_v28 = vadd.f32 %v9978_v46, %v14257_v54  ;;  %v9064_v3 = vpop.f32.mrb[157].mxu0  ;;  %v14259_v8 = vld [vmem:[#allocation36_spill] sm:$0xff] }
 0x363   : > { %v4491_v62 = vor.u32 %v4489_v4, %v4488_v36  ;;  %v4493_v31 = vrot.slane %v4488_v36, 4  ;;  %v5647_v6 = vsel %vm1482_vm9, %v5645_v47, %v5646_v1  ;;  %v5523_v23 = vrot.slane %v5521_v22, 1  ;;  %v9066_v34 = vpop.f32.mrb[158].mxu0  ;;  %v14260_v22 = vld [vmem:[#allocation35_spill] sm:$0xff] }
 0x364   : > { %v4679_v19 = vsel %vm11590_vm7, %v4483_v17, %v4678_v52  ;;  %9697 = vmatmul.mubr.bf16.gmra.mrb[112].mxu1 %v5647_v6  ;;  %v5526_v0 = vshll.u32 %v10541_v50, 16  ;;  %v8678_v60 = vpack.c.bf16 %v4117_v29, %v4117_v29  ;;  %v4086_v37 = vadd.f32 %v12978_v57, %v9979_v28  ;;  %v9067_v35 = vpop.f32.mrb[159].mxu0  ;;  %v14258_v50 = vld [vmem:[#allocation39_spill] sm:$0xff]  ;;  %v14261_v17 = vld [vmem:[#allocation32_spill] sm:$0xff] }
 0x365   : > { %v4492_v63 = vsel %vm11582_vm6, %v4484_v51, %v4491_v62  ;;  %v4683_v2 = vsel %vm11597_vm8, %v4493_v31, %v4682_v40  ;;  %4680 = vst [vmem:[#allocation3 + $0x9c] sm:$0xf] %v4679_v19  ;;  %v5524_v33 = vor.u32 %v5523_v23, %v5519_v21  ;;  %v9059_v48 = vadd.f32 %v9058_v9, %v13043_v38  ;;  %v4689_v62 = vld [vmem:[#allocation3 + $0xb0] sm:$0x1] }
 0x366   : > { %4681 = vst [vmem:[#allocation3 + $0xa0] sm:$0xf] %v4492_v63  ;;  %4684 = vst [vmem:[#allocation3 + $0xa4] sm:$0x1] %v4683_v2  ;;  %v5528_v13 = vrot.slane %v5526_v0, 1  ;;  %v9062_v18 = vadd.f32 %v9061_v10, %v9060_v55  ;;  %v5648_v11 = vrot.slane %v13062_v61, 1  ;;  %v9065_v30 = vadd.f32 %v9064_v3, %v9063_v58 }
 0x367   : > { %v5649_v32 = vrot.slane %v10544_v7, 1  ;;  %v4495_v25 = vshrl.u32 %v8678_v60, 16  ;;  %v4498_v27 = vshll.u32 %v8678_v60, 16  ;;  %v4118_v41 = vmax.f32 %v4086_v37, 0.0  ;;  %v13084_v45 = vld [vmem:[#allocation3 + $0x90] sm:$0xff]   ;;  %v14262_v3 = vld [vmem:[#allocation41_spill] sm:$0xff] }
 0x368   : > { %v9990_v43 = vadd.f32 %v9059_v48, %v14258_v50  ;;  %v5529_v14 = vsel %vm1273_vm4, %v5524_v33, %v5528_v13  ;;  %v9998_v26 = vadd.f32 %v9062_v18, %v14259_v8  ;;  %v5531_v38 = vshrl.u32 %v13062_v61, 16  ;;  %v13086_v47 = vld [vmem:[#allocation3 + $0x98] ss:$0 sps:$4 sm:$0x11]  }
 0x369   : > { %v5650_v59 = vsel %vm1482_vm9, %v5648_v11, %v5649_v32  ;;  %v4497_v9 = vrot.slane %v4495_v25, 7  ;;  %v8679_v24 = vpack.c.bf16 %v4118_v41, %v4118_v41  ;;  %5979 = vmatprep.mubr.bf16.mxu0 %v5529_v14  ;;  %v5533_v10 = vshll.u32 %v13062_v61, 16  ;;  %v4692_v32 = vld [vmem:[#allocation3 + $0xb4] sm:$0xf] }
 0x36a   : > { %v9991_v55 = vadd.f32 %v9990_v43, %v12871_v39  ;;  %9700 = vmatprep.mubr.bf16.mxu1 %v5650_v59  ;;  %5980 = vmatmul.mubr.bf16.gmra.mrb[196].mxu0 %v13045_v53  ;;  %v9999_v52 = vadd.f32 %v9998_v26, %v12880_v56  ;;  %v5538_v4 = vshll.u32 %v10544_v7, 16  ;;  %v9068_v12 = vadd.f32 %v9067_v35, %v9066_v34 }
 0x36b   : > { %v4500_v36 = vor.u32 %v4498_v27, %v4497_v9  ;;  %v4501_v40 = vrot.slane %v4497_v9, 4  ;;  %v4503_v20 = vshrl.u32 %v8679_v24, 16  ;;  %v4506_v46 = vshll.u32 %v8679_v24, 16  ;;  %v4696_v27 = vld [vmem:[#allocation3 + $0xbc] sm:$0x1] }
 0x36c   : > { %v4087_v39 = vadd.f32 %v12978_v57, %v9991_v55  ;;  %v4088_v16 = vadd.f32 %v12978_v57, %v9999_v52  ;;  %v5535_v1 = vrot.slane %v5533_v10, 1  ;;  %v5540_v21 = vrot.slane %v5538_v4, 1 }
 0x36d   : > { %v4686_v56 = vsel %vm11590_vm7, %v4500_v36, %v4685_v15  ;;  %v4505_v53 = vrot.slane %v4503_v20, 7  ;;  %v9986_v7 = vadd.f32 %v9065_v30, %v14260_v22  ;;  %v9994_v51 = vadd.f32 %v9068_v12, %v14261_v17  ;;  %v13107_v35 = vld [vmem:[#allocation3 + $0xa4] ss:$0 sps:$4 sm:$0x11]  }
 0x36e   : > { %4687 = vst [vmem:[#allocation3 + $0xa8] sm:$0xf] %v4686_v56  ;;  %v4119_v31 = vmax.f32 %v4087_v39, 0.0  ;;  %v4120_v58 = vmax.f32 %v4088_v16, 0.0  ;;  %v5536_v29 = vor.u32 %v5535_v1, %v5531_v38  ;;  %v5651_v54 = vrot.slane %v13084_v45, 1 }
 0x36f   : > { %v4508_v28 = vor.u32 %v4506_v46, %v4505_v53  ;;  %v4510_v6 = vrot.slane %v4505_v53, 4  ;;  %v9987_v23 = vadd.f32 %v9986_v7, %v12869_v44  ;;  %v9995_v19 = vadd.f32 %v9994_v51, %v14262_v3  ;;  %v13105_v44 = vld [vmem:[#allocation3 + $0x9c] sm:$0xff]  }
 0x370   : > { %v8680_v63 = vpack.c.bf16 %v4119_v31, %v4119_v31  ;;  %v8681_v2 = vpack.c.bf16 %v4120_v58, %v4120_v58  ;;  %v5541_v0 = vsel %vm1273_vm4, %v5536_v29, %v5540_v21  ;;  %v5652_v34 = vrot.slane %v13086_v47, 1  ;;  %v4699_v46 = vld [vmem:[#allocation3 + $0xc0] sm:$0xf] }
 0x371   : > { %v4509_v60 = vsel %vm11582_vm6, %v4501_v40, %v4508_v28  ;;  %v4690_v37 = vsel %vm11597_vm8, %v4510_v6, %v4689_v62  ;;  %5987 = vmatprep.mubr.bf16.mxu0 %v5541_v0  ;;  %v4089_v33 = vadd.f32 %v12978_v57, %v9987_v23  ;;  %v4090_v48 = vadd.f32 %v12978_v57, %v9995_v19 }
 0x372   : > { %4688 = vst [vmem:[#allocation3 + $0xac] sm:$0xf] %v4509_v60  ;;  %4691 = vst [vmem:[#allocation3 + $0xb0] sm:$0x1] %v4690_v37  ;;  %v4512_v13 = vshrl.u32 %v8680_v63, 16  ;;  %v4515_v18 = vshll.u32 %v8680_v63, 16  ;;  %5988 = vmatmul.mubr.bf16.gmra.mrb[200].mxu0 %v13062_v61  ;;  %v5653_v43 = vsel %vm1482_vm9, %v5651_v54, %v5652_v34 }
 0x373   : > { %v4520_v11 = vshrl.u32 %v8681_v2, 16  ;;  %v4523_v25 = vshll.u32 %v8681_v2, 16  ;;  %v4121_v41 = vmax.f32 %v4089_v33, 0.0  ;;  %v4122_v50 = vmax.f32 %v4090_v48, 0.0  ;;  %9701 = vmatmul.mubr.bf16.gmra.mrb[116].mxu1 %v5653_v43  ;;  %v13139_v48 = vld [vmem:[#allocation3] sm:$0xff]  }
 0x374   : > { %v4514_v15 = vrot.slane %v4512_v13, 7  ;;  %v5545_v14 = vshll.u32 %v13084_v45, 16  ;;  %v5550_v8 = vshll.u32 %v13086_v47, 16  ;;  %v5654_v38 = vrot.slane %v13105_v44, 1  ;;  %v4703_v47 = vld [vmem:[#allocation3 + $0xc8] sm:$0x1] }
 0x375   : > { %v4522_v57 = vrot.slane %v4520_v11, 7  ;;  %v8682_v26 = vpack.c.bf16 %v4121_v41, %v4121_v41  ;;  %v8683_v59 = vpack.c.bf16 %v4122_v50, %v4122_v50  ;;  %v5655_v61 = vrot.slane %v13107_v35, 1 }
 0x376   : > { %v4517_v9 = vor.u32 %v4515_v18, %v4514_v15  ;;  %v4518_v24 = vrot.slane %v4514_v15, 4  ;;  %v5543_v12 = vshrl.u32 %v13084_v45, 16  ;;  %v5547_v39 = vrot.slane %v5545_v14, 1 }
 0x377   : > { %v4525_v55 = vor.u32 %v4523_v25, %v4522_v57  ;;  %v4527_v10 = vrot.slane %v4522_v57, 4  ;;  %v4529_v52 = vshrl.u32 %v8682_v26, 16  ;;  %v4532_v4 = vshll.u32 %v8682_v26, 16 }
 0x378   : > { %v4537_v30 = vshrl.u32 %v8683_v59, 16  ;;  %v4693_v36 = vsel %vm11590_vm7, %v4517_v9, %v4692_v32  ;;  %v4540_v21 = vshll.u32 %v8683_v59, 16  ;;  %v5656_v56 = vsel %vm1482_vm9, %v5654_v38, %v5655_v61 }
 0x379   : > { %v4526_v40 = vsel %vm11582_vm6, %v4518_v24, %v4525_v55  ;;  %v4697_v20 = vsel %vm11597_vm8, %v4527_v10, %v4696_v27  ;;  %4694 = vst [vmem:[#allocation3 + $0xb4] sm:$0xf] %v4693_v36  ;;  %v4531_v16 = vrot.slane %v4529_v52, 7  ;;  %v13123_v53 = vld [vmem:[#allocation3 + $0xa8] sm:$0xff]   ;;  %v5548_v22 = vor.u32 %v5547_v39, %v5543_v12  ;;  %9704 = vmatprep.mubr.bf16.mxu1 %v5656_v56 }
 0x37a   : > { %4695 = vst [vmem:[#allocation3 + $0xb8] sm:$0xf] %v4526_v40  ;;  %4698 = vst [vmem:[#allocation3 + $0xbc] sm:$0x1] %v4697_v20  ;;  %v4539_v1 = vrot.slane %v4537_v30, 7  ;;  %v5552_v7 = vrot.slane %v5550_v8, 1 }
 0x37b   : > { %v5557_v17 = vshll.u32 %v13105_v44, 16  ;;  %v5562_v51 = vshll.u32 %v13107_v35, 16  ;;  %v4534_v62 = vor.u32 %v4532_v4, %v4531_v16  ;;  %v4535_v31 = vrot.slane %v4531_v16, 4  ;;  %v10555_v54 = vld [vmem:[#allocation3 + $0xb0] ss:$0 sps:$4 sm:$0x11]  }
 0x37c   : > { %v4542_v58 = vor.u32 %v4540_v21, %v4539_v1  ;;  %v4544_v29 = vrot.slane %v4539_v1, 4  ;;  %v5553_v28 = vsel %vm1273_vm4, %v5548_v22, %v5552_v7  ;;  %v5555_v6 = vshrl.u32 %v13105_v44, 16  ;;  %v13155_v52 = vld [vmem:[#allocation3 + $0x14] ss:$0 sps:$4 sm:$0x11]   ;;  %v13158_v12 = vld [vmem:[#allocation3 + $0xc] sm:$0xff]  }
 0x37d   : > { %v5559_v23 = vrot.slane %v5557_v17, 1  ;;  %v5657_v3 = vrot.slane %v13123_v53, 1  ;;  %v4700_v19 = vsel %vm11590_vm7, %v4534_v62, %v4699_v46  ;;  %5995 = vmatprep.mubr.bf16.mxu0 %v5553_v28  ;;  %v5658_v0 = vrot.slane %v10555_v54, 1  ;;  %v13162_v36 = vld [vmem:[#allocation3 + $0x20] ss:$0 sps:$4 sm:$0x11]  }
 0x37e   : > { %v4543_v63 = vsel %vm11582_vm6, %v4535_v31, %v4542_v58  ;;  %v4704_v2 = vsel %vm11597_vm8, %v4544_v29, %v4703_v47  ;;  %4701 = vst [vmem:[#allocation3 + $0xc0] sm:$0xf] %v4700_v19  ;;  %5996 = vmatmul.mubr.bf16.gmra.mrb[204].mxu0 %v13084_v45  ;;  %v5564_v60 = vrot.slane %v5562_v51, 1  ;;  %v5569_v37 = vshll.u32 %v13123_v53, 16  ;;  %v10583_v22 = vld [vmem:[#allocation10 + $0x180] sm:$0xff]   ;;  %v10587_v51 = vld [vmem:[#allocation10 + $0x1c8] sm:$0xff]  }
 0x37f   : > { %4702 = vst [vmem:[#allocation3 + $0xc4] sm:$0xf] %v4543_v63  ;;  %4705 = vst [vmem:[#allocation3 + $0xc8] sm:$0x1] %v4704_v2  ;;  %v5560_v34 = vor.u32 %v5559_v23, %v5555_v6  ;;  %v5574_v33 = vshll.u32 %v10555_v54, 16  ;;  %v5659_v5 = vsel %vm1482_vm9, %v5657_v3, %v5658_v0  ;;  %v5567_v35 = vshrl.u32 %v13123_v53, 16 }
 0x380   : > { %9705 = vmatmul.mubr.bf16.gmra.mrb[120].mxu1 %v5659_v5  ;;  %v5571_v13 = vrot.slane %v5569_v37, 1  ;;  %v5106_v50 = vrot.slane %v13139_v48, 1  ;;  %v5107_v57 = vrot.slane %v13141_v49, 1  ;;  %v5109_v39 = vrot.slane %v13158_v12, 1  ;;  %v13175_v31 = vld [vmem:[#allocation3 + $0x24] sm:$0xff]   ;;  %v13181_v28 = vld [vmem:[#allocation3 + $0x30] sm:$0xff]  }
 0x381   : > { %v5565_v42 = vsel %vm1273_vm4, %v5560_v34, %v5564_v60  ;;  %v10561_v18 = vld [vmem:[#allocation3 + $0xb4] sm:$0xff]   ;;  %v10562_v45 = vld [vmem:[#allocation3 + $0xbc] ss:$0 sps:$4 sm:$0x11]   ;;  %v5576_v32 = vrot.slane %v5574_v33, 1  ;;  %v5110_v16 = vrot.slane %v13155_v52, 1 }
 0x382   : > { %6003 = vmatprep.mubr.bf16.mxu0 %v5565_v42  ;;  %v5572_v11 = vor.u32 %v5571_v13, %v5567_v35  ;;  %v5660_v25 = vrot.slane %v10561_v18, 1  ;;  %v5661_v27 = vrot.slane %v10562_v45, 1  ;;  %v5581_v41 = vshll.u32 %v10561_v18, 16  ;;  %v13172_v17 = vld [vmem:[#allocation3 + $0x2c] ss:$0 sps:$4 sm:$0x11]  }
 0x383   : > { %v5579_v15 = vshrl.u32 %v10561_v18, 16  ;;  %v5586_v59 = vshll.u32 %v10562_v45, 16  ;;  %v5108_v10 = vsel %vm1482_vm9, %v5106_v50, %v5107_v57  ;;  %v5113_v21 = vrot.slane %v13162_v36, 1  ;;  %v13177_v58 = vld [vmem:[#allocation3 + $0x38] ss:$0 sps:$4 sm:$0x11]  }
 0x384   : > { %v5577_v43 = vsel %vm1273_vm4, %v5572_v11, %v5576_v32  ;;  %v5662_v14 = vsel %vm1482_vm9, %v5660_v25, %v5661_v27  ;;  %v5583_v8 = vrot.slane %v5581_v41, 1  ;;  %v4901_v7 = vshll.u32 %v13139_v48, 16  ;;  %v10590_v6 = vld [vmem:[#allocation10 + $0x188] sm:$0xff]   ;;  %v10593_v63 = vld [vmem:[#allocation10 + $0x1d0] sm:$0xff]   ;;  %v10602_v27 = vld [vmem:[#allocation10 + $0x198] sm:$0xff]  }
 0x385   : > { %9708 = vmatprep.mubr.bf16.mxu1 %v5662_v14  ;;  %v5588_v4 = vrot.slane %v5586_v59, 1  ;;  %v5111_v62 = vsel %vm1482_vm9, %v5109_v39, %v5110_v16  ;;  %v4899_v54 = vshrl.u32 %v13139_v48, 16  ;;  %v4906_v19 = vshll.u32 %v13141_v49, 16  ;;  %v10596_v5 = vld [vmem:[#allocation10 + $0x190] sm:$0xff]   ;;  %v13189_v42 = vld [vmem:[#allocation3 + $0x3c] sm:$0xff]   ;;  %v10599_v49 = vld [vmem:[#allocation10 + $0x1d8] sm:$0xff]  }
 0x386   : > { %v13149_v26 = vld [vmem:[#allocation3 + $0xc0] sm:$0xff]   ;;  %6004 = vmatmul.mubr.bf16.gmra.mrb[208].mxu0 %v13105_v44  ;;  %v10569_v38 = vld [vmem:[#allocation3 + $0xc8] ss:$0 sps:$4 sm:$0x11]   ;;  %v5584_v9 = vor.u32 %v5583_v8, %v5579_v15  ;;  %v13160_v44 = vld [vmem:[#allocation3 + $0x18] sm:$0xff]   ;;  %v4903_v3 = vrot.slane %v4901_v7, 1 }
 0x387   : > { %6011 = vmatprep.mubr.bf16.mxu0 %v5577_v43  ;;  %v5663_v61 = vrot.slane %v13149_v26, 1  ;;  %v5664_v24 = vrot.slane %v10569_v38, 1  ;;  %v5593_v55 = vshll.u32 %v13149_v26, 16  ;;  %v5591_v46 = vshrl.u32 %v13149_v26, 16  ;;  %v13196_v11 = vld [vmem:[#allocation3 + $0x48] sm:$0xff]   ;;  %v10605_v41 = vld [vmem:[#allocation10 + $0x1e0] sm:$0xff]  }
 0x388   : > { %v5589_v40 = vsel %vm1273_vm4, %v5584_v9, %v5588_v4  ;;  %v5598_v47 = vshll.u32 %v10569_v38, 16  ;;  %v5112_v1 = vrot.slane %v13160_v44, 1  ;;  %v5115_v2 = vrot.slane %v13175_v31, 1  ;;  %v13198_v32 = vld [vmem:[#allocation3 + $0x50] ss:$0 sps:$4 sm:$0x11]  }
 0x389   : > { %v5665_v30 = vsel %vm1482_vm9, %v5663_v61, %v5664_v24  ;;  %v5595_v20 = vrot.slane %v5593_v55, 1  ;;  %v5116_v0 = vrot.slane %v13172_v17, 1  ;;  %v5118_v34 = vrot.slane %v13181_v28, 1  ;;  %v10608_v38 = vld [vmem:[#allocation10 + $0x1a0] sm:$0xff]   ;;  %v10611_v61 = vld [vmem:[#allocation10 + $0x1e8] sm:$0xff]  }
 0x38a   : > { %9709 = vmatmul.mubr.bf16.gmra.mrb[124].mxu1 %v5665_v30  ;;  %v5114_v29 = vsel %vm1482_vm9, %v5112_v1, %v5113_v21  ;;  %v5119_v60 = vrot.slane %v13177_v58, 1  ;;  %v4904_v37 = vor.u32 %v4903_v3, %v4899_v54  ;;  %v4908_v33 = vrot.slane %v4906_v19, 1  ;;  %v13210_v55 = vld [vmem:[#allocation3 + $0x54] sm:$0xff]   ;;  %v13215_v30 = vld [vmem:[#allocation3 + $0x60] sm:$0xff]   ;;  %v13229_v54 = vld [vmem:[#allocation3 + $0x6c] sm:$0xff]  }
 0x38b   : > { %9728 = vmatprep.mubr.bf16.mxu1 %v5108_v10  ;;  %v5596_v56 = vor.u32 %v5595_v20, %v5591_v46  ;;  %v4913_v35 = vshll.u32 %v13158_v12, 16  ;;  %v5117_v13 = vsel %vm1482_vm9, %v5115_v2, %v5116_v0  ;;  %v5121_v43 = vrot.slane %v13189_v42, 1  ;;  %v13212_v10 = vld [vmem:[#allocation3 + $0x5c] ss:$0 sps:$4 sm:$0x11]   ;;  %v10614_v20 = vld [vmem:[#allocation10 + $0x1a8] sm:$0xff]  }
 0x38c   : > { %v5120_v45 = vsel %vm1482_vm9, %v5118_v34, %v5119_v60  ;;  %v4909_v25 = vsel %vm1273_vm4, %v4904_v37, %v4908_v33  ;;  %v5124_v57 = vrot.slane %v13196_v11, 1  ;;  %v5125_v14 = vrot.slane %v13198_v32, 1  ;;  %v10617_v46 = vld [vmem:[#allocation10 + $0x1f0] sm:$0xff]   ;;  %v13234_v3 = vld [vmem:[#allocation3 + $0x78] sm:$0xff]  }
 0x38d   : > { %v4915_v50 = vrot.slane %v4913_v35, 1  ;;  %v4911_v8 = vshrl.u32 %v13158_v12, 16  ;;  %v4918_v59 = vshll.u32 %v13155_v52, 16  ;;  %v5127_v16 = vrot.slane %v13210_v55, 1  ;;  %v13238_v2 = vld [vmem:[#allocation10 + $0x200] sm:$0xff]  }
 0x38e   : > { %6012 = vmatmul.mubr.bf16.gmra.mrb[212].mxu0 %v13123_v53  ;;  %v5600_v53 = vrot.slane %v5598_v47, 1  ;;  %v5126_v4 = vsel %vm1482_vm9, %v5124_v57, %v5125_v14  ;;  %v5128_v1 = vrot.slane %v13212_v10, 1  ;;  %v5130_v21 = vrot.slane %v13215_v30, 1  ;;  %v13236_v19 = vld [vmem:[#allocation3 + $0x80] ss:$0 sps:$4 sm:$0x11]  }
 0x38f   : > { %6019 = vmatprep.mubr.bf16.mxu0 %v5589_v40  ;;  %v4916_v9 = vor.u32 %v4915_v50, %v4911_v8  ;;  %v13217_v40 = vld [vmem:[#allocation3 + $0x68] ss:$0 sps:$4 sm:$0x11]   ;;  %v4920_v52 = vrot.slane %v4918_v59, 1  ;;  %v4930_v7 = vshll.u32 %v13162_v36, 16  ;;  %v5133_v60 = vrot.slane %v13229_v54, 1 }
 0x390   : > { %v5601_v23 = vsel %vm1273_vm4, %v5596_v56, %v5600_v53  ;;  %v5131_v56 = vrot.slane %v13217_v40, 1  ;;  %v5136_v33 = vrot.slane %v13234_v3, 1  ;;  %v4942_v35 = vshll.u32 %v13172_v17, 16  ;;  %v13256_v50 = vld [vmem:[#allocation3 + $0x90] sm:$0xff]  }
 0x391   : > { %v4921_v47 = vsel %vm1273_vm4, %v4916_v9, %v4920_v52  ;;  %v4932_v36 = vrot.slane %v4930_v7, 1  ;;  %v5142_v59 = vrot.slane %v13256_v50, 1  ;;  %v4954_v9 = vshll.u32 %v13177_v58, 16  ;;  %v13272_v52 = vld [vmem:[#allocation3 + $0xa4] ss:$0 sps:$4 sm:$0x11]  }
 0x392   : > { %9729 = vmatmul.mubr.bf16.vlgmr.msra.gmra.mrb[96].mxu1 %v5111_v62  ;;  %v4937_v62 = vshll.u32 %v13175_v31, 16  ;;  %v4944_v17 = vrot.slane %v4942_v35, 1  ;;  %v13300_v35 = vld [vmem:[#allocation3 + $0x30] sm:$0xff]  }
 0x393   : > { %9732 = vmatprep.mubr.bf16.mxu1 %v5114_v29  ;;  %9366 = vmatpush3.bf16.msra.mxu1 %v10583_v22  ;;  %v4923_v22 = vshrl.u32 %v13160_v44, 16  ;;  %v5129_v29 = vsel %vm1482_vm9, %v5127_v16, %v5128_v1  ;;  %v4956_v16 = vrot.slane %v4954_v9, 1 }
 0x394   : > { %9367 = vmatprep.subr.bf16.mxu1 %v10587_v51  ;;  %v10620_v51 = vld [vmem:[#allocation10 + $0x1b0] sm:$0xff]   ;;  %v4939_v34 = vrot.slane %v4937_v62, 1  ;;  %v10626_v62 = vld [vmem:[#allocation3 + $0x20] ss:$0 sps:$4 sm:$0x11]  }
 0x396   : > { %6020 = vmatmul.mubr.bf16.gmra.mrb[216].mxu0 %v10561_v18  ;;  %v13193_v18 = vld [vmem:[#allocation3 + $0x44] ss:$0 sps:$4 sm:$0x11]  }
 0x397   : > { %6027 = vmatprep.mubr.bf16.mxu0 %v5601_v23  ;;  %9368 = vmatpush3.bf16.msra.mxu1 %v10590_v6  ;;  %v5122_v15 = vrot.slane %v13193_v18, 1  ;;  %v13231_v6 = vld [vmem:[#allocation3 + $0x74] ss:$0 sps:$4 sm:$0x11]   ;;  %v5132_v23 = vsel %vm1482_vm9, %v5130_v21, %v5131_v56  ;;  %v5146_v56 = vrot.slane %v13272_v52, 1 }
 0x398   : > { %9369 = vmatprep.subr.bf16.mxu1 %v10593_v63  ;;  %v10624_v63 = vld [vmem:[#allocation10 + $0x1b8] sm:$0xff]   ;;  %v5134_v37 = vrot.slane %v13231_v6, 1 }
 0x399   : > { %v5123_v24 = vsel %vm1482_vm9, %v5121_v43, %v5122_v15  ;;  %v13258_v43 = vld [vmem:[#allocation3 + $0x98] ss:$0 sps:$4 sm:$0x11]  }
 0x39a   : > { %9733 = vmatmul.mubr.bf16.gmra.mrb[100].mxu1 %v5117_v13  ;;  %v4949_v13 = vshll.u32 %v13181_v28, 16 }
 0x39b   : > { %9736 = vmatprep.mubr.bf16.mxu1 %v5120_v45  ;;  %9370 = vmatpush3.bf16.msra.mxu1 %v10596_v5  ;;  %v5137_v5 = vrot.slane %v13236_v19, 1  ;;  %v5135_v45 = vsel %vm1482_vm9, %v5133_v60, %v5134_v37  ;;  %v13297_v60 = vld [vmem:[#allocation3 + $0x24] sm:$0xff]  }
 0x39c   : > { %9371 = vmatprep.subr.bf16.mxu1 %v10599_v49  ;;  %v4935_v49 = vshrl.u32 %v13175_v31, 16  ;;  %v4951_v57 = vrot.slane %v4949_v13, 1  ;;  %v4971_v13 = vshrl.u32 %v13196_v11, 16 }
 0x39e   : > { %6028 = vmatmul.mubr.bf16.gmra.mrb[220].mxu0 %v13149_v26  ;;  %v4925_v26 = vshll.u32 %v13160_v44, 16 }
 0x39f   : > { %6373 = vmatprep.mubr.bf16.mxu0 %v4909_v25  ;;  %9372 = vmatpush3.bf16.msra.mxu1 %v10602_v27  ;;  %v13251_v25 = vld [vmem:[#allocation3 + $0x84] sm:$0xff]   ;;  %v13253_v27 = vld [vmem:[#allocation3 + $0x8c] ss:$0 sps:$4 sm:$0x11]  }
 0x3a0   : > { %9373 = vmatprep.subr.bf16.mxu1 %v10605_v41  ;;  %v4927_v39 = vrot.slane %v4925_v26, 1  ;;  %v5138_v41 = vsel %vm1482_vm9, %v5136_v33, %v5137_v5  ;;  %v5139_v14 = vrot.slane %v13251_v25, 1  ;;  %v5140_v8 = vrot.slane %v13253_v27, 1 }
 0x3a1   : > { %v6864_v5 = vshll.u32 %v10626_v62, 16 }
 0x3a2   : > { %9737 = vmatmul.mubr.bf16.gmra.mrb[104].mxu1 %v5123_v24  ;;  %v4928_v53 = vor.u32 %v4927_v39, %v4923_v22  ;;  %v4961_v24 = vshll.u32 %v13189_v42, 16  ;;  %v13279_v39 = vld [vmem:[#allocation3 + $0x18] sm:$0xff]  }
 0x3a3   : > { %9740 = vmatprep.mubr.bf16.mxu1 %v5126_v4  ;;  %9374 = vmatpush3.bf16.msra.mxu1 %v10608_v38  ;;  %v5143_v38 = vrot.slane %v13258_v43, 1  ;;  %v13270_v4 = vld [vmem:[#allocation3 + $0x9c] sm:$0xff]  }
 0x3a4   : > { %9375 = vmatprep.subr.bf16.mxu1 %v10611_v61  ;;  %v4933_v0 = vsel %vm1273_vm4, %v4928_v53, %v4932_v36  ;;  %v4947_v61 = vshrl.u32 %v13181_v28, 16  ;;  %v4963_v1 = vrot.slane %v4961_v24, 1  ;;  %v5145_v21 = vrot.slane %v13270_v4, 1  ;;  %v13292_v36 = vld [vmem:[#allocation3 + $0xb4] sm:$0xff]  }
 0x3a5   : > { %v4966_v53 = vshll.u32 %v13193_v18, 16  ;;  %v6857_v18 = vshrl.u32 %v13279_v39, 16  ;;  %v4985_v24 = vshll.u32 %v13210_v55, 16 }
 0x3a6   : > { %6374 = vmatmul.mubr.bf16.vlgmr.msra.gmra.mrb[224].mxu0 %v13139_v48  ;;  %v10623_v48 = vld [vmem:[#allocation10 + $0x1f8] sm:$0xff]   ;;  %v4952_v26 = vor.u32 %v4951_v57, %v4947_v61  ;;  %v6871_v57 = vshll.u32 %v13297_v60, 16  ;;  %v7067_v61 = vrot.slane %v13297_v60, 1 }
 0x3a7   : > { %6381 = vmatprep.mubr.bf16.mxu0 %v4921_v47  ;;  %9376 = vmatpush3.bf16.msra.mxu1 %v10614_v20  ;;  %v5144_v20 = vsel %vm1482_vm9, %v5142_v59, %v5143_v38  ;;  %v13277_v47 = vld [vmem:[#allocation3 + $0xb0] ss:$0 sps:$4 sm:$0x11]   ;;  %v4968_v37 = vrot.slane %v4966_v53, 1  ;;  %v4978_v59 = vshll.u32 %v13198_v32, 16  ;;  %v7065_v38 = vrot.slane %v10626_v62, 1 }
 0x3a8   : > { %9377 = vmatprep.subr.bf16.mxu1 %v10617_v46  ;;  %v13275_v46 = vld [vmem:[#allocation3 + $0xa8] sm:$0xff]   ;;  %v4957_v58 = vsel %vm1273_vm4, %v4952_v26, %v4956_v16  ;;  %v5149_v7 = vrot.slane %v13277_v47, 1  ;;  %v7070_v26 = vrot.slane %v13300_v35, 1  ;;  %v4983_v62 = vshrl.u32 %v13210_v55, 16 }
 0x3a9   : > { %v5148_v22 = vrot.slane %v13275_v46, 1 }
 0x3aa   : > { %9741 = vmatmul.mubr.bf16.gmra.mrb[108].mxu1 %v5129_v29 }
 0x3ab   : > { %9744 = vmatprep.mubr.bf16.mxu1 %v5132_v23  ;;  %9378 = vmatpush3.bf16.msra.mxu1 %v10620_v51  ;;  %v6859_v51 = vshll.u32 %v13279_v39, 16  ;;  %v5147_v23 = vsel %vm1482_vm9, %v5145_v21, %v5146_v56  ;;  %v4980_v21 = vrot.slane %v4978_v59, 1 }
 0x3ac   : > { %9379 = vmatprep.subr.bf16.mxu1 %v10623_v48  ;;  %v4959_v48 = vshrl.u32 %v13189_v42, 16 }
 0x3ae   : > { %6382 = vmatmul.mubr.bf16.gmra.mrb[228].mxu0 %v13158_v12  ;;  %v4940_v12 = vor.u32 %v4939_v34, %v4935_v49  ;;  %v4964_v29 = vor.u32 %v4963_v1, %v4959_v48  ;;  %v6861_v34 = vrot.slane %v6859_v51, 1  ;;  %v10629_v49 = vld [vmem:[#allocation3 + $0x2c] ss:$0 sps:$4 sm:$0x11]   ;;  %v6873_v1 = vrot.slane %v6871_v57, 1 }
 0x3af   : > { %6389 = vmatprep.mubr.bf16.mxu0 %v4933_v0  ;;  %9380 = vmatpush3.bf16.msra.mxu1 %v10624_v63  ;;  %v13294_v63 = vld [vmem:[#allocation3 + $0xbc] ss:$0 sps:$4 sm:$0x11]   ;;  %v5150_v0 = vsel %vm1482_vm9, %v5148_v22, %v5149_v7  ;;  %v7068_v9 = vrot.slane %v10629_v49, 1  ;;  %v6869_v22 = vshrl.u32 %v13297_v60, 16  ;;  %v6876_v7 = vshll.u32 %v10629_v49, 16 }
 0x3b0   : > { %9760 = vmatprep.subr.bf16.mxu1 %v13238_v2  ;;  %v4945_v15 = vsel %vm1273_vm4, %v4940_v12, %v4944_v17  ;;  %v4969_v12 = vsel %vm1273_vm4, %v4964_v29, %v4968_v37  ;;  %v10631_v17 = vld [vmem:[#allocation3 + $0x38] ss:$0 sps:$4 sm:$0x11]   ;;  %v4987_v48 = vrot.slane %v4985_v24, 1  ;;  %v4990_v29 = vshll.u32 %v13212_v10, 16  ;;  %v10637_v10 = vld [vmem:[#allocation10 + $0x210] sm:$0xff]  }
 0x3b1   : > { %v7071_v16 = vrot.slane %v10631_v17, 1  ;;  %v13319_v32 = vsel %vm1482_vm9, %v7067_v61, %v7068_v9  ;;  %v6874_v53 = vor.u32 %v6873_v1, %v6869_v22  ;;  %v4997_v37 = vshll.u32 %v13215_v30, 16  ;;  %v13356_v22 = vld [vmem:[#allocation3 + $0x50] ss:$0 sps:$4 sm:$0x11]  }
 0x3b2   : > { %9745 = vmatmul.mubr.bf16.gmra.mrb[112].mxu1 %v5135_v45  ;;  %v5151_v45 = vrot.slane %v13292_v36, 1  ;;  %v6881_v49 = vshrl.u32 %v13300_v35, 16  ;;  %v5002_v57 = vshll.u32 %v13217_v40, 16  ;;  %v5014_v1 = vshll.u32 %v13231_v6, 16 }
 0x3b3   : > { %9748 = vmatprep.mubr.bf16.mxu1 %v5138_v41  ;;  %v5152_v41 = vrot.slane %v13294_v63, 1  ;;  %v13322_v56 = vsel %vm1482_vm9, %v7070_v26, %v7071_v16  ;;  %v10647_v26 = vld [vmem:[#allocation10 + $0x220] sm:$0xff]  }
 0x3b4   : > { %v5004_v61 = vrot.slane %v5002_v57, 1 }
 0x3b6   : > { %6390 = vmatmul.mubr.bf16.gmra.mrb[232].mxu0 %v13160_v44  ;;  %v5141_v44 = vsel %vm1482_vm9, %v5139_v14, %v5140_v8  ;;  %v7064_v14 = vrot.slane %v13279_v39, 1 }
 0x3b7   : > { %6397 = vmatprep.mubr.bf16.mxu0 %v4945_v15  ;;  %v6862_v15 = vor.u32 %v6861_v34, %v6857_v18  ;;  %v4988_v34 = vor.u32 %v4987_v48, %v4983_v62  ;;  %v13333_v18 = vld [vmem:[#allocation3 + $0x3c] sm:$0xff]   ;;  %v5016_v62 = vrot.slane %v5014_v1, 1 }
 0x3b8   : > { %v6893_v40 = vshrl.u32 %v13333_v18, 16 }
 0x3ba   : > { %9749 = vmatmul.mubr.bf16.gmra.mrb[116].mxu1 %v5141_v44  ;;  %v5153_v44 = vsel %vm1482_vm9, %v5151_v45, %v5152_v41  ;;  %v4999_v45 = vrot.slane %v4997_v37, 1  ;;  %v6895_v41 = vshll.u32 %v13333_v18, 16 }
 0x3bb   : > { %9752 = vmatprep.mubr.bf16.mxu1 %v5144_v20  ;;  %v13315_v20 = vsel %vm1482_vm9, %v7064_v14, %v7065_v38  ;;  %v13342_v14 = vld [vmem:[#allocation3 + $0x44] ss:$0 sps:$4 sm:$0x11]  }
 0x3bc   : > { %v6897_v38 = vrot.slane %v6895_v41, 1  ;;  %v6900_v9 = vshll.u32 %v13342_v14, 16 }
 0x3be   : > { %6398 = vmatmul.mubr.bf16.gmra.mrb[236].mxu0 %v13175_v31  ;;  %v4973_v31 = vshll.u32 %v13196_v11, 16 }
 0x3bf   : > { %6405 = vmatprep.mubr.bf16.mxu0 %v4957_v58 }
 0x3c0   : > { %v4975_v33 = vrot.slane %v4973_v31, 1  ;;  %v6883_v31 = vshll.u32 %v13300_v35, 16 }
 0x3c2   : > { %9753 = vmatmul.mubr.bf16.gmra.mrb[120].mxu1 %v5147_v23  ;;  %v4976_v8 = vor.u32 %v4975_v33, %v4971_v13  ;;  %v6878_v23 = vrot.slane %v6876_v7, 1  ;;  %v6885_v33 = vrot.slane %v6883_v31, 1  ;;  %v10652_v7 = vld [vmem:[#allocation10 + $0x228] sm:$0xff]   ;;  %v13361_v31 = vld [vmem:[#allocation3 + $0x54] sm:$0xff]  }
 0x3c3   : > { %9756 = vmatprep.mubr.bf16.mxu1 %v5150_v0  ;;  %v10632_v0 = vld [vmem:[#allocation10 + $0x208] sm:$0xff]   ;;  %v6919_v37 = vshll.u32 %v13361_v31, 16 }
 0x3c4   : > { %v4981_v51 = vsel %vm1273_vm4, %v4976_v8, %v4980_v21  ;;  %v6902_v21 = vrot.slane %v6900_v9, 1 }
 0x3c5   : > { %v6921_v57 = vrot.slane %v6919_v37, 1 }
 0x3c6   : > { %6406 = vmatmul.mubr.bf16.gmra.mrb[240].mxu0 %v13181_v28  ;;  %v6866_v28 = vrot.slane %v6864_v5, 1  ;;  %v4992_v5 = vrot.slane %v4990_v29, 1  ;;  %v6912_v29 = vshll.u32 %v13356_v22, 16 }
 0x3c7   : > { %6413 = vmatprep.mubr.bf16.mxu0 %v4969_v12  ;;  %v6888_v12 = vshll.u32 %v10631_v17, 16  ;;  %v10642_v17 = vld [vmem:[#allocation10 + $0x218] sm:$0xff]  }
 0x3c8   : > { %v6867_v58 = vsel %vm1273_vm4, %v6862_v15, %v6866_v28  ;;  %v4993_v13 = vsel %vm1273_vm4, %v4988_v34, %v4992_v5  ;;  %v4995_v15 = vshrl.u32 %v13215_v30, 16  ;;  %v13347_v28 = vld [vmem:[#allocation3 + $0x48] sm:$0xff]  }
 0x3c9   : > { %v6907_v16 = vshll.u32 %v13347_v28, 16  ;;  %v6905_v6 = vshrl.u32 %v13347_v28, 16 }
 0x3ca   : > { %9757 = vmatmul.mubr.bf16.gmra.mrb[124].mxu1 %v5153_v44  ;;  %v5000_v8 = vor.u32 %v4999_v45, %v4995_v15 }
 0x3cb   : > { %7353 = vmatprep.mubr.bf16.mxu1 %v6867_v58  ;;  %v5007_v58 = vshrl.u32 %v13229_v54, 16 }
 0x3cc   : > { %v5005_v24 = vsel %vm1273_vm4, %v5000_v8, %v5004_v61 }
 0x3ce   : > { %6414 = vmatmul.mubr.bf16.gmra.mrb[244].mxu0 %v13189_v42  ;;  %v6879_v42 = vsel %vm1273_vm4, %v6874_v53, %v6878_v23  ;;  %v6909_v53 = vrot.slane %v6907_v16, 1  ;;  %v10657_v23 = vld [vmem:[#allocation10 + $0x230] sm:$0xff]  }
 0x3cf   : > { %6421 = vmatprep.mubr.bf16.mxu0 %v4981_v51 }
 0x3d2   : > { %7354 = vmatmul.mubr.bf16.vlgmr.msra.gmra.mrb[128].mxu1 %v13279_v39  ;;  %v6886_v39 = vor.u32 %v6885_v33, %v6881_v49  ;;  %v5026_v33 = vshll.u32 %v13236_v19, 16  ;;  %v6914_v49 = vrot.slane %v6912_v29, 1  ;;  %v13377_v19 = vld [vmem:[#allocation3 + $0x60] sm:$0xff]  }
 0x3d3   : > { %7361 = vmatprep.mubr.bf16.mxu1 %v6879_v42  ;;  %9761 = vmatpush3.bf16.msra.mxu1 %v13238_v2  ;;  %v6890_v2 = vrot.slane %v6888_v12, 1  ;;  %v5019_v42 = vshrl.u32 %v13234_v3, 16  ;;  %v13370_v12 = vld [vmem:[#allocation3 + $0x5c] ss:$0 sps:$4 sm:$0x11]   ;;  %v6931_v9 = vshll.u32 %v13377_v19, 16 }
 0x3d4   : > { %9762 = vmatprep.subr.bf16.mxu1 %v10632_v0 }
 0x3d5   : > { %v6891_v59 = vsel %vm1273_vm4, %v6886_v39, %v6890_v2  ;;  %v5028_v2 = vrot.slane %v5026_v33, 1  ;;  %v6933_v1 = vrot.slane %v6931_v9, 1  ;;  %v13404_v33 = vld [vmem:[#allocation3 + $0x74] ss:$0 sps:$4 sm:$0x11]  }
 0x3d6   : > { %6422 = vmatmul.mubr.bf16.gmra.mrb[248].mxu0 %v13196_v11  ;;  %v5009_v11 = vshll.u32 %v13229_v54, 16 }
 0x3d7   : > { %6429 = vmatprep.mubr.bf16.mxu0 %v4993_v13  ;;  %9763 = vmatpush3.bf16.msra.mxu1 %v10632_v0 }
 0x3d8   : > { %9764 = vmatprep.subr.bf16.mxu1 %v10637_v10  ;;  %v5011_v44 = vrot.slane %v5009_v11, 1  ;;  %v6917_v11 = vshrl.u32 %v13361_v31, 16 }
 0x3da   : > { %7362 = vmatmul.mubr.bf16.gmra.mrb[132].mxu1 %v13297_v60  ;;  %v6898_v60 = vor.u32 %v6897_v38, %v6893_v40  ;;  %v5012_v51 = vor.u32 %v5011_v44, %v5007_v58  ;;  %v6922_v40 = vor.u32 %v6921_v57, %v6917_v11  ;;  %v5045_v58 = vshll.u32 %v13256_v50, 16 }
 0x3db   : > { %7369 = vmatprep.mubr.bf16.mxu1 %v6891_v59  ;;  %9765 = vmatpush3.bf16.msra.mxu1 %v10637_v10  ;;  %v10662_v10 = vld [vmem:[#allocation10 + $0x238] sm:$0xff]   ;;  %v6924_v59 = vshll.u32 %v13370_v12, 16  ;;  %v5055_v11 = vshrl.u32 %v13270_v4, 16 }
 0x3dc   : > { %9766 = vmatprep.subr.bf16.mxu1 %v10642_v17  ;;  %v6903_v48 = vsel %vm1273_vm4, %v6898_v60, %v6902_v21  ;;  %v5017_v0 = vsel %vm1273_vm4, %v5012_v51, %v5016_v62  ;;  %v13388_v60 = vld [vmem:[#allocation3 + $0x68] ss:$0 sps:$4 sm:$0x11]   ;;  %v13393_v21 = vld [vmem:[#allocation3 + $0x6c] sm:$0xff]   ;;  %v6929_v51 = vshrl.u32 %v13377_v19, 16 }
 0x3dd   : > { %v6926_v44 = vrot.slane %v6924_v59, 1  ;;  %v6943_v29 = vshll.u32 %v13393_v21, 16  ;;  %v5062_v59 = vshll.u32 %v13272_v52, 16 }
 0x3de   : > { %6430 = vmatmul.mubr.bf16.gmra.mrb[252].mxu0 %v13210_v55  ;;  %v5021_v55 = vshll.u32 %v13234_v3, 16 }
 0x3df   : > { %6437 = vmatprep.mubr.bf16.mxu0 %v5005_v24  ;;  %9767 = vmatpush3.bf16.msra.mxu1 %v10642_v17  ;;  %v5038_v24 = vshll.u32 %v13253_v27, 16  ;;  %v6936_v27 = vshll.u32 %v13388_v60, 16 }
 0x3e0   : > { %9768 = vmatprep.subr.bf16.mxu1 %v10647_v26  ;;  %v5023_v34 = vrot.slane %v5021_v55, 1 }
 0x3e2   : > { %7370 = vmatmul.mubr.bf16.gmra.mrb[136].mxu1 %v13300_v35  ;;  %v6910_v35 = vor.u32 %v6909_v53, %v6905_v6  ;;  %v5024_v13 = vor.u32 %v5023_v34, %v5019_v42  ;;  %v6934_v6 = vor.u32 %v6933_v1, %v6929_v51  ;;  %v6938_v42 = vrot.slane %v6936_v27, 1 }
 0x3e3   : > { %7377 = vmatprep.mubr.bf16.mxu1 %v6903_v48  ;;  %9769 = vmatpush3.bf16.msra.mxu1 %v10647_v26  ;;  %v5031_v26 = vshrl.u32 %v13251_v25, 16  ;;  %v5047_v48 = vrot.slane %v5045_v58, 1  ;;  %v5064_v1 = vrot.slane %v5062_v59, 1 }
 0x3e4   : > { %9770 = vmatprep.subr.bf16.mxu1 %v10652_v7  ;;  %v6915_v41 = vsel %vm1273_vm4, %v6910_v35, %v6914_v49  ;;  %v5029_v38 = vsel %vm1273_vm4, %v5024_v13, %v5028_v2  ;;  %v5057_v49 = vshll.u32 %v13270_v4, 16  ;;  %v6945_v13 = vrot.slane %v6943_v29, 1 }
 0x3e5   : > { %v5074_v29 = vshll.u32 %v13277_v47, 16 }
 0x3e6   : > { %6438 = vmatmul.mubr.bf16.gmra.mrb[0].mxu0 %v13215_v30  ;;  %v5033_v30 = vshll.u32 %v13251_v25, 16  ;;  %v5059_v57 = vrot.slane %v5057_v49, 1 }
 0x3e7   : > { %6445 = vmatprep.mubr.bf16.mxu0 %v5017_v0  ;;  %9771 = vmatpush3.bf16.msra.mxu1 %v10652_v7  ;;  %v5040_v7 = vrot.slane %v5038_v24, 1  ;;  %v5050_v0 = vshll.u32 %v13258_v43, 16  ;;  %v5069_v24 = vshll.u32 %v13275_v46, 16 }
 0x3e8   : > { %v9109_v5 = vpop.f32.mrb[160].mxu0  ;;  %9772 = vmatprep.subr.bf16.mxu1 %v10657_v23  ;;  %v5035_v61 = vrot.slane %v5033_v30, 1  ;;  %v13411_v30 = vld [vmem:[#allocation3 + $0x78] sm:$0xff]   ;;  %v5060_v9 = vor.u32 %v5059_v57, %v5055_v11 }
 0x3e9   : > { %v9110_v45 = vpop.f32.mrb[161].mxu0  ;;  %v5052_v43 = vrot.slane %v5050_v0, 1  ;;  %v6953_v51 = vshrl.u32 %v13411_v30, 16  ;;  %v13438_v0 = vld [vmem:[#allocation3 + $0x8c] ss:$0 sps:$4 sm:$0x11]  }
 0x3ea   : > { %7378 = vmatmul.mubr.bf16.gmra.mrb[140].mxu1 %v13333_v18  ;;  %v13374_v39 = vadd.f32 %v9110_v45, %v9109_v5  ;;  %v9112_v15 = vpop.f32.mrb[162].mxu0  ;;  %v5036_v16 = vor.u32 %v5035_v61, %v5031_v26  ;;  %v6941_v45 = vshrl.u32 %v13393_v21, 16 }
 0x3eb   : > { %7385 = vmatprep.mubr.bf16.mxu1 %v6915_v41  ;;  %v9113_v17 = vpop.f32.mrb[163].mxu0  ;;  %9773 = vmatpush3.bf16.msra.mxu1 %v10657_v23  ;;  %v5043_v23 = vshrl.u32 %v13256_v50, 16  ;;  %v6948_v41 = vshll.u32 %v13404_v33, 16 }
 0x3ec   : > { %v13379_v8 = vadd.f32 %v9113_v17, %v9112_v15  ;;  %9774 = vmatprep.subr.bf16.mxu1 %v10662_v10  ;;  %v5041_v55 = vsel %vm1273_vm4, %v5036_v16, %v5040_v7  ;;  %v6946_v2 = vor.u32 %v6945_v13, %v6941_v45  ;;  %v6955_v17 = vshll.u32 %v13411_v30, 16 }
 0x3ed   : > { %v6950_v61 = vrot.slane %v6948_v41, 1  ;;  %v5076_v13 = vrot.slane %v5074_v29, 1 }
 0x3ee   : > { %6446 = vmatmul.mubr.bf16.gmra.mrb[4].mxu0 %v13229_v54  ;;  %v6927_v54 = vsel %vm1273_vm4, %v6922_v40, %v6926_v44  ;;  %v13420_v40 = vld [vmem:[#allocation3 + $0x80] ss:$0 sps:$4 sm:$0x11]   ;;  %v6957_v58 = vrot.slane %v6955_v17, 1 }
 0x3ef   : > { %6453 = vmatprep.mubr.bf16.mxu0 %v5029_v38  ;;  %9775 = vmatpush3.bf16.msra.mxu1 %v10662_v10  ;;  %v6939_v10 = vsel %vm1273_vm4, %v6934_v6, %v6938_v42  ;;  %v6951_v16 = vsel %vm1273_vm4, %v6946_v2, %v6950_v61  ;;  %v6960_v27 = vshll.u32 %v13420_v40, 16  ;;  %v5067_v6 = vshrl.u32 %v13275_v46, 16 }
 0x3f0   : > { %v5081_v42 = vshll.u32 %v13292_v36, 16  ;;  %v5086_v61 = vshll.u32 %v13294_v63, 16 }
 0x3f2   : > { %7386 = vmatmul.mubr.bf16.gmra.mrb[144].mxu1 %v13347_v28  ;;  %v5083_v17 = vrot.slane %v5081_v42, 1 }
 0x3f3   : > { %7393 = vmatprep.mubr.bf16.mxu1 %v6927_v54  ;;  %v13427_v54 = vld [vmem:[#allocation3 + $0x84] sm:$0xff]  }
 0x3f4   : > { %v6965_v41 = vshrl.u32 %v13427_v54, 16 }
 0x3f5   : > { %v9115_v53 = vpop.f32.mrb[164].mxu0 }
 0x3f6   : > { %6454 = vmatmul.mubr.bf16.gmra.mrb[8].mxu0 %v13234_v3  ;;  %v9116_v62 = vpop.f32.mrb[165].mxu0  ;;  %v5048_v3 = vor.u32 %v5047_v48, %v5043_v23  ;;  %v5071_v48 = vrot.slane %v5069_v24, 1  ;;  %v6962_v23 = vrot.slane %v6960_v27, 1 }
 0x3f7   : > { %6461 = vmatprep.mubr.bf16.mxu0 %v5041_v55  ;;  %v13402_v34 = vadd.f32 %v9116_v62, %v9115_v53  ;;  %v9118_v35 = vpop.f32.mrb[166].mxu0  ;;  %v5065_v55 = vsel %vm1273_vm4, %v5060_v9, %v5064_v1  ;;  %v6958_v53 = vor.u32 %v6957_v58, %v6953_v51  ;;  %v6967_v62 = vshll.u32 %v13427_v54, 16  ;;  %v13460_v1 = vld [vmem:[#allocation3 + $0x9c] sm:$0xff]  }
 0x3f8   : > { %v9119_v37 = vpop.f32.mrb[167].mxu0  ;;  %v5053_v15 = vsel %vm1273_vm4, %v5048_v3, %v5052_v43  ;;  %v6991_v29 = vshll.u32 %v13460_v1, 16 }
 0x3f9   : > { %v13406_v5 = vadd.f32 %v9119_v37, %v9118_v35  ;;  %v5072_v35 = vor.u32 %v5071_v48, %v5067_v6  ;;  %v6969_v49 = vrot.slane %v6967_v62, 1 }
 0x3fa   : > { %7394 = vmatmul.mubr.bf16.gmra.mrb[148].mxu1 %v13361_v31 }
 0x3fb   : > { %7401 = vmatprep.mubr.bf16.mxu1 %v6939_v10  ;;  %v13443_v10 = vld [vmem:[#allocation3 + $0x90] sm:$0xff]   ;;  %v5077_v57 = vsel %vm1273_vm4, %v5072_v35, %v5076_v13  ;;  %v6970_v11 = vor.u32 %v6969_v49, %v6965_v41  ;;  %v13471_v35 = vld [vmem:[#allocation3 + $0xa4] ss:$0 sps:$4 sm:$0x11]   ;;  %v13475_v49 = vld [vmem:[#allocation3 + $0xa8] sm:$0xff]  }
 0x3fc   : > { %v6979_v59 = vshll.u32 %v13443_v10, 16  ;;  %v6977_v63 = vshrl.u32 %v13443_v10, 16  ;;  %v6996_v41 = vshll.u32 %v13471_v35, 16 }
 0x3fe   : > { %6462 = vmatmul.mubr.bf16.gmra.mrb[12].mxu0 %v13251_v25  ;;  %v6981_v58 = vrot.slane %v6979_v59, 1  ;;  %v13485_v59 = vld [vmem:[#allocation3 + $0xb0] ss:$0 sps:$4 sm:$0x11]  }
 0x3ff   : > { %6469 = vmatprep.mubr.bf16.mxu0 %v5053_v15  ;;  %v6972_v15 = vshll.u32 %v13438_v0, 16 }
 0x400   : > { %v6982_v6 = vor.u32 %v6981_v58, %v6977_v63  ;;  %v7001_v58 = vshrl.u32 %v13475_v49, 16 }
 0x401   : > { %v9121_v38 = vpop.f32.mrb[168].mxu0  ;;  %v6974_v9 = vrot.slane %v6972_v15, 1 }
 0x402   : > { %v9122_v26 = vpop.f32.mrb[169].mxu0  ;;  %7402 = vmatmul.mubr.bf16.gmra.mrb[152].mxu1 %v13377_v19 }
 0x403   : > { %v13423_v25 = vadd.f32 %v9122_v26, %v9121_v38  ;;  %v9124_v44 = vpop.f32.mrb[170].mxu0  ;;  %7409 = vmatprep.mubr.bf16.mxu1 %v6951_v16  ;;  %v5079_v38 = vshrl.u32 %v13292_v36, 16  ;;  %v13456_v26 = vld [vmem:[#allocation3 + $0x98] ss:$0 sps:$4 sm:$0x11]  }
 0x404   : > { %v9125_v52 = vpop.f32.mrb[171].mxu0  ;;  %v6984_v48 = vshll.u32 %v13456_v26, 16 }
 0x405   : > { %v13429_v7 = vadd.f32 %v9125_v52, %v9124_v44  ;;  %v5084_v24 = vor.u32 %v5083_v17, %v5079_v38  ;;  %v5088_v52 = vrot.slane %v5086_v61, 1  ;;  %v7003_v17 = vshll.u32 %v13475_v49, 16 }
 0x406   : > { %6470 = vmatmul.mubr.bf16.gmra.mrb[16].mxu0 %v13256_v50  ;;  %v6963_v50 = vsel %vm1273_vm4, %v6958_v53, %v6962_v23  ;;  %v6986_v23 = vrot.slane %v6984_v48, 1 }
 0x407   : > { %6477 = vmatprep.mubr.bf16.mxu0 %v5065_v55  ;;  %v5089_v53 = vsel %vm1273_vm4, %v5084_v24, %v5088_v52  ;;  %v7005_v24 = vrot.slane %v7003_v17, 1  ;;  %v7008_v52 = vshll.u32 %v13485_v59, 16 }
 0x409   : > { %v9127_v37 = vpop.f32.mrb[172].mxu0  ;;  %v7010_v48 = vrot.slane %v7008_v52, 1 }
 0x40a   : > { %v9128_v3 = vpop.f32.mrb[173].mxu0  ;;  %7410 = vmatmul.mubr.bf16.gmra.mrb[156].mxu1 %v13393_v21 }
 0x40b   : > { %v13445_v43 = vadd.f32 %v9128_v3, %v9127_v37  ;;  %v9130_v45 = vpop.f32.mrb[174].mxu0  ;;  %7417 = vmatprep.mubr.bf16.mxu1 %v6963_v50  ;;  %v6987_v3 = vsel %vm1273_vm4, %v6982_v6, %v6986_v23  ;;  %v6993_v50 = vrot.slane %v6991_v29, 1 }
 0x40c   : > { %v9131_v47 = vpop.f32.mrb[175].mxu0 }
 0x40d   : > { %v13451_v2 = vadd.f32 %v9131_v47, %v9130_v45  ;;  %v6989_v47 = vshrl.u32 %v13460_v1, 16 }
 0x40e   : > { %6478 = vmatmul.mubr.bf16.gmra.mrb[20].mxu0 %v13270_v4  ;;  %v6975_v4 = vsel %vm1273_vm4, %v6970_v11, %v6974_v9  ;;  %v6998_v11 = vrot.slane %v6996_v41, 1 }
 0x40f   : > { %6485 = vmatprep.mubr.bf16.mxu0 %v5077_v57  ;;  %v6994_v57 = vor.u32 %v6993_v50, %v6989_v47 }
 0x411   : > { %v9133_v44 = vpop.f32.mrb[176].mxu0  ;;  %v6999_v9 = vsel %vm1273_vm4, %v6994_v57, %v6998_v11 }
 0x412   : > { %v9134_v16 = vpop.f32.mrb[177].mxu0  ;;  %7418 = vmatmul.mubr.bf16.gmra.mrb[160].mxu1 %v13411_v30 }
 0x413   : > { %v13462_v51 = vadd.f32 %v9134_v16, %v9133_v44  ;;  %v9136_v27 = vpop.f32.mrb[178].mxu0  ;;  %7425 = vmatprep.mubr.bf16.mxu1 %v6975_v4  ;;  %v13489_v44 = vld [vmem:[#allocation3 + $0xb4] sm:$0xff]  }
 0x414   : > { %v9137_v55 = vpop.f32.mrb[179].mxu0  ;;  %v7015_v63 = vshll.u32 %v13489_v44, 16 }
 0x415   : > { %v13468_v62 = vadd.f32 %v9137_v55, %v9136_v27  ;;  %v7006_v55 = vor.u32 %v7005_v24, %v7001_v58 }
 0x416   : > { %6486 = vmatmul.mubr.bf16.gmra.mrb[24].mxu0 %v13275_v46  ;;  %v7017_v23 = vrot.slane %v7015_v63, 1 }
 0x417   : > { %6493 = vmatprep.mubr.bf16.mxu0 %v5089_v53  ;;  %v13498_v53 = vld [vmem:[#allocation3 + $0xbc] ss:$0 sps:$4 sm:$0x11]   ;;  %v7011_v29 = vsel %vm1273_vm4, %v7006_v55, %v7010_v48  ;;  %v13521_v48 = vld [vmem:[#allocation3 + $0xd4] ss:$0 sps:$4 sm:$0x11]  }
 0x419   : > { %v9139_v37 = vpop.f32.mrb[180].mxu0 }
 0x41a   : > { %v9140_v42 = vpop.f32.mrb[181].mxu0  ;;  %7426 = vmatmul.mubr.bf16.gmra.mrb[164].mxu1 %v13427_v54 }
 0x41b   : > { %v13477_v46 = vadd.f32 %v9140_v42, %v9139_v37  ;;  %v9142_v13 = vpop.f32.mrb[182].mxu0  ;;  %7433 = vmatprep.mubr.bf16.mxu1 %v6987_v3  ;;  %v13502_v37 = vld [vmem:[#allocation3 + $0xc0] sm:$0xff]  }
 0x41c   : > { %v9143_v45 = vpop.f32.mrb[183].mxu0  ;;  %v7027_v17 = vshll.u32 %v13502_v37, 16  ;;  %v7025_v58 = vshrl.u32 %v13502_v37, 16 }
 0x41d   : > { %v13482_v15 = vadd.f32 %v9143_v45, %v9142_v13  ;;  %v7013_v13 = vshrl.u32 %v13489_v44, 16  ;;  %v7020_v45 = vshll.u32 %v13498_v53, 16 }
 0x41e   : > { %6494 = vmatmul.mubr.bf16.gmra.mrb[28].mxu0 %v13292_v36 }
 0x41f   : > { %v7018_v57 = vor.u32 %v7017_v23, %v7013_v13  ;;  %v7022_v11 = vrot.slane %v7020_v45, 1 }
 0x421   : > { %v7023_v24 = vsel %vm1273_vm4, %v7018_v57, %v7022_v11 }
 0x422   : > { %7434 = vmatmul.mubr.bf16.gmra.mrb[168].mxu1 %v13443_v10 }
 0x423   : > { %v9145_v38 = vpop.f32.mrb[184].mxu0  ;;  %7441 = vmatprep.mubr.bf16.mxu1 %v6999_v9 }
 0x424   : > { %v9146_v61 = vpop.f32.mrb[185].mxu0 }
 0x425   : > { %v13491_v16 = vadd.f32 %v9146_v61, %v9145_v38  ;;  %v9148_v36 = vpop.f32.mrb[186].mxu0  ;;  %v13511_v38 = vld [vmem:[#allocation3 + $0xc8] ss:$0 sps:$4 sm:$0x11]   ;;  %v13513_v61 = vld [vmem:[#allocation3 + $0xcc] sm:$0xff]  }
 0x426   : > { %v9149_v4 = vpop.f32.mrb[187].mxu0  ;;  %v7032_v63 = vshll.u32 %v13511_v38, 16  ;;  %v7037_v13 = vshrl.u32 %v13513_v61, 16 }
 0x427   : > { %v13495_v27 = vadd.f32 %v9149_v4, %v9148_v36  ;;  %v7029_v36 = vrot.slane %v7027_v17, 1 }
 0x42a   : > { %7442 = vmatmul.mubr.bf16.gmra.mrb[172].mxu1 %v13460_v1 }
 0x42b   : > { %v9151_v6 = vpop.f32.mrb[188].mxu0  ;;  %7449 = vmatprep.mubr.bf16.mxu1 %v7011_v29 }
 0x42c   : > { %v9152_v42 = vpop.f32.mrb[189].mxu0 }
 0x42d   : > { %v13504_v3 = vadd.f32 %v9152_v42, %v9151_v6  ;;  %v9154_v50 = vpop.f32.mrb[190].mxu0  ;;  %v7039_v6 = vshll.u32 %v13513_v61, 16  ;;  %v7030_v42 = vor.u32 %v7029_v36, %v7025_v58 }
 0x42e   : > { %v9155_v47 = vpop.f32.mrb[191].mxu0 }
 0x42f   : > { %v13508_v41 = vadd.f32 %v9155_v47, %v9154_v50  ;;  %v7034_v50 = vrot.slane %v7032_v63, 1  ;;  %v7041_v45 = vrot.slane %v7039_v6, 1  ;;  %v7044_v47 = vshll.u32 %v13521_v48, 16 }
 0x431   : > { %v7035_v57 = vsel %vm1273_vm4, %v7030_v42, %v7034_v50  ;;  %v7042_v11 = vor.u32 %v7041_v45, %v7037_v13 }
 0x432   : > { %7450 = vmatmul.mubr.bf16.gmra.mrb[176].mxu1 %v13475_v49 }
 0x433   : > { %v9157_v9 = vpop.f32.mrb[192].mxu0  ;;  %7457 = vmatprep.mubr.bf16.mxu1 %v7023_v24 }
 0x434   : > { %v9158_v4 = vpop.f32.mrb[193].mxu0 }
 0x435   : > { %v13518_v52 = vadd.f32 %v9158_v4, %v9157_v9  ;;  %v9160_v55 = vpop.f32.mrb[194].mxu0  ;;  %v7046_v9 = vrot.slane %v7044_v47, 1 }
 0x436   : > { %v9161_v29 = vpop.f32.mrb[195].mxu0 }
 0x437   : > { %v13524_v23 = vadd.f32 %v9161_v29, %v9160_v55  ;;  %v7047_v58 = vsel %vm1273_vm4, %v7042_v11, %v7046_v9 }
 0x439   : > { %14263 = vst [vmem:[#allocation38_spill] sm:$0xff] %v13524_v23 }
 0x43a   : > { %7458 = vmatmul.mubr.bf16.gmra.mrb[180].mxu1 %v13489_v44 }
 0x43b   : > { %7465 = vmatprep.mubr.bf16.mxu1 %v7035_v57 }
 0x43d   : > { %v9163_v17 = vpop.f32.mrb[196].mxu0 }
 0x43e   : > { %v9164_v24 = vpop.f32.mrb[197].mxu0 }
 0x43f   : > { %v13530_v4 = vadd.f32 %v9164_v24, %v9163_v17  ;;  %v9166_v55 = vpop.f32.mrb[198].mxu0  ;;  %v7073_v24 = vrot.slane %v13333_v18, 1  ;;  %v7079_v18 = vrot.slane %v13361_v31, 1  ;;  %v7085_v31 = vrot.slane %v13393_v21, 1 }
 0x440   : > { %v9167_v29 = vpop.f32.mrb[199].mxu0  ;;  %v7091_v21 = vrot.slane %v13427_v54, 1  ;;  %v7097_v54 = vrot.slane %v13460_v1, 1 }
 0x441   : > { %v13532_v36 = vadd.f32 %v9167_v29, %v9166_v55  ;;  %v7074_v55 = vrot.slane %v13342_v14, 1  ;;  %v7076_v29 = vrot.slane %v13347_v28, 1  ;;  %v7080_v14 = vrot.slane %v13370_v12, 1 }
 0x442   : > { %7466 = vmatmul.mubr.bf16.gmra.mrb[184].mxu1 %v13502_v37  ;;  %v7082_v28 = vrot.slane %v13377_v19, 1  ;;  %v7086_v12 = vrot.slane %v13404_v33, 1  ;;  %v7088_v19 = vrot.slane %v13411_v30, 1  ;;  %v7092_v33 = vrot.slane %v13438_v0, 1 }
 0x443   : > { %7473 = vmatprep.mubr.bf16.mxu1 %v7047_v58  ;;  %v7094_v30 = vrot.slane %v13443_v10, 1  ;;  %v7098_v0 = vrot.slane %v13471_v35, 1  ;;  %v7100_v10 = vrot.slane %v13475_v49, 1  ;;  %v7103_v35 = vrot.slane %v13489_v44, 1 }
 0x444   : > { %v7104_v49 = vrot.slane %v13498_v53, 1  ;;  %v7109_v44 = vrot.slane %v13513_v61, 1 }
 0x445   : > { %v9169_v63 = vpop.f32.mrb[200].mxu0 }
 0x446   : > { %v9170_v6 = vpop.f32.mrb[201].mxu0 }
 0x447   : > { %v13536_v23 = vadd.f32 %v9170_v6, %v9169_v63  ;;  %v9172_v42 = vpop.f32.mrb[202].mxu0  ;;  %v7075_v6 = vsel %vm1482_vm9, %v7073_v24, %v7074_v55 }
 0x448   : > { %v9173_v50 = vpop.f32.mrb[203].mxu0 }
 0x449   : > { %v13538_v13 = vadd.f32 %v9173_v50, %v9172_v42 }
 0x44a   : > { %7474 = vmatmul.mubr.bf16.gmra.mrb[188].mxu1 %v13513_v61 }
 0x44b   : > { %9776 = vmatprep.mubr.bf16.mxu1 %v13315_v20  ;;  %v7077_v20 = vrot.slane %v13356_v22, 1  ;;  %v7083_v22 = vrot.slane %v13388_v60, 1  ;;  %v7089_v60 = vrot.slane %v13420_v40, 1  ;;  %v7095_v40 = vrot.slane %v13456_v26, 1 }
 0x44c   : > { %v7101_v26 = vrot.slane %v13485_v59, 1 }
 0x451   : > { %v9175_v45 = vpop.f32.mrb[204].mxu0 }
 0x452   : > { %v9176_v47 = vpop.f32.mrb[205].mxu0  ;;  %9777 = vmatmul.mubr.bf16.vlgmr.msra.gmra.mrb[96].mxu1 %v13319_v32 }
 0x453   : > { %v13542_v57 = vadd.f32 %v9176_v47, %v9175_v45  ;;  %v9178_v17 = vpop.f32.mrb[206].mxu0  ;;  %9780 = vmatprep.mubr.bf16.mxu1 %v13322_v56  ;;  %v7078_v56 = vsel %vm1482_vm9, %v7076_v29, %v7077_v20  ;;  %v7084_v29 = vsel %vm1482_vm9, %v7082_v28, %v7083_v22 }
 0x454   : > { %v9179_v11 = vpop.f32.mrb[207].mxu0 }
 0x455   : > { %v13546_v9 = vadd.f32 %v9179_v11, %v9178_v17  ;;  %v7081_v11 = vsel %vm1482_vm9, %v7079_v18, %v7080_v14  ;;  %v7090_v18 = vsel %vm1482_vm9, %v7088_v19, %v7089_v60  ;;  %v7099_v60 = vsel %vm1482_vm9, %v7097_v54, %v7098_v0 }
 0x459   : > { %v9181_v58 = vpop.f32.mrb[208].mxu0 }
 0x45a   : > { %v9182_v63 = vpop.f32.mrb[209].mxu0  ;;  %9781 = vmatmul.mubr.bf16.gmra.mrb[100].mxu1 %v7075_v6 }
 0x45b   : > { %v13553_v42 = vadd.f32 %v9182_v63, %v9181_v58  ;;  %v9184_v32 = vpop.f32.mrb[210].mxu0  ;;  %9784 = vmatprep.mubr.bf16.mxu1 %v7078_v56 }
 0x45c   : > { %v9185_v50 = vpop.f32.mrb[211].mxu0 }
 0x45d   : > { %v13556_v45 = vadd.f32 %v9185_v50, %v9184_v32  ;;  %v7087_v32 = vsel %vm1482_vm9, %v7085_v31, %v7086_v12 }
 0x461   : > { %v9187_v47 = vpop.f32.mrb[212].mxu0 }
 0x462   : > { %v9188_v17 = vpop.f32.mrb[213].mxu0  ;;  %9785 = vmatmul.mubr.bf16.gmra.mrb[104].mxu1 %v7081_v11 }
 0x463   : > { %v13563_v24 = vadd.f32 %v9188_v17, %v9187_v47  ;;  %v9190_v55 = vpop.f32.mrb[214].mxu0  ;;  %9788 = vmatprep.mubr.bf16.mxu1 %v7084_v29  ;;  %v7093_v17 = vsel %vm1482_vm9, %v7091_v21, %v7092_v33  ;;  %v7096_v29 = vsel %vm1482_vm9, %v7094_v30, %v7095_v40  ;;  %v7107_v21 = vrot.slane %v13511_v38, 1 }
 0x464   : > { %v9191_v20 = vpop.f32.mrb[215].mxu0  ;;  %v7105_v40 = vsel %vm1482_vm9, %v7103_v35, %v7104_v49 }
 0x465   : > { %v13566_v58 = vadd.f32 %v9191_v20, %v9190_v55 }
 0x469   : > { %v9193_v63 = vpop.f32.mrb[216].mxu0 }
 0x46a   : > { %v9194_v6 = vpop.f32.mrb[217].mxu0  ;;  %9789 = vmatmul.mubr.bf16.gmra.mrb[108].mxu1 %v7087_v32  ;;  %v7102_v32 = vsel %vm1482_vm9, %v7100_v10, %v7101_v26 }
 0x46b   : > { %v13573_v56 = vadd.f32 %v9194_v6, %v9193_v63  ;;  %v9196_v50 = vpop.f32.mrb[218].mxu0  ;;  %9792 = vmatprep.mubr.bf16.mxu1 %v7090_v18 }
 0x46c   : > { %v9197_v14 = vpop.f32.mrb[219].mxu0 }
 0x46d   : > { %v13576_v28 = vadd.f32 %v9197_v14, %v9196_v50  ;;  %v7106_v14 = vrot.slane %v13502_v37, 1 }
 0x471   : > { %v9199_v22 = vpop.f32.mrb[220].mxu0 }
 0x472   : > { %v9200_v47 = vpop.f32.mrb[221].mxu0  ;;  %9793 = vmatmul.mubr.bf16.gmra.mrb[112].mxu1 %v7093_v17 }
 0x473   : > { %v13583_v11 = vadd.f32 %v9200_v47, %v9199_v22  ;;  %v9202_v55 = vpop.f32.mrb[222].mxu0  ;;  %9796 = vmatprep.mubr.bf16.mxu1 %v7096_v29 }
 0x474   : > { %v9203_v20 = vpop.f32.mrb[223].mxu0 }
 0x475   : > { %v13586_v31 = vadd.f32 %v9203_v20, %v9202_v55 }
 0x479   : > { %v9245_v12 = vpop.f32.mrb[224].mxu0 }
 0x47a   : > { %v9246_v19 = vpop.f32.mrb[225].mxu0  ;;  %9797 = vmatmul.mubr.bf16.gmra.mrb[116].mxu1 %v7099_v60 }
 0x47b   : > { %v9247_v63 = vadd.f32 %v9246_v19, %v9245_v12  ;;  %v9248_v6 = vpop.f32.mrb[226].mxu0  ;;  %9800 = vmatprep.mubr.bf16.mxu1 %v7102_v32 }
 0x47c   : > { %v9249_v50 = vpop.f32.mrb[227].mxu0 }
 0x47d   : > { %v13595_v18 = vadd.f32 %v9247_v63, %v13374_v39  ;;  %v9250_v1 = vadd.f32 %v9249_v50, %v9248_v6  ;;  %v7108_v39 = vsel %vm1482_vm9, %v7106_v14, %v7107_v21 }
 0x47f   : > { %v13600_v59 = vadd.f32 %v9250_v1, %v13379_v8  ;;  %v7110_v8 = vrot.slane %v13521_v48, 1 }
 0x481   : > { %v9251_v33 = vpop.f32.mrb[228].mxu0  ;;  %v7111_v55 = vsel %vm1482_vm9, %v7109_v44, %v7110_v8 }
 0x482   : > { %v9252_v30 = vpop.f32.mrb[229].mxu0  ;;  %9801 = vmatmul.mubr.bf16.gmra.mrb[120].mxu1 %v7105_v40 }
 0x483   : > { %v9253_v22 = vadd.f32 %v9252_v30, %v9251_v33  ;;  %v9254_v47 = vpop.f32.mrb[230].mxu0  ;;  %9804 = vmatprep.mubr.bf16.mxu1 %v7108_v39 }
 0x484   : > { %v9255_v17 = vpop.f32.mrb[231].mxu0 }
 0x485   : > { %v10000_v53 = vadd.f32 %v9253_v22, %v13402_v34  ;;  %v9256_v37 = vadd.f32 %v9255_v17, %v9254_v47 }
 0x487   : > { %v13610_v38 = vadd.f32 %v9256_v37, %v13406_v5 }
 0x489   : > { %v9257_v29 = vpop.f32.mrb[232].mxu0 }
 0x48a   : > { %v9258_v20 = vpop.f32.mrb[233].mxu0  ;;  %9805 = vmatmul.mubr.bf16.gmra.mrb[124].mxu1 %v7111_v55 }
 0x48b   : > { %v9259_v54 = vadd.f32 %v9258_v20, %v9257_v29  ;;  %v9260_v0 = vpop.f32.mrb[234].mxu0 }
 0x48c   : > { %v9261_v10 = vpop.f32.mrb[235].mxu0 }
 0x48d   : > { %v13614_v26 = vadd.f32 %v9259_v54, %v13423_v25  ;;  %v9262_v61 = vadd.f32 %v9261_v10, %v9260_v0 }
 0x48f   : > { %v13617_v48 = vadd.f32 %v9262_v61, %v13429_v7 }
 0x491   : > { %v9263_v34 = vpop.f32.mrb[236].mxu0 }
 0x492   : > { %v9264_v12 = vpop.f32.mrb[237].mxu0 }
 0x493   : > { %v9265_v19 = vadd.f32 %v9264_v12, %v9263_v34  ;;  %v9266_v5 = vpop.f32.mrb[238].mxu0 }
 0x494   : > { %v9267_v60 = vpop.f32.mrb[239].mxu0 }
 0x495   : > { %v13620_v63 = vadd.f32 %v9265_v19, %v13445_v43  ;;  %v9268_v6 = vadd.f32 %v9267_v60, %v9266_v5 }
 0x497   : > { %v13623_v32 = vadd.f32 %v9268_v6, %v13451_v2 }
 0x499   : > { %v9269_v50 = vpop.f32.mrb[240].mxu0 }
 0x49a   : > { %v9270_v1 = vpop.f32.mrb[241].mxu0 }
 0x49b   : > { %v9271_v25 = vadd.f32 %v9270_v1, %v9269_v50  ;;  %v9272_v35 = vpop.f32.mrb[242].mxu0 }
 0x49c   : > { %v9273_v49 = vpop.f32.mrb[243].mxu0 }
 0x49d   : > { %v13626_v7 = vadd.f32 %v9271_v25, %v13462_v51  ;;  %v9274_v14 = vadd.f32 %v9273_v49, %v9272_v35 }
 0x49f   : > { %v13629_v21 = vadd.f32 %v9274_v14, %v13468_v62 }
 0x4a1   : > { %v9275_v33 = vpop.f32.mrb[244].mxu0 }
 0x4a2   : > { %v9276_v30 = vpop.f32.mrb[245].mxu0 }
 0x4a3   : > { %v9277_v43 = vadd.f32 %v9276_v30, %v9275_v33  ;;  %v9278_v40 = vpop.f32.mrb[246].mxu0 }
 0x4a4   : > { %v9279_v22 = vpop.f32.mrb[247].mxu0 }
 0x4a5   : > { %v13632_v2 = vadd.f32 %v9277_v43, %v13477_v46  ;;  %v9280_v47 = vadd.f32 %v9279_v22, %v9278_v40  ;;  %v9381_v39 = vpop.f32.mrb[128].mxu1 }
 0x4a6   : > { %v9382_v44 = vpop.f32.mrb[129].mxu1 }
 0x4a7   : > { %v13635_v17 = vadd.f32 %v9280_v47, %v13482_v15  ;;  %v9383_v51 = vadd.f32 %v9382_v44, %v9381_v39  ;;  %v9384_v8 = vpop.f32.mrb[130].mxu1 }
 0x4a8   : > { %v9385_v55 = vpop.f32.mrb[131].mxu1 }
 0x4a9   : > { %v9281_v37 = vpop.f32.mrb[248].mxu0  ;;  %v9386_v29 = vadd.f32 %v9385_v55, %v9384_v8  ;;  %v13638_v20 = vadd.f32 %v13595_v18, %v9383_v51 }
 0x4aa   : > { %v9282_v62 = vpop.f32.mrb[249].mxu0 }
 0x4ab   : > { %v9283_v54 = vadd.f32 %v9282_v62, %v9281_v37  ;;  %v9284_v0 = vpop.f32.mrb[250].mxu0  ;;  %v13641_v46 = vadd.f32 %v13600_v59, %v9386_v29  ;;  %v14264_v29 = vld [vmem:[#allocation38_spill] sm:$0xff] }
 0x4ac   : > { %v9285_v10 = vpop.f32.mrb[251].mxu0 }
 0x4ad   : > { %v13644_v61 = vadd.f32 %v9283_v54, %v13491_v16  ;;  %v9286_v15 = vadd.f32 %v9285_v10, %v9284_v0  ;;  %v9387_v34 = vpop.f32.mrb[132].mxu1 }
 0x4ae   : > { %v9388_v19 = vpop.f32.mrb[133].mxu1 }
 0x4af   : > { %v13647_v12 = vadd.f32 %v9286_v15, %v13495_v27  ;;  %v9389_v5 = vadd.f32 %v9388_v19, %v9387_v34  ;;  %v9390_v60 = vpop.f32.mrb[134].mxu1  ;;  %v7752_v34 = vld [vmem:[#allocation13] sm:$0xff] }
 0x4b0   : > { %v9391_v18 = vpop.f32.mrb[135].mxu1 }
 0x4b1   : > { %v9287_v6 = vpop.f32.mrb[252].mxu0  ;;  %v9392_v1 = vadd.f32 %v9391_v18, %v9390_v60  ;;  %v13649_v25 = vadd.f32 %v10000_v53, %v9389_v5  ;;  %v11088_v60 = vmov 0.0|0.0  }
 0x4b2   : > { %v9288_v50 = vpop.f32.mrb[253].mxu0  ;;  %9848 = vmatprep.subr.bf16.mxu1 %v11088_v60 }
 0x4b3   : > { %v9289_v35 = vadd.f32 %v9288_v50, %v9287_v6  ;;  %v9290_v59 = vpop.f32.mrb[254].mxu0  ;;  %v13652_v16 = vadd.f32 %v13610_v38, %v9392_v1 }
 0x4b4   : > { %v9291_v49 = vpop.f32.mrb[255].mxu0 }
 0x4b5   : > { %v13655_v14 = vadd.f32 %v9289_v35, %v13504_v3  ;;  %v9292_v27 = vadd.f32 %v9291_v49, %v9290_v59  ;;  %v9393_v33 = vpop.f32.mrb[136].mxu1 }
 0x4b6   : > { %v9394_v43 = vpop.f32.mrb[137].mxu1 }
 0x4b7   : > { %v13658_v30 = vadd.f32 %v9292_v27, %v13508_v41  ;;  %v9395_v40 = vadd.f32 %v9394_v43, %v9393_v33  ;;  %v9396_v22 = vpop.f32.mrb[138].mxu1 }
 0x4b8   : > { %v9397_v53 = vpop.f32.mrb[139].mxu1 }
 0x4b9   : > { %v9293_v47 = vpop.f32.mrb[0].mxu0  ;;  %v9398_v44 = vadd.f32 %v9397_v53, %v9396_v22  ;;  %v13661_v51 = vadd.f32 %v13614_v26, %v9395_v40  ;;  %v7753_v26 = vld [vmem:[#allocation13 + $0x8] sm:$0xff]  ;;  %v7755_v53 = vld [vmem:[#allocation13 + $0x18] sm:$0xff] }
 0x4ba   : > { %v9294_v39 = vpop.f32.mrb[1].mxu0 }
 0x4bb   : > { %v9295_v38 = vadd.f32 %v9294_v39, %v9293_v47  ;;  %v9296_v8 = vpop.f32.mrb[2].mxu0  ;;  %v13664_v3 = vadd.f32 %v13617_v48, %v9398_v44  ;;  %v9849_v48 = vpack.c.bf16 %v7753_v26, %v7752_v34  ;;  %v7754_v47 = vld [vmem:[#allocation13 + $0x10] sm:$0xff] }
 0x4bc   : > { %v9297_v37 = vpop.f32.mrb[3].mxu0 }
 0x4bd   : > { %v13667_v55 = vadd.f32 %v9295_v38, %v13518_v52  ;;  %v9298_v41 = vadd.f32 %v9297_v37, %v9296_v8  ;;  %v9399_v62 = vpop.f32.mrb[140].mxu1  ;;  %9850 = vmatpush3.bf16.msra.mxu1 %v9849_v48  ;;  %v9852_v38 = vpack.c.bf16 %v7755_v53, %v7754_v47 }
 0x4be   : > { %v9400_v0 = vpop.f32.mrb[141].mxu1  ;;  %9851 = vmatprep.subr.bf16.mxu1 %v11088_v60 }
 0x4bf   : > { %v13670_v54 = vadd.f32 %v9298_v41, %v14264_v29  ;;  %v9401_v10 = vadd.f32 %v9400_v0, %v9399_v62  ;;  %v9402_v15 = vpop.f32.mrb[142].mxu1 }
 0x4c0   : > { %v9403_v5 = vpop.f32.mrb[143].mxu1 }
 0x4c1   : > { %v9299_v19 = vpop.f32.mrb[4].mxu0  ;;  %v9404_v18 = vadd.f32 %v9403_v5, %v9402_v15  ;;  %v13674_v52 = vadd.f32 %v13620_v63, %v9401_v10  ;;  %9853 = vmatpush3.bf16.msra.mxu1 %v9852_v38  ;;  %v7757_v5 = vld [vmem:[#allocation13 + $0x28] sm:$0xff] }
 0x4c2   : > { %v9300_v6 = vpop.f32.mrb[5].mxu0  ;;  %9854 = vmatprep.subr.bf16.mxu1 %v11088_v60 }
 0x4c3   : > { %v9301_v50 = vadd.f32 %v9300_v6, %v9299_v19  ;;  %v9302_v1 = vpop.f32.mrb[6].mxu0  ;;  %v13677_v59 = vadd.f32 %v13623_v32, %v9404_v18  ;;  %v7756_v19 = vld [vmem:[#allocation13 + $0x20] sm:$0xff] }
 0x4c4   : > { %v9303_v35 = vpop.f32.mrb[7].mxu0  ;;  %v9855_v18 = vpack.c.bf16 %v7757_v5, %v7756_v19 }
 0x4c5   : > { %v13681_v49 = vadd.f32 %v9301_v50, %v13530_v4  ;;  %v9304_v27 = vadd.f32 %v9303_v35, %v9302_v1  ;;  %v9405_v33 = vpop.f32.mrb[144].mxu1 }
 0x4c6   : > { %v9406_v40 = vpop.f32.mrb[145].mxu1  ;;  %9856 = vmatpush3.bf16.msra.mxu1 %v9855_v18 }
 0x4c7   : > { %v13684_v43 = vadd.f32 %v9304_v27, %v13532_v36  ;;  %v9407_v63 = vadd.f32 %v9406_v40, %v9405_v33  ;;  %v9408_v22 = vpop.f32.mrb[146].mxu1  ;;  %9857 = vmatprep.subr.bf16.mxu1 %v11088_v60 }
 0x4c8   : > { %v9409_v44 = vpop.f32.mrb[147].mxu1 }
 0x4c9   : > { %v9305_v39 = vpop.f32.mrb[8].mxu0  ;;  %v9410_v8 = vadd.f32 %v9409_v44, %v9408_v22  ;;  %v13687_v37 = vadd.f32 %v13626_v7, %v9407_v63  ;;  %v7759_v44 = vld [vmem:[#allocation13 + $0x38] sm:$0xff] }
 0x4ca   : > { %v9306_v32 = vpop.f32.mrb[9].mxu0 }
 0x4cb   : > { %v9307_v4 = vadd.f32 %v9306_v32, %v9305_v39  ;;  %v9308_v41 = vpop.f32.mrb[10].mxu0  ;;  %v13690_v36 = vadd.f32 %v13629_v21, %v9410_v8  ;;  %v7758_v39 = vld [vmem:[#allocation13 + $0x30] sm:$0xff] }
 0x4cc   : > { %v9309_v62 = vpop.f32.mrb[11].mxu0  ;;  %v9858_v8 = vpack.c.bf16 %v7759_v44, %v7758_v39 }
 0x4cd   : > { %v13694_v29 = vadd.f32 %v9307_v4, %v13536_v23  ;;  %v9310_v0 = vadd.f32 %v9309_v62, %v9308_v41  ;;  %v9411_v10 = vpop.f32.mrb[148].mxu1 }
 0x4ce   : > { %v9412_v34 = vpop.f32.mrb[149].mxu1  ;;  %9859 = vmatpush3.bf16.msra.mxu1 %v9858_v8 }
 0x4cf   : > { %v13697_v15 = vadd.f32 %v9310_v0, %v13538_v13  ;;  %v9413_v7 = vadd.f32 %v9412_v34, %v9411_v10  ;;  %v9414_v26 = vpop.f32.mrb[150].mxu1  ;;  %9860 = vmatprep.subr.bf16.mxu1 %v11088_v60 }
 0x4d0   : > { %v9415_v6 = vpop.f32.mrb[151].mxu1 }
 0x4d1   : > { %v9311_v48 = vpop.f32.mrb[12].mxu0  ;;  %v9416_v50 = vadd.f32 %v9415_v6, %v9414_v26  ;;  %v13700_v1 = vadd.f32 %v13632_v2, %v9413_v7  ;;  %v7761_v6 = vld [vmem:[#allocation13 + $0x48] sm:$0xff] }
 0x4d2   : > { %v9312_v21 = vpop.f32.mrb[13].mxu0 }
 0x4d3   : > { %v9313_v23 = vadd.f32 %v9312_v21, %v9311_v48  ;;  %v9314_v35 = vpop.f32.mrb[14].mxu0  ;;  %v13703_v13 = vadd.f32 %v13635_v17, %v9416_v50  ;;  %v7760_v48 = vld [vmem:[#allocation13 + $0x40] sm:$0xff] }
 0x4d4   : > { %v9315_v27 = vpop.f32.mrb[15].mxu0  ;;  %v9861_v50 = vpack.c.bf16 %v7761_v6, %v7760_v48 }
 0x4d5   : > { %v13707_v33 = vadd.f32 %v9313_v23, %v13542_v57  ;;  %v9316_v40 = vadd.f32 %v9315_v27, %v9314_v35  ;;  %v9417_v63 = vpop.f32.mrb[152].mxu1 }
 0x4d6   : > { %v9418_v47 = vpop.f32.mrb[153].mxu1  ;;  %9862 = vmatpush3.bf16.msra.mxu1 %v9861_v50  ;;  %v7763_v50 = vld [vmem:[#allocation13 + $0x58] sm:$0xff] }
 0x4d7   : > { %v13710_v22 = vadd.f32 %v9316_v40, %v13546_v9  ;;  %v9419_v2 = vadd.f32 %v9418_v47, %v9417_v63  ;;  %v9420_v53 = vpop.f32.mrb[154].mxu1  ;;  %9863 = vmatprep.subr.bf16.mxu1 %v11088_v60 }
 0x4d8   : > { %v9421_v32 = vpop.f32.mrb[155].mxu1 }
 0x4d9   : > { %v9317_v38 = vpop.f32.mrb[16].mxu0  ;;  %v9422_v4 = vadd.f32 %v9421_v32, %v9420_v53  ;;  %v13713_v41 = vadd.f32 %v13644_v61, %v9419_v2 }
 0x4da   : > { %v9318_v17 = vpop.f32.mrb[17].mxu0 }
 0x4db   : > { %v9319_v57 = vadd.f32 %v9318_v17, %v9317_v38  ;;  %v9320_v62 = vpop.f32.mrb[18].mxu0  ;;  %v13716_v9 = vadd.f32 %v13647_v12, %v9422_v4 }
 0x4dc   : > { %v9321_v0 = vpop.f32.mrb[19].mxu0 }
 0x4dd   : > { %v13720_v10 = vadd.f32 %v9319_v57, %v13553_v42  ;;  %v9322_v34 = vadd.f32 %v9321_v0, %v9320_v62  ;;  %v9423_v7 = vpop.f32.mrb[156].mxu1 }
 0x4de   : > { %v9424_v19 = vpop.f32.mrb[157].mxu1 }
 0x4df   : > { %v13723_v26 = vadd.f32 %v9322_v34, %v13556_v45  ;;  %v9425_v61 = vadd.f32 %v9424_v19, %v9423_v7  ;;  %v9426_v5 = vpop.f32.mrb[158].mxu1 }
 0x4e0   : > { %v9427_v21 = vpop.f32.mrb[159].mxu1 }
 0x4e1   : > { %v9323_v18 = vpop.f32.mrb[20].mxu0  ;;  %v9428_v23 = vadd.f32 %v9427_v21, %v9426_v5  ;;  %v13726_v35 = vadd.f32 %v13655_v14, %v9425_v61 }
 0x4e2   : > { %v9324_v12 = vpop.f32.mrb[21].mxu0 }
 0x4e3   : > { %v9325_v42 = vadd.f32 %v9324_v12, %v9323_v18  ;;  %v9326_v27 = vpop.f32.mrb[22].mxu0  ;;  %v13729_v45 = vadd.f32 %v13658_v30, %v9428_v23  ;;  %v7764_v12 = vld [vmem:[#allocation13 + $0x60] sm:$0xff] }
 0x4e4   : > { %v9327_v40 = vpop.f32.mrb[23].mxu0 }
 0x4e5   : > { %v13733_v63 = vadd.f32 %v9325_v42, %v13563_v24  ;;  %v9328_v47 = vadd.f32 %v9327_v40, %v9326_v27  ;;  %v9429_v2 = vpop.f32.mrb[160].mxu1  ;;  %v7765_v27 = vld [vmem:[#allocation13 + $0x68] sm:$0xff] }
 0x4e6   : > { %v9430_v39 = vpop.f32.mrb[161].mxu1 }
 0x4e7   : > { %v13736_v53 = vadd.f32 %v9328_v47, %v13566_v58  ;;  %v9431_v14 = vadd.f32 %v9430_v39, %v9429_v2  ;;  %v9432_v44 = vpop.f32.mrb[162].mxu1  ;;  %v9867_v39 = vpack.c.bf16 %v7765_v27, %v7764_v12 }
 0x4e8   : > { %v9433_v32 = vpop.f32.mrb[163].mxu1 }
 0x4e9   : > { %v9329_v38 = vpop.f32.mrb[24].mxu0  ;;  %v9434_v17 = vadd.f32 %v9433_v32, %v9432_v44  ;;  %v13739_v30 = vadd.f32 %v13667_v55, %v9431_v14  ;;  %v7766_v44 = vld [vmem:[#allocation13 + $0x70] sm:$0xff] }
 0x4ea   : > { %v9330_v8 = vpop.f32.mrb[25].mxu0 }
 0x4eb   : > { %v9331_v4 = vadd.f32 %v9330_v8, %v9329_v38  ;;  %v9332_v57 = vpop.f32.mrb[26].mxu0  ;;  %v13742_v24 = vadd.f32 %v13670_v54, %v9434_v17  ;;  %v7762_v54 = vld [vmem:[#allocation13 + $0x50] sm:$0xff]  ;;  %v7767_v38 = vld [vmem:[#allocation13 + $0x78] sm:$0xff] }
 0x4ec   : > { %v9333_v62 = vpop.f32.mrb[27].mxu0  ;;  %v9864_v42 = vpack.c.bf16 %v7763_v50, %v7762_v54 }
 0x4ed   : > { %v13745_v0 = vadd.f32 %v9331_v4, %v13573_v56  ;;  %v9334_v58 = vadd.f32 %v9333_v62, %v9332_v57  ;;  %v9435_v34 = vpop.f32.mrb[164].mxu1 }
 0x4ee   : > { %v9436_v19 = vpop.f32.mrb[165].mxu1  ;;  %9865 = vmatpush3.bf16.msra.mxu1 %v9864_v42 }
 0x4ef   : > { %v13748_v7 = vadd.f32 %v9334_v58, %v13576_v28  ;;  %v9437_v61 = vadd.f32 %v9436_v19, %v9435_v34  ;;  %v9438_v5 = vpop.f32.mrb[166].mxu1  ;;  %v11090_v28 = vmov 0.0   ;;  %9866 = vmatprep.subr.bf16.mxu1 %v11088_v60 }
 0x4f0   : > { %v9439_v55 = vpop.f32.mrb[167].mxu1  ;;  %9840 = vmatprep.mubr.msk.f32.mxu1 %vm11089_vm10, %v11090_v28  ;;  %9843 = vmatprep.subr.mxu0 %v11090_v28 }
 0x4f1   : > { %v9335_v48 = vpop.f32.mrb[28].mxu0  ;;  %v9440_v18 = vadd.f32 %v9439_v55, %v9438_v5  ;;  %v13751_v21 = vadd.f32 %v13681_v49, %v9437_v61  ;;  %9845 = vmatprep.mubr.msk.f32.mxu0 %vm11089_vm10, %v11090_v28 }
 0x4f2   : > { %v9336_v6 = vpop.f32.mrb[29].mxu0  ;;  %9868 = vmatpush3.bf16.msra.mxu1 %v9867_v39 }
 0x4f3   : > { %v9337_v56 = vadd.f32 %v9336_v6, %v9335_v48  ;;  %v9338_v23 = vpop.f32.mrb[30].mxu0  ;;  %v13754_v47 = vadd.f32 %v13684_v43, %v9440_v18  ;;  %v9870_v43 = vpack.c.bf16 %v7767_v38, %v7766_v44  ;;  %9869 = vmatprep.subr.bf16.mxu1 %v11088_v60 }
 0x4f4   : > { %v9339_v40 = vpop.f32.mrb[31].mxu0 }
 0x4f5   : > { %v10084_v2 = vadd.f32 %v9337_v56, %v13583_v11  ;;  %v9340_v49 = vadd.f32 %v9339_v40, %v9338_v23  ;;  %v9441_v14 = vpop.f32.mrb[168].mxu1  ;;  %v7840_v11 = vld [vmem:[#allocation16] sm:$0xff] }
 0x4f6   : > { %v9442_v8 = vpop.f32.mrb[169].mxu1  ;;  %9844 = vmatpush3.msra.mxu0 %v7840_v11  ;;  %9871 = vmatpush3.bf16.msra.mxu1 %v9870_v43 }
 0x4f7   : > { %v10090_v32 = vadd.f32 %v9340_v49, %v13586_v31  ;;  %v9443_v17 = vadd.f32 %v9442_v8, %v9441_v14  ;;  %v9444_v4 = vpop.f32.mrb[170].mxu1 }
 0x4f8   : > { %v9445_v57 = vpop.f32.mrb[171].mxu1 }
 0x4f9   : > { %v9446_v62 = vadd.f32 %v9445_v57, %v9444_v4  ;;  %v13760_v58 = vadd.f32 %v13694_v29, %v9443_v17 }
 0x4fb   : > { %v13764_v34 = vadd.f32 %v13697_v15, %v9446_v62 }
 0x4fd   : > { %v9447_v19 = vpop.f32.mrb[172].mxu1 }
 0x4fe   : > { %v9448_v31 = vpop.f32.mrb[173].mxu1 }
 0x4ff   : > { %v9449_v61 = vadd.f32 %v9448_v31, %v9447_v19  ;;  %v9450_v5 = vpop.f32.mrb[174].mxu1 }
 0x500   : > { %v9451_v48 = vpop.f32.mrb[175].mxu1 }
 0x501   : > { %v9452_v55 = vadd.f32 %v9451_v48, %v9450_v5  ;;  %v13767_v6 = vadd.f32 %v13707_v33, %v9449_v61 }
 0x503   : > { %v13770_v29 = vadd.f32 %v13710_v22, %v9452_v55 }
 0x505   : > { %v9453_v18 = vpop.f32.mrb[176].mxu1 }
 0x506   : > { %v9454_v60 = vpop.f32.mrb[177].mxu1 }
 0x507   : > { %v9455_v54 = vadd.f32 %v9454_v60, %v9453_v18  ;;  %v9456_v50 = vpop.f32.mrb[178].mxu1  ;;  %v13796_v18 = vld [vmem:[#allocation12] ss:$0 sm:$0xff] }
 0x508   : > { %v9457_v12 = vpop.f32.mrb[179].mxu1 }
 0x509   : > { %v9458_v15 = vadd.f32 %v9457_v12, %v9456_v50  ;;  %v13773_v56 = vadd.f32 %v13720_v10, %v9455_v54 }
 0x50b   : > { %v13776_v23 = vadd.f32 %v13723_v26, %v9458_v15 }
 0x50d   : > { %v9459_v42 = vpop.f32.mrb[180].mxu1 }
 0x50e   : > { %v9460_v27 = vpop.f32.mrb[181].mxu1 }
 0x50f   : > { %v9461_v28 = vadd.f32 %v9460_v27, %v9459_v42  ;;  %v9462_v33 = vpop.f32.mrb[182].mxu1 }
 0x510   : > { %v9463_v40 = vpop.f32.mrb[183].mxu1 }
 0x511   : > { %v9464_v49 = vadd.f32 %v9463_v40, %v9462_v33  ;;  %v13779_v22 = vadd.f32 %v13733_v63, %v9461_v28 }
 0x513   : > { %v13782_v39 = vadd.f32 %v13736_v53, %v9464_v49 }
 0x515   : > { %v9465_v14 = vpop.f32.mrb[184].mxu1 }
 0x516   : > { %v9466_v44 = vpop.f32.mrb[185].mxu1 }
 0x517   : > { %v9467_v38 = vadd.f32 %v9466_v44, %v9465_v14  ;;  %v9468_v10 = vpop.f32.mrb[186].mxu1 }
 0x518   : > { %v9469_v8 = vpop.f32.mrb[187].mxu1 }
 0x519   : > { %v9470_v17 = vadd.f32 %v9469_v8, %v9468_v10  ;;  %v13785_v26 = vadd.f32 %v13745_v0, %v9467_v38 }
 0x51b   : > { %v13788_v4 = vadd.f32 %v13748_v7, %v9470_v17 }
 0x51d   : > { %v9471_v57 = vpop.f32.mrb[188].mxu1 }
 0x51e   : > { %v9472_v43 = vpop.f32.mrb[189].mxu1 }
 0x51f   : > { %v9473_v62 = vadd.f32 %v9472_v43, %v9471_v57  ;;  %v9474_v63 = vpop.f32.mrb[190].mxu1 }
 0x520   : > { %v9475_v11 = vpop.f32.mrb[191].mxu1 }
 0x521   : > { %v9476_v19 = vadd.f32 %v9475_v11, %v9474_v63  ;;  %v13790_v53 = vadd.f32 %v10084_v2, %v9473_v62 }
 0x523   : > { %v13792_v31 = vadd.f32 %v10090_v32, %v9476_v19 }
 0x525   : > { %v9778_v61 = vpop.f32.mrb[96].mxu1 }
 0x526   : > { %v10002_v5 = vadd.f32 %v13649_v25, %v9778_v61  ;;  %v7516_v48 = vpop.f32.mrb[97].mxu1 }
 0x527   : > { %v10005_v0 = vadd.f32 %v13638_v20, %v7516_v48  ;;  %v9779_v55 = vpop.f32.mrb[98].mxu1 }
 0x528   : > { %v10008_v7 = vadd.f32 %v13652_v16, %v9779_v55  ;;  %v7519_v60 = vpop.f32.mrb[99].mxu1  ;;  %v13807_v32 = vadd.f32 %v10002_v5, %v13796_v18 }
 0x529   : > { %v10011_v54 = vadd.f32 %v13641_v46, %v7519_v60  ;;  %v13801_v50 = vadd.f32 %v10005_v0, %v13796_v18 }
 0x52a   : > { %v13813_v16 = vadd.f32 %v10008_v7, %v13796_v18 }
 0x52b   : > { %v13804_v2 = vadd.f32 %v10011_v54, %v13796_v18 }
 0x52d   : > { %v7714_v20 = vadd.f32 %v13804_v2, %v13801_v50  ;;  %v9782_v25 = vpop.f32.mrb[100].mxu1 }
 0x52e   : > { %v10014_v12 = vadd.f32 %v13674_v52, %v9782_v25  ;;  %v7532_v15 = vpop.f32.mrb[101].mxu1 }
 0x52f   : > { %v7715_v46 = vadd.f32 %v7714_v20, %v13807_v32  ;;  %v10017_v42 = vadd.f32 %v13661_v51, %v7532_v15  ;;  %v9783_v27 = vpop.f32.mrb[102].mxu1 }
 0x530   : > { %v10020_v28 = vadd.f32 %v13677_v59, %v9783_v27  ;;  %v7535_v33 = vpop.f32.mrb[103].mxu1  ;;  %v13828_v38 = vadd.f32 %v10014_v12, %v13796_v18 }
 0x531   : > { %v13819_v40 = vadd.f32 %v10017_v42, %v13796_v18  ;;  %v7716_v49 = vadd.f32 %v7715_v46, %v13813_v16  ;;  %v10023_v14 = vadd.f32 %v13664_v3, %v7535_v33 }
 0x532   : > { %v13833_v17 = vadd.f32 %v10020_v28, %v13796_v18 }
 0x533   : > { %v7717_v52 = vadd.f32 %v7716_v49, %v13819_v40  ;;  %v13825_v44 = vadd.f32 %v10023_v14, %v13796_v18 }
 0x535   : > { %v7718_v51 = vadd.f32 %v7717_v52, %v13825_v44  ;;  %v9786_v10 = vpop.f32.mrb[104].mxu1 }
 0x536   : > { %v10026_v59 = vadd.f32 %v13700_v1, %v9786_v10  ;;  %v7548_v8 = vpop.f32.mrb[105].mxu1 }
 0x537   : > { %v7719_v57 = vadd.f32 %v7718_v51, %v13828_v38  ;;  %v10029_v3 = vadd.f32 %v13687_v37, %v7548_v8  ;;  %v9787_v43 = vpop.f32.mrb[106].mxu1 }
 0x538   : > { %v10032_v62 = vadd.f32 %v13703_v13, %v9787_v43  ;;  %v7551_v63 = vpop.f32.mrb[107].mxu1  ;;  %v13848_v48 = vadd.f32 %v10026_v59, %v13796_v18 }
 0x539   : > { %v13839_v11 = vadd.f32 %v10029_v3, %v13796_v18  ;;  %v7720_v19 = vadd.f32 %v7719_v57, %v13833_v17  ;;  %v10035_v61 = vadd.f32 %v13690_v36, %v7551_v63 }
 0x53a   : > { %v13853_v7 = vadd.f32 %v10032_v62, %v13796_v18 }
 0x53b   : > { %v7721_v1 = vadd.f32 %v7720_v19, %v13839_v11  ;;  %v13845_v5 = vadd.f32 %v10035_v61, %v13796_v18 }
 0x53d   : > { %v7722_v37 = vadd.f32 %v7721_v1, %v13845_v5  ;;  %v9790_v0 = vpop.f32.mrb[108].mxu1 }
 0x53e   : > { %v10038_v13 = vadd.f32 %v13726_v35, %v9790_v0  ;;  %v7564_v55 = vpop.f32.mrb[109].mxu1 }
 0x53f   : > { %v7723_v60 = vadd.f32 %v7722_v37, %v13848_v48  ;;  %v10041_v36 = vadd.f32 %v13713_v41, %v7564_v55  ;;  %v9791_v54 = vpop.f32.mrb[110].mxu1 }
 0x540   : > { %v10044_v20 = vadd.f32 %v13729_v45, %v9791_v54  ;;  %v7567_v25 = vpop.f32.mrb[111].mxu1  ;;  %v13868_v27 = vadd.f32 %v10038_v13, %v13796_v18 }
 0x541   : > { %v13859_v12 = vadd.f32 %v10041_v36, %v13796_v18  ;;  %v7724_v15 = vadd.f32 %v7723_v60, %v13853_v7  ;;  %v10047_v46 = vadd.f32 %v13716_v9, %v7567_v25 }
 0x542   : > { %v13873_v49 = vadd.f32 %v10044_v20, %v13796_v18 }
 0x543   : > { %v7725_v35 = vadd.f32 %v7724_v15, %v13859_v12  ;;  %v13865_v42 = vadd.f32 %v10047_v46, %v13796_v18 }
 0x545   : > { %v7726_v41 = vadd.f32 %v7725_v35, %v13865_v42  ;;  %v9794_v28 = vpop.f32.mrb[112].mxu1 }
 0x546   : > { %v10050_v45 = vadd.f32 %v13751_v21, %v9794_v28  ;;  %v7580_v33 = vpop.f32.mrb[113].mxu1 }
 0x547   : > { %v7727_v14 = vadd.f32 %v7726_v41, %v13868_v27  ;;  %v10053_v9 = vadd.f32 %v13739_v30, %v7580_v33  ;;  %v9795_v52 = vpop.f32.mrb[114].mxu1 }
 0x548   : > { %v10056_v51 = vadd.f32 %v13754_v47, %v9795_v52  ;;  %v7583_v10 = vpop.f32.mrb[115].mxu1  ;;  %v13888_v43 = vadd.f32 %v10050_v45, %v13796_v18 }
 0x549   : > { %v13879_v59 = vadd.f32 %v10053_v9, %v13796_v18  ;;  %v7728_v8 = vadd.f32 %v7727_v14, %v13873_v49  ;;  %v10059_v57 = vadd.f32 %v13742_v24, %v7583_v10 }
 0x54a   : > { %v13893_v19 = vadd.f32 %v10056_v51, %v13796_v18 }
 0x54b   : > { %v7729_v21 = vadd.f32 %v7728_v8, %v13879_v59  ;;  %v13885_v3 = vadd.f32 %v10059_v57, %v13796_v18 }
 0x54d   : > { %v7730_v30 = vadd.f32 %v7729_v21, %v13885_v3  ;;  %v9798_v62 = vpop.f32.mrb[116].mxu1 }
 0x54e   : > { %v10062_v47 = vadd.f32 %v13767_v6, %v9798_v62  ;;  %v7596_v63 = vpop.f32.mrb[117].mxu1 }
 0x54f   : > { %v7731_v61 = vadd.f32 %v7730_v30, %v13888_v43  ;;  %v10065_v24 = vadd.f32 %v13760_v58, %v7596_v63  ;;  %v9799_v1 = vpop.f32.mrb[118].mxu1 }
 0x550   : > { %v10068_v37 = vadd.f32 %v13770_v29, %v9799_v1  ;;  %v7599_v0 = vpop.f32.mrb[119].mxu1  ;;  %v13908_v54 = vadd.f32 %v10062_v47, %v13796_v18 }
 0x551   : > { %v13899_v13 = vadd.f32 %v10065_v24, %v13796_v18  ;;  %v7732_v55 = vadd.f32 %v7731_v61, %v13893_v19  ;;  %v10071_v60 = vadd.f32 %v13764_v34, %v7599_v0 }
 0x552   : > { %v13913_v15 = vadd.f32 %v10068_v37, %v13796_v18 }
 0x553   : > { %v7733_v6 = vadd.f32 %v7732_v55, %v13899_v13  ;;  %v13905_v36 = vadd.f32 %v10071_v60, %v13796_v18 }
 0x555   : > { %v7734_v58 = vadd.f32 %v7733_v6, %v13905_v36  ;;  %v9802_v20 = vpop.f32.mrb[120].mxu1 }
 0x556   : > { %v10074_v29 = vadd.f32 %v13779_v22, %v9802_v20  ;;  %v7612_v25 = vpop.f32.mrb[121].mxu1 }
 0x557   : > { %v7735_v46 = vadd.f32 %v7734_v58, %v13908_v54  ;;  %v10077_v34 = vadd.f32 %v13773_v56, %v7612_v25  ;;  %v9803_v35 = vpop.f32.mrb[122].mxu1  ;;  %v7768_v25 = vld [vmem:[#allocation15] sm:$0x1] }
 0x558   : > { %v10080_v41 = vadd.f32 %v13782_v39, %v9803_v35  ;;  %v7615_v28 = vpop.f32.mrb[123].mxu1  ;;  %v13928_v52 = vadd.f32 %v10074_v29, %v13796_v18 }
 0x559   : > { %v13919_v45 = vadd.f32 %v10077_v34, %v13796_v18  ;;  %v7736_v33 = vadd.f32 %v7735_v46, %v13913_v15  ;;  %v10083_v14 = vadd.f32 %v13776_v23, %v7615_v28 }
 0x55a   : > { %v13933_v8 = vadd.f32 %v10080_v41, %v13796_v18 }
 0x55b   : > { %v7737_v22 = vadd.f32 %v7736_v33, %v13919_v45  ;;  %v13925_v9 = vadd.f32 %v10083_v14, %v13796_v18 }
 0x55d   : > { %v7738_v56 = vadd.f32 %v7737_v22, %v13925_v9  ;;  %v9806_v51 = vpop.f32.mrb[124].mxu1 }
 0x55e   : > { %v10086_v39 = vadd.f32 %v13790_v53, %v9806_v51  ;;  %v7628_v10 = vpop.f32.mrb[125].mxu1 }
 0x55f   : > { %v7739_v57 = vadd.f32 %v7738_v56, %v13928_v52  ;;  %v10089_v23 = vadd.f32 %v13785_v26, %v7628_v10  ;;  %v9807_v21 = vpop.f32.mrb[126].mxu1 }
 0x560   : > { %v10092_v30 = vadd.f32 %v13792_v31, %v9807_v21  ;;  %v7631_v62 = vpop.f32.mrb[127].mxu1  ;;  %v13948_v1 = vadd.f32 %v10086_v39, %v13796_v18  ;;  %v7922_v39 = vlaneseq }
 0x561   : > { %v13939_v47 = vadd.f32 %v10089_v23, %v13796_v18  ;;  %v7740_v63 = vadd.f32 %v7739_v57, %v13933_v8  ;;  %v10095_v61 = vadd.f32 %v13788_v4, %v7631_v62 }
 0x562   : > { %v13952_v31 = vadd.f32 %v10092_v30, %v13796_v18  ;;  %v7923_v10 = vshrl.u32 %v7922_v39, 7 }
 0x563   : > { %v7741_v53 = vadd.f32 %v7740_v63, %v13939_v47  ;;  %v13945_v24 = vadd.f32 %v10095_v61, %v13796_v18  ;;  %v7841_v18 = vld [vmem:[#allocation18] sm:$0x1] }
 0x564   : > { %v7924_v57 = vsub.s32 0, %v7923_v10  ;;  %v10718_v10 = vld [vmem:[%s11447_s18 + $0x70] sm:$0xff] }
 0x565   : > { %v7742_v26 = vadd.f32 %v7741_v53, %v13945_v24 }
 0x567   : > { %v7743_v37 = vadd.f32 %v7742_v26, %v13948_v1 }
 0x569   : > { %v7744_v0 = vadd.f32 %v7743_v37, %v13952_v31 }
 0x56b   : > { %v7745_v55 = vrot.slane %v7744_v0, 4 }
 0x56d   : > { %v7746_v60 = vadd.f32 %v7745_v55, %v7744_v0 }
 0x56f   : > { %v7747_v4 = vrot.slane %v7746_v60, 2 }
 0x571   : > { %v7748_v6 = vadd.f32 %v7747_v4, %v7746_v60  ;;  %v10708_v4 = vld [vmem:[%s11447_s18 + $0x20] sm:$0xff] }
 0x573   : > { %v7749_v58 = vrot.slane %v7748_v6, 1 }
 0x575   : > { %v7750_v20 = vadd.f32 %v7749_v58, %v7748_v6  ;;  %v10709_v6 = vld [vmem:[%s11447_s18 + $0x28] sm:$0xff] }
 0x577   : > { %v7751_v29 = vmul.f32 0.00390625, %v7750_v20  ;;  %v10710_v20 = vld [vmem:[%s11447_s18 + $0x30] sm:$0xff] }
 0x579   : > { %9841 = vmatmul.mubr.f32.vlgmr.msra.gmra.mrb[192].mxu1 %v7751_v29  ;;  %v10711_v29 = vld [vmem:[%s11447_s18 + $0x38] sm:$0xff] }
 0x64c   : > { %v7835_v46 = vpop.f32.mrb[192].mxu1 }
 0x64d   : > { %v7836_v34 = vadd.f32 %v7835_v46, %v7768_v25  ;;  %v9842_v35 = vpop.f32.mrb[193].mxu1  ;;  %v10712_v46 = vld [vmem:[%s11447_s18 + $0x40] sm:$0xff] }
 0x64e   : > { %v10713_v35 = vld [vmem:[%s11447_s18 + $0x48] sm:$0xff] }
 0x64f   : > { %v7839_v41 = vmax.f32 %v7836_v34, 0.0 }
 0x651   : > { %9846 = vmatmul.mubr.msk.f32.vlgmr.msra.gmra.mrb[32].mxu0 %vm7842_vm11, %v7839_v41 }
 0x724   : > { %v7912_v28 = vpop.f32.mrb[32].mxu0 }
 0x725   : > { %v7913_v33 = vadd.f32 %v7912_v28, %v7841_v18  ;;  %v9847_v14 = vpop.f32.mrb[33].mxu0  ;;  %v10714_v18 = vld [vmem:[%s11447_s18 + $0x50] sm:$0xff] }
 0x727   : > { %v8613_v22 = vmul.f32 -1.442695, %v7913_v33  ;;  %v10715_v33 = vld [vmem:[%s11447_s18 + $0x58] sm:$0xff] }
 0x729   : > { %10665 = vpow2.f32 %v8613_v22  ;;  %v10716_v22 = vld [vmem:[%s11447_s18 + $0x60] sm:$0xff] }
 0x733   : > { %v10666_v56 = vpop.eup %10665 }
 0x734   : > { %v7919_v51 = vadd.f32 1.0, %v10666_v56 }
 0x736   : > { %10667 = vrcp.f32 %v7919_v51  ;;  %v10717_v51 = vld [vmem:[%s11447_s18 + $0x68] sm:$0xff] }
 0x740   : > { %v10668_v23 = vpop.eup %10667 }
 0x741   : > { %v7925_v21 = vrot.slane %v10668_v23, %v7924_v57  ;;  %v10719_v23 = vld [vmem:[%s11447_s18 + $0x78] sm:$0xff] }
 0x743   : > { %v7926_v30 = vmul.f32 %v7925_v21, %v13801_v50  ;;  %v7927_v62 = vmul.f32 %v7925_v21, %v13804_v2  ;;  %v7928_v63 = vmul.f32 %v7925_v21, %v13807_v32  ;;  %v7929_v61 = vmul.f32 %v7925_v21, %v13813_v16 }
 0x744   : > { %v7930_v53 = vmul.f32 %v7925_v21, %v13819_v40  ;;  %v7931_v26 = vmul.f32 %v7925_v21, %v13825_v44  ;;  %v7932_v37 = vmul.f32 %v7925_v21, %v13828_v38  ;;  %v7933_v0 = vmul.f32 %v7925_v21, %v13833_v17 }
 0x745   : > { %v7934_v55 = vmul.f32 %v7925_v21, %v13839_v11  ;;  %v7935_v60 = vmul.f32 %v7925_v21, %v13845_v5  ;;  %v7936_v50 = vmul.f32 %v7925_v21, %v13848_v48  ;;  %v7937_v2 = vmul.f32 %v7925_v21, %v13853_v7 }
 0x746   : > { %v7938_v32 = vmul.f32 %v7925_v21, %v13859_v12  ;;  %v7939_v16 = vmul.f32 %v7925_v21, %v13865_v42  ;;  %v7940_v40 = vmul.f32 %v7925_v21, %v13868_v27  ;;  %v7941_v44 = vmul.f32 %v7925_v21, %v13873_v49 }
 0x747   : > { %v7942_v38 = vmul.f32 %v7925_v21, %v13879_v59  ;;  %v7943_v17 = vmul.f32 %v7925_v21, %v13885_v3  ;;  %v7944_v11 = vmul.f32 %v7925_v21, %v13888_v43  ;;  %v13976_v5 = vmul.f32 %v7925_v21, %v13893_v19 }
 0x748   : > { %v13979_v48 = vmul.f32 %v7925_v21, %v13899_v13  ;;  %v13982_v7 = vmul.f32 %v7925_v21, %v13905_v36  ;;  %v13985_v12 = vmul.f32 %v7925_v21, %v13908_v54  ;;  %v13988_v42 = vmul.f32 %v7925_v21, %v13913_v15  ;;  %v10704_v54 = vld [vmem:[%s11447_s18] sm:$0xff] }
 0x749   : > { %v13991_v27 = vmul.f32 %v7925_v21, %v13919_v45  ;;  %v13994_v49 = vmul.f32 %v7925_v21, %v13925_v9  ;;  %v13997_v59 = vmul.f32 %v7925_v21, %v13928_v52  ;;  %v14000_v3 = vmul.f32 %v7925_v21, %v13933_v8  ;;  %v10705_v45 = vld [vmem:[%s11447_s18 + $0x8] sm:$0xff]  ;;  %v10706_v52 = vld [vmem:[%s11447_s18 + $0x10] sm:$0xff] }
 0x74a   : > { %v14003_v43 = vmul.f32 %v7925_v21, %v13939_v47  ;;  %v14006_v19 = vmul.f32 %v7925_v21, %v13945_v24  ;;  %v14009_v13 = vmul.f32 %v7925_v21, %v13948_v1  ;;  %v14012_v36 = vmul.f32 %v7925_v21, %v13952_v31  ;;  %v10707_v47 = vld [vmem:[%s11447_s18 + $0x18] sm:$0xff] }
 0x74b   : > { %v7958_v15 = vadd.f32 %v10704_v54, %v7926_v30  ;;  %v7959_v9 = vadd.f32 %v10705_v45, %v7927_v62  ;;  %v7960_v8 = vadd.f32 %v10706_v52, %v7928_v63  ;;  %v7961_v24 = vadd.f32 %v10707_v47, %v7929_v61  ;;  %v10720_v30 = vld [vmem:[%s11447_s18 + $0x80] sm:$0xff]  ;;  %v10721_v63 = vld [vmem:[%s11447_s18 + $0x88] sm:$0xff]  ;;  %v10734_v54 = vld [vmem:[%s11447_s18 + $0xf0] sm:$0xff] }
 0x74c   : > { %v7962_v1 = vadd.f32 %v10708_v4, %v7930_v53  ;;  %v7963_v58 = vadd.f32 %v10709_v6, %v7931_v26  ;;  %v7964_v31 = vadd.f32 %v10710_v20, %v7932_v37  ;;  %v7965_v25 = vadd.f32 %v10711_v29, %v7933_v0  ;;  %v10722_v53 = vld [vmem:[%s11447_s18 + $0x90] sm:$0xff]  ;;  %v10723_v37 = vld [vmem:[%s11447_s18 + $0x98] sm:$0xff] }
 0x74d   : > { %v7966_v34 = vadd.f32 %v10712_v46, %v7934_v55  ;;  %v7967_v41 = vadd.f32 %v10713_v35, %v7935_v60  ;;  %v7968_v28 = vadd.f32 %v10714_v18, %v7936_v50  ;;  %v7969_v14 = vadd.f32 %v10715_v33, %v7937_v2  ;;  %7990 = vst [vmem:[%s14028_s16] sm:$0xff] %v7958_v15  ;;  %v10724_v55 = vld [vmem:[%s11447_s18 + $0xa0] sm:$0xff]  ;;  %v10725_v50 = vld [vmem:[%s11447_s18 + $0xa8] sm:$0xff]  ;;  %v10735_v45 = vld [vmem:[%s11447_s18 + $0xf8] sm:$0xff] }
 0x74e   : > { %7991 = vst [vmem:[%s14028_s16 + $0x8] sm:$0xff] %v7959_v9  ;;  %7992 = vst [vmem:[%s14028_s16 + $0x10] sm:$0xff] %v7960_v8  ;;  %v7970_v56 = vadd.f32 %v10716_v22, %v7938_v32  ;;  %v7971_v39 = vadd.f32 %v10717_v51, %v7939_v16  ;;  %v7972_v57 = vadd.f32 %v10718_v10, %v7940_v40  ;;  %v10726_v32 = vld [vmem:[%s11447_s18 + $0xb0] sm:$0xff]  ;;  %v10727_v40 = vld [vmem:[%s11447_s18 + $0xb8] sm:$0xff] }
 0x74f   : > { %7993 = vst [vmem:[%s14028_s16 + $0x18] sm:$0xff] %v7961_v24  ;;  %v7973_v21 = vadd.f32 %v10719_v23, %v7941_v44  ;;  %7994 = vst [vmem:[%s14028_s16 + $0x20] sm:$0xff] %v7962_v1  ;;  %v7974_v62 = vadd.f32 %v10720_v30, %v7942_v38  ;;  %v7975_v61 = vadd.f32 %v10721_v63, %v7943_v17  ;;  %v10728_v38 = vld [vmem:[%s11447_s18 + $0xc0] sm:$0xff] }
 0x750   : > { %7995 = vst [vmem:[%s14028_s16 + $0x28] sm:$0xff] %v7963_v58  ;;  %7996 = vst [vmem:[%s14028_s16 + $0x30] sm:$0xff] %v7964_v31  ;;  %v7976_v26 = vadd.f32 %v10722_v53, %v7944_v11  ;;  %v7977_v0 = vadd.f32 %v10723_v37, %v13976_v5  ;;  %v7978_v60 = vadd.f32 %v10724_v55, %v13979_v48  ;;  %v10729_v11 = vld [vmem:[%s11447_s18 + $0xc8] sm:$0xff]  ;;  %v10730_v48 = vld [vmem:[%s11447_s18 + $0xd0] sm:$0xff] }
 0x751   : > { %7997 = vst [vmem:[%s14028_s16 + $0x38] sm:$0xff] %v7965_v25  ;;  %7998 = vst [vmem:[%s14028_s16 + $0x40] sm:$0xff] %v7966_v34  ;;  %v7979_v2 = vadd.f32 %v10725_v50, %v13982_v7  ;;  %v7980_v16 = vadd.f32 %v10726_v32, %v13985_v12  ;;  %v7981_v44 = vadd.f32 %v10727_v40, %v13988_v42  ;;  %v10731_v12 = vld [vmem:[%s11447_s18 + $0xd8] sm:$0xff] }
 0x752   : > { %7999 = vst [vmem:[%s14028_s16 + $0x48] sm:$0xff] %v7967_v41  ;;  %8000 = vst [vmem:[%s14028_s16 + $0x50] sm:$0xff] %v7968_v28  ;;  %v7982_v17 = vadd.f32 %v10728_v38, %v13991_v27  ;;  %v7983_v5 = vadd.f32 %v10729_v11, %v13994_v49  ;;  %v7984_v7 = vadd.f32 %v10730_v48, %v13997_v59  ;;  %v10732_v27 = vld [vmem:[%s11447_s18 + $0xe0] sm:$0xff]  ;;  %v10733_v59 = vld [vmem:[%s11447_s18 + $0xe8] sm:$0xff] }
 0x753   : > { %8001 = vst [vmem:[%s14028_s16 + $0x58] sm:$0xff] %v7969_v14  ;;  %8002 = vst [vmem:[%s14028_s16 + $0x60] sm:$0xff] %v7970_v56  ;;  %v7985_v42 = vadd.f32 %v10731_v12, %v14000_v3  ;;  %v7986_v49 = vadd.f32 %v10732_v27, %v14003_v43  ;;  %v7987_v3 = vadd.f32 %v10733_v59, %v14006_v19 }
 0x754   : > { %8003 = vst [vmem:[%s14028_s16 + $0x68] sm:$0xff] %v7971_v39  ;;  %8004 = vst [vmem:[%s14028_s16 + $0x70] sm:$0xff] %v7972_v57  ;;  %v7988_v15 = vadd.f32 %v10734_v54, %v14009_v13  ;;  %v7989_v9 = vadd.f32 %v10735_v45, %v14012_v36 }
 0x755   : > { %8005 = vst [vmem:[%s14028_s16 + $0x78] sm:$0xff] %v7973_v21  ;;  %8006 = vst [vmem:[%s14028_s16 + $0x80] sm:$0xff] %v7974_v62 }
 0x756   : > { %8007 = vst [vmem:[%s14028_s16 + $0x88] sm:$0xff] %v7975_v61  ;;  %8008 = vst [vmem:[%s14028_s16 + $0x90] sm:$0xff] %v7976_v26 }
 0x757   : > { %8009 = vst [vmem:[%s14028_s16 + $0x98] sm:$0xff] %v7977_v0  ;;  %8010 = vst [vmem:[%s14028_s16 + $0xa0] sm:$0xff] %v7978_v60 }
 0x758   : > { %8011 = vst [vmem:[%s14028_s16 + $0xa8] sm:$0xff] %v7979_v2  ;;  %8012 = vst [vmem:[%s14028_s16 + $0xb0] sm:$0xff] %v7980_v16 }
 0x759   : > { %8013 = vst [vmem:[%s14028_s16 + $0xb8] sm:$0xff] %v7981_v44  ;;  %8014 = vst [vmem:[%s14028_s16 + $0xc0] sm:$0xff] %v7982_v17 }
 0x75a   : > { %8015 = vst [vmem:[%s14028_s16 + $0xc8] sm:$0xff] %v7983_v5  ;;  %8016 = vst [vmem:[%s14028_s16 + $0xd0] sm:$0xff] %v7984_v7 }
 0x75b   : > { %8017 = vst [vmem:[%s14028_s16 + $0xd8] sm:$0xff] %v7985_v42  ;;  %8018 = vst [vmem:[%s14028_s16 + $0xe0] sm:$0xff] %v7986_v49 }
 0x75c   : > { %8019 = vst [vmem:[%s14028_s16 + $0xe8] sm:$0xff] %v7987_v3  ;;  %8020 = vst [vmem:[%s14028_s16 + $0xf0] sm:$0xff] %v7988_v15 }
 0x75d   : > { %8021 = vst [vmem:[%s14028_s16 + $0xf8] sm:$0xff] %v7989_v9 }
 0x75e   : > { %11003 = shalt.err (!%p11000_p10)
}
 0x75f   : > { %s11004_s22 = scalar_lea.hbm %s14082_s21, 4096  ;;  %s11008_s16 = scalar_lea.hbm %s14265_s27, 8192 }
 0x760   : > { %p11005_p11 = scmp.ne.s32.totalorder %s14082_s21, %s11004_s22  ;;  %p11009_p7 = scmp.lt.u32.totalorder %s14082_s21, %s14265_s27 }
 0x761   : > { %p11010_p6 = scmp.lt.u32.totalorder %s11008_s16, %s11004_s22  ;;  %p11012_p12 = scmp.lt.u32.totalorder %s11004_s22, %s14082_s21 }
 0x762   : > { %p11006_p0 = pnand %p11005_p11, %p14266_p13 }
 0x763   : > { %p11011_p9 = por %p11010_p6, %p11009_p7 }
 0x764   : > { %p11007_p5 = pneg %p11006_p0 }
 0x765   : > { %p11013_p1 = por %p11012_p12, %p11011_p9 }
 0x767   : > { %p11014_p3 = pnand %p11013_p1, %p11007_p5 }
 0x769   : > { %11017 = shalt.err (!%p11014_p3)
}
 0x76a   : > { %s11092_s9 = smov 128   ;;  %s11093_s24 = smov 8  }
 0x76b   : > { %10226 = dma.vmem_to_hbm [thread:$0]  (%p14266_p13), %s14086_s20, 4096, %s14082_s21, %s8023_s15, %s11092_s9, %s11092_s9, %s11093_s24  }
 0x76c PF: > { %s8051_s29 = sand.u32 1, %s11060_s30   ;;  %p14267_p2 = scmp.ne.s32.totalorder %s14182_s28, 0 }
 0x76d   : > { %p14268_p8 = scmp.ge.s32.totalorder %s11072_s12, 2  ;;  %s8052_s13 = scalar_lea.sflag [#allocation6], %s8051_s29 }
 0x76f   : > { %p10258_p4 = pnand %p14268_p8, %p14267_p2 }
 0x771   : > { %11055 = dma.done.wait (!%p10258_p4), %s8052_s13, 4096  }
 0x772   : > { %11057 = vsyncadd (!%p10258_p4), %s8052_s13, 4294963200  ;;  %p26_p10 = scmp.ge.s32.totalorder %s11359_s19, 4   ;;  %s14269_s30 = smov %s11064_s10 }
 0x773   : > { %s14270_s10 = smov %s11068_s11  ;;  %s14271_s11 = smov %s11370_s1 }
 0x774   : > { %s14272_s12 = smov %s11359_s19  ;;  %28 = sbr.rel (!%p26_p10) target bundleno = 13 (0xd), region = 141 }
 0x77b   :  { %8057 = vsyncpa [#allocation5], 1 }
 0x77c   :  { %8059 = vsyncpa [#allocation5 + $0x1], 1 }
 0x77d   :  { %8060 = vsyncpa [#allocation8], 1 }
 0x77e   :  { %8061 = vsyncpa [#allocation11], 1 }
 0x77f   :  { %8062 = vsyncpa [#allocation14], 1 }
 0x780   :  { %8063 = vsyncpa [#allocation17], 1 }
 0x781   :  { %8064 = vsyncpa [#allocation6], 1 }
 0x782   :  { %8066 = vsyncpa [#allocation6 + $0x1], 1 }

</bundles_post_ra>
